<compile_context>
chip_gen: v7x
topology: tpu7x:2x2x1
jax: 0.10.0
libtpu: 0.0.40
codegen_flags: <defaults>
</compile_context>

<pallas_src>
import math
import numpy as np
import jax
import jax.numpy as jnp
from jax.experimental import pallas as pl
from jax.experimental.pallas import tpu as pltpu


_MSSSIM_WEIGHTS = np.array([0.0448, 0.2856, 0.3001, 0.2363, 0.1333],
                           dtype=np.float32)
_LEVELS = 5


# ----------------------------------------------------------------------------
# 1-D Gaussian taps (the 2-D window of the reference is the outer product
# g g^T of this normalized vector, i.e. exactly separable).
# ----------------------------------------------------------------------------
def _gaussian_1d_np(window_size: int, sigma: float = 1.5) -> np.ndarray:
    g = np.array(
        [math.exp(-((x - window_size // 2) ** 2) / (2.0 * sigma ** 2))
         for x in range(window_size)],
        dtype=np.float32,
    )
    return g / g.sum()


def _banded_conv_mats(win, taps, h, w):
    """Banded tap matrices so that  acc = Gh @ img @ Gw  == valid Gaussian conv."""
    ho, wo = h - win + 1, w - win + 1
    gw = np.zeros((w, wo), dtype=np.float32)   # horizontal pass: s @ Gw
    gh = np.zeros((ho, h), dtype=np.float32)   # vertical pass:   Gh @ th
    for q in range(wo):
        gw[q:q + win, q] = taps
    for p in range(ho):
        gh[p, p:p + win] = taps
    return gw, gh


def _pool_mats(h, w):
    """2-D 0.5-banded matrices so that  Pv @ img @ Ph  == 2x2 stride-2 avg pool."""
    hn, wn = h // 2, w // 2
    ph = np.zeros((w, wn), dtype=np.float32)
    pv = np.zeros((hn, h), dtype=np.float32)
    for q in range(wn):
        ph[2 * q, q] = 0.5
        ph[2 * q + 1, q] = 0.5
    for p in range(hn):
        pv[p, 2 * p] = 0.5
        pv[p, 2 * p + 1] = 0.5
    return ph, pv


def _vmem_limit_bytes(N, C, H, W, levels):
    # Rough live-set estimate (f32) with 2x headroom; ceiling is ~75% of the
    # actual per-core VMEM (64 MiB on v7x, 128 MiB on v5e/v6e).
    nc = N * C
    need = 0
    h, w = H, W
    for _ in range(levels):
        need += 32 * nc * h * w * 4        # x1/x2, 5-image conv batch, temps, maps
        h, w = max(h // 2, 1), max(w // 2, 1)
    try:
        cap = pltpu.get_tpu_info().vmem_capacity_bytes
    except Exception:                      # pragma: no cover - fallback
        cap = 64 * 1024 * 1024             # conservative (v7x per-core VMEM)
    ceiling = int(0.75 * cap)              # headroom for Mosaic internal scratch
    return int(min(ceiling, max(16 * 1024 * 1024, 2 * need)))


# ----------------------------------------------------------------------------
# Fused MS-SSIM kernel (all levels + in-VMEM pooling in one invocation)
# ----------------------------------------------------------------------------
def _build_msssim_kernel(N, C, H0, W0, window_size, levels, mxu_bf16=False):
    NC = N * C
    NC5 = 5 * NC
    cdt = jnp.bfloat16 if mxu_bf16 else jnp.float32

    # Static per-level geometry + banded matrices (real_size = min(win, H, W)).
    level_cfg = []
    mats = []                      # flat list, consumed in-order by the kernel
    h, w = H0, W0
    for lvl in range(levels):
        win = min(window_size, h, w)
        ho, wo = h - win + 1, w - win + 1
        taps = _gaussian_1d_np(win)
        use_mxu = (ho >= 2) and (wo >= 2)          # tiny tail levels stay on VPU
        if use_mxu:
            gw, gh = _banded_conv_mats(win, taps, h, w)
            mats += [gw, gh]
        has_pool = lvl < levels - 1
        if has_pool:
            ph, pv = _pool_mats(h, w)
            mats += [ph, pv]
        level_cfg.append(dict(h=h, w=w, win=win, ho=ho, wo=wo,
                              taps=[float(t) for t in taps],
                              use_mxu=use_mxu, has_pool=has_pool))
        if has_pool:
            h, w = h // 2, w // 2

    def kernel(x1_ref, x2_ref, *rest):
        out_ref = rest[-1]
        mat_it = iter(rest[:-1])

        # Collapse (N, C) -> NC; last two (layout) dims untouched.
        x1 = x1_ref[...].reshape(NC, H0, W0)
        x2 = x2_ref[...].reshape(NC, H0, W0)

        rows = []
        for cfg in level_cfg:
            h, w = cfg["h"], cfg["w"]
            win, ho, wo = cfg["win"], cfg["ho"], cfg["wo"]

            # --- data-dependent dynamic range L (per level, as in the ref) ---
            max1 = jnp.max(x1)
            min1 = jnp.min(x1)
            max_val = jnp.where(max1 > 128.0, 255.0, 1.0).astype(jnp.float32)
            min_val = jnp.where(min1 < -0.5, -1.0, 0.0).astype(jnp.float32)
            L = max_val - min_val
            C1 = (0.01 * L) ** 2
            C2 = (0.03 * L) ** 2

            # --- all 5 depthwise Gaussian convs in one batch:
            #     mu1, mu2, E[x1^2], E[x2^2], E[x1*x2] -------------------------
            s = jnp.concatenate([x1, x2, x1 * x1, x2 * x2, x1 * x2],
                                axis=0)                        # (5*NC, h, w)

            if cfg["use_mxu"]:
                gw = next(mat_it)[...]                         # (w, wo)
                gh = next(mat_it)[...]                         # (ho, h)
                # Horizontal pass: batch folded into M -> one 2-D MXU matmul.
                # (batched fallback when h is not sublane-aligned)
                if h % 8 == 0:
                    th = jnp.dot(s.reshape(NC5 * h, w).astype(cdt),
                                 gw.astype(cdt),
                                 preferred_element_type=jnp.float32)
                    th = th.reshape(NC5, h, wo)
                else:
                    gw_b = jnp.broadcast_to(gw, (NC5, w, wo))
                    th = jnp.einsum("nhw,nwq->nhq",
                                    s.astype(cdt), gw_b.astype(cdt),
                                    preferred_element_type=jnp.float32)
                # Vertical pass: canonical batched matmul with shared Gh.
                gh_b = jnp.broadcast_to(gh, (NC5, ho, h))
                acc = jnp.einsum("nph,nhq->npq",
                                 gh_b.astype(cdt), th.astype(cdt),
                                 preferred_element_type=jnp.float32)
            else:
                # Degenerate tiny level (valid output < 2 in a dim): keep the
                # proven VPU slice path; compute here is negligible.
                taps = cfg["taps"]
                th = taps[0] * s[:, :, 0:wo]
                for j in range(1, win):
                    th = th + taps[j] * s[:, :, j:j + wo]
                acc = taps[0] * th[:, 0:ho, :]
                for i in range(1, win):
                    acc = acc + taps[i] * th[:, i:i + ho, :]

            mu1 = acc[0 * NC:1 * NC]
            mu2 = acc[1 * NC:2 * NC]
            mu1_sq = mu1 * mu1
            mu2_sq = mu2 * mu2
            mu1_mu2 = mu1 * mu2
            sigma1_sq = acc[2 * NC:3 * NC] - mu1_sq
            sigma2_sq = acc[3 * NC:4 * NC] - mu2_sq
            sigma12 = acc[4 * NC:5 * NC] - mu1_mu2

            v1 = 2.0 * sigma12 + C2
            v2 = sigma1_sq + sigma2_sq + C2
            # Exact divisions for parity with the PyTorch reference.
            cs_map = v1 / v2
            ssim_map = ((2.0 * mu1_mu2 + C1) * v1) / ((mu1_sq + mu2_sq + C1) * v2)

            inv_cnt = 1.0 / float(NC * ho * wo)
            sim = jnp.sum(ssim_map) * inv_cnt
            cs = jnp.sum(cs_map) * inv_cnt
            rows.append(jnp.concatenate(
                [jnp.full((1, 1), sim, jnp.float32),
                 jnp.full((1, 1), cs, jnp.float32)], axis=1))

            # --- 2x2 average pool to the next level, entirely in VMEM, via the
            #     shared 2-D banded 0.5 matrices (batch folded into M for the
            #     horizontal pass) ---------------------------------------------
            if cfg["has_pool"]:
                ph = next(mat_it)[...]                          # (w, w//2)
                pv = next(mat_it)[...]                          # (h//2, h)
                hn, wn = h // 2, w // 2
                xcat = jnp.concatenate([x1, x2], axis=0)        # (2*NC, h, w)
                if h % 8 == 0:
                    xh = jnp.dot(xcat.reshape(2 * NC * h, w), ph,
                                 preferred_element_type=jnp.float32)
                    xh = xh.reshape(2 * NC, h, wn)
                else:
                    ph_b = jnp.broadcast_to(ph, (2 * NC, w, wn))
                    xh = jnp.einsum("nhw,nwq->nhq", xcat, ph_b,
                                    preferred_element_type=jnp.float32)
                pv_b = jnp.broadcast_to(pv, (2 * NC, hn, h))
                xp = jnp.einsum("nph,nhq->npq", pv_b, xh,
                                preferred_element_type=jnp.float32)
                x1 = xp[:NC]
                x2 = xp[NC:]

        # Single merged (levels, 2) output: column 0 = sim, column 1 = cs.
        out_ref[...] = jnp.concatenate(rows, axis=0)

    return kernel, mats


def _msssim_pallas(img1, img2, window_size=11, levels=_LEVELS, mxu_bf16=False):
    x1 = img1.astype(jnp.float32)
    x2 = img2.astype(jnp.float32)
    N, C, H, W = x1.shape
    kernel, mats = _build_msssim_kernel(N, C, H, W, window_size, levels,
                                        mxu_bf16=mxu_bf16)
    n_in = 2 + len(mats)
    out = pl.pallas_call(
        kernel,
        out_shape=jax.ShapeDtypeStruct((levels, 2), jnp.float32),
        in_specs=[pl.BlockSpec(memory_space=pltpu.MemorySpace.VMEM)] * n_in,
        out_specs=pl.BlockSpec(memory_space=pltpu.MemorySpace.VMEM),
        compiler_params=pltpu.CompilerParams(
            vmem_limit_bytes=_vmem_limit_bytes(N, C, H, W, levels)),
    )(x1, x2, *[jnp.asarray(m) for m in mats])

    mssim = out[:, 0]
    mcs = out[:, 1]
    weights = jnp.asarray(_MSSSIM_WEIGHTS)
    pow1 = mcs ** weights                      # NaN for negative cs, like torch
    pow2 = mssim ** weights
    return jnp.prod(pow1[:-1]) * pow2[-1]


class MSSSIM:
    """JAX/Pallas re-implementation of the PyTorch MSSSIM module (no params)."""

    def __init__(self, window_size=11, size_average=True, channel=3,
                 mxu_bf16=False):
        self.window_size = window_size
        self.size_average = size_average   # TODO(synk): only size_average=True (mean) path is implemented.
        self.channel = channel
        self.mxu_bf16 = mxu_bf16           # bf16 MXU operands (v6e/v7x); off for exact f32 parity.

    def __call__(self, img1, img2):
        return _msssim_pallas(img1, img2, window_size=self.window_size,
                              mxu_bf16=self.mxu_bf16)


if __name__ == "__main__":
    key = jax.random.PRNGKey(0)
    k1, k2 = jax.random.split(key)
    # batch=2, channels=3 (module default), spatial=32 -> 5 pyramid levels
    img1 = jax.random.uniform(k1, (2, 3, 32, 32), dtype=jnp.float32)
    noise = 0.05 * jax.random.normal(k2, (2, 3, 32, 32), dtype=jnp.float32)
    img2 = jnp.clip(img1 + noise, 0.0, 1.0)

    model = MSSSIM(window_size=11, size_average=True, channel=3)
    out = jax.jit(model.__call__)(img1, img2)
    out = jax.block_until_ready(out)
    assert out.shape == ()
    assert bool(jnp.isfinite(out))
    print("KERNEL_OK")
</pallas_src>

<mosaic_0001>
module attributes {stable_mosaic.version = 11 : i64} {
  func.func @kernel(%arg0: memref<2x3x32x32xf32, #tpu.memory_space<vmem>>, %arg1: memref<2x3x32x32xf32, #tpu.memory_space<vmem>>, %arg2: memref<32x22xf32, #tpu.memory_space<vmem>>, %arg3: memref<22x32xf32, #tpu.memory_space<vmem>>, %arg4: memref<32x16xf32, #tpu.memory_space<vmem>>, %arg5: memref<16x32xf32, #tpu.memory_space<vmem>>, %arg6: memref<16x6xf32, #tpu.memory_space<vmem>>, %arg7: memref<6x16xf32, #tpu.memory_space<vmem>>, %arg8: memref<16x8xf32, #tpu.memory_space<vmem>>, %arg9: memref<8x16xf32, #tpu.memory_space<vmem>>, %arg10: memref<8x4xf32, #tpu.memory_space<vmem>>, %arg11: memref<4x8xf32, #tpu.memory_space<vmem>>, %arg12: memref<4x2xf32, #tpu.memory_space<vmem>>, %arg13: memref<2x4xf32, #tpu.memory_space<vmem>>, %arg14: memref<5x2xf32, #tpu.memory_space<vmem>>) attributes {dimension_semantics = [], scalar_prefetch = 0 : i64, scratch_operands = 0 : i64, tpu.core_type = #tpu.core_type<tc>} {
    %c0 = arith.constant 0 : index
    %c0_0 = arith.constant 0 : index
    %c0_1 = arith.constant 0 : index
    %c0_2 = arith.constant 0 : index
    %0 = vector.load %arg0[%c0, %c0_0, %c0_1, %c0_2] : memref<2x3x32x32xf32, #tpu.memory_space<vmem>>, vector<2x3x32x32xf32>
    %1 = vector.shape_cast %0 : vector<2x3x32x32xf32> to vector<6x32x32xf32>
    %c0_3 = arith.constant 0 : index
    %c0_4 = arith.constant 0 : index
    %c0_5 = arith.constant 0 : index
    %c0_6 = arith.constant 0 : index
    %2 = vector.load %arg1[%c0_3, %c0_4, %c0_5, %c0_6] : memref<2x3x32x32xf32, #tpu.memory_space<vmem>>, vector<2x3x32x32xf32>
    %3 = vector.shape_cast %2 : vector<2x3x32x32xf32> to vector<6x32x32xf32>
    %4 = vector.shape_cast %1 : vector<6x32x32xf32> to vector<1x6x32x32xf32>
    %cst = arith.constant dense<0xFF800000> : vector<1xf32>
    %5 = vector.multi_reduction <maximumf>, %4, %cst [1, 2, 3] : vector<1x6x32x32xf32> to vector<1xf32>
    %6 = vector.shape_cast %5 : vector<1xf32> to vector<1x1x1x1xf32>
    %7 = vector.extract %6[0, 0, 0, 0] : f32 from vector<1x1x1x1xf32>
    %8 = vector.shape_cast %1 : vector<6x32x32xf32> to vector<1x6x32x32xf32>
    %cst_7 = arith.constant dense<0x7F800000> : vector<1xf32>
    %9 = vector.multi_reduction <minimumf>, %8, %cst_7 [1, 2, 3] : vector<1x6x32x32xf32> to vector<1xf32>
    %10 = vector.shape_cast %9 : vector<1xf32> to vector<1x1x1x1xf32>
    %11 = vector.extract %10[0, 0, 0, 0] : f32 from vector<1x1x1x1xf32>
    %cst_8 = arith.constant 1.280000e+02 : f32
    %12 = arith.cmpf ogt, %7, %cst_8 : f32
    %cst_9 = arith.constant 2.550000e+02 : f32
    %cst_10 = arith.constant 1.000000e+00 : f32
    %13 = arith.select %12, %cst_9, %cst_10 : f32
    %cst_11 = arith.constant -5.000000e-01 : f32
    %14 = arith.cmpf olt, %11, %cst_11 : f32
    %cst_12 = arith.constant -1.000000e+00 : f32
    %cst_13 = arith.constant 0.000000e+00 : f32
    %15 = arith.select %14, %cst_12, %cst_13 : f32
    %16 = arith.subf %13, %15 : f32
    %cst_14 = arith.constant 0.00999999977 : f32
    %17 = arith.mulf %cst_14, %16 : f32
    %18 = arith.mulf %17, %17 : f32
    %cst_15 = arith.constant 3.000000e-02 : f32
    %19 = arith.mulf %cst_15, %16 : f32
    %20 = arith.mulf %19, %19 : f32
    %21 = arith.mulf %1, %1 : vector<6x32x32xf32>
    %22 = arith.mulf %3, %3 : vector<6x32x32xf32>
    %23 = arith.mulf %1, %3 : vector<6x32x32xf32>
    %24 = tpu.concatenate %1, %3, %21, %22, %23 in 0 : vector<6x32x32xf32>, vector<6x32x32xf32>, vector<6x32x32xf32>, vector<6x32x32xf32>, vector<6x32x32xf32> -> vector<30x32x32xf32>
    %c0_16 = arith.constant 0 : index
    %c0_17 = arith.constant 0 : index
    %25 = vector.load %arg2[%c0_16, %c0_17] : memref<32x22xf32, #tpu.memory_space<vmem>>, vector<32x22xf32>
    %c0_18 = arith.constant 0 : index
    %c0_19 = arith.constant 0 : index
    %26 = vector.load %arg3[%c0_18, %c0_19] : memref<22x32xf32, #tpu.memory_space<vmem>>, vector<22x32xf32>
    %27 = vector.shape_cast %24 : vector<30x32x32xf32> to vector<960x32xf32>
    %cst_20 = arith.constant dense<0.000000e+00> : vector<960x22xf32>
    %28 = tpu.matmul %27, %25, %cst_20 {dimension_numbers = #tpu.dot_dimension_numbers<[1], [0], [0], [1], [0, 0, 1, 1], [], []>} : vector<960x32xf32>, vector<32x22xf32>, vector<960x22xf32> -> vector<960x22xf32>
    %29 = vector.shape_cast %28 : vector<960x22xf32> to vector<30x32x22xf32>
    %30 = vector.shape_cast %26 : vector<22x32xf32> to vector<1x22x32xf32>
    %31 = vector.broadcast %30 : vector<1x22x32xf32> to vector<30x22x32xf32>
    "tpu.trace_start"() <{level = 10 : i32, message = "nph,nhq->npq"}> : () -> ()
    %cst_21 = arith.constant dense<0.000000e+00> : vector<30x22x22xf32>
    %32 = tpu.matmul %31, %29, %cst_21 {dimension_numbers = #tpu.dot_dimension_numbers<[2], [1], [1], [2], [0, 0, 0, 1, 1, 2], [0], [0]>} : vector<30x22x32xf32>, vector<30x32x22xf32>, vector<30x22x22xf32> -> vector<30x22x22xf32>
    "tpu.trace_stop"() : () -> ()
    %33 = vector.extract_strided_slice %32 {offsets = [0, 0, 0], sizes = [6, 22, 22], strides = [1, 1, 1]} : vector<30x22x22xf32> to vector<6x22x22xf32>
    %34 = vector.extract_strided_slice %32 {offsets = [6, 0, 0], sizes = [6, 22, 22], strides = [1, 1, 1]} : vector<30x22x22xf32> to vector<6x22x22xf32>
    %35 = arith.mulf %33, %33 : vector<6x22x22xf32>
    %36 = arith.mulf %34, %34 : vector<6x22x22xf32>
    %37 = arith.mulf %33, %34 : vector<6x22x22xf32>
    %38 = vector.extract_strided_slice %32 {offsets = [12, 0, 0], sizes = [6, 22, 22], strides = [1, 1, 1]} : vector<30x22x22xf32> to vector<6x22x22xf32>
    %39 = arith.subf %38, %35 : vector<6x22x22xf32>
    %40 = vector.extract_strided_slice %32 {offsets = [18, 0, 0], sizes = [6, 22, 22], strides = [1, 1, 1]} : vector<30x22x22xf32> to vector<6x22x22xf32>
    %41 = arith.subf %40, %36 : vector<6x22x22xf32>
    %42 = vector.extract_strided_slice %32 {offsets = [24, 0, 0], sizes = [6, 22, 22], strides = [1, 1, 1]} : vector<30x22x22xf32> to vector<6x22x22xf32>
    %43 = arith.subf %42, %37 : vector<6x22x22xf32>
    %cst_22 = arith.constant 2.000000e+00 : f32
    %44 = vector.broadcast %cst_22 : f32 to vector<6x22x22xf32>
    %45 = arith.mulf %44, %43 : vector<6x22x22xf32>
    %46 = vector.broadcast %20 : f32 to vector<6x22x22xf32>
    %47 = arith.addf %45, %46 : vector<6x22x22xf32>
    %48 = arith.addf %39, %41 : vector<6x22x22xf32>
    %49 = vector.broadcast %20 : f32 to vector<6x22x22xf32>
    %50 = arith.addf %48, %49 : vector<6x22x22xf32>
    %51 = arith.divf %47, %50 : vector<6x22x22xf32>
    %cst_23 = arith.constant 2.000000e+00 : f32
    %52 = vector.broadcast %cst_23 : f32 to vector<6x22x22xf32>
    %53 = arith.mulf %52, %37 : vector<6x22x22xf32>
    %54 = vector.broadcast %18 : f32 to vector<6x22x22xf32>
    %55 = arith.addf %53, %54 : vector<6x22x22xf32>
    %56 = arith.mulf %55, %47 : vector<6x22x22xf32>
    %57 = arith.addf %35, %36 : vector<6x22x22xf32>
    %58 = vector.broadcast %18 : f32 to vector<6x22x22xf32>
    %59 = arith.addf %57, %58 : vector<6x22x22xf32>
    %60 = arith.mulf %59, %50 : vector<6x22x22xf32>
    %61 = arith.divf %56, %60 : vector<6x22x22xf32>
    %62 = vector.shape_cast %61 : vector<6x22x22xf32> to vector<1x6x22x22xf32>
    %cst_24 = arith.constant dense<0.000000e+00> : vector<1xf32>
    %63 = vector.multi_reduction <add>, %62, %cst_24 [1, 2, 3] : vector<1x6x22x22xf32> to vector<1xf32>
    %64 = vector.shape_cast %63 : vector<1xf32> to vector<1x1x1x1xf32>
    %65 = vector.extract %64[0, 0, 0, 0] : f32 from vector<1x1x1x1xf32>
    %cst_25 = arith.constant 3.44352622E-4 : f32
    %66 = arith.mulf %65, %cst_25 : f32
    %67 = vector.shape_cast %51 : vector<6x22x22xf32> to vector<1x6x22x22xf32>
    %cst_26 = arith.constant dense<0.000000e+00> : vector<1xf32>
    %68 = vector.multi_reduction <add>, %67, %cst_26 [1, 2, 3] : vector<1x6x22x22xf32> to vector<1xf32>
    %69 = vector.shape_cast %68 : vector<1xf32> to vector<1x1x1x1xf32>
    %70 = vector.extract %69[0, 0, 0, 0] : f32 from vector<1x1x1x1xf32>
    %cst_27 = arith.constant 3.44352622E-4 : f32
    %71 = arith.mulf %70, %cst_27 : f32
    %72 = vector.broadcast %66 : f32 to vector<1x1xf32>
    %73 = vector.broadcast %71 : f32 to vector<1x1xf32>
    %74 = tpu.concatenate %72, %73 in 1 : vector<1x1xf32>, vector<1x1xf32> -> vector<1x2xf32>
    %c0_28 = arith.constant 0 : index
    %c0_29 = arith.constant 0 : index
    %75 = vector.load %arg4[%c0_28, %c0_29] : memref<32x16xf32, #tpu.memory_space<vmem>>, vector<32x16xf32>
    %c0_30 = arith.constant 0 : index
    %c0_31 = arith.constant 0 : index
    %76 = vector.load %arg5[%c0_30, %c0_31] : memref<16x32xf32, #tpu.memory_space<vmem>>, vector<16x32xf32>
    %77 = tpu.concatenate %1, %3 in 0 : vector<6x32x32xf32>, vector<6x32x32xf32> -> vector<12x32x32xf32>
    %78 = vector.shape_cast %77 : vector<12x32x32xf32> to vector<384x32xf32>
    %cst_32 = arith.constant dense<0.000000e+00> : vector<384x16xf32>
    %79 = tpu.matmul %78, %75, %cst_32 {dimension_numbers = #tpu.dot_dimension_numbers<[1], [0], [0], [1], [0, 0, 1, 1], [], []>} : vector<384x32xf32>, vector<32x16xf32>, vector<384x16xf32> -> vector<384x16xf32>
    %80 = vector.shape_cast %79 : vector<384x16xf32> to vector<12x32x16xf32>
    %81 = vector.shape_cast %76 : vector<16x32xf32> to vector<1x16x32xf32>
    %82 = vector.broadcast %81 : vector<1x16x32xf32> to vector<12x16x32xf32>
    "tpu.trace_start"() <{level = 10 : i32, message = "nph,nhq->npq"}> : () -> ()
    %cst_33 = arith.constant dense<0.000000e+00> : vector<12x16x16xf32>
    %83 = tpu.matmul %82, %80, %cst_33 {dimension_numbers = #tpu.dot_dimension_numbers<[2], [1], [1], [2], [0, 0, 0, 1, 1, 2], [0], [0]>} : vector<12x16x32xf32>, vector<12x32x16xf32>, vector<12x16x16xf32> -> vector<12x16x16xf32>
    "tpu.trace_stop"() : () -> ()
    %84 = vector.extract_strided_slice %83 {offsets = [0, 0, 0], sizes = [6, 16, 16], strides = [1, 1, 1]} : vector<12x16x16xf32> to vector<6x16x16xf32>
    %85 = vector.extract_strided_slice %83 {offsets = [6, 0, 0], sizes = [6, 16, 16], strides = [1, 1, 1]} : vector<12x16x16xf32> to vector<6x16x16xf32>
    %86 = vector.shape_cast %84 : vector<6x16x16xf32> to vector<1x6x16x16xf32>
    %cst_34 = arith.constant dense<0xFF800000> : vector<1xf32>
    %87 = vector.multi_reduction <maximumf>, %86, %cst_34 [1, 2, 3] : vector<1x6x16x16xf32> to vector<1xf32>
    %88 = vector.shape_cast %87 : vector<1xf32> to vector<1x1x1x1xf32>
    %89 = vector.extract %88[0, 0, 0, 0] : f32 from vector<1x1x1x1xf32>
    %90 = vector.shape_cast %84 : vector<6x16x16xf32> to vector<1x6x16x16xf32>
    %cst_35 = arith.constant dense<0x7F800000> : vector<1xf32>
    %91 = vector.multi_reduction <minimumf>, %90, %cst_35 [1, 2, 3] : vector<1x6x16x16xf32> to vector<1xf32>
    %92 = vector.shape_cast %91 : vector<1xf32> to vector<1x1x1x1xf32>
    %93 = vector.extract %92[0, 0, 0, 0] : f32 from vector<1x1x1x1xf32>
    %cst_36 = arith.constant 1.280000e+02 : f32
    %94 = arith.cmpf ogt, %89, %cst_36 : f32
    %cst_37 = arith.constant 2.550000e+02 : f32
    %cst_38 = arith.constant 1.000000e+00 : f32
    %95 = arith.select %94, %cst_37, %cst_38 : f32
    %cst_39 = arith.constant -5.000000e-01 : f32
    %96 = arith.cmpf olt, %93, %cst_39 : f32
    %cst_40 = arith.constant -1.000000e+00 : f32
    %cst_41 = arith.constant 0.000000e+00 : f32
    %97 = arith.select %96, %cst_40, %cst_41 : f32
    %98 = arith.subf %95, %97 : f32
    %cst_42 = arith.constant 0.00999999977 : f32
    %99 = arith.mulf %cst_42, %98 : f32
    %100 = arith.mulf %99, %99 : f32
    %cst_43 = arith.constant 3.000000e-02 : f32
    %101 = arith.mulf %cst_43, %98 : f32
    %102 = arith.mulf %101, %101 : f32
    %103 = arith.mulf %84, %84 : vector<6x16x16xf32>
    %104 = arith.mulf %85, %85 : vector<6x16x16xf32>
    %105 = arith.mulf %84, %85 : vector<6x16x16xf32>
    %106 = tpu.concatenate %84, %85, %103, %104, %105 in 0 : vector<6x16x16xf32>, vector<6x16x16xf32>, vector<6x16x16xf32>, vector<6x16x16xf32>, vector<6x16x16xf32> -> vector<30x16x16xf32>
    %c0_44 = arith.constant 0 : index
    %c0_45 = arith.constant 0 : index
    %107 = vector.load %arg6[%c0_44, %c0_45] : memref<16x6xf32, #tpu.memory_space<vmem>>, vector<16x6xf32>
    %c0_46 = arith.constant 0 : index
    %c0_47 = arith.constant 0 : index
    %108 = vector.load %arg7[%c0_46, %c0_47] : memref<6x16xf32, #tpu.memory_space<vmem>>, vector<6x16xf32>
    %109 = vector.shape_cast %106 : vector<30x16x16xf32> to vector<480x16xf32>
    %cst_48 = arith.constant dense<0.000000e+00> : vector<480x6xf32>
    %110 = tpu.matmul %109, %107, %cst_48 {dimension_numbers = #tpu.dot_dimension_numbers<[1], [0], [0], [1], [0, 0, 1, 1], [], []>} : vector<480x16xf32>, vector<16x6xf32>, vector<480x6xf32> -> vector<480x6xf32>
    %111 = vector.shape_cast %110 : vector<480x6xf32> to vector<30x16x6xf32>
    %112 = vector.shape_cast %108 : vector<6x16xf32> to vector<1x6x16xf32>
    %113 = vector.broadcast %112 : vector<1x6x16xf32> to vector<30x6x16xf32>
    "tpu.trace_start"() <{level = 10 : i32, message = "nph,nhq->npq"}> : () -> ()
    %cst_49 = arith.constant dense<0.000000e+00> : vector<30x6x6xf32>
    %114 = tpu.matmul %113, %111, %cst_49 {dimension_numbers = #tpu.dot_dimension_numbers<[2], [1], [1], [2], [0, 0, 0, 1, 1, 2], [0], [0]>} : vector<30x6x16xf32>, vector<30x16x6xf32>, vector<30x6x6xf32> -> vector<30x6x6xf32>
    "tpu.trace_stop"() : () -> ()
    %115 = vector.extract_strided_slice %114 {offsets = [0, 0, 0], sizes = [6, 6, 6], strides = [1, 1, 1]} : vector<30x6x6xf32> to vector<6x6x6xf32>
    %116 = vector.extract_strided_slice %114 {offsets = [6, 0, 0], sizes = [6, 6, 6], strides = [1, 1, 1]} : vector<30x6x6xf32> to vector<6x6x6xf32>
    %117 = arith.mulf %115, %115 : vector<6x6x6xf32>
    %118 = arith.mulf %116, %116 : vector<6x6x6xf32>
    %119 = arith.mulf %115, %116 : vector<6x6x6xf32>
    %120 = vector.extract_strided_slice %114 {offsets = [12, 0, 0], sizes = [6, 6, 6], strides = [1, 1, 1]} : vector<30x6x6xf32> to vector<6x6x6xf32>
    %121 = arith.subf %120, %117 : vector<6x6x6xf32>
    %122 = vector.extract_strided_slice %114 {offsets = [18, 0, 0], sizes = [6, 6, 6], strides = [1, 1, 1]} : vector<30x6x6xf32> to vector<6x6x6xf32>
    %123 = arith.subf %122, %118 : vector<6x6x6xf32>
    %124 = vector.extract_strided_slice %114 {offsets = [24, 0, 0], sizes = [6, 6, 6], strides = [1, 1, 1]} : vector<30x6x6xf32> to vector<6x6x6xf32>
    %125 = arith.subf %124, %119 : vector<6x6x6xf32>
    %cst_50 = arith.constant 2.000000e+00 : f32
    %126 = vector.broadcast %cst_50 : f32 to vector<6x6x6xf32>
    %127 = arith.mulf %126, %125 : vector<6x6x6xf32>
    %128 = vector.broadcast %102 : f32 to vector<6x6x6xf32>
    %129 = arith.addf %127, %128 : vector<6x6x6xf32>
    %130 = arith.addf %121, %123 : vector<6x6x6xf32>
    %131 = vector.broadcast %102 : f32 to vector<6x6x6xf32>
    %132 = arith.addf %130, %131 : vector<6x6x6xf32>
    %133 = arith.divf %129, %132 : vector<6x6x6xf32>
    %cst_51 = arith.constant 2.000000e+00 : f32
    %134 = vector.broadcast %cst_51 : f32 to vector<6x6x6xf32>
    %135 = arith.mulf %134, %119 : vector<6x6x6xf32>
    %136 = vector.broadcast %100 : f32 to vector<6x6x6xf32>
    %137 = arith.addf %135, %136 : vector<6x6x6xf32>
    %138 = arith.mulf %137, %129 : vector<6x6x6xf32>
    %139 = arith.addf %117, %118 : vector<6x6x6xf32>
    %140 = vector.broadcast %100 : f32 to vector<6x6x6xf32>
    %141 = arith.addf %139, %140 : vector<6x6x6xf32>
    %142 = arith.mulf %141, %132 : vector<6x6x6xf32>
    %143 = arith.divf %138, %142 : vector<6x6x6xf32>
    %144 = vector.shape_cast %143 : vector<6x6x6xf32> to vector<1x6x6x6xf32>
    %cst_52 = arith.constant dense<0.000000e+00> : vector<1xf32>
    %145 = vector.multi_reduction <add>, %144, %cst_52 [1, 2, 3] : vector<1x6x6x6xf32> to vector<1xf32>
    %146 = vector.shape_cast %145 : vector<1xf32> to vector<1x1x1x1xf32>
    %147 = vector.extract %146[0, 0, 0, 0] : f32 from vector<1x1x1x1xf32>
    %cst_53 = arith.constant 0.00462962966 : f32
    %148 = arith.mulf %147, %cst_53 : f32
    %149 = vector.shape_cast %133 : vector<6x6x6xf32> to vector<1x6x6x6xf32>
    %cst_54 = arith.constant dense<0.000000e+00> : vector<1xf32>
    %150 = vector.multi_reduction <add>, %149, %cst_54 [1, 2, 3] : vector<1x6x6x6xf32> to vector<1xf32>
    %151 = vector.shape_cast %150 : vector<1xf32> to vector<1x1x1x1xf32>
    %152 = vector.extract %151[0, 0, 0, 0] : f32 from vector<1x1x1x1xf32>
    %cst_55 = arith.constant 0.00462962966 : f32
    %153 = arith.mulf %152, %cst_55 : f32
    %154 = vector.broadcast %148 : f32 to vector<1x1xf32>
    %155 = vector.broadcast %153 : f32 to vector<1x1xf32>
    %156 = tpu.concatenate %154, %155 in 1 : vector<1x1xf32>, vector<1x1xf32> -> vector<1x2xf32>
    %c0_56 = arith.constant 0 : index
    %c0_57 = arith.constant 0 : index
    %157 = vector.load %arg8[%c0_56, %c0_57] : memref<16x8xf32, #tpu.memory_space<vmem>>, vector<16x8xf32>
    %c0_58 = arith.constant 0 : index
    %c0_59 = arith.constant 0 : index
    %158 = vector.load %arg9[%c0_58, %c0_59] : memref<8x16xf32, #tpu.memory_space<vmem>>, vector<8x16xf32>
    %159 = tpu.concatenate %84, %85 in 0 : vector<6x16x16xf32>, vector<6x16x16xf32> -> vector<12x16x16xf32>
    %160 = vector.shape_cast %159 : vector<12x16x16xf32> to vector<192x16xf32>
    %cst_60 = arith.constant dense<0.000000e+00> : vector<192x8xf32>
    %161 = tpu.matmul %160, %157, %cst_60 {dimension_numbers = #tpu.dot_dimension_numbers<[1], [0], [0], [1], [0, 0, 1, 1], [], []>} : vector<192x16xf32>, vector<16x8xf32>, vector<192x8xf32> -> vector<192x8xf32>
    %162 = vector.shape_cast %161 : vector<192x8xf32> to vector<12x16x8xf32>
    %163 = vector.shape_cast %158 : vector<8x16xf32> to vector<1x8x16xf32>
    %164 = vector.broadcast %163 : vector<1x8x16xf32> to vector<12x8x16xf32>
    "tpu.trace_start"() <{level = 10 : i32, message = "nph,nhq->npq"}> : () -> ()
    %cst_61 = arith.constant dense<0.000000e+00> : vector<12x8x8xf32>
    %165 = tpu.matmul %164, %162, %cst_61 {dimension_numbers = #tpu.dot_dimension_numbers<[2], [1], [1], [2], [0, 0, 0, 1, 1, 2], [0], [0]>} : vector<12x8x16xf32>, vector<12x16x8xf32>, vector<12x8x8xf32> -> vector<12x8x8xf32>
    "tpu.trace_stop"() : () -> ()
    %166 = vector.extract_strided_slice %165 {offsets = [0, 0, 0], sizes = [6, 8, 8], strides = [1, 1, 1]} : vector<12x8x8xf32> to vector<6x8x8xf32>
    %167 = vector.extract_strided_slice %165 {offsets = [6, 0, 0], sizes = [6, 8, 8], strides = [1, 1, 1]} : vector<12x8x8xf32> to vector<6x8x8xf32>
    %168 = vector.shape_cast %166 : vector<6x8x8xf32> to vector<1x6x8x8xf32>
    %cst_62 = arith.constant dense<0xFF800000> : vector<1xf32>
    %169 = vector.multi_reduction <maximumf>, %168, %cst_62 [1, 2, 3] : vector<1x6x8x8xf32> to vector<1xf32>
    %170 = vector.shape_cast %169 : vector<1xf32> to vector<1x1x1x1xf32>
    %171 = vector.extract %170[0, 0, 0, 0] : f32 from vector<1x1x1x1xf32>
    %172 = vector.shape_cast %166 : vector<6x8x8xf32> to vector<1x6x8x8xf32>
    %cst_63 = arith.constant dense<0x7F800000> : vector<1xf32>
    %173 = vector.multi_reduction <minimumf>, %172, %cst_63 [1, 2, 3] : vector<1x6x8x8xf32> to vector<1xf32>
    %174 = vector.shape_cast %173 : vector<1xf32> to vector<1x1x1x1xf32>
    %175 = vector.extract %174[0, 0, 0, 0] : f32 from vector<1x1x1x1xf32>
    %cst_64 = arith.constant 1.280000e+02 : f32
    %176 = arith.cmpf ogt, %171, %cst_64 : f32
    %cst_65 = arith.constant 2.550000e+02 : f32
    %cst_66 = arith.constant 1.000000e+00 : f32
    %177 = arith.select %176, %cst_65, %cst_66 : f32
    %cst_67 = arith.constant -5.000000e-01 : f32
    %178 = arith.cmpf olt, %175, %cst_67 : f32
    %cst_68 = arith.constant -1.000000e+00 : f32
    %cst_69 = arith.constant 0.000000e+00 : f32
    %179 = arith.select %178, %cst_68, %cst_69 : f32
    %180 = arith.subf %177, %179 : f32
    %cst_70 = arith.constant 0.00999999977 : f32
    %181 = arith.mulf %cst_70, %180 : f32
    %182 = arith.mulf %181, %181 : f32
    %cst_71 = arith.constant 3.000000e-02 : f32
    %183 = arith.mulf %cst_71, %180 : f32
    %184 = arith.mulf %183, %183 : f32
    %185 = arith.mulf %166, %166 : vector<6x8x8xf32>
    %186 = arith.mulf %167, %167 : vector<6x8x8xf32>
    %187 = arith.mulf %166, %167 : vector<6x8x8xf32>
    %188 = tpu.concatenate %166, %167, %185, %186, %187 in 0 : vector<6x8x8xf32>, vector<6x8x8xf32>, vector<6x8x8xf32>, vector<6x8x8xf32>, vector<6x8x8xf32> -> vector<30x8x8xf32>
    %189 = vector.extract_strided_slice %188 {offsets = [0, 0, 0], sizes = [30, 8, 1], strides = [1, 1, 1]} : vector<30x8x8xf32> to vector<30x8x1xf32>
    %cst_72 = arith.constant 0.00767284352 : f32
    %190 = vector.broadcast %cst_72 : f32 to vector<30x8x1xf32>
    %191 = arith.mulf %190, %189 : vector<30x8x1xf32>
    %192 = vector.extract_strided_slice %188 {offsets = [0, 0, 1], sizes = [30, 8, 1], strides = [1, 1, 1]} : vector<30x8x8xf32> to vector<30x8x1xf32>
    %cst_73 = arith.constant 0.0363517702 : f32
    %193 = vector.broadcast %cst_73 : f32 to vector<30x8x1xf32>
    %194 = arith.mulf %193, %192 : vector<30x8x1xf32>
    %195 = arith.addf %191, %194 : vector<30x8x1xf32>
    %196 = vector.extract_strided_slice %188 {offsets = [0, 0, 2], sizes = [30, 8, 1], strides = [1, 1, 1]} : vector<30x8x8xf32> to vector<30x8x1xf32>
    %cst_74 = arith.constant 0.110426925 : f32
    %197 = vector.broadcast %cst_74 : f32 to vector<30x8x1xf32>
    %198 = arith.mulf %197, %196 : vector<30x8x1xf32>
    %199 = arith.addf %195, %198 : vector<30x8x1xf32>
    %200 = vector.extract_strided_slice %188 {offsets = [0, 0, 3], sizes = [30, 8, 1], strides = [1, 1, 1]} : vector<30x8x8xf32> to vector<30x8x1xf32>
    %cst_75 = arith.constant 0.215082273 : f32
    %201 = vector.broadcast %cst_75 : f32 to vector<30x8x1xf32>
    %202 = arith.mulf %201, %200 : vector<30x8x1xf32>
    %203 = arith.addf %199, %202 : vector<30x8x1xf32>
    %204 = vector.extract_strided_slice %188 {offsets = [0, 0, 4], sizes = [30, 8, 1], strides = [1, 1, 1]} : vector<30x8x8xf32> to vector<30x8x1xf32>
    %cst_76 = arith.constant 0.268605262 : f32
    %205 = vector.broadcast %cst_76 : f32 to vector<30x8x1xf32>
    %206 = arith.mulf %205, %204 : vector<30x8x1xf32>
    %207 = arith.addf %203, %206 : vector<30x8x1xf32>
    %208 = vector.extract_strided_slice %188 {offsets = [0, 0, 5], sizes = [30, 8, 1], strides = [1, 1, 1]} : vector<30x8x8xf32> to vector<30x8x1xf32>
    %cst_77 = arith.constant 0.215082273 : f32
    %209 = vector.broadcast %cst_77 : f32 to vector<30x8x1xf32>
    %210 = arith.mulf %209, %208 : vector<30x8x1xf32>
    %211 = arith.addf %207, %210 : vector<30x8x1xf32>
    %212 = vector.extract_strided_slice %188 {offsets = [0, 0, 6], sizes = [30, 8, 1], strides = [1, 1, 1]} : vector<30x8x8xf32> to vector<30x8x1xf32>
    %cst_78 = arith.constant 0.110426925 : f32
    %213 = vector.broadcast %cst_78 : f32 to vector<30x8x1xf32>
    %214 = arith.mulf %213, %212 : vector<30x8x1xf32>
    %215 = arith.addf %211, %214 : vector<30x8x1xf32>
    %216 = vector.extract_strided_slice %188 {offsets = [0, 0, 7], sizes = [30, 8, 1], strides = [1, 1, 1]} : vector<30x8x8xf32> to vector<30x8x1xf32>
    %cst_79 = arith.constant 0.0363517702 : f32
    %217 = vector.broadcast %cst_79 : f32 to vector<30x8x1xf32>
    %218 = arith.mulf %217, %216 : vector<30x8x1xf32>
    %219 = arith.addf %215, %218 : vector<30x8x1xf32>
    %220 = vector.extract_strided_slice %219 {offsets = [0, 0, 0], sizes = [30, 1, 1], strides = [1, 1, 1]} : vector<30x8x1xf32> to vector<30x1x1xf32>
    %cst_80 = arith.constant 0.00767284352 : f32
    %221 = vector.broadcast %cst_80 : f32 to vector<30x1x1xf32>
    %222 = arith.mulf %221, %220 : vector<30x1x1xf32>
    %223 = vector.extract_strided_slice %219 {offsets = [0, 1, 0], sizes = [30, 1, 1], strides = [1, 1, 1]} : vector<30x8x1xf32> to vector<30x1x1xf32>
    %cst_81 = arith.constant 0.0363517702 : f32
    %224 = vector.broadcast %cst_81 : f32 to vector<30x1x1xf32>
    %225 = arith.mulf %224, %223 : vector<30x1x1xf32>
    %226 = arith.addf %222, %225 : vector<30x1x1xf32>
    %227 = vector.extract_strided_slice %219 {offsets = [0, 2, 0], sizes = [30, 1, 1], strides = [1, 1, 1]} : vector<30x8x1xf32> to vector<30x1x1xf32>
    %cst_82 = arith.constant 0.110426925 : f32
    %228 = vector.broadcast %cst_82 : f32 to vector<30x1x1xf32>
    %229 = arith.mulf %228, %227 : vector<30x1x1xf32>
    %230 = arith.addf %226, %229 : vector<30x1x1xf32>
    %231 = vector.extract_strided_slice %219 {offsets = [0, 3, 0], sizes = [30, 1, 1], strides = [1, 1, 1]} : vector<30x8x1xf32> to vector<30x1x1xf32>
    %cst_83 = arith.constant 0.215082273 : f32
    %232 = vector.broadcast %cst_83 : f32 to vector<30x1x1xf32>
    %233 = arith.mulf %232, %231 : vector<30x1x1xf32>
    %234 = arith.addf %230, %233 : vector<30x1x1xf32>
    %235 = vector.extract_strided_slice %219 {offsets = [0, 4, 0], sizes = [30, 1, 1], strides = [1, 1, 1]} : vector<30x8x1xf32> to vector<30x1x1xf32>
    %cst_84 = arith.constant 0.268605262 : f32
    %236 = vector.broadcast %cst_84 : f32 to vector<30x1x1xf32>
    %237 = arith.mulf %236, %235 : vector<30x1x1xf32>
    %238 = arith.addf %234, %237 : vector<30x1x1xf32>
    %239 = vector.extract_strided_slice %219 {offsets = [0, 5, 0], sizes = [30, 1, 1], strides = [1, 1, 1]} : vector<30x8x1xf32> to vector<30x1x1xf32>
    %cst_85 = arith.constant 0.215082273 : f32
    %240 = vector.broadcast %cst_85 : f32 to vector<30x1x1xf32>
    %241 = arith.mulf %240, %239 : vector<30x1x1xf32>
    %242 = arith.addf %238, %241 : vector<30x1x1xf32>
    %243 = vector.extract_strided_slice %219 {offsets = [0, 6, 0], sizes = [30, 1, 1], strides = [1, 1, 1]} : vector<30x8x1xf32> to vector<30x1x1xf32>
    %cst_86 = arith.constant 0.110426925 : f32
    %244 = vector.broadcast %cst_86 : f32 to vector<30x1x1xf32>
    %245 = arith.mulf %244, %243 : vector<30x1x1xf32>
    %246 = arith.addf %242, %245 : vector<30x1x1xf32>
    %247 = vector.extract_strided_slice %219 {offsets = [0, 7, 0], sizes = [30, 1, 1], strides = [1, 1, 1]} : vector<30x8x1xf32> to vector<30x1x1xf32>
    %cst_87 = arith.constant 0.0363517702 : f32
    %248 = vector.broadcast %cst_87 : f32 to vector<30x1x1xf32>
    %249 = arith.mulf %248, %247 : vector<30x1x1xf32>
    %250 = arith.addf %246, %249 : vector<30x1x1xf32>
    %251 = vector.extract_strided_slice %250 {offsets = [0, 0, 0], sizes = [6, 1, 1], strides = [1, 1, 1]} : vector<30x1x1xf32> to vector<6x1x1xf32>
    %252 = vector.extract_strided_slice %250 {offsets = [6, 0, 0], sizes = [6, 1, 1], strides = [1, 1, 1]} : vector<30x1x1xf32> to vector<6x1x1xf32>
    %253 = arith.mulf %251, %251 : vector<6x1x1xf32>
    %254 = arith.mulf %252, %252 : vector<6x1x1xf32>
    %255 = arith.mulf %251, %252 : vector<6x1x1xf32>
    %256 = vector.extract_strided_slice %250 {offsets = [12, 0, 0], sizes = [6, 1, 1], strides = [1, 1, 1]} : vector<30x1x1xf32> to vector<6x1x1xf32>
    %257 = arith.subf %256, %253 : vector<6x1x1xf32>
    %258 = vector.extract_strided_slice %250 {offsets = [18, 0, 0], sizes = [6, 1, 1], strides = [1, 1, 1]} : vector<30x1x1xf32> to vector<6x1x1xf32>
    %259 = arith.subf %258, %254 : vector<6x1x1xf32>
    %260 = vector.extract_strided_slice %250 {offsets = [24, 0, 0], sizes = [6, 1, 1], strides = [1, 1, 1]} : vector<30x1x1xf32> to vector<6x1x1xf32>
    %261 = arith.subf %260, %255 : vector<6x1x1xf32>
    %cst_88 = arith.constant 2.000000e+00 : f32
    %262 = vector.broadcast %cst_88 : f32 to vector<6x1x1xf32>
    %263 = arith.mulf %262, %261 : vector<6x1x1xf32>
    %264 = vector.broadcast %184 : f32 to vector<6x1x1xf32>
    %265 = arith.addf %263, %264 : vector<6x1x1xf32>
    %266 = arith.addf %257, %259 : vector<6x1x1xf32>
    %267 = vector.broadcast %184 : f32 to vector<6x1x1xf32>
    %268 = arith.addf %266, %267 : vector<6x1x1xf32>
    %269 = arith.divf %265, %268 : vector<6x1x1xf32>
    %cst_89 = arith.constant 2.000000e+00 : f32
    %270 = vector.broadcast %cst_89 : f32 to vector<6x1x1xf32>
    %271 = arith.mulf %270, %255 : vector<6x1x1xf32>
    %272 = vector.broadcast %182 : f32 to vector<6x1x1xf32>
    %273 = arith.addf %271, %272 : vector<6x1x1xf32>
    %274 = arith.mulf %273, %265 : vector<6x1x1xf32>
    %275 = arith.addf %253, %254 : vector<6x1x1xf32>
    %276 = vector.broadcast %182 : f32 to vector<6x1x1xf32>
    %277 = arith.addf %275, %276 : vector<6x1x1xf32>
    %278 = arith.mulf %277, %268 : vector<6x1x1xf32>
    %279 = arith.divf %274, %278 : vector<6x1x1xf32>
    %280 = vector.shape_cast %279 : vector<6x1x1xf32> to vector<1x6x1x1xf32>
    %cst_90 = arith.constant dense<0.000000e+00> : vector<1xf32>
    %281 = vector.multi_reduction <add>, %280, %cst_90 [1, 2, 3] : vector<1x6x1x1xf32> to vector<1xf32>
    %282 = vector.shape_cast %281 : vector<1xf32> to vector<1x1x1x1xf32>
    %283 = vector.extract %282[0, 0, 0, 0] : f32 from vector<1x1x1x1xf32>
    %cst_91 = arith.constant 0.166666672 : f32
    %284 = arith.mulf %283, %cst_91 : f32
    %285 = vector.shape_cast %269 : vector<6x1x1xf32> to vector<1x6x1x1xf32>
    %cst_92 = arith.constant dense<0.000000e+00> : vector<1xf32>
    %286 = vector.multi_reduction <add>, %285, %cst_92 [1, 2, 3] : vector<1x6x1x1xf32> to vector<1xf32>
    %287 = vector.shape_cast %286 : vector<1xf32> to vector<1x1x1x1xf32>
    %288 = vector.extract %287[0, 0, 0, 0] : f32 from vector<1x1x1x1xf32>
    %cst_93 = arith.constant 0.166666672 : f32
    %289 = arith.mulf %288, %cst_93 : f32
    %290 = vector.broadcast %284 : f32 to vector<1x1xf32>
    %291 = vector.broadcast %289 : f32 to vector<1x1xf32>
    %292 = tpu.concatenate %290, %291 in 1 : vector<1x1xf32>, vector<1x1xf32> -> vector<1x2xf32>
    %c0_94 = arith.constant 0 : index
    %c0_95 = arith.constant 0 : index
    %293 = vector.load %arg10[%c0_94, %c0_95] : memref<8x4xf32, #tpu.memory_space<vmem>>, vector<8x4xf32>
    %c0_96 = arith.constant 0 : index
    %c0_97 = arith.constant 0 : index
    %294 = vector.load %arg11[%c0_96, %c0_97] : memref<4x8xf32, #tpu.memory_space<vmem>>, vector<4x8xf32>
    %295 = tpu.concatenate %166, %167 in 0 : vector<6x8x8xf32>, vector<6x8x8xf32> -> vector<12x8x8xf32>
    %296 = vector.shape_cast %295 : vector<12x8x8xf32> to vector<96x8xf32>
    %cst_98 = arith.constant dense<0.000000e+00> : vector<96x4xf32>
    %297 = tpu.matmul %296, %293, %cst_98 {dimension_numbers = #tpu.dot_dimension_numbers<[1], [0], [0], [1], [0, 0, 1, 1], [], []>} : vector<96x8xf32>, vector<8x4xf32>, vector<96x4xf32> -> vector<96x4xf32>
    %298 = vector.shape_cast %297 : vector<96x4xf32> to vector<12x8x4xf32>
    %299 = vector.shape_cast %294 : vector<4x8xf32> to vector<1x4x8xf32>
    %300 = vector.broadcast %299 : vector<1x4x8xf32> to vector<12x4x8xf32>
    "tpu.trace_start"() <{level = 10 : i32, message = "nph,nhq->npq"}> : () -> ()
    %cst_99 = arith.constant dense<0.000000e+00> : vector<12x4x4xf32>
    %301 = tpu.matmul %300, %298, %cst_99 {dimension_numbers = #tpu.dot_dimension_numbers<[2], [1], [1], [2], [0, 0, 0, 1, 1, 2], [0], [0]>} : vector<12x4x8xf32>, vector<12x8x4xf32>, vector<12x4x4xf32> -> vector<12x4x4xf32>
    "tpu.trace_stop"() : () -> ()
    %302 = vector.extract_strided_slice %301 {offsets = [0, 0, 0], sizes = [6, 4, 4], strides = [1, 1, 1]} : vector<12x4x4xf32> to vector<6x4x4xf32>
    %303 = vector.extract_strided_slice %301 {offsets = [6, 0, 0], sizes = [6, 4, 4], strides = [1, 1, 1]} : vector<12x4x4xf32> to vector<6x4x4xf32>
    %304 = vector.shape_cast %302 : vector<6x4x4xf32> to vector<1x6x4x4xf32>
    %cst_100 = arith.constant dense<0xFF800000> : vector<1xf32>
    %305 = vector.multi_reduction <maximumf>, %304, %cst_100 [1, 2, 3] : vector<1x6x4x4xf32> to vector<1xf32>
    %306 = vector.shape_cast %305 : vector<1xf32> to vector<1x1x1x1xf32>
    %307 = vector.extract %306[0, 0, 0, 0] : f32 from vector<1x1x1x1xf32>
    %308 = vector.shape_cast %302 : vector<6x4x4xf32> to vector<1x6x4x4xf32>
    %cst_101 = arith.constant dense<0x7F800000> : vector<1xf32>
    %309 = vector.multi_reduction <minimumf>, %308, %cst_101 [1, 2, 3] : vector<1x6x4x4xf32> to vector<1xf32>
    %310 = vector.shape_cast %309 : vector<1xf32> to vector<1x1x1x1xf32>
    %311 = vector.extract %310[0, 0, 0, 0] : f32 from vector<1x1x1x1xf32>
    %cst_102 = arith.constant 1.280000e+02 : f32
    %312 = arith.cmpf ogt, %307, %cst_102 : f32
    %cst_103 = arith.constant 2.550000e+02 : f32
    %cst_104 = arith.constant 1.000000e+00 : f32
    %313 = arith.select %312, %cst_103, %cst_104 : f32
    %cst_105 = arith.constant -5.000000e-01 : f32
    %314 = arith.cmpf olt, %311, %cst_105 : f32
    %cst_106 = arith.constant -1.000000e+00 : f32
    %cst_107 = arith.constant 0.000000e+00 : f32
    %315 = arith.select %314, %cst_106, %cst_107 : f32
    %316 = arith.subf %313, %315 : f32
    %cst_108 = arith.constant 0.00999999977 : f32
    %317 = arith.mulf %cst_108, %316 : f32
    %318 = arith.mulf %317, %317 : f32
    %cst_109 = arith.constant 3.000000e-02 : f32
    %319 = arith.mulf %cst_109, %316 : f32
    %320 = arith.mulf %319, %319 : f32
    %321 = arith.mulf %302, %302 : vector<6x4x4xf32>
    %322 = arith.mulf %303, %303 : vector<6x4x4xf32>
    %323 = arith.mulf %302, %303 : vector<6x4x4xf32>
    %324 = tpu.concatenate %302, %303, %321, %322, %323 in 0 : vector<6x4x4xf32>, vector<6x4x4xf32>, vector<6x4x4xf32>, vector<6x4x4xf32>, vector<6x4x4xf32> -> vector<30x4x4xf32>
    %325 = vector.extract_strided_slice %324 {offsets = [0, 0, 0], sizes = [30, 4, 1], strides = [1, 1, 1]} : vector<30x4x4xf32> to vector<30x4x1xf32>
    %cst_110 = arith.constant 0.136464864 : f32
    %326 = vector.broadcast %cst_110 : f32 to vector<30x4x1xf32>
    %327 = arith.mulf %326, %325 : vector<30x4x1xf32>
    %328 = vector.extract_strided_slice %324 {offsets = [0, 0, 1], sizes = [30, 4, 1], strides = [1, 1, 1]} : vector<30x4x4xf32> to vector<30x4x1xf32>
    %cst_111 = arith.constant 0.265797257 : f32
    %329 = vector.broadcast %cst_111 : f32 to vector<30x4x1xf32>
    %330 = arith.mulf %329, %328 : vector<30x4x1xf32>
    %331 = arith.addf %327, %330 : vector<30x4x1xf32>
    %332 = vector.extract_strided_slice %324 {offsets = [0, 0, 2], sizes = [30, 4, 1], strides = [1, 1, 1]} : vector<30x4x4xf32> to vector<30x4x1xf32>
    %cst_112 = arith.constant 0.331940621 : f32
    %333 = vector.broadcast %cst_112 : f32 to vector<30x4x1xf32>
    %334 = arith.mulf %333, %332 : vector<30x4x1xf32>
    %335 = arith.addf %331, %334 : vector<30x4x1xf32>
    %336 = vector.extract_strided_slice %324 {offsets = [0, 0, 3], sizes = [30, 4, 1], strides = [1, 1, 1]} : vector<30x4x4xf32> to vector<30x4x1xf32>
    %cst_113 = arith.constant 0.265797257 : f32
    %337 = vector.broadcast %cst_113 : f32 to vector<30x4x1xf32>
    %338 = arith.mulf %337, %336 : vector<30x4x1xf32>
    %339 = arith.addf %335, %338 : vector<30x4x1xf32>
    %340 = vector.extract_strided_slice %339 {offsets = [0, 0, 0], sizes = [30, 1, 1], strides = [1, 1, 1]} : vector<30x4x1xf32> to vector<30x1x1xf32>
    %cst_114 = arith.constant 0.136464864 : f32
    %341 = vector.broadcast %cst_114 : f32 to vector<30x1x1xf32>
    %342 = arith.mulf %341, %340 : vector<30x1x1xf32>
    %343 = vector.extract_strided_slice %339 {offsets = [0, 1, 0], sizes = [30, 1, 1], strides = [1, 1, 1]} : vector<30x4x1xf32> to vector<30x1x1xf32>
    %cst_115 = arith.constant 0.265797257 : f32
    %344 = vector.broadcast %cst_115 : f32 to vector<30x1x1xf32>
    %345 = arith.mulf %344, %343 : vector<30x1x1xf32>
    %346 = arith.addf %342, %345 : vector<30x1x1xf32>
    %347 = vector.extract_strided_slice %339 {offsets = [0, 2, 0], sizes = [30, 1, 1], strides = [1, 1, 1]} : vector<30x4x1xf32> to vector<30x1x1xf32>
    %cst_116 = arith.constant 0.331940621 : f32
    %348 = vector.broadcast %cst_116 : f32 to vector<30x1x1xf32>
    %349 = arith.mulf %348, %347 : vector<30x1x1xf32>
    %350 = arith.addf %346, %349 : vector<30x1x1xf32>
    %351 = vector.extract_strided_slice %339 {offsets = [0, 3, 0], sizes = [30, 1, 1], strides = [1, 1, 1]} : vector<30x4x1xf32> to vector<30x1x1xf32>
    %cst_117 = arith.constant 0.265797257 : f32
    %352 = vector.broadcast %cst_117 : f32 to vector<30x1x1xf32>
    %353 = arith.mulf %352, %351 : vector<30x1x1xf32>
    %354 = arith.addf %350, %353 : vector<30x1x1xf32>
    %355 = vector.extract_strided_slice %354 {offsets = [0, 0, 0], sizes = [6, 1, 1], strides = [1, 1, 1]} : vector<30x1x1xf32> to vector<6x1x1xf32>
    %356 = vector.extract_strided_slice %354 {offsets = [6, 0, 0], sizes = [6, 1, 1], strides = [1, 1, 1]} : vector<30x1x1xf32> to vector<6x1x1xf32>
    %357 = arith.mulf %355, %355 : vector<6x1x1xf32>
    %358 = arith.mulf %356, %356 : vector<6x1x1xf32>
    %359 = arith.mulf %355, %356 : vector<6x1x1xf32>
    %360 = vector.extract_strided_slice %354 {offsets = [12, 0, 0], sizes = [6, 1, 1], strides = [1, 1, 1]} : vector<30x1x1xf32> to vector<6x1x1xf32>
    %361 = arith.subf %360, %357 : vector<6x1x1xf32>
    %362 = vector.extract_strided_slice %354 {offsets = [18, 0, 0], sizes = [6, 1, 1], strides = [1, 1, 1]} : vector<30x1x1xf32> to vector<6x1x1xf32>
    %363 = arith.subf %362, %358 : vector<6x1x1xf32>
    %364 = vector.extract_strided_slice %354 {offsets = [24, 0, 0], sizes = [6, 1, 1], strides = [1, 1, 1]} : vector<30x1x1xf32> to vector<6x1x1xf32>
    %365 = arith.subf %364, %359 : vector<6x1x1xf32>
    %cst_118 = arith.constant 2.000000e+00 : f32
    %366 = vector.broadcast %cst_118 : f32 to vector<6x1x1xf32>
    %367 = arith.mulf %366, %365 : vector<6x1x1xf32>
    %368 = vector.broadcast %320 : f32 to vector<6x1x1xf32>
    %369 = arith.addf %367, %368 : vector<6x1x1xf32>
    %370 = arith.addf %361, %363 : vector<6x1x1xf32>
    %371 = vector.broadcast %320 : f32 to vector<6x1x1xf32>
    %372 = arith.addf %370, %371 : vector<6x1x1xf32>
    %373 = arith.divf %369, %372 : vector<6x1x1xf32>
    %cst_119 = arith.constant 2.000000e+00 : f32
    %374 = vector.broadcast %cst_119 : f32 to vector<6x1x1xf32>
    %375 = arith.mulf %374, %359 : vector<6x1x1xf32>
    %376 = vector.broadcast %318 : f32 to vector<6x1x1xf32>
    %377 = arith.addf %375, %376 : vector<6x1x1xf32>
    %378 = arith.mulf %377, %369 : vector<6x1x1xf32>
    %379 = arith.addf %357, %358 : vector<6x1x1xf32>
    %380 = vector.broadcast %318 : f32 to vector<6x1x1xf32>
    %381 = arith.addf %379, %380 : vector<6x1x1xf32>
    %382 = arith.mulf %381, %372 : vector<6x1x1xf32>
    %383 = arith.divf %378, %382 : vector<6x1x1xf32>
    %384 = vector.shape_cast %383 : vector<6x1x1xf32> to vector<1x6x1x1xf32>
    %cst_120 = arith.constant dense<0.000000e+00> : vector<1xf32>
    %385 = vector.multi_reduction <add>, %384, %cst_120 [1, 2, 3] : vector<1x6x1x1xf32> to vector<1xf32>
    %386 = vector.shape_cast %385 : vector<1xf32> to vector<1x1x1x1xf32>
    %387 = vector.extract %386[0, 0, 0, 0] : f32 from vector<1x1x1x1xf32>
    %cst_121 = arith.constant 0.166666672 : f32
    %388 = arith.mulf %387, %cst_121 : f32
    %389 = vector.shape_cast %373 : vector<6x1x1xf32> to vector<1x6x1x1xf32>
    %cst_122 = arith.constant dense<0.000000e+00> : vector<1xf32>
    %390 = vector.multi_reduction <add>, %389, %cst_122 [1, 2, 3] : vector<1x6x1x1xf32> to vector<1xf32>
    %391 = vector.shape_cast %390 : vector<1xf32> to vector<1x1x1x1xf32>
    %392 = vector.extract %391[0, 0, 0, 0] : f32 from vector<1x1x1x1xf32>
    %cst_123 = arith.constant 0.166666672 : f32
    %393 = arith.mulf %392, %cst_123 : f32
    %394 = vector.broadcast %388 : f32 to vector<1x1xf32>
    %395 = vector.broadcast %393 : f32 to vector<1x1xf32>
    %396 = tpu.concatenate %394, %395 in 1 : vector<1x1xf32>, vector<1x1xf32> -> vector<1x2xf32>
    %c0_124 = arith.constant 0 : index
    %c0_125 = arith.constant 0 : index
    %397 = vector.load %arg12[%c0_124, %c0_125] : memref<4x2xf32, #tpu.memory_space<vmem>>, vector<4x2xf32>
    %c0_126 = arith.constant 0 : index
    %c0_127 = arith.constant 0 : index
    %398 = vector.load %arg13[%c0_126, %c0_127] : memref<2x4xf32, #tpu.memory_space<vmem>>, vector<2x4xf32>
    %399 = tpu.concatenate %302, %303 in 0 : vector<6x4x4xf32>, vector<6x4x4xf32> -> vector<12x4x4xf32>
    %400 = vector.shape_cast %397 : vector<4x2xf32> to vector<1x4x2xf32>
    %401 = vector.broadcast %400 : vector<1x4x2xf32> to vector<12x4x2xf32>
    "tpu.trace_start"() <{level = 10 : i32, message = "nhw,nwq->nhq"}> : () -> ()
    %cst_128 = arith.constant dense<0.000000e+00> : vector<12x4x2xf32>
    %402 = tpu.matmul %399, %401, %cst_128 {dimension_numbers = #tpu.dot_dimension_numbers<[2], [1], [1], [2], [0, 0, 0, 1, 1, 2], [0], [0]>} : vector<12x4x4xf32>, vector<12x4x2xf32>, vector<12x4x2xf32> -> vector<12x4x2xf32>
    "tpu.trace_stop"() : () -> ()
    %403 = vector.shape_cast %398 : vector<2x4xf32> to vector<1x2x4xf32>
    %404 = vector.broadcast %403 : vector<1x2x4xf32> to vector<12x2x4xf32>
    "tpu.trace_start"() <{level = 10 : i32, message = "nph,nhq->npq"}> : () -> ()
    %cst_129 = arith.constant dense<0.000000e+00> : vector<12x2x2xf32>
    %405 = tpu.matmul %404, %402, %cst_129 {dimension_numbers = #tpu.dot_dimension_numbers<[2], [1], [1], [2], [0, 0, 0, 1, 1, 2], [0], [0]>} : vector<12x2x4xf32>, vector<12x4x2xf32>, vector<12x2x2xf32> -> vector<12x2x2xf32>
    "tpu.trace_stop"() : () -> ()
    %406 = vector.extract_strided_slice %405 {offsets = [0, 0, 0], sizes = [6, 2, 2], strides = [1, 1, 1]} : vector<12x2x2xf32> to vector<6x2x2xf32>
    %407 = vector.extract_strided_slice %405 {offsets = [6, 0, 0], sizes = [6, 2, 2], strides = [1, 1, 1]} : vector<12x2x2xf32> to vector<6x2x2xf32>
    %408 = vector.shape_cast %406 : vector<6x2x2xf32> to vector<1x6x2x2xf32>
    %cst_130 = arith.constant dense<0xFF800000> : vector<1xf32>
    %409 = vector.multi_reduction <maximumf>, %408, %cst_130 [1, 2, 3] : vector<1x6x2x2xf32> to vector<1xf32>
    %410 = vector.shape_cast %409 : vector<1xf32> to vector<1x1x1x1xf32>
    %411 = vector.extract %410[0, 0, 0, 0] : f32 from vector<1x1x1x1xf32>
    %412 = vector.shape_cast %406 : vector<6x2x2xf32> to vector<1x6x2x2xf32>
    %cst_131 = arith.constant dense<0x7F800000> : vector<1xf32>
    %413 = vector.multi_reduction <minimumf>, %412, %cst_131 [1, 2, 3] : vector<1x6x2x2xf32> to vector<1xf32>
    %414 = vector.shape_cast %413 : vector<1xf32> to vector<1x1x1x1xf32>
    %415 = vector.extract %414[0, 0, 0, 0] : f32 from vector<1x1x1x1xf32>
    %cst_132 = arith.constant 1.280000e+02 : f32
    %416 = arith.cmpf ogt, %411, %cst_132 : f32
    %cst_133 = arith.constant 2.550000e+02 : f32
    %cst_134 = arith.constant 1.000000e+00 : f32
    %417 = arith.select %416, %cst_133, %cst_134 : f32
    %cst_135 = arith.constant -5.000000e-01 : f32
    %418 = arith.cmpf olt, %415, %cst_135 : f32
    %cst_136 = arith.constant -1.000000e+00 : f32
    %cst_137 = arith.constant 0.000000e+00 : f32
    %419 = arith.select %418, %cst_136, %cst_137 : f32
    %420 = arith.subf %417, %419 : f32
    %cst_138 = arith.constant 0.00999999977 : f32
    %421 = arith.mulf %cst_138, %420 : f32
    %422 = arith.mulf %421, %421 : f32
    %cst_139 = arith.constant 3.000000e-02 : f32
    %423 = arith.mulf %cst_139, %420 : f32
    %424 = arith.mulf %423, %423 : f32
    %425 = arith.mulf %406, %406 : vector<6x2x2xf32>
    %426 = arith.mulf %407, %407 : vector<6x2x2xf32>
    %427 = arith.mulf %406, %407 : vector<6x2x2xf32>
    %428 = tpu.concatenate %406, %407, %425, %426, %427 in 0 : vector<6x2x2xf32>, vector<6x2x2xf32>, vector<6x2x2xf32>, vector<6x2x2xf32>, vector<6x2x2xf32> -> vector<30x2x2xf32>
    %429 = vector.extract_strided_slice %428 {offsets = [0, 0, 0], sizes = [30, 2, 1], strides = [1, 1, 1]} : vector<30x2x2xf32> to vector<30x2x1xf32>
    %cst_140 = arith.constant 0.444671929 : f32
    %430 = vector.broadcast %cst_140 : f32 to vector<30x2x1xf32>
    %431 = arith.mulf %430, %429 : vector<30x2x1xf32>
    %432 = vector.extract_strided_slice %428 {offsets = [0, 0, 1], sizes = [30, 2, 1], strides = [1, 1, 1]} : vector<30x2x2xf32> to vector<30x2x1xf32>
    %cst_141 = arith.constant 0.555328071 : f32
    %433 = vector.broadcast %cst_141 : f32 to vector<30x2x1xf32>
    %434 = arith.mulf %433, %432 : vector<30x2x1xf32>
    %435 = arith.addf %431, %434 : vector<30x2x1xf32>
    %436 = vector.extract_strided_slice %435 {offsets = [0, 0, 0], sizes = [30, 1, 1], strides = [1, 1, 1]} : vector<30x2x1xf32> to vector<30x1x1xf32>
    %cst_142 = arith.constant 0.444671929 : f32
    %437 = vector.broadcast %cst_142 : f32 to vector<30x1x1xf32>
    %438 = arith.mulf %437, %436 : vector<30x1x1xf32>
    %439 = vector.extract_strided_slice %435 {offsets = [0, 1, 0], sizes = [30, 1, 1], strides = [1, 1, 1]} : vector<30x2x1xf32> to vector<30x1x1xf32>
    %cst_143 = arith.constant 0.555328071 : f32
    %440 = vector.broadcast %cst_143 : f32 to vector<30x1x1xf32>
    %441 = arith.mulf %440, %439 : vector<30x1x1xf32>
    %442 = arith.addf %438, %441 : vector<30x1x1xf32>
    %443 = vector.extract_strided_slice %442 {offsets = [0, 0, 0], sizes = [6, 1, 1], strides = [1, 1, 1]} : vector<30x1x1xf32> to vector<6x1x1xf32>
    %444 = vector.extract_strided_slice %442 {offsets = [6, 0, 0], sizes = [6, 1, 1], strides = [1, 1, 1]} : vector<30x1x1xf32> to vector<6x1x1xf32>
    %445 = arith.mulf %443, %443 : vector<6x1x1xf32>
    %446 = arith.mulf %444, %444 : vector<6x1x1xf32>
    %447 = arith.mulf %443, %444 : vector<6x1x1xf32>
    %448 = vector.extract_strided_slice %442 {offsets = [12, 0, 0], sizes = [6, 1, 1], strides = [1, 1, 1]} : vector<30x1x1xf32> to vector<6x1x1xf32>
    %449 = arith.subf %448, %445 : vector<6x1x1xf32>
    %450 = vector.extract_strided_slice %442 {offsets = [18, 0, 0], sizes = [6, 1, 1], strides = [1, 1, 1]} : vector<30x1x1xf32> to vector<6x1x1xf32>
    %451 = arith.subf %450, %446 : vector<6x1x1xf32>
    %452 = vector.extract_strided_slice %442 {offsets = [24, 0, 0], sizes = [6, 1, 1], strides = [1, 1, 1]} : vector<30x1x1xf32> to vector<6x1x1xf32>
    %453 = arith.subf %452, %447 : vector<6x1x1xf32>
    %cst_144 = arith.constant 2.000000e+00 : f32
    %454 = vector.broadcast %cst_144 : f32 to vector<6x1x1xf32>
    %455 = arith.mulf %454, %453 : vector<6x1x1xf32>
    %456 = vector.broadcast %424 : f32 to vector<6x1x1xf32>
    %457 = arith.addf %455, %456 : vector<6x1x1xf32>
    %458 = arith.addf %449, %451 : vector<6x1x1xf32>
    %459 = vector.broadcast %424 : f32 to vector<6x1x1xf32>
    %460 = arith.addf %458, %459 : vector<6x1x1xf32>
    %461 = arith.divf %457, %460 : vector<6x1x1xf32>
    %cst_145 = arith.constant 2.000000e+00 : f32
    %462 = vector.broadcast %cst_145 : f32 to vector<6x1x1xf32>
    %463 = arith.mulf %462, %447 : vector<6x1x1xf32>
    %464 = vector.broadcast %422 : f32 to vector<6x1x1xf32>
    %465 = arith.addf %463, %464 : vector<6x1x1xf32>
    %466 = arith.mulf %465, %457 : vector<6x1x1xf32>
    %467 = arith.addf %445, %446 : vector<6x1x1xf32>
    %468 = vector.broadcast %422 : f32 to vector<6x1x1xf32>
    %469 = arith.addf %467, %468 : vector<6x1x1xf32>
    %470 = arith.mulf %469, %460 : vector<6x1x1xf32>
    %471 = arith.divf %466, %470 : vector<6x1x1xf32>
    %472 = vector.shape_cast %471 : vector<6x1x1xf32> to vector<1x6x1x1xf32>
    %cst_146 = arith.constant dense<0.000000e+00> : vector<1xf32>
    %473 = vector.multi_reduction <add>, %472, %cst_146 [1, 2, 3] : vector<1x6x1x1xf32> to vector<1xf32>
    %474 = vector.shape_cast %473 : vector<1xf32> to vector<1x1x1x1xf32>
    %475 = vector.extract %474[0, 0, 0, 0] : f32 from vector<1x1x1x1xf32>
    %cst_147 = arith.constant 0.166666672 : f32
    %476 = arith.mulf %475, %cst_147 : f32
    %477 = vector.shape_cast %461 : vector<6x1x1xf32> to vector<1x6x1x1xf32>
    %cst_148 = arith.constant dense<0.000000e+00> : vector<1xf32>
    %478 = vector.multi_reduction <add>, %477, %cst_148 [1, 2, 3] : vector<1x6x1x1xf32> to vector<1xf32>
    %479 = vector.shape_cast %478 : vector<1xf32> to vector<1x1x1x1xf32>
    %480 = vector.extract %479[0, 0, 0, 0] : f32 from vector<1x1x1x1xf32>
    %cst_149 = arith.constant 0.166666672 : f32
    %481 = arith.mulf %480, %cst_149 : f32
    %482 = vector.broadcast %476 : f32 to vector<1x1xf32>
    %483 = vector.broadcast %481 : f32 to vector<1x1xf32>
    %484 = tpu.concatenate %482, %483 in 1 : vector<1x1xf32>, vector<1x1xf32> -> vector<1x2xf32>
    %485 = tpu.concatenate %74, %156, %292, %396, %484 in 0 : vector<1x2xf32>, vector<1x2xf32>, vector<1x2xf32>, vector<1x2xf32>, vector<1x2xf32> -> vector<5x2xf32>
    %c0_150 = arith.constant 0 : index
    %c0_151 = arith.constant 0 : index
    %486 = vector.load %arg14[%c0_150, %c0_151] : memref<5x2xf32, #tpu.memory_space<vmem>>, vector<5x2xf32>
    tpu.vector_store %arg14[%c0_150, %c0_151], %485 {strides = array<i32>} : memref<5x2xf32, #tpu.memory_space<vmem>>, vector<5x2xf32>,
    return
  }
}

</mosaic_0001>

<bundles_post_ra>
// kernel: a_call__.1
= control target key start
LH: loop header
LB: loop body
LE: loop exit
PB: predicated region body
PF: predicated region fallthrough
CT: control target
= control target key end

     0   :  { %19 = vsyncpa [#allocation3], 0  ;;  %s25317_s0 = inlined_call_operand.hbm [shape: f32[2,3,32,32], index: 0, kind: input, shape index: {}]   ;;  %s25318_s1 = inlined_call_operand.hbm [shape: f32[2,3,32,32], index: 1, kind: input, shape index: {}]   ;;  %s25319_s2 = inlined_call_operand.hbm [shape: f32[32,22], index: 2, kind: input, shape index: {}]   ;;  %s25320_s3 = inlined_call_operand.hbm [shape: f32[22,32], index: 3, kind: input, shape index: {}]   ;;  %s25321_s4 = inlined_call_operand.hbm [shape: f32[32,16], index: 4, kind: input, shape index: {}]   ;;  %s25322_s5 = inlined_call_operand.hbm [shape: f32[16,32], index: 5, kind: input, shape index: {}]   ;;  %s25323_s6 = inlined_call_operand.hbm [shape: f32[16,6], index: 6, kind: input, shape index: {}]   ;;  %s25324_s7 = inlined_call_operand.hbm [shape: f32[6,16], index: 7, kind: input, shape index: {}]   ;;  %s25325_s8 = inlined_call_operand.vmem [shape: f32[16,8], index: 8, kind: input, shape index: {}]   ;;  %s25326_s9 = inlined_call_operand.vmem [shape: f32[8,16], index: 9, kind: input, shape index: {}]   ;;  %s25327_s10 = inlined_call_operand.vmem [shape: f32[8,4], index: 10, kind: input, shape index: {}]   ;;  %s25328_s11 = inlined_call_operand.vmem [shape: f32[4,8], index: 11, kind: input, shape index: {}]   ;;  %s25329_s12 = inlined_call_operand.vmem [shape: f32[4,2], index: 12, kind: input, shape index: {}]   ;;  %s25330_s13 = inlined_call_operand.vmem [shape: f32[2,4], index: 13, kind: input, shape index: {}]   ;;  %s25331_s14 = inlined_call_operand.vmem [shape: f32[5,2], index: 14, kind: output, shape index: {}]  }
   0x1   :  { %20 = vsyncpa [#allocation5], 0 }
   0x2   :  { %21 = vsyncpa [#allocation8], 0 }
   0x3   :  { %22 = vsyncpa [#allocation11], 0 }
   0x4   :  { %23 = vsyncpa [#allocation14], 0  ;;  %s19973_s29 = smov [#allocation4]   ;;  %s19974_s15 = smov [#allocation7]  }
   0x5   :  { %s41_s30 = sshll.u32 %s19973_s29, 4  ;;  %s65_s16 = sshll.u32 %s19974_s15, 4  ;;  %s42_s30 = int_to_ptr.vmem [resolvable:$true] %s41_s30  ;;  %s20068_s16 = int_to_ptr.vmem [resolvable:$true] %s65_s16 }
   0x6   :  { %s19787_s19 = scalar_lea.hbm %s25318_s1, 3072 }
   0x7   :  { %p19788_p0 = scmp.ne.s32.totalorder %s25318_s1, %s19787_s19  ;;  %p19791_p1 = scmp.lt.u32.totalorder %s19787_s19, %s25318_s1 }
   0x9   :  { %p19793_p2 = pnand %p19791_p1, %p19788_p0 }
   0xb   :  { %19796 = shalt.err (!%p19793_p2)
}
   0xc   :  { %s19797_s24 = scalar_lea.vmem %s42_s30, 3072  ;;  %p19802_p4 = scmp.lt.s32.totalorder %s42_s30, %s42_s30 }
   0xd   :  { %p19798_p3 = scmp.ne.s32.totalorder %s42_s30, %s19797_s24  ;;  %p19803_p5 = scmp.lt.s32.totalorder %s19797_s24, %s19797_s24 }
   0xf   :  { %p19804_p6 = por %p19803_p5, %p19802_p4 }
  0x11   :  { %p19805_p7 = pnand %p19804_p6, %p19798_p3 }
  0x13   :  { %19808 = shalt.err (!%p19805_p7)
}
  0x14   :  { %s19975_s25 = smov 128   ;;  %s19976_s26 = smov 8  }
  0x15   :  { %47 = dma.hbm_to_vmem [thread:$0]  %s25318_s1, 3072, %s42_s30, [#allocation5], %s19975_s25, %s19975_s25, %s19976_s26  }
  0x16   :  { %s19809_s17 = scalar_lea.hbm %s25320_s3, 384 }
  0x17   :  { %p19810_p8 = scmp.ne.s32.totalorder %s25320_s3, %s19809_s17  ;;  %p19813_p9 = scmp.lt.u32.totalorder %s19809_s17, %s25320_s3 }
  0x19   :  { %p19815_p10 = pnand %p19813_p9, %p19810_p8 }
  0x1b   :  { %19818 = shalt.err (!%p19815_p10)
}
  0x1c   :  { %s19819_s22 = scalar_lea.vmem %s20068_s16, 384  ;;  %p19824_p12 = scmp.lt.s32.totalorder %s20068_s16, %s20068_s16 }
  0x1d   :  { %p19820_p11 = scmp.ne.s32.totalorder %s20068_s16, %s19819_s22  ;;  %p19825_p13 = scmp.lt.s32.totalorder %s19819_s22, %s19819_s22 }
  0x1f   :  { %p19826_p0 = por %p19825_p13, %p19824_p12 }
  0x21   :  { %p19827_p1 = pnand %p19826_p0, %p19820_p11 }
  0x23   :  { %19830 = shalt.err (!%p19827_p1)
}
  0x24   :  { %71 = dma.hbm_to_vmem [thread:$0]  %s25320_s3, 384, %s20068_s16, [#allocation8], %s19975_s25, %s19975_s25, %s19976_s26  }
  0x25   :  { %s19977_s23 = smov [#allocation10]   ;;  %s19978_s27 = smov [#allocation2]  }
  0x26   :  { %s89_s24 = sshll.u32 %s19977_s23, 4  ;;  %s29_s28 = sshll.u32 %s19978_s27, 4  ;;  %s90_s24 = int_to_ptr.vmem [resolvable:$true] %s89_s24  ;;  %s20105_s28 = int_to_ptr.vmem [resolvable:$true] %s29_s28 }
  0x27   :  { %s19831_s17 = scalar_lea.hbm %s25322_s5, 256 }
  0x28   :  { %p19832_p2 = scmp.ne.s32.totalorder %s25322_s5, %s19831_s17  ;;  %p19835_p3 = scmp.lt.u32.totalorder %s19831_s17, %s25322_s5 }
  0x2a   :  { %p19837_p4 = pnand %p19835_p3, %p19832_p2 }
  0x2c   :  { %19840 = shalt.err (!%p19837_p4)
}
  0x2d   :  { %s19841_s3 = scalar_lea.vmem %s90_s24, 256  ;;  %p19846_p6 = scmp.lt.s32.totalorder %s90_s24, %s90_s24 }
  0x2e   :  { %p19842_p5 = scmp.ne.s32.totalorder %s90_s24, %s19841_s3  ;;  %p19847_p7 = scmp.lt.s32.totalorder %s19841_s3, %s19841_s3 }
  0x30   :  { %p19848_p8 = por %p19847_p7, %p19846_p6 }
  0x32   :  { %p19849_p9 = pnand %p19848_p8, %p19842_p5 }
  0x34   :  { %19852 = shalt.err (!%p19849_p9)
}
  0x35   :  { %95 = dma.hbm_to_vmem [thread:$0]  %s25322_s5, 256, %s90_s24, [#allocation11], %s19975_s25, %s19975_s25, %s19976_s26  }
  0x36   :  { %s19853_s23 = scalar_lea.hbm %s25317_s0, 3072 }
  0x37   :  { %p19854_p10 = scmp.ne.s32.totalorder %s25317_s0, %s19853_s23  ;;  %p19857_p11 = scmp.lt.u32.totalorder %s19853_s23, %s25317_s0 }
  0x39   :  { %p19859_p12 = pnand %p19857_p11, %p19854_p10 }
  0x3b   :  { %19862 = shalt.err (!%p19859_p12)
}
  0x3c   :  { %s19863_s18 = scalar_lea.vmem %s20105_s28, 3072  ;;  %p19868_p0 = scmp.lt.s32.totalorder %s20105_s28, %s20105_s28 }
  0x3d   :  { %p19864_p13 = scmp.ne.s32.totalorder %s20105_s28, %s19863_s18  ;;  %p19869_p1 = scmp.lt.s32.totalorder %s19863_s18, %s19863_s18 }
  0x3f   :  { %p19870_p2 = por %p19869_p1, %p19868_p0 }
  0x41   :  { %p19871_p3 = pnand %p19870_p2, %p19864_p13 }
  0x43   :  { %19874 = shalt.err (!%p19871_p3)
}
  0x44   :  { %35 = dma.hbm_to_vmem [thread:$0]  %s25317_s0, 3072, %s20105_s28, [#allocation3], %s19975_s25, %s19975_s25, %s19976_s26  }
  0x45   :  { %s19979_s19 = smov [#allocation6]   ;;  %s19980_s21 = smov [#allocation9]  }
  0x46   :  { %s53_s20 = sshll.u32 %s19979_s19, 4  ;;  %s77_s3 = sshll.u32 %s19980_s21, 4  ;;  %s54_s20 = int_to_ptr.vmem [resolvable:$true] %s53_s20  ;;  %s20142_s3 = int_to_ptr.vmem [resolvable:$true] %s77_s3 }
  0x47   :  { %s19875_s1 = scalar_lea.hbm %s25319_s2, 512 }
  0x48   :  { %p19876_p4 = scmp.ne.s32.totalorder %s25319_s2, %s19875_s1  ;;  %p19879_p5 = scmp.lt.u32.totalorder %s19875_s1, %s25319_s2 }
  0x4a   :  { %p19881_p6 = pnand %p19879_p5, %p19876_p4 }
  0x4c   :  { %19884 = shalt.err (!%p19881_p6)
}
  0x4d   :  { %s19885_s0 = scalar_lea.vmem %s54_s20, 512  ;;  %p19890_p8 = scmp.lt.s32.totalorder %s54_s20, %s54_s20 }
  0x4e   :  { %p19886_p7 = scmp.ne.s32.totalorder %s54_s20, %s19885_s0  ;;  %p19891_p9 = scmp.lt.s32.totalorder %s19885_s0, %s19885_s0 }
  0x50   :  { %p19892_p10 = por %p19891_p9, %p19890_p8 }
  0x52   :  { %p19893_p11 = pnand %p19892_p10, %p19886_p7 }
  0x54   :  { %19896 = shalt.err (!%p19893_p11)
}
  0x55   :  { %59 = dma.hbm_to_vmem [thread:$0]  %s25319_s2, 512, %s54_s20, [#allocation5], %s19975_s25, %s19975_s25, %s19976_s26  }
  0x56   :  { %s19897_s5 = scalar_lea.hbm %s25321_s4, 512 }
  0x57   :  { %p19898_p12 = scmp.ne.s32.totalorder %s25321_s4, %s19897_s5  ;;  %p19901_p13 = scmp.lt.u32.totalorder %s19897_s5, %s25321_s4 }
  0x59   :  { %p19903_p0 = pnand %p19901_p13, %p19898_p12 }
  0x5b   :  { %19906 = shalt.err (!%p19903_p0)
}
  0x5c   :  { %s19907_s22 = scalar_lea.vmem %s20142_s3, 512  ;;  %p19912_p2 = scmp.lt.s32.totalorder %s20142_s3, %s20142_s3 }
  0x5d   :  { %p19908_p1 = scmp.ne.s32.totalorder %s20142_s3, %s19907_s22  ;;  %p19913_p3 = scmp.lt.s32.totalorder %s19907_s22, %s19907_s22 }
  0x5f   :  { %p19914_p4 = por %p19913_p3, %p19912_p2 }
  0x61   :  { %p19915_p5 = pnand %p19914_p4, %p19908_p1 }
  0x63   :  { %19918 = shalt.err (!%p19915_p5)
}
  0x64   :  { %83 = dma.hbm_to_vmem [thread:$0]  %s25321_s4, 512, %s20142_s3, [#allocation8], %s19975_s25, %s19975_s25, %s19976_s26  }
  0x65   :  { %s19981_s1 = smov [#allocation12]   ;;  %s19982_s23 = smov [#allocation13]  }
  0x66   :  { %s101_s30 = sshll.u32 %s19981_s1, 4  ;;  %s114_s27 = sshll.u32 %s19982_s23, 4  ;;  %s102_s30 = int_to_ptr.vmem [resolvable:$true] %s101_s30  ;;  %s115_s27 = int_to_ptr.vmem [resolvable:$true] %s114_s27 }
  0x67   :  { %s19919_s28 = scalar_lea.hbm %s25323_s6, 256 }
  0x68   :  { %p19920_p6 = scmp.ne.s32.totalorder %s25323_s6, %s19919_s28  ;;  %p19923_p7 = scmp.lt.u32.totalorder %s19919_s28, %s25323_s6 }
  0x6a   :  { %p19925_p8 = pnand %p19923_p7, %p19920_p6 }
  0x6c   :  { %19928 = shalt.err (!%p19925_p8)
}
  0x6d   :  { %s19929_s4 = scalar_lea.vmem %s102_s30, 256  ;;  %p19934_p10 = scmp.lt.s32.totalorder %s102_s30, %s102_s30 }
  0x6e   :  { %p19930_p9 = scmp.ne.s32.totalorder %s102_s30, %s19929_s4  ;;  %p19935_p11 = scmp.lt.s32.totalorder %s19929_s4, %s19929_s4 }
  0x70   :  { %p19936_p12 = por %p19935_p11, %p19934_p10 }
  0x72   :  { %p19937_p13 = pnand %p19936_p12, %p19930_p9 }
  0x74   :  { %19940 = shalt.err (!%p19937_p13)
}
  0x75   :  { %107 = dma.hbm_to_vmem [thread:$0]  %s25323_s6, 256, %s102_s30, [#allocation11], %s19975_s25, %s19975_s25, %s19976_s26  }
  0x76   :  { %s19941_s16 = scalar_lea.hbm %s25324_s7, 128 }
  0x77   :  { %p19942_p0 = scmp.ne.s32.totalorder %s25324_s7, %s19941_s16  ;;  %p19945_p1 = scmp.lt.u32.totalorder %s19941_s16, %s25324_s7 }
  0x79   :  { %p19947_p2 = pnand %p19945_p1, %p19942_p0 }
  0x7b   :  { %19950 = shalt.err (!%p19947_p2)
}
  0x7c   :  { %s19951_s23 = scalar_lea.vmem %s115_s27, 128  ;;  %p19956_p4 = scmp.lt.s32.totalorder %s115_s27, %s115_s27 }
  0x7d   :  { %p19952_p3 = scmp.ne.s32.totalorder %s115_s27, %s19951_s23  ;;  %p19957_p5 = scmp.lt.s32.totalorder %s19951_s23, %s19951_s23 }
  0x7f   :  { %p19958_p6 = por %p19957_p5, %p19956_p4 }
  0x81   :  { %p19959_p7 = pnand %p19958_p6, %p19952_p3 }
  0x83   :  { %19962 = shalt.err (!%p19959_p7)
}
  0x84   :  { %117 = dma.hbm_to_vmem [thread:$0]  %s25324_s7, 128, %s115_s27, [#allocation14]  }
  0x85   :  { %19963 = dma.done.wait [#allocation3], 3072  }
  0x86   :  { %19964 = vsyncadd [#allocation3], 4294964224 }
  0x87   :  { %19965 = dma.done.wait [#allocation5], 3584  }
  0x88   :  { %19966 = vsyncadd [#allocation5], 4294963712 }
  0x89   :  { %19967 = dma.done.wait [#allocation8], 896  }
  0x8a   :  { %19968 = vsyncadd [#allocation8], 4294966400 }
  0x8b   :  { %19969 = dma.done.wait [#allocation11], 512  }
  0x8c   :  { %19970 = vsyncadd [#allocation11], 4294966784 }
  0x8d   :  { %19971 = dma.done.wait [#allocation14], 128  }
  0x8e   :  { %19972 = vsyncadd [#allocation14], 4294967168  ;;  %vm202_vm0 = vcmask 261120   ;;  %v396_v0 = vld [vmem:[#allocation6] sm:$0xff]  ;;  %v397_v1 = vld [vmem:[#allocation6 + $0x8] sm:$0xff]  ;;  %v25334_v52 = vmov 0.0|0.0  }
  0x8f   :  { %v398_v2 = vld [vmem:[#allocation6 + $0x10] sm:$0xff]  ;;  %v19081_v3 = vpack.c.bf16 %v397_v1, %v396_v0  ;;  %v399_v4 = vld [vmem:[#allocation6 + $0x18] sm:$0xff]  ;;  %v20206_v5 = vld [vmem:[#allocation2] sm:$0xff]  ;;  %19089 = vmatprep.subr.bf16.mxu1 %v25334_v52  ;;  %vm19984_vm1 = vmmov 0   ;;  %v25332_v58 = vmov 0.0   ;;  %vm4199_vm2 = vcmask 179200  }
  0x90   :  { %v19085_v6 = vpack.c.bf16 %v399_v4, %v398_v2  ;;  %17551 = vmatprep.mubr.msk.f32.mxu0 %vm202_vm0, %v20206_v5  ;;  %v20210_v7 = vld [vmem:[#allocation2 + $0x8] sm:$0xff]  ;;  %v20212_v8 = vld [vmem:[#allocation2 + $0x10] sm:$0xff]  ;;  %v20218_v9 = vld [vmem:[#allocation2 + $0x18] sm:$0xff]  ;;  %v324_v55 = vmul.f32 %v20206_v5, %v20206_v5  ;;  %17739 = vmatprep.mubr.msk.f32.mxu1 %vm19984_vm1, %v25332_v58  ;;  %vm4203_vm3 = vcmask 177152   ;;  %vm5512_vm4 = vcmask 130048  }
  0x91   :  { %19082 = vmatprep.subr.bf16.mxu0 %v19081_v3  ;;  %v20220_v10 = vld [vmem:[#allocation2 + $0x20] sm:$0xff]  ;;  %v20226_v11 = vld [vmem:[#allocation2 + $0x28] sm:$0xff]  ;;  %v20228_v12 = vld [vmem:[#allocation2 + $0x30] sm:$0xff]  ;;  %v325_v56 = vmul.f32 %v20210_v7, %v20210_v7  ;;  %v326_v57 = vmul.f32 %v20212_v8, %v20212_v8  ;;  %v327_v59 = vmul.f32 %v20218_v9, %v20218_v9  ;;  %vm8395_vm5 = vcmask 46080  }
  0x92   :  { %19084 = vmatpush3.bf16.msra.mxu0 %v19081_v3  ;;  %v20234_v13 = vld [vmem:[#allocation2 + $0x38] sm:$0xff]  ;;  %v20236_v14 = vld [vmem:[#allocation2 + $0x40] sm:$0xff]  ;;  %v20242_v15 = vld [vmem:[#allocation2 + $0x48] sm:$0xff]  ;;  %v328_v60 = vmul.f32 %v20220_v10, %v20220_v10  ;;  %v329_v61 = vmul.f32 %v20226_v11, %v20226_v11  ;;  %v330_v62 = vmul.f32 %v20228_v12, %v20228_v12  ;;  %vm9472_vm6 = vcmask 64512  }
  0x93   :  { %19086 = vmatprep.subr.bf16.mxu0 %v19085_v6  ;;  %v20244_v16 = vld [vmem:[#allocation2 + $0x50] sm:$0xff]  ;;  %v20250_v17 = vld [vmem:[#allocation2 + $0x58] sm:$0xff]  ;;  %v20252_v18 = vld [vmem:[#allocation2 + $0x60] sm:$0xff]  ;;  %v331_v63 = vmul.f32 %v20234_v13, %v20234_v13  ;;  %v332_v0 = vmul.f32 %v20236_v14, %v20236_v14  ;;  %v333_v1 = vmul.f32 %v20242_v15, %v20242_v15  ;;  %vm4293_vm7 = vcmask 7168  }
  0x94   :  { %v20258_v19 = vld [vmem:[#allocation2 + $0x68] sm:$0xff]  ;;  %v20260_v20 = vld [vmem:[#allocation2 + $0x70] sm:$0xff]  ;;  %v20266_v21 = vld [vmem:[#allocation2 + $0x78] sm:$0xff]  ;;  %v334_v2 = vmul.f32 %v20244_v16, %v20244_v16  ;;  %v335_v3 = vmul.f32 %v20250_v17, %v20250_v17  ;;  %v336_v4 = vmul.f32 %v20252_v18, %v20252_v18  ;;  %vm16288_vm8 = vcmask 1040384  }
  0x95   :  { %v20268_v22 = vld [vmem:[#allocation2 + $0x80] sm:$0xff]  ;;  %v20274_v23 = vld [vmem:[#allocation2 + $0x88] sm:$0xff]  ;;  %v20276_v24 = vld [vmem:[#allocation2 + $0x90] sm:$0xff]  ;;  %vm13895_vm9 = vcmask 1043456   ;;  %vm13891_vm10 = vcmask 31744   ;;  %vm11672_vm11 = vcmask 0  }
  0x96   :  { %19088 = vmatpush3.bf16.msra.mxu0 %v19085_v6  ;;  %v20282_v25 = vld [vmem:[#allocation2 + $0x98] sm:$0xff]  ;;  %v20284_v26 = vld [vmem:[#allocation2 + $0xa0] sm:$0xff]  ;;  %v20290_v27 = vld [vmem:[#allocation2 + $0xa8] sm:$0xff]  ;;  %v337_v6 = vmul.f32 %v20258_v19, %v20258_v19  ;;  %vm12724_vm12 = vcmask 27648   ;;  %vm16290_vm13 = vcmask 1041408   ;;  %vm15651_vm14 = vcmask 9216  }
  0x97   :  { %v20292_v28 = vld [vmem:[#allocation2 + $0xb0] sm:$0xff]  ;;  %v20298_v29 = vld [vmem:[#allocation2 + $0xb8] sm:$0xff]  ;;  %v20300_v30 = vld [vmem:[#allocation4] sm:$0xff]  ;;  %19209 = vmatprep.subr.bf16.mxu0 %v25334_v52  ;;  %vm16292_vm15 = vcmask 1042432  }
  0x98   :  { %v20306_v31 = vld [vmem:[#allocation4 + $0x8] sm:$0xff]  ;;  %v20308_v32 = vld [vmem:[#allocation4 + $0x10] sm:$0xff]  ;;  %v20314_v33 = vld [vmem:[#allocation4 + $0x18] sm:$0xff] }
  0x99   :  { %17552 = vmatmul.mubr.msk.f32.vlgmr.msra.gmra.mrb[0].mxu0 %vm202_vm0, %v20210_v7  ;;  %v20316_v34 = vld [vmem:[#allocation4 + $0x20] sm:$0xff]  ;;  %v20322_v35 = vld [vmem:[#allocation4 + $0x28] sm:$0xff]  ;;  %v20324_v36 = vld [vmem:[#allocation4 + $0x30] sm:$0xff] }
  0x9a   :  { %17554 = vmatprep.mubr.msk.f32.mxu0 %vm202_vm0, %v20212_v8  ;;  %v20330_v37 = vld [vmem:[#allocation4 + $0x38] sm:$0xff]  ;;  %v20332_v38 = vld [vmem:[#allocation4 + $0x40] sm:$0xff]  ;;  %v20338_v39 = vld [vmem:[#allocation4 + $0x48] sm:$0xff] }
  0x9b   :  { %v20340_v40 = vld [vmem:[#allocation4 + $0x50] sm:$0xff]  ;;  %v20346_v41 = vld [vmem:[#allocation4 + $0x58] sm:$0xff]  ;;  %v20348_v42 = vld [vmem:[#allocation4 + $0x60] sm:$0xff] }
  0x9c   :  { %v20354_v43 = vld [vmem:[#allocation4 + $0x68] sm:$0xff]  ;;  %v20356_v44 = vld [vmem:[#allocation4 + $0x70] sm:$0xff]  ;;  %v20362_v45 = vld [vmem:[#allocation4 + $0x78] sm:$0xff] }
  0x9d   :  { %17555 = vmatmul.mubr.msk.f32.gmra.mrb[2].mxu0 %vm202_vm0, %v20218_v9  ;;  %v20364_v46 = vld [vmem:[#allocation4 + $0x80] sm:$0xff]  ;;  %v20370_v47 = vld [vmem:[#allocation4 + $0x88] sm:$0xff]  ;;  %v20372_v48 = vld [vmem:[#allocation4 + $0x90] sm:$0xff] }
  0x9e   :  { %17557 = vmatprep.mubr.msk.f32.mxu0 %vm202_vm0, %v20220_v10  ;;  %v20378_v49 = vld [vmem:[#allocation4 + $0x98] sm:$0xff]  ;;  %v20380_v50 = vld [vmem:[#allocation4 + $0xa0] sm:$0xff]  ;;  %v20386_v51 = vld [vmem:[#allocation4 + $0xa8] sm:$0xff] }
  0x9f   :  { %v20389_v53 = vld [vmem:[#allocation4 + $0xb0] sm:$0xff]  ;;  %v20396_v54 = vld [vmem:[#allocation4 + $0xb8] sm:$0xff] }
  0xa1   :  { %17558 = vmatmul.mubr.msk.f32.gmra.mrb[4].mxu0 %vm202_vm0, %v20226_v11 }
  0xa2   :  { %17560 = vmatprep.mubr.msk.f32.mxu0 %vm202_vm0, %v20228_v12 }
  0xa5   :  { %17561 = vmatmul.mubr.msk.f32.gmra.mrb[6].mxu0 %vm202_vm0, %v20234_v13 }
  0xa6   :  { %17563 = vmatprep.mubr.msk.f32.mxu0 %vm202_vm0, %v20236_v14 }
  0xa9   :  { %17564 = vmatmul.mubr.msk.f32.gmra.mrb[8].mxu0 %vm202_vm0, %v20242_v15 }
  0xaa   :  { %17566 = vmatprep.mubr.msk.f32.mxu0 %vm202_vm0, %v20244_v16 }
  0xad   :  { %17567 = vmatmul.mubr.msk.f32.gmra.mrb[10].mxu0 %vm202_vm0, %v20250_v17 }
  0xae   :  { %17569 = vmatprep.mubr.msk.f32.mxu0 %vm202_vm0, %v20252_v18 }
  0xb1   :  { %17570 = vmatmul.mubr.msk.f32.gmra.mrb[12].mxu0 %vm202_vm0, %v20258_v19 }
  0xb2   :  { %17572 = vmatprep.mubr.msk.f32.mxu0 %vm202_vm0, %v20260_v20 }
  0xb5   :  { %17573 = vmatmul.mubr.msk.f32.gmra.mrb[14].mxu0 %vm202_vm0, %v20266_v21 }
  0xb6   :  { %17575 = vmatprep.mubr.msk.f32.mxu0 %vm202_vm0, %v20268_v22 }
  0xb9   :  { %17576 = vmatmul.mubr.msk.f32.gmra.mrb[16].mxu0 %vm202_vm0, %v20274_v23 }
  0xba   :  { %17578 = vmatprep.mubr.msk.f32.mxu0 %vm202_vm0, %v20276_v24 }
  0xbd   :  { %17579 = vmatmul.mubr.msk.f32.gmra.mrb[18].mxu0 %vm202_vm0, %v20282_v25 }
  0xbe   :  { %17581 = vmatprep.mubr.msk.f32.mxu0 %vm202_vm0, %v20284_v26 }
  0xc1   :  { %17582 = vmatmul.mubr.msk.f32.gmra.mrb[20].mxu0 %vm202_vm0, %v20290_v27 }
  0xc2   :  { %17584 = vmatprep.mubr.msk.f32.mxu0 %vm202_vm0, %v20292_v28 }
  0xc5   :  { %17585 = vmatmul.mubr.msk.f32.gmra.mrb[22].mxu0 %vm202_vm0, %v20298_v29 }
  0xc6   :  { %17587 = vmatprep.mubr.msk.f32.mxu0 %vm202_vm0, %v20300_v30 }
  0xc9   :  { %17588 = vmatmul.mubr.msk.f32.gmra.mrb[24].mxu0 %vm202_vm0, %v20306_v31 }
  0xca   :  { %17590 = vmatprep.mubr.msk.f32.mxu0 %vm202_vm0, %v20308_v32 }
  0xcd   :  { %17591 = vmatmul.mubr.msk.f32.gmra.mrb[26].mxu0 %vm202_vm0, %v20314_v33 }
  0xce   :  { %17593 = vmatprep.mubr.msk.f32.mxu0 %vm202_vm0, %v20316_v34 }
  0xd1   :  { %17594 = vmatmul.mubr.msk.f32.gmra.mrb[28].mxu0 %vm202_vm0, %v20322_v35 }
  0xd2   :  { %17596 = vmatprep.mubr.msk.f32.mxu0 %vm202_vm0, %v20324_v36 }
  0xd5   :  { %17597 = vmatmul.mubr.msk.f32.gmra.mrb[30].mxu0 %vm202_vm0, %v20330_v37 }
  0xd6   :  { %17599 = vmatprep.mubr.msk.f32.mxu0 %vm202_vm0, %v20332_v38 }
  0xd9   :  { %17600 = vmatmul.mubr.msk.f32.gmra.mrb[32].mxu0 %vm202_vm0, %v20338_v39 }
  0xda   :  { %17602 = vmatprep.mubr.msk.f32.mxu0 %vm202_vm0, %v20340_v40 }
  0xdd   :  { %17603 = vmatmul.mubr.msk.f32.gmra.mrb[34].mxu0 %vm202_vm0, %v20346_v41 }
  0xde   :  { %17605 = vmatprep.mubr.msk.f32.mxu0 %vm202_vm0, %v20348_v42 }
  0xe1   :  { %17606 = vmatmul.mubr.msk.f32.gmra.mrb[36].mxu0 %vm202_vm0, %v20354_v43 }
  0xe2   :  { %17608 = vmatprep.mubr.msk.f32.mxu0 %vm202_vm0, %v20356_v44 }
  0xe5   :  { %17609 = vmatmul.mubr.msk.f32.gmra.mrb[38].mxu0 %vm202_vm0, %v20362_v45 }
  0xe6   :  { %17611 = vmatprep.mubr.msk.f32.mxu0 %vm202_vm0, %v20364_v46 }
  0xe9   :  { %17612 = vmatmul.mubr.msk.f32.gmra.mrb[40].mxu0 %vm202_vm0, %v20370_v47 }
  0xea   :  { %17614 = vmatprep.mubr.msk.f32.mxu0 %vm202_vm0, %v20372_v48 }
  0xed   :  { %17615 = vmatmul.mubr.msk.f32.gmra.mrb[42].mxu0 %vm202_vm0, %v20378_v49 }
  0xee   :  { %17617 = vmatprep.mubr.msk.f32.mxu0 %vm202_vm0, %v20380_v50 }
  0xf1   :  { %17618 = vmatmul.mubr.msk.f32.gmra.mrb[44].mxu0 %vm202_vm0, %v20386_v51 }
  0xf2   :  { %17620 = vmatprep.mubr.msk.f32.mxu0 %vm202_vm0, %v20389_v53 }
  0xf5   :  { %17621 = vmatmul.mubr.msk.f32.gmra.mrb[46].mxu0 %vm202_vm0, %v20396_v54 }
  0xf6   :  { %17623 = vmatprep.mubr.msk.f32.mxu0 %vm202_vm0, %v324_v55  ;;  %v338_v55 = vmul.f32 %v20260_v20, %v20260_v20 }
  0xf9   :  { %17624 = vmatmul.mubr.msk.f32.gmra.mrb[48].mxu0 %vm202_vm0, %v325_v56  ;;  %v339_v56 = vmul.f32 %v20266_v21, %v20266_v21 }
  0xfa   :  { %17626 = vmatprep.mubr.msk.f32.mxu0 %vm202_vm0, %v326_v57  ;;  %v340_v57 = vmul.f32 %v20268_v22, %v20268_v22 }
  0xfd   :  { %17627 = vmatmul.mubr.msk.f32.gmra.mrb[50].mxu0 %vm202_vm0, %v327_v59  ;;  %v341_v59 = vmul.f32 %v20274_v23, %v20274_v23 }
  0xfe   :  { %17629 = vmatprep.mubr.msk.f32.mxu0 %vm202_vm0, %v328_v60  ;;  %v342_v60 = vmul.f32 %v20276_v24, %v20276_v24 }
 0x101   :  { %17630 = vmatmul.mubr.msk.f32.gmra.mrb[52].mxu0 %vm202_vm0, %v329_v61  ;;  %v343_v61 = vmul.f32 %v20282_v25, %v20282_v25 }
 0x102   :  { %17632 = vmatprep.mubr.msk.f32.mxu0 %vm202_vm0, %v330_v62  ;;  %v344_v62 = vmul.f32 %v20284_v26, %v20284_v26 }
 0x105   :  { %17633 = vmatmul.mubr.msk.f32.gmra.mrb[54].mxu0 %vm202_vm0, %v331_v63  ;;  %v345_v63 = vmul.f32 %v20290_v27, %v20290_v27 }
 0x106   :  { %17635 = vmatprep.mubr.msk.f32.mxu0 %vm202_vm0, %v332_v0  ;;  %v346_v0 = vmul.f32 %v20292_v28, %v20292_v28 }
 0x109   :  { %17636 = vmatmul.mubr.msk.f32.gmra.mrb[56].mxu0 %vm202_vm0, %v333_v1  ;;  %v347_v1 = vmul.f32 %v20298_v29, %v20298_v29 }
 0x10a   :  { %17638 = vmatprep.mubr.msk.f32.mxu0 %vm202_vm0, %v334_v2  ;;  %v348_v2 = vmul.f32 %v20300_v30, %v20300_v30 }
 0x10d   :  { %17639 = vmatmul.mubr.msk.f32.gmra.mrb[58].mxu0 %vm202_vm0, %v335_v3  ;;  %v349_v3 = vmul.f32 %v20306_v31, %v20306_v31 }
 0x10e   :  { %17641 = vmatprep.mubr.msk.f32.mxu0 %vm202_vm0, %v336_v4  ;;  %v350_v4 = vmul.f32 %v20308_v32, %v20308_v32 }
 0x111   :  { %17642 = vmatmul.mubr.msk.f32.gmra.mrb[60].mxu0 %vm202_vm0, %v337_v6  ;;  %v351_v6 = vmul.f32 %v20314_v33, %v20314_v33 }
 0x112   :  { %17644 = vmatprep.mubr.msk.f32.mxu0 %vm202_vm0, %v338_v55  ;;  %v352_v55 = vmul.f32 %v20316_v34, %v20316_v34 }
 0x115   :  { %17645 = vmatmul.mubr.msk.f32.gmra.mrb[62].mxu0 %vm202_vm0, %v339_v56  ;;  %v353_v56 = vmul.f32 %v20322_v35, %v20322_v35 }
 0x116   :  { %17647 = vmatprep.mubr.msk.f32.mxu0 %vm202_vm0, %v340_v57  ;;  %v354_v57 = vmul.f32 %v20324_v36, %v20324_v36 }
 0x119   :  { %17648 = vmatmul.mubr.msk.f32.gmra.mrb[64].mxu0 %vm202_vm0, %v341_v59  ;;  %v355_v59 = vmul.f32 %v20330_v37, %v20330_v37 }
 0x11a   :  { %17650 = vmatprep.mubr.msk.f32.mxu0 %vm202_vm0, %v342_v60  ;;  %v356_v60 = vmul.f32 %v20332_v38, %v20332_v38 }
 0x11d   :  { %17651 = vmatmul.mubr.msk.f32.gmra.mrb[66].mxu0 %vm202_vm0, %v343_v61  ;;  %v357_v61 = vmul.f32 %v20338_v39, %v20338_v39 }
 0x11e   :  { %17653 = vmatprep.mubr.msk.f32.mxu0 %vm202_vm0, %v344_v62  ;;  %v358_v62 = vmul.f32 %v20340_v40, %v20340_v40 }
 0x121   :  { %17654 = vmatmul.mubr.msk.f32.gmra.mrb[68].mxu0 %vm202_vm0, %v345_v63  ;;  %v359_v63 = vmul.f32 %v20346_v41, %v20346_v41 }
 0x122   :  { %17656 = vmatprep.mubr.msk.f32.mxu0 %vm202_vm0, %v346_v0  ;;  %v360_v0 = vmul.f32 %v20348_v42, %v20348_v42 }
 0x125   :  { %17657 = vmatmul.mubr.msk.f32.gmra.mrb[70].mxu0 %vm202_vm0, %v347_v1  ;;  %v361_v1 = vmul.f32 %v20354_v43, %v20354_v43 }
 0x126   :  { %17659 = vmatprep.mubr.msk.f32.mxu0 %vm202_vm0, %v348_v2  ;;  %v362_v2 = vmul.f32 %v20356_v44, %v20356_v44 }
 0x129   :  { %17660 = vmatmul.mubr.msk.f32.gmra.mrb[72].mxu0 %vm202_vm0, %v349_v3  ;;  %v363_v3 = vmul.f32 %v20362_v45, %v20362_v45 }
 0x12a   :  { %17662 = vmatprep.mubr.msk.f32.mxu0 %vm202_vm0, %v350_v4  ;;  %v364_v4 = vmul.f32 %v20364_v46, %v20364_v46 }
 0x12d   :  { %17663 = vmatmul.mubr.msk.f32.gmra.mrb[74].mxu0 %vm202_vm0, %v351_v6  ;;  %v365_v6 = vmul.f32 %v20370_v47, %v20370_v47 }
 0x12e   :  { %17665 = vmatprep.mubr.msk.f32.mxu0 %vm202_vm0, %v352_v55  ;;  %v366_v55 = vmul.f32 %v20372_v48, %v20372_v48 }
 0x131   :  { %17666 = vmatmul.mubr.msk.f32.gmra.mrb[76].mxu0 %vm202_vm0, %v353_v56  ;;  %v367_v56 = vmul.f32 %v20378_v49, %v20378_v49 }
 0x132   :  { %17668 = vmatprep.mubr.msk.f32.mxu0 %vm202_vm0, %v354_v57  ;;  %v368_v57 = vmul.f32 %v20380_v50, %v20380_v50 }
 0x135   :  { %17669 = vmatmul.mubr.msk.f32.gmra.mrb[78].mxu0 %vm202_vm0, %v355_v59  ;;  %v369_v59 = vmul.f32 %v20386_v51, %v20386_v51 }
 0x136   :  { %17671 = vmatprep.mubr.msk.f32.mxu0 %vm202_vm0, %v356_v60  ;;  %v370_v60 = vmul.f32 %v20389_v53, %v20389_v53 }
 0x139   :  { %17672 = vmatmul.mubr.msk.f32.gmra.mrb[80].mxu0 %vm202_vm0, %v357_v61  ;;  %v371_v61 = vmul.f32 %v20396_v54, %v20396_v54 }
 0x13a   :  { %17674 = vmatprep.mubr.msk.f32.mxu0 %vm202_vm0, %v358_v62  ;;  %v372_v62 = vmul.f32 %v20300_v30, %v20206_v5  ;;  %v376_v30 = vmul.f32 %v20316_v34, %v20220_v10  ;;  %v380_v34 = vmul.f32 %v20332_v38, %v20236_v14  ;;  %v384_v38 = vmul.f32 %v20348_v42, %v20252_v18 }
 0x13b   :  { %v387_v42 = vmul.f32 %v20362_v45, %v20266_v21  ;;  %v390_v45 = vmul.f32 %v20372_v48, %v20276_v24  ;;  %v392_v48 = vmul.f32 %v20380_v50, %v20284_v26  ;;  %v394_v50 = vmul.f32 %v20389_v53, %v20292_v28 }
 0x13d   :  { %17675 = vmatmul.mubr.msk.f32.gmra.mrb[82].mxu0 %vm202_vm0, %v359_v63  ;;  %v373_v63 = vmul.f32 %v20306_v31, %v20210_v7  ;;  %v377_v31 = vmul.f32 %v20322_v35, %v20226_v11  ;;  %v381_v35 = vmul.f32 %v20338_v39, %v20242_v15  ;;  %v385_v39 = vmul.f32 %v20354_v43, %v20258_v19 }
 0x13e   :  { %17677 = vmatprep.mubr.msk.f32.mxu0 %vm202_vm0, %v360_v0  ;;  %v374_v0 = vmul.f32 %v20308_v32, %v20212_v8  ;;  %v378_v32 = vmul.f32 %v20324_v36, %v20228_v12  ;;  %v382_v36 = vmul.f32 %v20340_v40, %v20244_v16  ;;  %v388_v43 = vmul.f32 %v20364_v46, %v20268_v22 }
 0x141   :  { %17678 = vmatmul.mubr.msk.f32.gmra.mrb[84].mxu0 %vm202_vm0, %v361_v1  ;;  %v375_v1 = vmul.f32 %v20314_v33, %v20218_v9  ;;  %v379_v33 = vmul.f32 %v20330_v37, %v20234_v13  ;;  %v383_v37 = vmul.f32 %v20346_v41, %v20250_v17 }
 0x142   :  { %17680 = vmatprep.mubr.msk.f32.mxu0 %vm202_vm0, %v362_v2 }
 0x145   :  { %17681 = vmatmul.mubr.msk.f32.gmra.mrb[86].mxu0 %vm202_vm0, %v363_v3 }
 0x146   :  { %17683 = vmatprep.mubr.msk.f32.mxu0 %vm202_vm0, %v364_v4  ;;  %v386_v4 = vmul.f32 %v20356_v44, %v20260_v20 }
 0x149   :  { %17684 = vmatmul.mubr.msk.f32.gmra.mrb[88].mxu0 %vm202_vm0, %v365_v6 }
 0x14a   :  { %17686 = vmatprep.mubr.msk.f32.mxu0 %vm202_vm0, %v366_v55 }
 0x14d   :  { %17687 = vmatmul.mubr.msk.f32.gmra.mrb[90].mxu0 %vm202_vm0, %v367_v56 }
 0x14e   :  { %17689 = vmatprep.mubr.msk.f32.mxu0 %vm202_vm0, %v368_v57  ;;  %v20596_v57 = vld [vmem:[#allocation7] sm:$0xff] }
 0x151   :  { %17690 = vmatmul.mubr.msk.f32.gmra.mrb[92].mxu0 %vm202_vm0, %v369_v59  ;;  %v389_v59 = vmul.f32 %v20370_v47, %v20274_v23  ;;  %v391_v47 = vmul.f32 %v20378_v49, %v20282_v25  ;;  %v393_v49 = vmul.f32 %v20386_v51, %v20290_v27 }
 0x152   :  { %17692 = vmatprep.mubr.msk.f32.mxu0 %vm202_vm0, %v370_v60 }
 0x155   :  { %17693 = vmatmul.mubr.msk.f32.gmra.mrb[94].mxu0 %vm202_vm0, %v371_v61  ;;  %v20609_v61 = vld [vmem:[#allocation7 + $0x8] sm:$0xff] }
 0x156   :  { %17695 = vmatprep.mubr.msk.f32.mxu0 %vm202_vm0, %v372_v62 }
 0x159   :  { %17696 = vmatmul.mubr.msk.f32.gmra.mrb[96].mxu0 %vm202_vm0, %v373_v63 }
 0x15a   :  { %17698 = vmatprep.mubr.msk.f32.mxu0 %vm202_vm0, %v374_v0 }
 0x15d   :  { %17699 = vmatmul.mubr.msk.f32.gmra.mrb[98].mxu0 %vm202_vm0, %v375_v1  ;;  %v20622_v1 = vld [vmem:[#allocation7 + $0x10] sm:$0x3f] }
 0x15e   :  { %17701 = vmatprep.mubr.msk.f32.mxu0 %vm202_vm0, %v376_v30 }
 0x161   :  { %17702 = vmatmul.mubr.msk.f32.gmra.mrb[100].mxu0 %vm202_vm0, %v377_v31 }
 0x162   :  { %17704 = vmatprep.mubr.msk.f32.mxu0 %vm202_vm0, %v378_v32 }
 0x165   :  { %17705 = vmatmul.mubr.msk.f32.gmra.mrb[102].mxu0 %vm202_vm0, %v379_v33 }
 0x166   :  { %17707 = vmatprep.mubr.msk.f32.mxu0 %vm202_vm0, %v380_v34  ;;  %v395_v34 = vmul.f32 %v20396_v54, %v20298_v29 }
 0x169   :  { %17708 = vmatmul.mubr.msk.f32.gmra.mrb[104].mxu0 %vm202_vm0, %v381_v35 }
 0x16a   :  { %17710 = vmatprep.mubr.msk.f32.mxu0 %vm202_vm0, %v382_v36 }
 0x16c   :  { %v17553_v2 = vpop.f32.mrb[0].mxu0 }
 0x16d   :  { %v829_v3 = vpop.f32.mrb[1].mxu0  ;;  %17711 = vmatmul.mubr.msk.f32.gmra.mrb[106].mxu0 %vm202_vm0, %v383_v37  ;;  %v203_v37 = vsel %vm202_vm0, %v20206_v5, -inf }
 0x16e   :  { %17713 = vmatprep.mubr.msk.f32.mxu0 %vm202_vm0, %v384_v38  ;;  %v19090_v40 = vpack.c.bf16 %v17553_v2, %v829_v3  ;;  %v204_v38 = vsel %vm202_vm0, %v20210_v7, -inf  ;;  %v205_v2 = vsel %vm202_vm0, %v20212_v8, -inf  ;;  %v206_v3 = vsel %vm202_vm0, %v20218_v9, -inf }
 0x170   :  { %v17556_v6 = vpop.f32.mrb[2].mxu0  ;;  %19091 = vmatpush3.bf16.msra.mxu1 %v19090_v40  ;;  %v207_v40 = vsel %vm202_vm0, %v20220_v10, -inf }
 0x171   :  { %v839_v41 = vpop.f32.mrb[3].mxu0  ;;  %17714 = vmatmul.mubr.msk.f32.gmra.mrb[108].mxu0 %vm202_vm0, %v385_v39  ;;  %19092 = vmatprep.subr.bf16.mxu1 %v25334_v52 }
 0x172   :  { %v19093_v55 = vpack.c.bf16 %v17556_v6, %v839_v41  ;;  %17716 = vmatprep.mubr.msk.f32.mxu0 %vm202_vm0, %v386_v4  ;;  %v209_v4 = vsel %vm202_vm0, %v20226_v11, -inf  ;;  %v211_v6 = vsel %vm202_vm0, %v20228_v12, -inf  ;;  %v213_v41 = vsel %vm202_vm0, %v20234_v13, -inf }
 0x174   :  { %v17559_v56 = vpop.f32.mrb[4].mxu0  ;;  %19094 = vmatpush3.bf16.msra.mxu1 %v19093_v55  ;;  %v208_v55 = vmax.f32 %v203_v37, %v207_v40  ;;  %v235_v37 = vsel %vm202_vm0, %v20276_v24, -inf  ;;  %v237_v40 = vsel %vm202_vm0, %v20282_v25, -inf }
 0x175   :  { %v849_v44 = vpop.f32.mrb[5].mxu0  ;;  %17717 = vmatmul.mubr.msk.f32.gmra.mrb[110].mxu0 %vm202_vm0, %v387_v42  ;;  %19095 = vmatprep.subr.bf16.mxu1 %v25334_v52 }
 0x176   :  { %v19096_v60 = vpack.c.bf16 %v17559_v56, %v849_v44  ;;  %17719 = vmatprep.mubr.msk.f32.mxu0 %vm202_vm0, %v388_v43  ;;  %v210_v43 = vmax.f32 %v204_v38, %v209_v4  ;;  %v212_v56 = vmax.f32 %v205_v2, %v211_v6  ;;  %v214_v44 = vmax.f32 %v206_v3, %v213_v41 }
 0x177   :  { %17740 = vmatmul.mubr.msk.f32.vlgmr.msra.gmra.mrb[0].mxu1 %vm202_vm0, %v20596_v57  ;;  %v239_v41 = vsel %vm202_vm0, %v20284_v26, -inf }
 0x178   :  { %v17562_v46 = vpop.f32.mrb[6].mxu0  ;;  %19097 = vmatpush3.bf16.msra.mxu1 %v19096_v60  ;;  %17742 = vmatprep.mubr.msk.f32.mxu1 %vm19984_vm1, %v25332_v58  ;;  %v217_v60 = vsel %vm202_vm0, %v20242_v15, -inf }
 0x179   :  { %v859_v62 = vpop.f32.mrb[7].mxu0  ;;  %17720 = vmatmul.mubr.msk.f32.gmra.mrb[112].mxu0 %vm202_vm0, %v389_v59  ;;  %19098 = vmatprep.subr.bf16.mxu1 %v25334_v52  ;;  %v215_v59 = vsel %vm202_vm0, %v20236_v14, -inf }
 0x17a   :  { %v19099_v63 = vpack.c.bf16 %v17562_v46, %v859_v62  ;;  %17722 = vmatprep.mubr.msk.f32.mxu0 %vm202_vm0, %v390_v45  ;;  %v219_v45 = vsel %vm202_vm0, %v20244_v16, -inf  ;;  %v216_v62 = vmax.f32 %v208_v55, %v215_v59  ;;  %v243_v55 = vsel %vm202_vm0, %v20292_v28, -inf }
 0x17b   :  { %17743 = vmatmul.mubr.msk.f32.gmra.mrb[2].mxu1 %vm202_vm0, %v20609_v61 }
 0x17c   :  { %v17565_v0 = vpop.f32.mrb[8].mxu0  ;;  %19100 = vmatpush3.bf16.msra.mxu1 %v19099_v63  ;;  %17745 = vmatprep.mubr.msk.f32.mxu1 %vm19984_vm1, %v25332_v58  ;;  %v220_v63 = vmax.f32 %v212_v56, %v219_v45  ;;  %v245_v45 = vsel %vm202_vm0, %v20298_v29, -inf }
 0x17d   :  { %v869_v30 = vpop.f32.mrb[9].mxu0  ;;  %17723 = vmatmul.mubr.msk.f32.gmra.mrb[114].mxu0 %vm202_vm0, %v391_v47  ;;  %19101 = vmatprep.subr.bf16.mxu1 %v25334_v52  ;;  %v218_v47 = vmax.f32 %v210_v43, %v217_v60 }
 0x17e   :  { %v19102_v31 = vpack.c.bf16 %v17565_v0, %v869_v30  ;;  %17725 = vmatprep.mubr.msk.f32.mxu0 %vm202_vm0, %v392_v48  ;;  %v221_v48 = vsel %vm202_vm0, %v20250_v17, -inf }
 0x17f   :  { %17746 = vmatmul.mubr.msk.f32.gmra.mrb[4].mxu1 %vm202_vm0, %v20622_v1  ;;  %v222_v30 = vmax.f32 %v214_v44, %v221_v48 }
 0x180   :  { %v17568_v32 = vpop.f32.mrb[10].mxu0  ;;  %17756 = vmatprep.mubr.msk.f32.mxu1 %vm19984_vm1, %v25332_v58 }
 0x181   :  { %v879_v33 = vpop.f32.mrb[11].mxu0  ;;  %17726 = vmatmul.mubr.msk.f32.gmra.mrb[116].mxu0 %vm202_vm0, %v393_v49  ;;  %v223_v49 = vsel %vm202_vm0, %v20252_v18, -inf }
 0x182   :  { %v19105_v51 = vpack.c.bf16 %v17568_v32, %v879_v33  ;;  %17728 = vmatprep.mubr.msk.f32.mxu0 %vm202_vm0, %v394_v50  ;;  %v227_v50 = vsel %vm202_vm0, %v20260_v20, -inf  ;;  %v224_v33 = vmax.f32 %v216_v62, %v223_v49  ;;  %v259_v62 = vsel %vm202_vm0, %v20206_v5, inf }
 0x183   :  { %17757 = vmatmul.mubr.msk.f32.vlgmr.msra.gmra.mrb[6].mxu1 %vm202_vm0, %v20596_v57  ;;  %v261_v49 = vsel %vm202_vm0, %v20212_v8, inf  ;;  %v263_v5 = vsel %vm202_vm0, %v20220_v10, inf }
 0x184   :  { %19103 = vmatpush3.bf16.msra.mxu1 %v19102_v31  ;;  %v17571_v53 = vpop.f32.mrb[12].mxu0  ;;  %17759 = vmatprep.mubr.msk.f32.mxu1 %vm19984_vm1, %v25332_v58  ;;  %v225_v31 = vsel %vm202_vm0, %v20258_v19, -inf }
 0x185   :  { %v889_v35 = vpop.f32.mrb[13].mxu0  ;;  %19104 = vmatprep.subr.bf16.mxu1 %v25334_v52  ;;  %17729 = vmatmul.mubr.msk.f32.gmra.mrb[118].mxu0 %vm202_vm0, %v395_v34  ;;  %v226_v34 = vmax.f32 %v218_v47, %v225_v31  ;;  %v260_v47 = vsel %vm202_vm0, %v20210_v7, inf  ;;  %v262_v31 = vsel %vm202_vm0, %v20218_v9, inf  ;;  %v265_v7 = vsel %vm202_vm0, %v20226_v11, inf }
 0x186   :  { %v19108_v36 = vpack.c.bf16 %v17571_v53, %v889_v35  ;;  %18079 = vmatprep.mubr.msk.f32.mxu0 %vm19984_vm1, %v25332_v58  ;;  %v229_v53 = vsel %vm202_vm0, %v20266_v21, -inf  ;;  %v231_v35 = vsel %vm202_vm0, %v20268_v22, -inf  ;;  %v271_v11 = vsel %vm202_vm0, %v20236_v14, inf }
 0x187   :  { %17760 = vmatmul.mubr.msk.f32.gmra.mrb[8].mxu1 %vm202_vm0, %v20609_v61  ;;  %v230_v2 = vmax.f32 %v222_v30, %v229_v53  ;;  %v232_v3 = vmax.f32 %v224_v33, %v231_v35  ;;  %v269_v33 = vsel %vm202_vm0, %v20234_v13, inf  ;;  %v279_v14 = vsel %vm202_vm0, %v20252_v18, inf }
 0x188   :  { %19106 = vmatpush3.bf16.msra.mxu1 %v19105_v51  ;;  %v20649_v54 = vpop.f32.mrb[14].mxu0  ;;  %17762 = vmatprep.mubr.msk.f32.mxu1 %vm19984_vm1, %v25332_v58  ;;  %v228_v51 = vmax.f32 %v220_v63, %v227_v50  ;;  %v270_v10 = vmin.f32 %v262_v31, %v269_v33  ;;  %v287_v18 = vsel %vm202_vm0, %v20268_v22, inf }
 0x189   :  { %v899_v39 = vpop.f32.mrb[15].mxu0  ;;  %19107 = vmatprep.subr.bf16.mxu1 %v25334_v52  ;;  %v238_v56 = vmax.f32 %v230_v2, %v237_v40  ;;  %v240_v44 = vmax.f32 %v232_v3, %v239_v41  ;;  %v275_v2 = vsel %vm202_vm0, %v20244_v16, inf  ;;  %v277_v40 = vsel %vm202_vm0, %v20250_v17, inf }
 0x18a   :  { %v19111_v42 = vpack.c.bf16 %v20649_v54, %v899_v39  ;;  %v233_v54 = vsel %vm202_vm0, %v20274_v23, -inf  ;;  %v236_v6 = vmax.f32 %v228_v51, %v235_v37  ;;  %v266_v51 = vmin.f32 %v260_v47, %v265_v7 }
 0x18b   :  { %17763 = vmatmul.mubr.msk.f32.gmra.mrb[10].mxu1 %vm202_vm0, %v20622_v1  ;;  %v234_v39 = vmax.f32 %v226_v34, %v233_v54  ;;  %v246_v48 = vmax.f32 %v238_v56, %v245_v45  ;;  %v264_v34 = vmin.f32 %v259_v62, %v263_v5  ;;  %v278_v41 = vmin.f32 %v270_v10, %v277_v40 }
 0x18c   :  { %v20679_v46 = vpop.f32.mrb[16].mxu0  ;;  %17773 = vmatprep.mubr.msk.f32.mxu1 %vm19984_vm1, %v25332_v58  ;;  %v244_v60 = vmax.f32 %v236_v6, %v243_v55  ;;  %v283_v16 = vsel %vm202_vm0, %v20260_v20, inf  ;;  %v285_v17 = vsel %vm202_vm0, %v20266_v21, inf  ;;  %v291_v21 = vsel %vm202_vm0, %v20276_v24, inf }
 0x18d   :  { %v20685_v0 = vpop.f32.mrb[17].mxu0  ;;  %v272_v54 = vmin.f32 %v264_v34, %v271_v11 }
 0x18e   :  { %v19114_v32 = vpack.c.bf16 %v20679_v46, %v20685_v0  ;;  %v248_v9 = vmax.f32 %v244_v60, %v246_v48  ;;  %v295_v46 = vsel %vm202_vm0, %v20284_v26, inf  ;;  %v297_v0 = vsel %vm202_vm0, %v20290_v27, inf }
 0x18f   :  { %17774 = vmatmul.mubr.msk.f32.vlgmr.msra.gmra.mrb[12].mxu1 %vm202_vm0, %v20596_v57  ;;  %v299_v48 = vsel %vm202_vm0, %v20292_v28, inf }
 0x190   :  { %19109 = vmatpush3.bf16.msra.mxu1 %v19108_v36  ;;  %v20705_v38 = vpop.f32.mrb[18].mxu0  ;;  %17776 = vmatprep.mubr.msk.f32.mxu1 %vm19984_vm1, %v25332_v58  ;;  %v241_v36 = vsel %vm202_vm0, %v20290_v27, -inf }
 0x191   :  { %v20711_v4 = vpop.f32.mrb[19].mxu0  ;;  %19110 = vmatprep.subr.bf16.mxu1 %v25334_v52  ;;  %v242_v59 = vmax.f32 %v234_v39, %v241_v36  ;;  %v280_v36 = vmin.f32 %v272_v54, %v279_v14 }
 0x192   :  { %v19117_v43 = vpack.c.bf16 %v20705_v38, %v20711_v4 }
 0x193   :  { %17777 = vmatmul.mubr.msk.f32.gmra.mrb[14].mxu1 %vm202_vm0, %v20609_v61  ;;  %v247_v30 = vmax.f32 %v240_v44, %v242_v59  ;;  %v286_v59 = vmin.f32 %v278_v41, %v285_v17  ;;  %v288_v20 = vmin.f32 %v280_v36, %v287_v18 }
 0x194   :  { %19112 = vmatpush3.bf16.msra.mxu1 %v19111_v42  ;;  %v20730_v63 = vpop.f32.mrb[20].mxu0  ;;  %17779 = vmatprep.mubr.msk.f32.mxu1 %vm19984_vm1, %v25332_v58  ;;  %v267_v42 = vsel %vm202_vm0, %v20228_v12, inf  ;;  %v273_v12 = vsel %vm202_vm0, %v20242_v15, inf  ;;  %v281_v15 = vsel %vm202_vm0, %v20258_v19, inf  ;;  %v289_v19 = vsel %vm202_vm0, %v20274_v23, inf }
 0x195   :  { %v20738_v50 = vpop.f32.mrb[21].mxu0  ;;  %19113 = vmatprep.subr.bf16.mxu1 %v25334_v52  ;;  %v268_v53 = vmin.f32 %v261_v49, %v267_v42  ;;  %v249_v13 = vmax.f32 %v247_v30, %v248_v9  ;;  %v274_v37 = vmin.f32 %v266_v51, %v273_v12  ;;  %v293_v23 = vsel %vm202_vm0, %v20282_v25, inf }
 0x196   :  { %v19120_v8 = vpack.c.bf16 %v20730_v63, %v20738_v50  ;;  %v294_v62 = vmin.f32 %v286_v59, %v293_v23  ;;  %v296_v47 = vmin.f32 %v288_v20, %v295_v46  ;;  %v301_v25 = vsel %vm202_vm0, %v20298_v29, inf }
 0x197   :  { %17780 = vmatmul.mubr.msk.f32.gmra.mrb[16].mxu1 %vm202_vm0, %v20622_v1  ;;  %v276_v39 = vmin.f32 %v268_v53, %v275_v2  ;;  %250 = vmax.xlane.f32.xlu0 %v249_v13  ;;  %v282_v55 = vmin.f32 %v274_v37, %v281_v15 }
 0x198   :  { %v20757_v35 = vpop.f32.mrb[22].mxu0  ;;  %17790 = vmatprep.mubr.msk.f32.mxu1 %vm19984_vm1, %v25332_v58  ;;  %v302_v30 = vmin.f32 %v294_v62, %v301_v25 }
 0x199   :  { %v939_v3 = vpop.f32.mrb[23].mxu0  ;;  %v284_v44 = vmin.f32 %v276_v39, %v283_v16  ;;  %v290_v22 = vmin.f32 %v282_v55, %v289_v19 }
 0x19a   :  { %v19123_v6 = vpack.c.bf16 %v20757_v35, %v939_v3 }
 0x19b   :  { %17791 = vmatmul.mubr.msk.f32.vlgmr.msra.gmra.mrb[18].mxu1 %vm202_vm0, %v20596_v57  ;;  %v292_v45 = vmin.f32 %v284_v44, %v291_v21  ;;  %v298_v24 = vmin.f32 %v290_v22, %v297_v0 }
 0x19c   :  { %19115 = vmatpush3.bf16.msra.mxu1 %v19114_v32  ;;  %v17589_v56 = vpop.f32.mrb[24].mxu0  ;;  %17793 = vmatprep.mubr.msk.f32.mxu1 %vm19984_vm1, %v25332_v58 }
 0x19d   :  { %v949_v60 = vpop.f32.mrb[25].mxu0  ;;  %19116 = vmatprep.subr.bf16.mxu1 %v25334_v52  ;;  %v300_v27 = vmin.f32 %v292_v45, %v299_v48  ;;  %v303_v31 = vmin.f32 %v296_v47, %v298_v24 }
 0x19e   :  { %v19126_v32 = vpack.c.bf16 %v17589_v56, %v949_v60 }
 0x19f   :  { %17794 = vmatmul.mubr.msk.f32.gmra.mrb[20].mxu1 %vm202_vm0, %v20609_v61  ;;  %v304_v7 = vmin.f32 %v300_v27, %v302_v30 }
 0x1a0   :  { %19118 = vmatpush3.bf16.msra.mxu1 %v19117_v43  ;;  %v17592_v26 = vpop.f32.mrb[26].mxu0  ;;  %17796 = vmatprep.mubr.msk.f32.mxu1 %vm19984_vm1, %v25332_v58 }
 0x1a1   :  { %v959_v49 = vpop.f32.mrb[27].mxu0  ;;  %19119 = vmatprep.subr.bf16.mxu1 %v25334_v52  ;;  %v305_v29 = vmin.f32 %v303_v31, %v304_v7 }
 0x1a2   :  { %v19129_v5 = vpack.c.bf16 %v17592_v26, %v959_v49 }
 0x1a3   :  { %17797 = vmatmul.mubr.msk.f32.gmra.mrb[22].mxu1 %vm202_vm0, %v20622_v1  ;;  %306 = vmin.xlane.f32.xlu0 %v305_v29 }
 0x1a4   :  { %v17595_v28 = vpop.f32.mrb[28].mxu0  ;;  %17807 = vmatprep.mubr.msk.f32.mxu1 %vm19984_vm1, %v25332_v58 }
 0x1a5   :  { %v969_v38 = vpop.f32.mrb[29].mxu0 }
 0x1a6   :  { %v19132_v4 = vpack.c.bf16 %v17595_v28, %v969_v38 }
 0x1a7   :  { %17808 = vmatmul.mubr.msk.f32.vlgmr.msra.gmra.mrb[24].mxu1 %vm202_vm0, %v20596_v57 }
 0x1a8   :  { %19121 = vmatpush3.bf16.msra.mxu1 %v19120_v8  ;;  %v17598_v43 = vpop.f32.mrb[30].mxu0  ;;  %17810 = vmatprep.mubr.msk.f32.mxu1 %vm19984_vm1, %v25332_v58 }
 0x1a9   :  { %v979_v42 = vpop.f32.mrb[31].mxu0  ;;  %19122 = vmatprep.subr.bf16.mxu1 %v25334_v52 }
 0x1aa   :  { %v19135_v33 = vpack.c.bf16 %v17598_v43, %v979_v42 }
 0x1ab   :  { %17811 = vmatmul.mubr.msk.f32.gmra.mrb[26].mxu1 %vm202_vm0, %v20609_v61 }
 0x1ac   :  { %19124 = vmatpush3.bf16.msra.mxu1 %v19123_v6  ;;  %v17601_v9 = vpop.f32.mrb[32].mxu0  ;;  %17813 = vmatprep.mubr.msk.f32.mxu1 %vm19984_vm1, %v25332_v58 }
 0x1ad   :  { %v989_v34 = vpop.f32.mrb[33].mxu0  ;;  %19125 = vmatprep.subr.bf16.mxu1 %v25334_v52 }
 0x1ae   :  { %v19138_v63 = vpack.c.bf16 %v17601_v9, %v989_v34 }
 0x1af   :  { %17814 = vmatmul.mubr.msk.f32.gmra.mrb[28].mxu1 %vm202_vm0, %v20622_v1 }
 0x1b0   :  { %v17604_v50 = vpop.f32.mrb[34].mxu0  ;;  %17824 = vmatprep.mubr.msk.f32.mxu1 %vm19984_vm1, %v25332_v58 }
 0x1b1   :  { %v999_v8 = vpop.f32.mrb[35].mxu0 }
 0x1b2   :  { %v19141_v51 = vpack.c.bf16 %v17604_v50, %v999_v8 }
 0x1b3   :  { %17825 = vmatmul.mubr.msk.f32.vlgmr.msra.gmra.mrb[30].mxu1 %vm202_vm0, %v20596_v57 }
 0x1b4   :  { %19127 = vmatpush3.bf16.msra.mxu1 %v19126_v32  ;;  %v17607_v53 = vpop.f32.mrb[36].mxu0  ;;  %17827 = vmatprep.mubr.msk.f32.mxu1 %vm19984_vm1, %v25332_v58 }
 0x1b5   :  { %v1009_v10 = vpop.f32.mrb[37].mxu0  ;;  %19128 = vmatprep.subr.bf16.mxu1 %v25334_v52 }
 0x1b6   :  { %v19144_v11 = vpack.c.bf16 %v17607_v53, %v1009_v10 }
 0x1b7   :  { %17828 = vmatmul.mubr.msk.f32.gmra.mrb[32].mxu1 %vm202_vm0, %v20609_v61 }
 0x1b8   :  { %19130 = vmatpush3.bf16.msra.mxu1 %v19129_v5  ;;  %v17610_v12 = vpop.f32.mrb[38].mxu0  ;;  %17830 = vmatprep.mubr.msk.f32.mxu1 %vm19984_vm1, %v25332_v58 }
 0x1b9   :  { %v1019_v35 = vpop.f32.mrb[39].mxu0  ;;  %19131 = vmatprep.subr.bf16.mxu1 %v25334_v52 }
 0x1ba   :  { %v19147_v13 = vpack.c.bf16 %v17610_v12, %v1019_v35 }
 0x1bb   :  { %17831 = vmatmul.mubr.msk.f32.gmra.mrb[34].mxu1 %vm202_vm0, %v20622_v1 }
 0x1bc   :  { %v17613_v54 = vpop.f32.mrb[40].mxu0  ;;  %17841 = vmatprep.mubr.msk.f32.mxu1 %vm19984_vm1, %v25332_v58 }
 0x1bd   :  { %v1029_v37 = vpop.f32.mrb[41].mxu0 }
 0x1be   :  { %v19150_v2 = vpack.c.bf16 %v17613_v54, %v1029_v37 }
 0x1bf   :  { %17842 = vmatmul.mubr.msk.f32.vlgmr.msra.gmra.mrb[36].mxu1 %vm202_vm0, %v20596_v57 }
 0x1c0   :  { %19133 = vmatpush3.bf16.msra.mxu1 %v19132_v4  ;;  %v20843_v3 = vpop.f32.mrb[42].mxu0  ;;  %17844 = vmatprep.mubr.msk.f32.mxu1 %vm19984_vm1, %v25332_v58 }
 0x1c1   :  { %v1039_v39 = vpop.f32.mrb[43].mxu0  ;;  %19134 = vmatprep.subr.bf16.mxu1 %v25334_v52 }
 0x1c2   :  { %v19153_v40 = vpack.c.bf16 %v20843_v3, %v1039_v39 }
 0x1c3   :  { %17845 = vmatmul.mubr.msk.f32.gmra.mrb[38].mxu1 %vm202_vm0, %v20609_v61 }
 0x1c4   :  { %19136 = vmatpush3.bf16.msra.mxu1 %v19135_v33  ;;  %v20851_v14 = vpop.f32.mrb[44].mxu0  ;;  %17847 = vmatprep.mubr.msk.f32.mxu1 %vm19984_vm1, %v25332_v58 }
 0x1c5   :  { %v20855_v15 = vpop.f32.mrb[45].mxu0  ;;  %19137 = vmatprep.subr.bf16.mxu1 %v25334_v52 }
 0x1c6   :  { %v19156_v6 = vpack.c.bf16 %v20851_v14, %v20855_v15 }
 0x1c7   :  { %17848 = vmatmul.mubr.msk.f32.gmra.mrb[40].mxu1 %vm202_vm0, %v20622_v1 }
 0x1c8   :  { %v20862_v41 = vpop.f32.mrb[46].mxu0  ;;  %17858 = vmatprep.mubr.msk.f32.mxu1 %vm19984_vm1, %v25332_v58 }
 0x1c9   :  { %v20866_v36 = vpop.f32.mrb[47].mxu0 }
 0x1ca   :  { %v19159_v55 = vpack.c.bf16 %v20862_v41, %v20866_v36 }
 0x1cb   :  { %17859 = vmatmul.mubr.msk.f32.vlgmr.msra.gmra.mrb[42].mxu1 %vm202_vm0, %v20596_v57 }
 0x1cc   :  { %19139 = vmatpush3.bf16.msra.mxu1 %v19138_v63  ;;  %v20872_v16 = vpop.f32.mrb[48].mxu0  ;;  %17861 = vmatprep.mubr.msk.f32.mxu1 %vm19984_vm1, %v25332_v58 }
 0x1cd   :  { %v20876_v17 = vpop.f32.mrb[49].mxu0  ;;  %19140 = vmatprep.subr.bf16.mxu1 %v25334_v52 }
 0x1ce   :  { %v19162_v18 = vpack.c.bf16 %v20872_v16, %v20876_v17 }
 0x1cf   :  { %17862 = vmatmul.mubr.msk.f32.gmra.mrb[44].mxu1 %vm202_vm0, %v20609_v61 }
 0x1d0   :  { %19142 = vmatpush3.bf16.msra.mxu1 %v19141_v51  ;;  %v20883_v19 = vpop.f32.mrb[50].mxu0  ;;  %17864 = vmatprep.mubr.msk.f32.mxu1 %vm19984_vm1, %v25332_v58 }
 0x1d1   :  { %v20887_v56 = vpop.f32.mrb[51].mxu0  ;;  %19143 = vmatprep.subr.bf16.mxu1 %v25334_v52 }
 0x1d2   :  { %v19165_v44 = vpack.c.bf16 %v20883_v19, %v20887_v56 }
 0x1d3   :  { %17865 = vmatmul.mubr.msk.f32.gmra.mrb[46].mxu1 %vm202_vm0, %v20622_v1 }
 0x1d4   :  { %v20894_v59 = vpop.f32.mrb[52].mxu0  ;;  %17875 = vmatprep.mubr.msk.f32.mxu1 %vm19984_vm1, %v25332_v58 }
 0x1d5   :  { %v20898_v20 = vpop.f32.mrb[53].mxu0 }
 0x1d6   :  { %v19168_v21 = vpack.c.bf16 %v20894_v59, %v20898_v20 }
 0x1d7   :  { %17876 = vmatmul.mubr.msk.f32.vlgmr.msra.gmra.mrb[48].mxu1 %vm202_vm0, %v20596_v57 }
 0x1d8   :  { %19145 = vmatpush3.bf16.msra.mxu1 %v19144_v11  ;;  %v20904_v60 = vpop.f32.mrb[54].mxu0  ;;  %17878 = vmatprep.mubr.msk.f32.mxu1 %vm19984_vm1, %v25332_v58 }
 0x1d9   :  { %v20908_v22 = vpop.f32.mrb[55].mxu0  ;;  %19146 = vmatprep.subr.bf16.mxu1 %v25334_v52 }
 0x1da   :  { %v19171_v23 = vpack.c.bf16 %v20904_v60, %v20908_v22 }
 0x1db   :  { %17879 = vmatmul.mubr.msk.f32.gmra.mrb[50].mxu1 %vm202_vm0, %v20609_v61 }
 0x1dc   :  { %19148 = vmatpush3.bf16.msra.mxu1 %v19147_v13  ;;  %v20915_v46 = vpop.f32.mrb[56].mxu0  ;;  %17881 = vmatprep.mubr.msk.f32.mxu1 %vm19984_vm1, %v25332_v58 }
 0x1dd   :  { %v20919_v0 = vpop.f32.mrb[57].mxu0  ;;  %19149 = vmatprep.subr.bf16.mxu1 %v25334_v52 }
 0x1de   :  { %v19174_v32 = vpack.c.bf16 %v20915_v46, %v20919_v0 }
 0x1df   :  { %17882 = vmatmul.mubr.msk.f32.gmra.mrb[52].mxu1 %vm202_vm0, %v20622_v1 }
 0x1e0   :  { %v20926_v45 = vpop.f32.mrb[58].mxu0  ;;  %17892 = vmatprep.mubr.msk.f32.mxu1 %vm19984_vm1, %v25332_v58 }
 0x1e1   :  { %v20930_v62 = vpop.f32.mrb[59].mxu0 }
 0x1e2   :  { %v19177_v47 = vpack.c.bf16 %v20926_v45, %v20930_v62 }
 0x1e3   :  { %17893 = vmatmul.mubr.msk.f32.vlgmr.msra.gmra.mrb[54].mxu1 %vm202_vm0, %v20596_v57 }
 0x1e4   :  { %19151 = vmatpush3.bf16.msra.mxu1 %v19150_v2  ;;  %v20936_v24 = vpop.f32.mrb[60].mxu0  ;;  %17895 = vmatprep.mubr.msk.f32.mxu1 %vm19984_vm1, %v25332_v58 }
 0x1e5   :  { %v20940_v48 = vpop.f32.mrb[61].mxu0  ;;  %19152 = vmatprep.subr.bf16.mxu1 %v25334_v52 }
 0x1e6   :  { %v19180_v25 = vpack.c.bf16 %v20936_v24, %v20940_v48 }
 0x1e7   :  { %17896 = vmatmul.mubr.msk.f32.gmra.mrb[56].mxu1 %vm202_vm0, %v20609_v61 }
 0x1e8   :  { %19154 = vmatpush3.bf16.msra.mxu1 %v19153_v40  ;;  %v20947_v26 = vpop.f32.mrb[62].mxu0  ;;  %17898 = vmatprep.mubr.msk.f32.mxu1 %vm19984_vm1, %v25332_v58 }
 0x1e9   :  { %v20951_v27 = vpop.f32.mrb[63].mxu0  ;;  %19155 = vmatprep.subr.bf16.mxu1 %v25334_v52 }
 0x1ea   :  { %v19183_v30 = vpack.c.bf16 %v20947_v26, %v20951_v27 }
 0x1eb   :  { %17899 = vmatmul.mubr.msk.f32.gmra.mrb[58].mxu1 %vm202_vm0, %v20622_v1 }
 0x1ec   :  { %v20958_v49 = vpop.f32.mrb[64].mxu0  ;;  %17909 = vmatprep.mubr.msk.f32.mxu1 %vm19984_vm1, %v25332_v58 }
 0x1ed   :  { %v20962_v31 = vpop.f32.mrb[65].mxu0 }
 0x1ee   :  { %v19186_v5 = vpack.c.bf16 %v20958_v49, %v20962_v31 }
 0x1ef   :  { %17910 = vmatmul.mubr.msk.f32.vlgmr.msra.gmra.mrb[60].mxu1 %vm202_vm0, %v20596_v57 }
 0x1f0   :  { %19157 = vmatpush3.bf16.msra.mxu1 %v19156_v6  ;;  %v20971_v7 = vpop.f32.mrb[66].mxu0  ;;  %17912 = vmatprep.mubr.msk.f32.mxu1 %vm19984_vm1, %v25332_v58 }
 0x1f1   :  { %v20975_v28 = vpop.f32.mrb[67].mxu0  ;;  %19158 = vmatprep.subr.bf16.mxu1 %v25334_v52 }
 0x1f2   :  { %v19189_v29 = vpack.c.bf16 %v20971_v7, %v20975_v28 }
 0x1f3   :  { %17913 = vmatmul.mubr.msk.f32.gmra.mrb[62].mxu1 %vm202_vm0, %v20609_v61 }
 0x1f4   :  { %19160 = vmatpush3.bf16.msra.mxu1 %v19159_v55  ;;  %v20985_v38 = vpop.f32.mrb[68].mxu0  ;;  %17915 = vmatprep.mubr.msk.f32.mxu1 %vm19984_vm1, %v25332_v58 }
 0x1f5   :  { %v20989_v4 = vpop.f32.mrb[69].mxu0  ;;  %19161 = vmatprep.subr.bf16.mxu1 %v25334_v52 }
 0x1f6   :  { %v19192_v43 = vpack.c.bf16 %v20985_v38, %v20989_v4 }
 0x1f7   :  { %17916 = vmatmul.mubr.msk.f32.gmra.mrb[64].mxu1 %vm202_vm0, %v20622_v1 }
 0x1f8   :  { %v20996_v42 = vpop.f32.mrb[70].mxu0  ;;  %17926 = vmatprep.mubr.msk.f32.mxu1 %vm19984_vm1, %v25332_v58 }
 0x1f9   :  { %v21000_v33 = vpop.f32.mrb[71].mxu0 }
 0x1fa   :  { %v19195_v9 = vpack.c.bf16 %v20996_v42, %v21000_v33 }
 0x1fb   :  { %17927 = vmatmul.mubr.msk.f32.vlgmr.msra.gmra.mrb[66].mxu1 %vm202_vm0, %v20596_v57 }
 0x1fc   :  { %19163 = vmatpush3.bf16.msra.mxu1 %v19162_v18  ;;  %v21009_v34 = vpop.f32.mrb[72].mxu0  ;;  %17929 = vmatprep.mubr.msk.f32.mxu1 %vm19984_vm1, %v25332_v58 }
 0x1fd   :  { %v21013_v63 = vpop.f32.mrb[73].mxu0  ;;  %19164 = vmatprep.subr.bf16.mxu1 %v25334_v52 }
 0x1fe   :  { %v19198_v50 = vpack.c.bf16 %v21009_v34, %v21013_v63 }
 0x1ff   :  { %17930 = vmatmul.mubr.msk.f32.gmra.mrb[68].mxu1 %vm202_vm0, %v20609_v61 }
 0x200   :  { %19166 = vmatpush3.bf16.msra.mxu1 %v19165_v44  ;;  %v21023_v8 = vpop.f32.mrb[74].mxu0  ;;  %17932 = vmatprep.mubr.msk.f32.mxu1 %vm19984_vm1, %v25332_v58 }
 0x201   :  { %v21027_v51 = vpop.f32.mrb[75].mxu0  ;;  %19167 = vmatprep.subr.bf16.mxu1 %v25334_v52 }
 0x202   :  { %v19201_v53 = vpack.c.bf16 %v21023_v8, %v21027_v51 }
 0x203   :  { %17933 = vmatmul.mubr.msk.f32.gmra.mrb[70].mxu1 %vm202_vm0, %v20622_v1 }
 0x204   :  { %v21034_v10 = vpop.f32.mrb[76].mxu0  ;;  %17943 = vmatprep.mubr.msk.f32.mxu1 %vm19984_vm1, %v25332_v58 }
 0x205   :  { %v21038_v11 = vpop.f32.mrb[77].mxu0 }
 0x206   :  { %v19204_v12 = vpack.c.bf16 %v21034_v10, %v21038_v11 }
 0x207   :  { %17944 = vmatmul.mubr.msk.f32.vlgmr.msra.gmra.mrb[72].mxu1 %vm202_vm0, %v20596_v57 }
 0x208   :  { %19169 = vmatpush3.bf16.msra.mxu1 %v19168_v21  ;;  %v21047_v35 = vpop.f32.mrb[78].mxu0  ;;  %17946 = vmatprep.mubr.msk.f32.mxu1 %vm19984_vm1, %v25332_v58 }
 0x209   :  { %v21051_v13 = vpop.f32.mrb[79].mxu0  ;;  %19170 = vmatprep.subr.bf16.mxu1 %v25334_v52 }
 0x20a   :  { %v19207_v54 = vpack.c.bf16 %v21047_v35, %v21051_v13 }
 0x20b   :  { %17947 = vmatmul.mubr.msk.f32.gmra.mrb[74].mxu1 %vm202_vm0, %v20609_v61 }
 0x20c   :  { %19172 = vmatpush3.bf16.msra.mxu1 %v19171_v23  ;;  %v17673_v37 = vpop.f32.mrb[80].mxu0  ;;  %17949 = vmatprep.mubr.msk.f32.mxu1 %vm19984_vm1, %v25332_v58 }
 0x20d   :  { %v1229_v2 = vpop.f32.mrb[81].mxu0  ;;  %19173 = vmatprep.subr.bf16.mxu1 %v25334_v52 }
 0x20e   :  { %v19210_v3 = vpack.c.bf16 %v17673_v37, %v1229_v2 }
 0x20f   :  { %17950 = vmatmul.mubr.msk.f32.gmra.mrb[76].mxu1 %vm202_vm0, %v20622_v1 }
 0x210   :  { %19211 = vmatpush3.bf16.msra.mxu0 %v19210_v3  ;;  %17960 = vmatprep.mubr.msk.f32.mxu1 %vm19984_vm1, %v25332_v58  ;;  %v17676_v39 = vpop.f32.mrb[82].mxu0 }
 0x211   :  { %v1239_v40 = vpop.f32.mrb[83].mxu0  ;;  %19212 = vmatprep.subr.bf16.mxu0 %v25334_v52 }
 0x212   :  { %v19213_v14 = vpack.c.bf16 %v17676_v39, %v1239_v40 }
 0x213   :  { %17961 = vmatmul.mubr.msk.f32.vlgmr.msra.gmra.mrb[78].mxu1 %vm202_vm0, %v20596_v57 }
 0x214   :  { %19175 = vmatpush3.bf16.msra.mxu1 %v19174_v32  ;;  %17963 = vmatprep.mubr.msk.f32.mxu1 %vm19984_vm1, %v25332_v58  ;;  %v21076_v15 = vpop.f32.mrb[84].mxu0 }
 0x215   :  { %19176 = vmatprep.subr.bf16.mxu1 %v25334_v52  ;;  %19214 = vmatpush3.bf16.msra.mxu0 %v19213_v14  ;;  %v21079_v6 = vpop.f32.mrb[85].mxu0 }
 0x216   :  { %v19216_v41 = vpack.c.bf16 %v21076_v15, %v21079_v6  ;;  %19221 = vmatprep.subr.bf16.mxu0 %v25334_v52  ;;  %v19739_v6 = vld [vmem:[#allocation2 + $0x8] sm:$0xff] }
 0x217   :  { %17964 = vmatmul.mubr.msk.f32.gmra.mrb[80].mxu1 %vm202_vm0, %v20609_v61 }
 0x218   :  { %19178 = vmatpush3.bf16.msra.mxu1 %v19177_v47  ;;  %17966 = vmatprep.mubr.msk.f32.mxu1 %vm19984_vm1, %v25332_v58  ;;  %v21091_v36 = vpop.f32.mrb[86].mxu0 }
 0x219   :  { %19179 = vmatprep.subr.bf16.mxu1 %v25334_v52  ;;  %v21094_v55 = vpop.f32.mrb[87].mxu0  ;;  %18080 = vmatmul.mubr.msk.f32.vlgmr.msra.gmra.mrb[120].mxu0 %vm202_vm0, %v20596_v57 }
 0x21a   :  { %v19219_v16 = vpack.c.bf16 %v21091_v36, %v21094_v55  ;;  %18082 = vmatprep.mubr.msk.f32.mxu0 %vm19984_vm1, %v25332_v58  ;;  %v19741_v36 = vld [vmem:[#allocation2 + $0x18] sm:$0xff] }
 0x21b   :  { %17967 = vmatmul.mubr.msk.f32.gmra.mrb[82].mxu1 %vm202_vm0, %v20622_v1 }
 0x21c   :  { %17977 = vmatprep.mubr.msk.f32.mxu1 %vm19984_vm1, %v25332_v58  ;;  %v17685_v17 = vpop.f32.mrb[88].mxu0 }
 0x21d   :  { %v1269_v18 = vpop.f32.mrb[89].mxu0  ;;  %18083 = vmatmul.mubr.msk.f32.gmra.mrb[122].mxu0 %vm202_vm0, %v20609_v61 }
 0x21e   :  { %v19222_v19 = vpack.c.bf16 %v17685_v17, %v1269_v18  ;;  %18085 = vmatprep.mubr.msk.f32.mxu0 %vm19984_vm1, %v25332_v58 }
 0x21f   :  { %17978 = vmatmul.mubr.msk.f32.vlgmr.msra.gmra.mrb[84].mxu1 %vm202_vm0, %v20596_v57 }
 0x220   :  { %19181 = vmatpush3.bf16.msra.mxu1 %v19180_v25  ;;  %17980 = vmatprep.mubr.msk.f32.mxu1 %vm19984_vm1, %v25332_v58  ;;  %v17688_v56 = vpop.f32.mrb[90].mxu0 }
 0x221   :  { %19182 = vmatprep.subr.bf16.mxu1 %v25334_v52  ;;  %19223 = vmatpush3.bf16.msra.mxu0 %v19222_v19  ;;  %v1279_v44 = vpop.f32.mrb[91].mxu0 }
 0x222   :  { %v19225_v59 = vpack.c.bf16 %v17688_v56, %v1279_v44  ;;  %18086 = vmatmul.mubr.msk.f32.gmra.mrb[124].mxu0 %vm202_vm0, %v20622_v1  ;;  %19224 = vmatprep.subr.bf16.mxu0 %v25334_v52 }
 0x223   :  { %17981 = vmatmul.mubr.msk.f32.gmra.mrb[86].mxu1 %vm202_vm0, %v20609_v61  ;;  %18113 = vmatprep.mubr.msk.f32.mxu0 %vm19984_vm1, %v25332_v58 }
 0x224   :  { %19184 = vmatpush3.bf16.msra.mxu1 %v19183_v30  ;;  %17983 = vmatprep.mubr.msk.f32.mxu1 %vm19984_vm1, %v25332_v58  ;;  %v21130_v20 = vpop.f32.mrb[92].mxu0  ;;  %v251_v23 = vpop.xlane.xlu0 %250 }
 0x225   :  { %19185 = vmatprep.subr.bf16.mxu1 %v25334_v52  ;;  %19226 = vmatpush3.bf16.msra.mxu0 %v19225_v59  ;;  %v21133_v21 = vpop.f32.mrb[93].mxu0  ;;  %v252_v0 = vrot.slane %v251_v23, 4 }
 0x226   :  { %v19228_v60 = vpack.c.bf16 %v21130_v20, %v21133_v21  ;;  %19233 = vmatprep.subr.bf16.mxu0 %v25334_v52  ;;  %v19745_v21 = vld [vmem:[#allocation2 + $0x38] sm:$0xff] }
 0x227   :  { %17984 = vmatmul.mubr.msk.f32.gmra.mrb[88].mxu1 %vm202_vm0, %v20622_v1  ;;  %v253_v45 = vmax.f32 %v251_v23, %v252_v0  ;;  %v4295_v0 = vld [vmem:[#allocation9] sm:$0xff] }
 0x228   :  { %17994 = vmatprep.mubr.msk.f32.mxu1 %vm19984_vm1, %v25332_v58  ;;  %v21142_v22 = vpop.f32.mrb[94].mxu0  ;;  %18114 = vmatmul.mubr.msk.f32.vlgmr.msra.gmra.mrb[126].mxu0 %vm202_vm0, %v20596_v57 }
 0x229   :  { %v21146_v46 = vpop.f32.mrb[95].mxu0  ;;  %18116 = vmatprep.mubr.msk.f32.mxu0 %vm19984_vm1, %v25332_v58  ;;  %v254_v24 = vrot.slane %v253_v45, 2 }
 0x22a   :  { %v19231_v32 = vpack.c.bf16 %v21142_v22, %v21146_v46  ;;  %v19747_v22 = vld [vmem:[#allocation2 + $0x48] sm:$0xff] }
 0x22b   :  { %17995 = vmatmul.mubr.msk.f32.vlgmr.msra.gmra.mrb[90].mxu1 %vm202_vm0, %v20596_v57  ;;  %v255_v25 = vmax.f32 %v253_v45, %v254_v24  ;;  %v4296_v45 = vld [vmem:[#allocation9 + $0x8] sm:$0xff] }
 0x22c   :  { %19187 = vmatpush3.bf16.msra.mxu1 %v19186_v5  ;;  %17997 = vmatprep.mubr.msk.f32.mxu1 %vm19984_vm1, %v25332_v58  ;;  %v17697_v62 = vpop.f32.mrb[96].mxu0 }
 0x22d   :  { %19188 = vmatprep.subr.bf16.mxu1 %v25334_v52  ;;  %v1309_v47 = vpop.f32.mrb[97].mxu0  ;;  %18117 = vmatmul.mubr.msk.f32.gmra.mrb[128].mxu0 %vm202_vm0, %v20609_v61  ;;  %v256_v30 = vrot.slane %v255_v25, 1 }
 0x22e   :  { %v19234_v48 = vpack.c.bf16 %v17697_v62, %v1309_v47  ;;  %18119 = vmatprep.mubr.msk.f32.mxu0 %vm19984_vm1, %v25332_v58  ;;  %v21272_v47 = vld [vmem:[#allocation7] sm:$0xff] }
 0x22f   :  { %17998 = vmatmul.mubr.msk.f32.gmra.mrb[92].mxu1 %vm202_vm0, %v20609_v61  ;;  %v257_v5 = vmax.f32 %v255_v25, %v256_v30  ;;  %v19269_v25 = vpack.c.bf16 %v4296_v45, %v4295_v0  ;;  %v4298_v30 = vld [vmem:[#allocation9 + $0x18] sm:$0xff]  ;;  %v19749_v45 = vld [vmem:[#allocation2 + $0x58] sm:$0xff] }
 0x230   :  { %19190 = vmatpush3.bf16.msra.mxu1 %v19189_v29  ;;  %18000 = vmatprep.mubr.msk.f32.mxu1 %vm19984_vm1, %v25332_v58  ;;  %v17700_v26 = vpop.f32.mrb[98].mxu0  ;;  %v307_v31 = vpop.xlane.xlu0 %306 }
 0x231   :  { %19191 = vmatprep.subr.bf16.mxu1 %v25334_v52  ;;  %19235 = vmatpush3.bf16.msra.mxu0 %v19234_v48  ;;  %v1319_v27 = vpop.f32.mrb[99].mxu0  ;;  %v308_v28 = vrot.slane %v307_v31, 4  ;;  %19507 = vpush %v257_v5 }
 0x232   :  { %v19237_v49 = vpack.c.bf16 %v17700_v26, %v1319_v27  ;;  %18120 = vmatmul.mubr.msk.f32.gmra.mrb[130].mxu0 %vm202_vm0, %v20622_v1  ;;  %19236 = vmatprep.subr.bf16.mxu0 %v25334_v52  ;;  %v4297_v27 = vld [vmem:[#allocation9 + $0x10] sm:$0xff] }
 0x233   :  { %18001 = vmatmul.mubr.msk.f32.gmra.mrb[94].mxu1 %vm202_vm0, %v20622_v1  ;;  %18147 = vmatprep.mubr.msk.f32.mxu0 %vm19984_vm1, %v25332_v58  ;;  %v309_v2 = vmin.f32 %v307_v31, %v308_v28  ;;  %v19273_v11 = vpack.c.bf16 %v4298_v30, %v4297_v27  ;;  %v21313_v28 = vld [vmem:[#allocation7 + $0x10] sm:$0x3f]  ;;  %v19755_v27 = vld [vmem:[#allocation2 + $0x88] sm:$0xff] }
 0x234   :  { %18011 = vmatprep.mubr.msk.f32.mxu1 %vm19984_vm1, %v25332_v58  ;;  %v21181_v7 = vpop.f32.mrb[100].mxu0 }
 0x235   :  { %19238 = vmatpush3.bf16.msra.mxu0 %v19237_v49  ;;  %v21183_v29 = vpop.f32.mrb[101].mxu0  ;;  %v310_v39 = vrot.slane %v309_v2, 2 }
 0x236   :  { %v19240_v37 = vpack.c.bf16 %v21181_v7, %v21183_v29  ;;  %19245 = vmatprep.subr.bf16.mxu0 %v25334_v52  ;;  %v19751_v29 = vld [vmem:[#allocation2 + $0x68] sm:$0xff] }
 0x237   :  { %18012 = vmatmul.mubr.msk.f32.vlgmr.msra.gmra.mrb[96].mxu1 %vm202_vm0, %v20596_v57  ;;  %v311_v38 = vmin.f32 %v309_v2, %v310_v39 }
 0x238   :  { %19193 = vmatpush3.bf16.msra.mxu1 %v19192_v43  ;;  %18014 = vmatprep.mubr.msk.f32.mxu1 %vm19984_vm1, %v25332_v58  ;;  %v21195_v3 = vpop.f32.mrb[102].mxu0 }
 0x239   :  { %19194 = vmatprep.subr.bf16.mxu1 %v25334_v52  ;;  %v21198_v40 = vpop.f32.mrb[103].mxu0  ;;  %18148 = vmatmul.mubr.msk.f32.vlgmr.msra.gmra.mrb[132].mxu0 %vm202_vm0, %v20596_v57  ;;  %v312_v43 = vrot.slane %v311_v38, 1 }
 0x23a   :  { %v19243_v14 = vpack.c.bf16 %v21195_v3, %v21198_v40  ;;  %18150 = vmatprep.mubr.msk.f32.mxu0 %vm19984_vm1, %v25332_v58  ;;  %v19753_v3 = vld [vmem:[#allocation2 + $0x78] sm:$0xff] }
 0x23b   :  { %18015 = vmatmul.mubr.msk.f32.gmra.mrb[98].mxu1 %vm202_vm0, %v20609_v61  ;;  %v313_v19 = vmin.f32 %v311_v38, %v312_v43 }
 0x23c   :  { %19196 = vmatpush3.bf16.msra.mxu1 %v19195_v9  ;;  %18017 = vmatprep.mubr.msk.f32.mxu1 %vm19984_vm1, %v25332_v58  ;;  %v17709_v4 = vpop.f32.mrb[104].mxu0 }
 0x23d   :  { %v1349_v17 = vpop.f32.mrb[105].mxu0  ;;  %19197 = vmatprep.subr.bf16.mxu1 %v25334_v52  ;;  %18151 = vmatmul.mubr.msk.f32.gmra.mrb[134].mxu0 %vm202_vm0, %v20609_v61  ;;  %19509 = vpush %v313_v19  ;;  %v19740_v19 = vld [vmem:[#allocation2 + $0x10] sm:$0xff] }
 0x23e   :  { %v19246_v18 = vpack.c.bf16 %v17709_v4, %v1349_v17  ;;  %18153 = vmatprep.mubr.msk.f32.mxu0 %vm19984_vm1, %v25332_v58 }
 0x23f   :  { %18018 = vmatmul.mubr.msk.f32.gmra.mrb[100].mxu1 %vm202_vm0, %v20622_v1 }
 0x240   :  { %18028 = vmatprep.mubr.msk.f32.mxu1 %vm19984_vm1, %v25332_v58  ;;  %v17712_v42 = vpop.f32.mrb[106].mxu0  ;;  %19247 = vmatpush3.bf16.msra.mxu0 %v19246_v18  ;;  %v19738_v18 = vld [vmem:[#allocation2] sm:$0xff] }
 0x241   :  { %v1359_v33 = vpop.f32.mrb[107].mxu0  ;;  %18154 = vmatmul.mubr.msk.f32.gmra.mrb[136].mxu0 %vm202_vm0, %v20622_v1  ;;  %19248 = vmatprep.subr.bf16.mxu0 %v25334_v52 }
 0x242   :  { %v19249_v9 = vpack.c.bf16 %v17712_v42, %v1359_v33  ;;  %18181 = vmatprep.mubr.msk.f32.mxu0 %vm19984_vm1, %v25332_v58 }
 0x243   :  { %18029 = vmatmul.mubr.msk.f32.vlgmr.msra.gmra.mrb[102].mxu1 %vm202_vm0, %v20596_v57 }
 0x244   :  { %19199 = vmatpush3.bf16.msra.mxu1 %v19198_v50  ;;  %18031 = vmatprep.mubr.msk.f32.mxu1 %vm19984_vm1, %v25332_v58  ;;  %v21234_v56 = vpop.f32.mrb[108].mxu0 }
 0x245   :  { %19200 = vmatprep.subr.bf16.mxu1 %v25334_v52  ;;  %19250 = vmatpush3.bf16.msra.mxu0 %v19249_v9  ;;  %v21237_v44 = vpop.f32.mrb[109].mxu0  ;;  %v19743_v9 = vld [vmem:[#allocation2 + $0x28] sm:$0xff] }
 0x246   :  { %v19252_v59 = vpack.c.bf16 %v21234_v56, %v21237_v44  ;;  %19257 = vmatprep.subr.bf16.mxu0 %v25334_v52  ;;  %v19757_v44 = vld [vmem:[#allocation2 + $0x98] sm:$0xff] }
 0x247   :  { %18032 = vmatmul.mubr.msk.f32.gmra.mrb[104].mxu1 %vm202_vm0, %v20609_v61 }
 0x248   :  { %19202 = vmatpush3.bf16.msra.mxu1 %v19201_v53  ;;  %v21247_v34 = vpop.f32.mrb[110].mxu0  ;;  %18034 = vmatprep.mubr.msk.f32.mxu1 %vm19984_vm1, %v25332_v58 }
 0x249   :  { %v21251_v63 = vpop.f32.mrb[111].mxu0  ;;  %18182 = vmatmul.mubr.msk.f32.vlgmr.msra.gmra.mrb[138].mxu0 %vm202_vm0, %v20596_v57  ;;  %19203 = vmatprep.subr.bf16.mxu1 %v25334_v52 }
 0x24a   :  { %v19255_v50 = vpack.c.bf16 %v21247_v34, %v21251_v63  ;;  %18184 = vmatprep.mubr.msk.f32.mxu0 %vm19984_vm1, %v25332_v58  ;;  %v21260_v8 = vpop.f32.mrb[0].mxu1  ;;  %v19759_v34 = vld [vmem:[#allocation2 + $0xa8] sm:$0xff] }
 0x24b   :  { %18035 = vmatmul.mubr.msk.f32.gmra.mrb[106].mxu1 %vm202_vm0, %v20622_v1  ;;  %v17741_v51 = vpop.f32.mrb[1].mxu1 }
 0x24c   :  { %v17721_v53 = vpop.f32.mrb[112].mxu0  ;;  %18045 = vmatprep.mubr.msk.f32.mxu1 %vm19984_vm1, %v25332_v58 }
 0x24d   :  { %v1389_v23 = vpop.f32.mrb[113].mxu0  ;;  %18185 = vmatmul.mubr.msk.f32.gmra.mrb[140].mxu0 %vm202_vm0, %v20609_v61 }
 0x24e   :  { %v19258_v57 = vpack.c.bf16 %v17721_v53, %v1389_v23  ;;  %18187 = vmatprep.mubr.msk.f32.mxu0 %vm19984_vm1, %v25332_v58  ;;  %v21270_v62 = vpop.f32.mrb[2].mxu1  ;;  %v19744_v53 = vld [vmem:[#allocation2 + $0x30] sm:$0xff]  ;;  %v19746_v23 = vld [vmem:[#allocation2 + $0x40] sm:$0xff] }
 0x24f   :  { %18046 = vmatmul.mubr.msk.f32.vlgmr.msra.gmra.mrb[108].mxu1 %vm202_vm0, %v21272_v47  ;;  %v17744_v24 = vpop.f32.mrb[3].mxu1 }
 0x250   :  { %19205 = vmatpush3.bf16.msra.mxu1 %v19204_v12  ;;  %v17724_v48 = vpop.f32.mrb[114].mxu0  ;;  %19259 = vmatpush3.bf16.msra.mxu0 %v19258_v57  ;;  %v21294_v12 = vld [vmem:[#allocation7 + $0x8] sm:$0xff] }
 0x251   :  { %v1399_v61 = vpop.f32.mrb[115].mxu0  ;;  %19206 = vmatprep.subr.bf16.mxu1 %v25334_v52  ;;  %18188 = vmatmul.mubr.msk.f32.gmra.mrb[142].mxu0 %vm202_vm0, %v20622_v1 }
 0x252   :  { %v19261_v26 = vpack.c.bf16 %v17724_v48, %v1399_v61  ;;  %19260 = vmatprep.subr.bf16.mxu0 %v25334_v52  ;;  %18215 = vmatprep.mubr.msk.f32.mxu0 %vm19984_vm1, %v25332_v58  ;;  %v21285_v49 = vpop.f32.mrb[4].mxu1  ;;  %v19750_v48 = vld [vmem:[#allocation2 + $0x60] sm:$0xff]  ;;  %v19752_v61 = vld [vmem:[#allocation2 + $0x70] sm:$0xff] }
 0x253   :  { %18048 = vmatprep.mubr.msk.f32.mxu1 %vm19984_vm1, %v25332_v58  ;;  %v17747_v10 = vpop.f32.mrb[5].mxu1 }
 0x254   :  { %19208 = vmatpush3.bf16.msra.mxu1 %v19207_v54  ;;  %19262 = vmatpush3.bf16.msra.mxu0 %v19261_v26  ;;  %v21292_v1 = vpop.f32.mrb[116].mxu0  ;;  %v19756_v10 = vld [vmem:[#allocation2 + $0x90] sm:$0xff] }
 0x255   :  { %19270 = vmatprep.subr.bf16.mxu0 %v19269_v25  ;;  %18049 = vmatmul.mubr.msk.f32.gmra.mrb[110].mxu1 %vm202_vm0, %v21294_v12  ;;  %v21298_v31 = vpop.f32.mrb[117].mxu0 }
 0x256   :  { %18051 = vmatprep.mubr.msk.f32.mxu1 %vm19984_vm1, %v25332_v58  ;;  %19215 = vmatprep.subr.bf16.mxu1 %v25334_v52  ;;  %v19264_v35 = vpack.c.bf16 %v21292_v1, %v21298_v31  ;;  %v21305_v13 = vpop.f32.mrb[6].mxu1  ;;  %v19763_v31 = vld [vmem:[#allocation4 + $0x8] sm:$0xff] }
 0x257   :  { %18216 = vmatmul.mubr.msk.f32.vlgmr.msra.gmra.mrb[144].mxu0 %vm202_vm0, %v21272_v47  ;;  %v17758_v54 = vpop.f32.mrb[7].mxu1 }
 0x258   :  { %18218 = vmatprep.mubr.msk.f32.mxu0 %vm19984_vm1, %v25332_v58  ;;  %19272 = vmatpush3.bf16.msra.mxu0 %v19269_v25  ;;  %v21311_v5 = vpop.f32.mrb[118].mxu0 }
 0x259   :  { %19274 = vmatprep.subr.bf16.mxu0 %v19273_v11  ;;  %18052 = vmatmul.mubr.msk.f32.gmra.mrb[112].mxu1 %vm202_vm0, %v21313_v28  ;;  %v21317_v2 = vpop.f32.mrb[119].mxu0 }
 0x25a   :  { %18062 = vmatprep.mubr.msk.f32.mxu1 %vm19984_vm1, %v25332_v58  ;;  %v19267_v39 = vpack.c.bf16 %v21311_v5, %v21317_v2  ;;  %v21323_v38 = vpop.f32.mrb[8].mxu1  ;;  %v21493_v5 = vmul.f32 %v21270_v62, %v21270_v62 }
 0x25b   :  { %18219 = vmatmul.mubr.msk.f32.gmra.mrb[146].mxu0 %vm202_vm0, %v21294_v12  ;;  %v17761_v4 = vpop.f32.mrb[9].mxu1 }
 0x25c   :  { %18221 = vmatprep.mubr.msk.f32.mxu0 %vm19984_vm1, %v25332_v58  ;;  %19276 = vmatpush3.bf16.msra.mxu0 %v19273_v11  ;;  %v19758_v11 = vld [vmem:[#allocation2 + $0xa0] sm:$0xff] }
 0x25d   :  { %18063 = vmatmul.mubr.msk.f32.vlgmr.msra.gmra.mrb[114].mxu1 %vm202_vm0, %v21272_v47  ;;  %19377 = vmatprep.subr.bf16.mxu0 %v25334_v52 }
 0x25e   :  { %18065 = vmatprep.mubr.msk.f32.mxu1 %vm19984_vm1, %v25332_v58  ;;  %19217 = vmatpush3.bf16.msra.mxu1 %v19216_v41  ;;  %v21337_v43 = vpop.f32.mrb[10].mxu1 }
 0x25f   :  { %18222 = vmatmul.mubr.msk.f32.gmra.mrb[148].mxu0 %vm202_vm0, %v21313_v28  ;;  %19218 = vmatprep.subr.bf16.mxu1 %v25334_v52  ;;  %v17764_v17 = vpop.f32.mrb[11].mxu1 }
 0x260   :  { %18249 = vmatprep.mubr.msk.f32.mxu0 %vm202_vm0, %v19738_v18  ;;  %v19761_v17 = vld [vmem:[#allocation2 + $0xb8] sm:$0xff] }
 0x261   :  { %18066 = vmatmul.mubr.msk.f32.gmra.mrb[116].mxu1 %vm202_vm0, %v21294_v12 }
 0x262   :  { %18068 = vmatprep.mubr.msk.f32.mxu1 %vm19984_vm1, %v25332_v58  ;;  %19220 = vmatpush3.bf16.msra.mxu1 %v19219_v16  ;;  %v21350_v15 = vpop.f32.mrb[12].mxu1  ;;  %v19742_v16 = vld [vmem:[#allocation2 + $0x20] sm:$0xff]  ;;  %s19508_s7 = spop %19507 }
 0x263   :  { %18250 = vmatmul.mubr.msk.f32.vlgmr.msra.gmra.mrb[150].mxu0 %vm202_vm0, %v19739_v6  ;;  %19227 = vmatprep.subr.bf16.mxu1 %v25334_v52  ;;  %v17775_v41 = vpop.f32.mrb[13].mxu1  ;;  %v19762_v6 = vld [vmem:[#allocation4] sm:$0xff]  ;;  %p315_p8 = scmp.gt.f32.partialorder %s19508_s7, 128.0 }
 0x264   :  { %18252 = vmatprep.mubr.msk.f32.mxu0 %vm202_vm0, %v19740_v19  ;;  %v21475_v41 = vmul.f32 %v21260_v8, %v21260_v8 }
 0x265   :  { %18069 = vmatmul.mubr.msk.f32.gmra.mrb[118].mxu1 %vm202_vm0, %v21313_v28  ;;  %s316_s30 = scalar_select %p315_p8, 255.0, 1.0 }
 0x266   :  { %18096 = vmatprep.mubr.msk.f32.mxu1 %vm19984_vm1, %v25332_v58  ;;  %v21359_v42 = vpop.f32.mrb[14].mxu1 }
 0x267   :  { %18253 = vmatmul.mubr.msk.f32.gmra.mrb[152].mxu0 %vm202_vm0, %v19741_v36  ;;  %v17778_v55 = vpop.f32.mrb[15].mxu1 }
 0x268   :  { %18255 = vmatprep.mubr.msk.f32.mxu0 %vm202_vm0, %v19742_v16  ;;  %v19764_v55 = vld [vmem:[#allocation4 + $0x10] sm:$0xff] }
 0x269   :  { %18097 = vmatmul.mubr.msk.f32.vlgmr.msra.gmra.mrb[120].mxu1 %vm202_vm0, %v21272_v47 }
 0x26a   :  { %18099 = vmatprep.mubr.msk.f32.mxu1 %vm19984_vm1, %v25332_v58  ;;  %19229 = vmatpush3.bf16.msra.mxu1 %v19228_v60  ;;  %v21370_v33 = vpop.f32.mrb[16].mxu1 }
 0x26b   :  { %18256 = vmatmul.mubr.msk.f32.gmra.mrb[154].mxu0 %vm202_vm0, %v19743_v9  ;;  %19230 = vmatprep.subr.bf16.mxu1 %v25334_v52  ;;  %v17781_v51 = vpop.f32.mrb[17].mxu1 }
 0x26c   :  { %18258 = vmatprep.mubr.msk.f32.mxu0 %vm202_vm0, %v19744_v53  ;;  %v19766_v53 = vld [vmem:[#allocation4 + $0x20] sm:$0xff] }
 0x26d   :  { %18100 = vmatmul.mubr.msk.f32.gmra.mrb[122].mxu1 %vm202_vm0, %v21294_v12 }
 0x26e   :  { %18102 = vmatprep.mubr.msk.f32.mxu1 %vm19984_vm1, %v25332_v58  ;;  %19232 = vmatpush3.bf16.msra.mxu1 %v19231_v32  ;;  %v21382_v20 = vpop.f32.mrb[18].mxu1  ;;  %v19748_v32 = vld [vmem:[#allocation2 + $0x50] sm:$0xff]  ;;  %s19510_s26 = spop %19509 }
 0x26f   :  { %18259 = vmatmul.mubr.msk.f32.gmra.mrb[156].mxu0 %vm202_vm0, %v19745_v21  ;;  %19239 = vmatprep.subr.bf16.mxu1 %v25334_v52  ;;  %v17792_v60 = vpop.f32.mrb[19].mxu1  ;;  %v21512_v21 = vmul.f32 %v21285_v49, %v21285_v49  ;;  %p317_p9 = scmp.lt.f32.partialorder %s19510_s26, -0.5  ;;  %s19986_s26 = smov 127  }
 0x270   :  { %18261 = vmatprep.mubr.msk.f32.mxu0 %vm202_vm0, %v19746_v23  ;;  %v19767_v23 = vld [vmem:[#allocation4 + $0x28] sm:$0xff] }
 0x271   :  { %18103 = vmatmul.mubr.msk.f32.gmra.mrb[124].mxu1 %vm202_vm0, %v21313_v28  ;;  %s318_s27 = scalar_select %p317_p9, -1.0, 0.0 }
 0x272   :  { %18130 = vmatprep.mubr.msk.f32.mxu1 %vm19984_vm1, %v25332_v58  ;;  %v21391_v57 = vpop.f32.mrb[20].mxu1 }
 0x273   :  { %18262 = vmatmul.mubr.msk.f32.gmra.mrb[158].mxu0 %vm202_vm0, %v19747_v22  ;;  %v17795_v46 = vpop.f32.mrb[21].mxu1  ;;  %s319_s29 = ssub.f32 %s316_s30, %s318_s27  ;;  %s19987_s30 = smov 124  }
 0x274   :  { %18264 = vmatprep.mubr.msk.f32.mxu0 %vm202_vm0, %v19748_v32  ;;  %v19768_v32 = vld [vmem:[#allocation4 + $0x30] sm:$0xff]  ;;  %s19988_s27 = smov 126  }
 0x275   :  { %18131 = vmatmul.mubr.msk.f32.vlgmr.msra.gmra.mrb[126].mxu1 %vm202_vm0, %v21272_v47  ;;  %s320_s0 = smul.f32 0.01, %s319_s29 }
 0x276   :  { %18133 = vmatprep.mubr.msk.f32.mxu1 %vm19984_vm1, %v25332_v58  ;;  %19241 = vmatpush3.bf16.msra.mxu1 %v19240_v37  ;;  %v21402_v0 = vpop.f32.mrb[22].mxu1  ;;  %s322_s28 = smul.f32 0.03, %s319_s29  ;;  %s19989_s29 = smov 122  }
 0x277   :  { %18265 = vmatmul.mubr.msk.f32.gmra.mrb[160].mxu0 %vm202_vm0, %v19749_v45  ;;  %19242 = vmatprep.subr.bf16.mxu1 %v25334_v52  ;;  %v17798_v24 = vpop.f32.mrb[23].mxu1  ;;  %v21531_v45 = vmul.f32 %v21305_v13, %v21305_v13  ;;  %s321_s15 = smul.f32 %s320_s0, %s320_s0  ;;  %s19990_s0 = smov 125  }
 0x278   :  { %18267 = vmatprep.mubr.msk.f32.mxu0 %vm202_vm0, %v19750_v48  ;;  %v19769_v48 = vld [vmem:[#allocation4 + $0x38] sm:$0xff]  ;;  %s323_s17 = smul.f32 %s322_s28, %s322_s28  ;;  %s19991_s28 = smov 123  }
 0x279   :  { %18134 = vmatmul.mubr.msk.f32.gmra.mrb[128].mxu1 %vm202_vm0, %v21294_v12 }
 0x27a   :  { %18136 = vmatprep.mubr.msk.f32.mxu1 %vm19984_vm1, %v25332_v58  ;;  %19244 = vmatpush3.bf16.msra.mxu1 %v19243_v14  ;;  %v21414_v7 = vpop.f32.mrb[24].mxu1  ;;  %v19754_v14 = vld [vmem:[#allocation2 + $0x80] sm:$0xff] }
 0x27b   :  { %18268 = vmatmul.mubr.msk.f32.gmra.mrb[162].mxu0 %vm202_vm0, %v19751_v29  ;;  %19251 = vmatprep.subr.bf16.mxu1 %v25334_v52  ;;  %v17809_v37 = vpop.f32.mrb[25].mxu1 }
 0x27c   :  { %18270 = vmatprep.mubr.msk.f32.mxu0 %vm202_vm0, %v19752_v61  ;;  %v19770_v61 = vld [vmem:[#allocation4 + $0x40] sm:$0xff] }
 0x27d   :  { %18137 = vmatmul.mubr.msk.f32.gmra.mrb[130].mxu1 %vm202_vm0, %v21313_v28 }
 0x27e   :  { %18164 = vmatprep.mubr.msk.f32.mxu1 %vm19984_vm1, %v25332_v58  ;;  %v21423_v25 = vpop.f32.mrb[26].mxu1 }
 0x27f   :  { %18271 = vmatmul.mubr.msk.f32.gmra.mrb[164].mxu0 %vm202_vm0, %v19753_v3  ;;  %v17812_v40 = vpop.f32.mrb[27].mxu1  ;;  %v21550_v3 = vmul.f32 %v21323_v38, %v21323_v38 }
 0x280   :  { %18273 = vmatprep.mubr.msk.f32.mxu0 %vm202_vm0, %v19754_v14 }
 0x281   :  { %18165 = vmatmul.mubr.msk.f32.vlgmr.msra.gmra.mrb[132].mxu1 %vm202_vm0, %v21272_v47  ;;  %25427 = vst [vmem:[#allocation21_spill] sm:$0xff] %v21550_v3 }
 0x282   :  { %18167 = vmatprep.mubr.msk.f32.mxu1 %vm19984_vm1, %v25332_v58  ;;  %19253 = vmatpush3.bf16.msra.mxu1 %v19252_v59  ;;  %v21434_v26 = vpop.f32.mrb[28].mxu1 }
 0x283   :  { %18274 = vmatmul.mubr.msk.f32.gmra.mrb[166].mxu0 %vm202_vm0, %v19755_v27  ;;  %19254 = vmatprep.subr.bf16.mxu1 %v25334_v52  ;;  %v17815_v30 = vpop.f32.mrb[29].mxu1  ;;  %v19771_v27 = vld [vmem:[#allocation4 + $0x48] sm:$0xff] }
 0x284   :  { %18276 = vmatprep.mubr.msk.f32.mxu0 %vm202_vm0, %v19756_v10 }
 0x285   :  { %18168 = vmatmul.mubr.msk.f32.gmra.mrb[134].mxu1 %vm202_vm0, %v21294_v12 }
 0x286   :  { %18170 = vmatprep.mubr.msk.f32.mxu1 %vm19984_vm1, %v25332_v58  ;;  %19256 = vmatpush3.bf16.msra.mxu1 %v19255_v50  ;;  %v21446_v56 = vpop.f32.mrb[30].mxu1  ;;  %v19760_v50 = vld [vmem:[#allocation2 + $0xb0] sm:$0xff] }
 0x287   :  { %18277 = vmatmul.mubr.msk.f32.gmra.mrb[168].mxu0 %vm202_vm0, %v19757_v44  ;;  %19263 = vmatprep.subr.bf16.mxu1 %v25334_v52  ;;  %v17826_v59 = vpop.f32.mrb[31].mxu1  ;;  %v19772_v44 = vld [vmem:[#allocation4 + $0x50] sm:$0xff] }
 0x288   :  { %18279 = vmatprep.mubr.msk.f32.mxu0 %vm202_vm0, %v19758_v11  ;;  %v21569_v59 = vmul.f32 %v21337_v43, %v21337_v43 }
 0x289   :  { %18171 = vmatmul.mubr.msk.f32.gmra.mrb[136].mxu1 %vm202_vm0, %v21313_v28 }
 0x28a   :  { %18198 = vmatprep.mubr.msk.f32.mxu1 %vm19984_vm1, %v25332_v58  ;;  %v21455_v54 = vpop.f32.mrb[32].mxu1  ;;  %25430 = vst [vmem:[#allocation24_spill] sm:$0xff] %v21569_v59 }
 0x28b   :  { %18280 = vmatmul.mubr.msk.f32.gmra.mrb[170].mxu0 %vm202_vm0, %v19759_v34  ;;  %v17829_v63 = vpop.f32.mrb[33].mxu1  ;;  %v19773_v34 = vld [vmem:[#allocation4 + $0x58] sm:$0xff] }
 0x28c   :  { %18282 = vmatprep.mubr.msk.f32.mxu0 %vm202_vm0, %v19760_v50 }
 0x28d   :  { %18199 = vmatmul.mubr.msk.f32.vlgmr.msra.gmra.mrb[138].mxu1 %vm202_vm0, %v21272_v47 }
 0x28e   :  { %18201 = vmatprep.mubr.msk.f32.mxu1 %vm19984_vm1, %v25332_v58  ;;  %19265 = vmatpush3.bf16.msra.mxu1 %v19264_v35  ;;  %v21466_v4 = vpop.f32.mrb[34].mxu1 }
 0x28f   :  { %18283 = vmatmul.mubr.msk.f32.gmra.mrb[172].mxu0 %vm202_vm0, %v19761_v17  ;;  %19266 = vmatprep.subr.bf16.mxu1 %v25334_v52  ;;  %v17832_v18 = vpop.f32.mrb[35].mxu1  ;;  %v19774_v17 = vld [vmem:[#allocation4 + $0x60] sm:$0xff] }
 0x290   :  { %18285 = vmatprep.mubr.msk.f32.mxu0 %vm202_vm0, %v19762_v6 }
 0x291   :  { %18202 = vmatmul.mubr.msk.f32.gmra.mrb[140].mxu1 %vm202_vm0, %v21294_v12 }
 0x292   :  { %18204 = vmatprep.mubr.msk.f32.mxu1 %vm19984_vm1, %v25332_v58  ;;  %19268 = vmatpush3.bf16.msra.mxu1 %v19267_v39  ;;  %v1983_v1 = vpop.f32.mrb[36].mxu1  ;;  %v19765_v39 = vld [vmem:[#allocation4 + $0x18] sm:$0xff] }
 0x293   :  { %18286 = vmatmul.mubr.msk.f32.gmra.mrb[174].mxu0 %vm202_vm0, %v19763_v31  ;;  %v21484_v35 = vmul.f32 %v1983_v1, %v21260_v8  ;;  %v17843_v19 = vpop.f32.mrb[37].mxu1  ;;  %v21486_v36 = vmul.f32 %v1983_v1, %v1983_v1  ;;  %v19775_v1 = vld [vmem:[#allocation4 + $0x68] sm:$0xff] }
 0x294   :  { %18288 = vmatprep.mubr.msk.f32.mxu0 %vm202_vm0, %v19764_v55 }
 0x295   :  { %18205 = vmatmul.mubr.msk.f32.gmra.mrb[142].mxu1 %vm202_vm0, %v21313_v28  ;;  %v21497_v2 = vadd.f32 %v21486_v36, %v21475_v41 }
 0x296   :  { %18232 = vmatprep.mubr.msk.f32.mxu1 %vm19984_vm1, %v25332_v58  ;;  %v1988_v8 = vpop.f32.mrb[38].mxu1 }
 0x297   :  { %18289 = vmatmul.mubr.msk.f32.gmra.mrb[176].mxu0 %vm202_vm0, %v19765_v39  ;;  %v21503_v16 = vmul.f32 %v1988_v8, %v21270_v62  ;;  %v17846_v9 = vpop.f32.mrb[39].mxu1  ;;  %v21505_v51 = vmul.f32 %v1988_v8, %v1988_v8  ;;  %v19776_v8 = vld [vmem:[#allocation4 + $0x70] sm:$0xff] }
 0x298   :  { %18291 = vmatprep.mubr.msk.f32.mxu0 %vm202_vm0, %v19766_v53  ;;  %v19777_v53 = vld [vmem:[#allocation4 + $0x78] sm:$0xff] }
 0x299   :  { %18233 = vmatmul.mubr.msk.f32.vlgmr.msra.gmra.mrb[144].mxu1 %vm202_vm0, %v21272_v47  ;;  %v21516_v60 = vadd.f32 %v21505_v51, %v21493_v5 }
 0x29a   :  { %18235 = vmatprep.mubr.msk.f32.mxu1 %vm19984_vm1, %v25332_v58  ;;  %v1993_v62 = vpop.f32.mrb[40].mxu1 }
 0x29b   :  { %18292 = vmatmul.mubr.msk.f32.gmra.mrb[178].mxu0 %vm202_vm0, %v19767_v23  ;;  %v21522_v22 = vmul.f32 %v1993_v62, %v21285_v49  ;;  %v17849_v46 = vpop.f32.mrb[41].mxu1  ;;  %v21524_v47 = vmul.f32 %v1993_v62, %v1993_v62 }
 0x29c   :  { %18294 = vmatprep.mubr.msk.f32.mxu0 %vm202_vm0, %v19768_v32  ;;  %v19778_v32 = vld [vmem:[#allocation4 + $0x80] sm:$0xff] }
 0x29d   :  { %18236 = vmatmul.mubr.msk.f32.gmra.mrb[146].mxu1 %vm202_vm0, %v21294_v12  ;;  %v21535_v24 = vadd.f32 %v21524_v47, %v21512_v21 }
 0x29e   :  { %18238 = vmatprep.mubr.msk.f32.mxu1 %vm19984_vm1, %v25332_v58  ;;  %v2063_v49 = vpop.f32.mrb[42].mxu1 }
 0x29f   :  { %18295 = vmatmul.mubr.msk.f32.gmra.mrb[180].mxu0 %vm202_vm0, %v19769_v48  ;;  %v17860_v29 = vpop.f32.mrb[43].mxu1  ;;  %v21540_v37 = vmul.f32 %v2063_v49, %v2063_v49  ;;  %v21543_v12 = vmul.f32 %v2063_v49, %v21305_v13 }
 0x2a0   :  { %18297 = vmatprep.mubr.msk.f32.mxu0 %vm202_vm0, %v19770_v61  ;;  %v19779_v29 = vld [vmem:[#allocation4 + $0x88] sm:$0xff] }
 0x2a1   :  { %25426 = vst [vmem:[#allocation20_spill] sm:$0xff] %v21543_v12  ;;  %18239 = vmatmul.mubr.msk.f32.gmra.mrb[148].mxu1 %vm202_vm0, %v21313_v28  ;;  %v21554_v40 = vadd.f32 %v21540_v37, %v21531_v45 }
 0x2a2   :  { %v2068_v14 = vpop.f32.mrb[44].mxu1 }
 0x2a3   :  { %18298 = vmatmul.mubr.msk.f32.gmra.mrb[182].mxu0 %vm202_vm0, %v19771_v27  ;;  %v21557_v13 = vmul.f32 %v2068_v14, %v2068_v14  ;;  %v21560_v30 = vmul.f32 %v2068_v14, %v21323_v38  ;;  %v17863_v10 = vpop.f32.mrb[45].mxu1 }
 0x2a4   :  { %18300 = vmatprep.mubr.msk.f32.mxu0 %vm202_vm0, %v19772_v44  ;;  %v19780_v10 = vld [vmem:[#allocation4 + $0x90] sm:$0xff] }
 0x2a5   :  { %25428 = vst [vmem:[#allocation22_spill] sm:$0xff] %v21560_v30  ;;  %v21565_v28 = vadd.f32 %v21557_v13, %v21550_v3 }
 0x2a6   :  { %v2073_v11 = vpop.f32.mrb[46].mxu1 }
 0x2a7   :  { %25429 = vst [vmem:[#allocation23_spill] sm:$0xff] %v21565_v28  ;;  %18301 = vmatmul.mubr.msk.f32.gmra.mrb[184].mxu0 %vm202_vm0, %v19773_v34  ;;  %v21572_v63 = vmul.f32 %v2073_v11, %v2073_v11  ;;  %v21575_v38 = vmul.f32 %v2073_v11, %v21337_v43  ;;  %v17866_v50 = vpop.f32.mrb[47].mxu1  ;;  %v21590_v43 = vmul.f32 %v21350_v15, %v21350_v15 }
 0x2a8   :  { %18303 = vmatprep.mubr.msk.f32.mxu0 %vm202_vm0, %v19774_v17  ;;  %v21629_v11 = vmul.f32 %v21382_v20, %v21382_v20  ;;  %v19781_v50 = vld [vmem:[#allocation4 + $0x98] sm:$0xff] }
 0x2a9   :  { %25431 = vst [vmem:[#allocation25_spill] sm:$0xff] %v21572_v63  ;;  %25432 = vst [vmem:[#allocation26_spill] sm:$0xff] %v21575_v38  ;;  %v21580_v18 = vadd.f32 %v21572_v63, %v21569_v59 }
 0x2aa   :  { %v2143_v6 = vpop.f32.mrb[48].mxu1  ;;  %25434 = vst [vmem:[#allocation28_spill] sm:$0xff] %v21629_v11 }
 0x2ab   :  { %25433 = vst [vmem:[#allocation27_spill] sm:$0xff] %v21580_v18  ;;  %18304 = vmatmul.mubr.msk.f32.gmra.mrb[186].mxu0 %vm202_vm0, %v19775_v1  ;;  %v21583_v31 = vmul.f32 %v2143_v6, %v2143_v6  ;;  %v21586_v19 = vmul.f32 %v2143_v6, %v21350_v15  ;;  %v17877_v55 = vpop.f32.mrb[49].mxu1  ;;  %v21605_v15 = vmul.f32 %v21359_v42, %v21359_v42  ;;  %v19782_v1 = vld [vmem:[#allocation4 + $0xa0] sm:$0xff] }
 0x2ac   :  { %18306 = vmatprep.mubr.msk.f32.mxu0 %vm202_vm0, %v19776_v8  ;;  %v21644_v8 = vmul.f32 %v21391_v57, %v21391_v57 }
 0x2ad   :  { %v21595_v39 = vadd.f32 %v21583_v31, %v21590_v43 }
 0x2ae   :  { %v2148_v9 = vpop.f32.mrb[50].mxu1  ;;  %25438 = vst [vmem:[#allocation32_spill] sm:$0xff] %v21644_v8 }
 0x2af   :  { %18307 = vmatmul.mubr.msk.f32.gmra.mrb[188].mxu0 %vm202_vm0, %v19777_v53  ;;  %v21598_v62 = vmul.f32 %v2148_v9, %v2148_v9  ;;  %v21601_v23 = vmul.f32 %v2148_v9, %v21359_v42  ;;  %v17880_v46 = vpop.f32.mrb[51].mxu1  ;;  %v21620_v42 = vmul.f32 %v21370_v33, %v21370_v33  ;;  %v19783_v53 = vld [vmem:[#allocation4 + $0xa8] sm:$0xff] }
 0x2b0   :  { %18309 = vmatprep.mubr.msk.f32.mxu0 %vm202_vm0, %v19778_v32 }
 0x2b1   :  { %v21610_v49 = vadd.f32 %v21598_v62, %v21605_v15 }
 0x2b2   :  { %v2153_v48 = vpop.f32.mrb[52].mxu1 }
 0x2b3   :  { %18310 = vmatmul.mubr.msk.f32.gmra.mrb[190].mxu0 %vm202_vm0, %v19779_v29  ;;  %v21613_v61 = vmul.f32 %v2153_v48, %v2153_v48  ;;  %v21616_v14 = vmul.f32 %v2153_v48, %v21370_v33  ;;  %v17883_v27 = vpop.f32.mrb[53].mxu1  ;;  %v19784_v48 = vld [vmem:[#allocation4 + $0xb0] sm:$0xff] }
 0x2b4   :  { %18312 = vmatprep.mubr.msk.f32.mxu0 %vm202_vm0, %v19780_v10  ;;  %v21659_v27 = vmul.f32 %v21402_v0, %v21402_v0 }
 0x2b5   :  { %v21625_v44 = vadd.f32 %v21613_v61, %v21620_v42 }
 0x2b6   :  { %v2223_v34 = vpop.f32.mrb[54].mxu1 }
 0x2b7   :  { %18313 = vmatmul.mubr.msk.f32.gmra.mrb[192].mxu0 %vm202_vm0, %v19781_v50  ;;  %v21632_v17 = vmul.f32 %v2223_v34, %v2223_v34  ;;  %v21635_v33 = vmul.f32 %v2223_v34, %v21382_v20  ;;  %v17894_v6 = vpop.f32.mrb[55].mxu1  ;;  %v19785_v34 = vld [vmem:[#allocation4 + $0xb8] sm:$0xff] }
 0x2b8   :  { %18315 = vmatprep.mubr.msk.f32.mxu0 %vm202_vm0, %v19782_v1 }
 0x2b9   :  { %25435 = vst [vmem:[#allocation29_spill] sm:$0xff] %v21632_v17  ;;  %25436 = vst [vmem:[#allocation30_spill] sm:$0xff] %v21635_v33  ;;  %v21640_v55 = vadd.f32 %v21632_v17, %v21629_v11 }
 0x2ba   :  { %v2228_v9 = vpop.f32.mrb[56].mxu1 }
 0x2bb   :  { %25437 = vst [vmem:[#allocation31_spill] sm:$0xff] %v21640_v55  ;;  %18316 = vmatmul.mubr.msk.f32.gmra.mrb[194].mxu0 %vm202_vm0, %v19783_v53  ;;  %v21647_v46 = vmul.f32 %v2228_v9, %v2228_v9  ;;  %v21650_v20 = vmul.f32 %v2228_v9, %v21391_v57  ;;  %v17897_v32 = vpop.f32.mrb[57].mxu1  ;;  %v21673_v9 = vld [vmem:[#allocation10] sm:$0xff] }
 0x2bc   :  { %18318 = vmatprep.mubr.msk.f32.mxu0 %vm202_vm0, %v19784_v48  ;;  %25445 = vst [vmem:[#allocation39_spill] sm:$0xff] %v21673_v9  ;;  %18329 = vmatprep.mubr.msk.f32.mxu1 %vm202_vm0, %v21673_v9 }
 0x2bd   :  { %25439 = vst [vmem:[#allocation33_spill] sm:$0xff] %v21647_v46  ;;  %25440 = vst [vmem:[#allocation34_spill] sm:$0xff] %v21650_v20  ;;  %v21655_v29 = vadd.f32 %v21647_v46, %v21644_v8 }
 0x2be   :  { %v2233_v10 = vpop.f32.mrb[58].mxu1 }
 0x2bf   :  { %25441 = vst [vmem:[#allocation35_spill] sm:$0xff] %v21655_v29  ;;  %18319 = vmatmul.mubr.msk.f32.gmra.mrb[196].mxu0 %vm202_vm0, %v19785_v34  ;;  %v21662_v50 = vmul.f32 %v2233_v10, %v2233_v10  ;;  %v21665_v57 = vmul.f32 %v2233_v10, %v21402_v0  ;;  %v17900_v6 = vpop.f32.mrb[59].mxu1  ;;  %v21684_v10 = vmul.f32 %v21414_v7, %v21414_v7 }
 0x2c0   :  { %18551 = vmatprep.mubr.msk.f32.mxu0 %vm19984_vm1, %v25332_v58 }
 0x2c1   :  { %25442 = vst [vmem:[#allocation36_spill] sm:$0xff] %v21662_v50  ;;  %25443 = vst [vmem:[#allocation37_spill] sm:$0xff] %v21665_v57  ;;  %v21671_v1 = vadd.f32 %v21662_v50, %v21659_v27 }
 0x2c2   :  { %v2303_v53 = vpop.f32.mrb[60].mxu1 }
 0x2c3   :  { %25444 = vst [vmem:[#allocation38_spill] sm:$0xff] %v21671_v1  ;;  %v21677_v32 = vmul.f32 %v2303_v53, %v2303_v53  ;;  %v21680_v48 = vmul.f32 %v2303_v53, %v21414_v7  ;;  %v17911_v0 = vpop.f32.mrb[61].mxu1  ;;  %v21697_v53 = vmul.f32 %v21423_v25, %v21423_v25 }
 0x2c5   :  { %v21688_v34 = vadd.f32 %v21677_v32, %v21684_v10 }
 0x2c6   :  { %v2308_v6 = vpop.f32.mrb[62].mxu1 }
 0x2c7   :  { %v21690_v58 = vmul.f32 %v2308_v6, %v2308_v6  ;;  %v21693_v52 = vmul.f32 %v2308_v6, %v21423_v25  ;;  %v17914_v57 = vpop.f32.mrb[63].mxu1  ;;  %v21710_v6 = vmul.f32 %v21434_v26, %v21434_v26  ;;  %v21718_v25 = vmul.f32 %v21446_v56, %v21446_v56 }
 0x2c9   :  { %v21701_v0 = vadd.f32 %v21690_v58, %v21697_v53 }
 0x2ca   :  { %v2313_v7 = vpop.f32.mrb[64].mxu1 }
 0x2cb   :  { %v21703_v20 = vmul.f32 %v2313_v7, %v2313_v7  ;;  %v21706_v33 = vmul.f32 %v2313_v7, %v21434_v26  ;;  %v17917_v38 = vpop.f32.mrb[65].mxu1  ;;  %v21731_v26 = vmul.f32 %v21455_v54, %v21455_v54 }
 0x2cd   :  { %v21714_v57 = vadd.f32 %v21703_v20, %v21710_v6 }
 0x2ce   :  { %v2383_v30 = vpop.f32.mrb[66].mxu1 }
 0x2cf   :  { %v21720_v12 = vmul.f32 %v2383_v30, %v2383_v30  ;;  %v21723_v1 = vmul.f32 %v2383_v30, %v21446_v56  ;;  %v17928_v7 = vpop.f32.mrb[67].mxu1  ;;  %v21744_v30 = vmul.f32 %v21466_v4, %v21466_v4 }
 0x2d1   :  { %25446 = vst [vmem:[#allocation40_spill] sm:$0xff] %v21720_v12  ;;  %25447 = vst [vmem:[#allocation41_spill] sm:$0xff] %v21723_v1  ;;  %v21727_v38 = vadd.f32 %v21720_v12, %v21718_v25 }
 0x2d2   :  { %v2388_v50 = vpop.f32.mrb[68].mxu1 }
 0x2d3   :  { %25448 = vst [vmem:[#allocation42_spill] sm:$0xff] %v21727_v38  ;;  %v21733_v29 = vmul.f32 %v2388_v50, %v2388_v50  ;;  %v21736_v9 = vmul.f32 %v2388_v50, %v21455_v54  ;;  %v17931_v46 = vpop.f32.mrb[69].mxu1 }
 0x2d5   :  { %25449 = vst [vmem:[#allocation43_spill] sm:$0xff] %v21733_v29  ;;  %25450 = vst [vmem:[#allocation44_spill] sm:$0xff] %v21736_v9  ;;  %v21740_v56 = vadd.f32 %v21733_v29, %v21731_v26 }
 0x2d6   :  { %v2393_v7 = vpop.f32.mrb[70].mxu1 }
 0x2d7   :  { %25451 = vst [vmem:[#allocation45_spill] sm:$0xff] %v21740_v56  ;;  %v21746_v1 = vmul.f32 %v2393_v7, %v2393_v7  ;;  %v21749_v38 = vmul.f32 %v2393_v7, %v21466_v4  ;;  %v17934_v12 = vpop.f32.mrb[71].mxu1 }
 0x2d9   :  { %25452 = vst [vmem:[#allocation46_spill] sm:$0xff] %v21746_v1  ;;  %25453 = vst [vmem:[#allocation47_spill] sm:$0xff] %v21749_v38  ;;  %v21753_v54 = vadd.f32 %v21746_v1, %v21744_v30 }
 0x2da   :  { %v21755_v46 = vpop.f32.mrb[72].mxu1 }
 0x2db   :  { %25454 = vst [vmem:[#allocation48_spill] sm:$0xff] %v21753_v54  ;;  %v17945_v9 = vpop.f32.mrb[73].mxu1 }
 0x2de   :  { %v21759_v56 = vpop.f32.mrb[74].mxu1 }
 0x2df   :  { %v17948_v7 = vpop.f32.mrb[75].mxu1 }
 0x2e2   :  { %v21763_v12 = vpop.f32.mrb[76].mxu1 }
 0x2e3   :  { %v17951_v54 = vpop.f32.mrb[77].mxu1 }
 0x2e6   :  { %v21767_v1 = vpop.f32.mrb[78].mxu1 }
 0x2e7   :  { %v17962_v50 = vpop.f32.mrb[79].mxu1 }
 0x2ea   :  { %v21771_v29 = vpop.f32.mrb[80].mxu1 }
 0x2eb   :  { %25455 = vst [vmem:[#allocation49_spill] sm:$0xff] %v21771_v29  ;;  %v17965_v4 = vpop.f32.mrb[81].mxu1  ;;  %v21782_v29 = vstv %s323_s17 }
 0x2ec   :  { %v3103_v55 = vpop.f32.mrb[120].mxu0 }
 0x2ed   :  { %v18081_v17 = vpop.f32.mrb[121].mxu0  ;;  %v3915_v54 = vsub.f32 %v3103_v55, %v21583_v31 }
 0x2ee   :  { %v21776_v38 = vpop.f32.mrb[82].mxu1  ;;  %v21784_v17 = vstv %s321_s15  ;;  %s19992_s15 = smov 121  }
 0x2ef   :  { %25456 = vst [vmem:[#allocation50_spill] sm:$0xff] %v21776_v38  ;;  %v17968_v9 = vpop.f32.mrb[83].mxu1  ;;  %v4133_v18 = vadd.f32 %v21595_v39, %v21784_v17 }
 0x2f0   :  { %v3108_v50 = vpop.f32.mrb[122].mxu0 }
 0x2f1   :  { %v18084_v63 = vpop.f32.mrb[123].mxu0  ;;  %v3916_v28 = vsub.f32 %v3108_v50, %v21598_v62 }
 0x2f2   :  { %v2623_v7 = vpop.f32.mrb[84].mxu1 }
 0x2f3   :  { %v3897_v4 = vsub.f32 %v2623_v7, %v21590_v43  ;;  %v17979_v3 = vpop.f32.mrb[85].mxu1  ;;  %v4134_v43 = vadd.f32 %v21610_v49, %v21784_v17 }
 0x2f5   :  { %v3113_v31 = vpop.f32.mrb[124].mxu0  ;;  %v3988_v55 = vadd.f32 %v3915_v54, %v3897_v4 }
 0x2f6   :  { %v18087_v9 = vpop.f32.mrb[125].mxu0  ;;  %v3917_v59 = vsub.f32 %v3113_v31, %v21613_v61  ;;  %v2628_v38 = vpop.f32.mrb[86].mxu1 }
 0x2f7   :  { %v3898_v63 = vsub.f32 %v2628_v38, %v21605_v15  ;;  %v17982_v62 = vpop.f32.mrb[87].mxu1  ;;  %v21791_v50 = vadd.f32 %v3988_v55, %v21782_v29 }
 0x2f9   :  { %v3989_v3 = vadd.f32 %v3916_v28, %v3898_v63  ;;  %v21796_v7 = vmul.f32 %v4133_v18, %v21791_v50  ;;  %v4135_v28 = vadd.f32 %v21625_v44, %v21784_v17  ;;  %19567 = vrcp.f32 %v21791_v50 }
 0x2fa   :  { %v2633_v54 = vpop.f32.mrb[88].mxu1 }
 0x2fb   :  { %v3263_v4 = vpop.f32.mrb[126].mxu0  ;;  %v3899_v39 = vsub.f32 %v2633_v54, %v21620_v42  ;;  %v17985_v9 = vpop.f32.mrb[89].mxu1  ;;  %v21800_v61 = vadd.f32 %v3989_v3, %v21782_v29  ;;  %19569 = vrcp.f32 %v21796_v7 }
 0x2fc   :  { %v18115_v15 = vpop.f32.mrb[127].mxu0  ;;  %v3921_v38 = vsub.f32 %v3263_v4, %v21677_v32 }
 0x2fd   :  { %v3990_v31 = vadd.f32 %v3917_v59, %v3899_v39  ;;  %v21806_v49 = vmul.f32 %v4134_v43, %v21800_v61  ;;  %19571 = vrcp.f32 %v21800_v61 }
 0x2fe   :  { %v21808_v18 = vpop.f32.mrb[90].mxu1 }
 0x2ff   :  { %v17996_v42 = vpop.f32.mrb[91].mxu1  ;;  %v21813_v63 = vadd.f32 %v3990_v31, %v21782_v29  ;;  %19573 = vrcp.f32 %v21806_v49 }
 0x300   :  { %v3268_v62 = vpop.f32.mrb[128].mxu0 }
 0x301   :  { %v18118_v3 = vpop.f32.mrb[129].mxu0  ;;  %v3922_v32 = vsub.f32 %v3268_v62, %v21690_v58  ;;  %v21817_v59 = vmul.f32 %v4135_v28, %v21813_v63  ;;  %19575 = vrcp.f32 %v21813_v63 }
 0x302   :  { %v21819_v44 = vpop.f32.mrb[92].mxu1 }
 0x303   :  { %v17999_v54 = vpop.f32.mrb[93].mxu1  ;;  %v19568_v61 = vpop.eup %19567  ;;  %19577 = vrcp.f32 %v21817_v59 }
 0x304   :  { %v4054_v54 = vmul.f32 2.0, %v21484_v35 }
 0x305   :  { %v3273_v4 = vpop.f32.mrb[130].mxu0 }
 0x306   :  { %v18121_v39 = vpop.f32.mrb[131].mxu0  ;;  %v3923_v9 = vsub.f32 %v3273_v4, %v21703_v20  ;;  %v21824_v15 = vpop.f32.mrb[94].mxu1  ;;  %v4139_v20 = vadd.f32 %v21688_v34, %v21784_v17 }
 0x307   :  { %v18002_v42 = vpop.f32.mrb[95].mxu1 }
 0x30a   :  { %v2783_v58 = vpop.f32.mrb[96].mxu1 }
 0x30b   :  { %v3903_v28 = vsub.f32 %v2783_v58, %v21684_v10  ;;  %v18013_v62 = vpop.f32.mrb[97].mxu1  ;;  %v4055_v58 = vmul.f32 2.0, %v21503_v16 }
 0x30c   :  { %v3423_v3 = vpop.f32.mrb[132].mxu0 }
 0x30d   :  { %v18149_v55 = vpop.f32.mrb[133].mxu0  ;;  %v3927_v11 = vsub.f32 %v3423_v3, %v21484_v35  ;;  %v3994_v43 = vadd.f32 %v3921_v38, %v3903_v28  ;;  %v4073_v38 = vadd.f32 %v21784_v17, %v4054_v54  ;;  %v4074_v54 = vadd.f32 %v21784_v17, %v4055_v58 }
 0x30e   :  { %v2788_v39 = vpop.f32.mrb[98].mxu1 }
 0x30f   :  { %v3945_v4 = vmul.f32 2.0, %v3927_v11  ;;  %v3904_v8 = vsub.f32 %v2788_v39, %v21697_v53  ;;  %v18016_v31 = vpop.f32.mrb[99].mxu1  ;;  %v21835_v42 = vadd.f32 %v3994_v43, %v21782_v29  ;;  %v4140_v11 = vadd.f32 %v21701_v0, %v21784_v17 }
 0x310   :  { %v3428_v10 = vpop.f32.mrb[134].mxu0 }
 0x311   :  { %v18152_v55 = vpop.f32.mrb[135].mxu0  ;;  %v3928_v62 = vsub.f32 %v3428_v10, %v21503_v16  ;;  %v3995_v3 = vadd.f32 %v3922_v32, %v3904_v8  ;;  %v21840_v35 = vadd.f32 %v21782_v29, %v3945_v4  ;;  %v21846_v53 = vmul.f32 %v4139_v20, %v21835_v42 }
 0x312   :  { %v2793_v34 = vpop.f32.mrb[100].mxu1  ;;  %v4056_v32 = vmul.f32 2.0, %v21522_v22  ;;  %19579 = vrcp.f32 %v21835_v42 }
 0x313   :  { %v3946_v43 = vmul.f32 2.0, %v3928_v62  ;;  %v3905_v31 = vsub.f32 %v2793_v34, %v21710_v6  ;;  %v18019_v28 = vpop.f32.mrb[101].mxu1  ;;  %v21850_v39 = vadd.f32 %v3995_v3, %v21782_v29  ;;  %v21853_v16 = vmul.f32 %v4073_v38, %v21840_v35 }
 0x314   :  { %v3433_v8 = vpop.f32.mrb[136].mxu0  ;;  %v4141_v6 = vadd.f32 %v21714_v57, %v21784_v17  ;;  %19581 = vrcp.f32 %v21846_v53 }
 0x315   :  { %v18155_v4 = vpop.f32.mrb[137].mxu0  ;;  %v3929_v0 = vsub.f32 %v3433_v8, %v21522_v22  ;;  %v3996_v20 = vadd.f32 %v3923_v9, %v3905_v31  ;;  %v21859_v10 = vadd.f32 %v21782_v29, %v3946_v43  ;;  %v21866_v62 = vmul.f32 %v4140_v11, %v21850_v39 }
 0x316   :  { %v21863_v55 = vpop.f32.mrb[102].mxu1  ;;  %v4075_v9 = vadd.f32 %v21784_v17, %v4056_v32  ;;  %v4060_v32 = vmul.f32 2.0, %v21586_v19 }
 0x317   :  { %v3947_v3 = vmul.f32 2.0, %v3929_v0  ;;  %v18030_v58 = vpop.f32.mrb[103].mxu1  ;;  %v21871_v34 = vadd.f32 %v3996_v20, %v21782_v29  ;;  %v21874_v22 = vmul.f32 %v4074_v54, %v21859_v10 }
 0x318   :  { %v4061_v58 = vmul.f32 2.0, %v21601_v23 }
 0x319   :  { %v21878_v57 = vadd.f32 %v21782_v29, %v3947_v3  ;;  %v21882_v11 = vmul.f32 %v4141_v6, %v21871_v34 }
 0x31a   :  { %v21884_v43 = vpop.f32.mrb[104].mxu1 }
 0x31b   :  { %v18033_v28 = vpop.f32.mrb[105].mxu1  ;;  %v21890_v8 = vmul.f32 %v4075_v9, %v21878_v57 }
 0x31c   :  { %v3583_v50 = vpop.f32.mrb[138].mxu0 }
 0x31d   :  { %v18183_v54 = vpop.f32.mrb[139].mxu0  ;;  %v3933_v4 = vsub.f32 %v3583_v50, %v21586_v19  ;;  %v4079_v19 = vadd.f32 %v21784_v17, %v4060_v32 }
 0x31e   :  { %v21895_v0 = vpop.f32.mrb[106].mxu1 }
 0x31f   :  { %v3951_v20 = vmul.f32 2.0, %v3933_v4  ;;  %v18036_v6 = vpop.f32.mrb[107].mxu1 }
 0x320   :  { %v3588_v3 = vpop.f32.mrb[140].mxu0 }
 0x321   :  { %v18186_v9 = vpop.f32.mrb[141].mxu0  ;;  %v3934_v28 = vsub.f32 %v3588_v3, %v21601_v23  ;;  %v3970_v50 = vadd.f32 %v21782_v29, %v3951_v20  ;;  %v4062_v23 = vmul.f32 2.0, %v21616_v14  ;;  %v4080_v20 = vadd.f32 %v21784_v17, %v4061_v58 }
 0x322   :  { %v2943_v54 = vpop.f32.mrb[108].mxu1  ;;  %v19570_v9 = vpop.eup %19569  ;;  %v25457_v3 = vsub.f32 %v21755_v46, %v21475_v41 }
 0x323   :  { %v3952_v4 = vmul.f32 2.0, %v3934_v28  ;;  %v3909_v6 = vsub.f32 %v2943_v54, %v21486_v36  ;;  %v18047_v49 = vpop.f32.mrb[109].mxu1  ;;  %v4097_v7 = vmul.f32 %v4079_v19, %v3970_v50  ;;  %v21907_v31 = vmul.f32 %v19568_v61, %v3970_v50  ;;  %v19572_v19 = vpop.eup %19571 }
 0x324   :  { %v3593_v38 = vpop.f32.mrb[142].mxu0  ;;  %v4127_v50 = vadd.f32 %v21497_v2, %v21784_v17  ;;  %v19574_v46 = vpop.eup %19573 }
 0x325   :  { %v18189_v32 = vpop.f32.mrb[143].mxu0  ;;  %v3935_v63 = vsub.f32 %v3593_v38, %v21616_v14  ;;  %v3982_v59 = vadd.f32 %v3909_v6, %v25457_v3  ;;  %v3971_v28 = vadd.f32 %v21782_v29, %v3952_v4  ;;  %v21916_v36 = vmul.f32 %v19570_v9, %v4097_v7 }
 0x326   :  { %v4081_v14 = vadd.f32 %v21784_v17, %v4062_v23  ;;  %v4066_v9 = vmul.f32 2.0, %v21680_v48  ;;  %v19576_v23 = vpop.eup %19575  ;;  %v25458_v32 = vsub.f32 %v21759_v56, %v21493_v5  ;;  %v4067_v56 = vmul.f32 2.0, %v21693_v52 }
 0x327   :  { %v3953_v61 = vmul.f32 2.0, %v3935_v63  ;;  %v4000_v54 = vadd.f32 %v3982_v59, %v21782_v29  ;;  %v4098_v58 = vmul.f32 %v4080_v20, %v3971_v28  ;;  %v21924_v41 = vmul.f32 %v19572_v19, %v3971_v28 }
 0x328   :  { %v2948_v38 = vpop.f32.mrb[110].mxu1  ;;  %v4128_v59 = vadd.f32 %v21516_v60, %v21784_v17 }
 0x329   :  { %v3972_v7 = vadd.f32 %v21782_v29, %v3953_v61  ;;  %v3910_v4 = vsub.f32 %v2948_v38, %v21505_v51  ;;  %19583 = vrcp.f32 %v4000_v54  ;;  %v4145_v2 = vmul.f32 %v4127_v50, %v4000_v54  ;;  %v18050_v6 = vpop.f32.mrb[111].mxu1  ;;  %v19578_v51 = vpop.eup %19577 }
 0x32a   :  { %v3743_v49 = vpop.f32.mrb[144].mxu0  ;;  %19585 = vrcp.f32 %v21850_v39  ;;  %v21930_v42 = vmul.f32 %v19574_v46, %v4098_v58  ;;  %v4085_v58 = vadd.f32 %v21784_v17, %v4066_v9 }
 0x32b   :  { %v18217_v20 = vpop.f32.mrb[145].mxu0  ;;  %v3939_v53 = vsub.f32 %v3743_v49, %v21680_v48  ;;  %v3983_v63 = vadd.f32 %v3910_v4, %v25458_v32  ;;  %v4099_v3 = vmul.f32 %v4081_v14, %v3972_v7  ;;  %19587 = vrcp.f32 %v4145_v2  ;;  %v19580_v2 = vpop.eup %19579 }
 0x32c   :  { %19589 = vrcp.f32 %v21866_v62  ;;  %v2953_v28 = vpop.f32.mrb[112].mxu1  ;;  %v21939_v39 = vmul.f32 %v19576_v23, %v3972_v7  ;;  %v4129_v7 = vadd.f32 %v21535_v24, %v21784_v17  ;;  %v19582_v9 = vpop.eup %19581  ;;  %v4068_v20 = vmul.f32 2.0, %v21706_v33 }
 0x32d   :  { %v3957_v50 = vmul.f32 2.0, %v3939_v53  ;;  %v4001_v19 = vadd.f32 %v3983_v63, %v21782_v29  ;;  %v3911_v48 = vsub.f32 %v2953_v28, %v21524_v47  ;;  %v18053_v61 = vpop.f32.mrb[113].mxu1  ;;  %v21943_v54 = vmul.f32 %v19578_v51, %v4099_v3 }
 0x32e   :  { %v3748_v5 = vpop.f32.mrb[146].mxu0  ;;  %19591 = vrcp.f32 %v21871_v34  ;;  %v25459_v47 = vsub.f32 %v21763_v12, %v21512_v21 }
 0x32f   :  { %v18220_v60 = vpop.f32.mrb[147].mxu0  ;;  %v3940_v62 = vsub.f32 %v3748_v5, %v21693_v52  ;;  %v3976_v14 = vadd.f32 %v21782_v29, %v3957_v50  ;;  %19593 = vrcp.f32 %v4001_v19  ;;  %v4146_v38 = vmul.f32 %v4128_v59, %v4001_v19 }
 0x330   :  { %19595 = vrcp.f32 %v21882_v11  ;;  %v3984_v46 = vadd.f32 %v3911_v48, %v25459_v47  ;;  %v3023_v4 = vpop.f32.mrb[114].mxu1  ;;  %v4086_v11 = vadd.f32 %v21784_v17, %v4067_v56  ;;  %v4130_v50 = vadd.f32 %v21554_v40, %v21784_v17 }
 0x331   :  { %v3958_v6 = vmul.f32 2.0, %v3940_v62  ;;  %19597 = vrcp.f32 %v4146_v38  ;;  %v4103_v34 = vmul.f32 %v4085_v58, %v3976_v14  ;;  %v3912_v52 = vsub.f32 %v3023_v4, %v21540_v37  ;;  %v18064_v49 = vpop.f32.mrb[115].mxu1 }
 0x332   :  { %v3753_v23 = vpop.f32.mrb[148].mxu0  ;;  %v4002_v21 = vadd.f32 %v3984_v46, %v21782_v29  ;;  %v21960_v12 = vmul.f32 %v19580_v2, %v3976_v14  ;;  %v25460_v37 = vsub.f32 %v21767_v1, %v21531_v45  ;;  %v25461_v46 = vld [vmem:[#allocation49_spill] sm:$0xff]  ;;  %v25464_v49 = vld [vmem:[#allocation23_spill] sm:$0xff] }
 0x333   :  { %v19584_v53 = vpop.eup %19583  ;;  %v18223_v24 = vpop.f32.mrb[149].mxu0  ;;  %v3941_v32 = vsub.f32 %v3753_v23, %v21706_v33  ;;  %v3977_v63 = vadd.f32 %v21782_v29, %v3958_v6  ;;  %v21967_v51 = vmul.f32 %v19582_v9, %v4103_v34  ;;  %v4131_v9 = vadd.f32 %v25464_v49, %v21784_v17  ;;  %v25471_v49 = vld [vmem:[#allocation28_spill] sm:$0xff] }
 0x334   :  { %v3985_v3 = vadd.f32 %v3912_v52, %v25460_v37  ;;  %v19586_v59 = vpop.eup %19585  ;;  %19599 = vrcp.f32 %v4002_v21  ;;  %v4147_v28 = vmul.f32 %v4129_v7, %v4002_v21  ;;  %v3028_v19 = vpop.f32.mrb[116].mxu1  ;;  %v4019_v48 = vmul.f32 %v19584_v53, %v21840_v35  ;;  %v25462_v7 = vld [vmem:[#allocation21_spill] sm:$0xff] }
 0x335   :  { %v19588_v61 = vpop.eup %19587  ;;  %v3959_v5 = vmul.f32 2.0, %v3941_v32  ;;  %v4104_v33 = vmul.f32 %v4086_v11, %v3977_v63  ;;  %v3913_v45 = vsub.f32 %v3028_v19, %v21557_v13  ;;  %v18067_v1 = vpop.f32.mrb[117].mxu1  ;;  %v21977_v14 = vmul.f32 %v19586_v59, %v3977_v63  ;;  %v25467_v19 = vld [vmem:[#allocation24_spill] sm:$0xff] }
 0x336   :  { %v21973_v56 = vadd.f32 %v3985_v3, %v21782_v29  ;;  %v19590_v58 = vpop.eup %19589  ;;  %v18251_v60 = vpop.f32.mrb[150].mxu0  ;;  %19601 = vrcp.f32 %v4147_v28  ;;  %v4164_v62 = vmul.f32 %v19588_v61, %v21853_v16  ;;  %v4087_v35 = vadd.f32 %v21784_v17, %v4068_v20  ;;  %v25465_v20 = vld [vmem:[#allocation25_spill] sm:$0xff] }
 0x337   :  { %v4367_v40 = vpop.f32.mrb[151].mxu0  ;;  %v3978_v38 = vadd.f32 %v21782_v29, %v3959_v5  ;;  %v25463_v4 = vsub.f32 %v25461_v46, %v25462_v7  ;;  %v21987_v52 = vmul.f32 %v19590_v58, %v4104_v33  ;;  %v25470_v46 = vld [vmem:[#allocation29_spill] sm:$0xff] }
 0x338   :  { %v21982_v47 = vmul.f32 %v4130_v50, %v21973_v56  ;;  %v19592_v2 = vpop.eup %19591  ;;  %v19277_v6 = vpack.c.bf16 %v18251_v60, %v4367_v40  ;;  %v3033_v34 = vpop.f32.mrb[118].mxu1  ;;  %v25466_v50 = vld [vmem:[#allocation50_spill] sm:$0xff]  ;;  %v25469_v40 = vld [vmem:[#allocation27_spill] sm:$0xff]  ;;  %19603 = vrcp.f32 %v21973_v56  ;;  %v25489_v56 = vsub.f32 %v21895_v0, %v21744_v30 }
 0x339   :  { %v3986_v13 = vadd.f32 %v3913_v45, %v25463_v4  ;;  %v19594_v16 = vpop.eup %19593  ;;  %v4105_v23 = vmul.f32 %v4087_v35, %v3978_v38  ;;  %v3914_v21 = vsub.f32 %v3033_v34, %v25465_v20  ;;  %v18070_v53 = vpop.f32.mrb[119].mxu1  ;;  %v21996_v37 = vmul.f32 %v19592_v2, %v3978_v38 }
 0x33a   :  { %v19596_v24 = vpop.eup %19595  ;;  %v18254_v32 = vpop.f32.mrb[152].mxu0  ;;  %19278 = vmatprep.subr.bf16.mxu1 %v19277_v6  ;;  %v4021_v63 = vmul.f32 %v19594_v16, %v21859_v10  ;;  %v25468_v61 = vsub.f32 %v25466_v50, %v25467_v19  ;;  %v4246_v10 = vsel %vm4199_vm2, %v4019_v48, 0.0  ;;  %v4132_v38 = vadd.f32 %v25469_v40, %v21784_v17  ;;  %v22016_v48 = vld [vmem:[#allocation10 + $0x8] sm:$0xff]  ;;  %v25474_v19 = vld [vmem:[#allocation33_spill] sm:$0xff] }
 0x33b   :  { %v21992_v11 = vadd.f32 %v3986_v13, %v21782_v29  ;;  %v19598_v3 = vpop.eup %19597  ;;  %v4377_v59 = vpop.f32.mrb[153].mxu0  ;;  %19280 = vmatpush3.bf16.msra.mxu1 %v19277_v6  ;;  %v22004_v33 = vmul.f32 %v19596_v24, %v4105_v23  ;;  %19605 = vrcp.f32 %v21982_v47 }
 0x33c   :  { %v3987_v5 = vadd.f32 %v3914_v21, %v25468_v61  ;;  %v19281_v45 = vpack.c.bf16 %v18254_v32, %v4377_v59  ;;  %v3183_v1 = vpop.f32.mrb[120].mxu1  ;;  %v4166_v58 = vmul.f32 %v19598_v3, %v21874_v22  ;;  %v4247_v60 = vsel %vm4199_vm2, %v4021_v63, 0.0  ;;  %v25473_v3 = vld [vmem:[#allocation31_spill] sm:$0xff] }
 0x33d   :  { %v21999_v28 = vmul.f32 %v4131_v9, %v21992_v11  ;;  %v3918_v7 = vsub.f32 %v3183_v1, %v25470_v46  ;;  %v18098_v4 = vpop.f32.mrb[121].mxu1  ;;  %v4248_v13 = vadd.f32 %v4247_v60, %v4246_v10  ;;  %v25472_v9 = vsub.f32 %v21808_v18, %v25471_v49  ;;  %v25475_v1 = vld [vmem:[#allocation39_spill] sm:$0xff]  ;;  %v25476_v10 = vld [vmem:[#allocation32_spill] sm:$0xff] }
 0x33e   :  { %v22012_v35 = vadd.f32 %v3987_v5, %v21782_v29  ;;  %v19600_v2 = vpop.eup %19599  ;;  %v18257_v6 = vpop.f32.mrb[154].mxu0  ;;  %19282 = vmatprep.subr.bf16.mxu1 %v19281_v45  ;;  %v4201_v34 = vsel %vm4199_vm2, %v4166_v58, 0.0  ;;  %v4200_v21 = vsel %vm4199_vm2, %v4164_v62, 0.0  ;;  %v4136_v59 = vadd.f32 %v25473_v3, %v21784_v17 }
 0x33f   :  { %v4387_v22 = vpop.f32.mrb[155].mxu0  ;;  %19284 = vmatpush3.bf16.msra.mxu1 %v19281_v45  ;;  %v3991_v23 = vadd.f32 %v3918_v7, %v25472_v9  ;;  %v4023_v20 = vmul.f32 %v19600_v2, %v21878_v57  ;;  %v4202_v63 = vadd.f32 %v4201_v34, %v4200_v21  ;;  %v25477_v60 = vsub.f32 %v21819_v44, %v25476_v10  ;;  %v25478_v2 = vld [vmem:[#allocation35_spill] sm:$0xff]  ;;  %v25484_v10 = vld [vmem:[#allocation42_spill] sm:$0xff] }
 0x340   :  { %v22019_v16 = vmul.f32 %v4132_v38, %v22012_v35  ;;  %v19602_v53 = vpop.eup %19601  ;;  %v19285_v24 = vpack.c.bf16 %v18257_v6, %v4387_v22  ;;  %v3188_v32 = vpop.f32.mrb[122].mxu1  ;;  %v4137_v6 = vadd.f32 %v25478_v2, %v21784_v17  ;;  %v25479_v22 = vld [vmem:[#allocation36_spill] sm:$0xff]  ;;  %19607 = vrcp.f32 %v21992_v11  ;;  %v25494_v11 = vld [vmem:[#allocation30_spill] sm:$0xff] }
 0x341   :  { %v22029_v50 = vadd.f32 %v3991_v23, %v21782_v29  ;;  %v3919_v61 = vsub.f32 %v3188_v32, %v25474_v19  ;;  %v18101_v5 = vpop.f32.mrb[123].mxu1  ;;  %v4168_v18 = vmul.f32 %v19602_v53, %v21890_v8  ;;  %v4249_v57 = vsel %vm4203_vm3, %v4023_v20, 0.0  ;;  %v25481_v32 = vld [vmem:[#allocation38_spill] sm:$0xff] }
 0x342   :  { %v18260_v45 = vpop.f32.mrb[156].mxu0  ;;  %19286 = vmatprep.subr.bf16.mxu1 %v19285_v24  ;;  %18330 = vmatmul.mubr.msk.f32.vlgmr.msra.gmra.mrb[150].mxu1 %vm202_vm0, %v22016_v48  ;;  %v22047_v4 = vadd.f32 %v4249_v57, %v4248_v13  ;;  %v25480_v13 = vsub.f32 %v21824_v15, %v21659_v27  ;;  %v25483_v15 = vsub.f32 %v21863_v55, %v21718_v25  ;;  %19609 = vrcp.f32 %v21999_v28 }
 0x343   :  { %v4397_v62 = vpop.f32.mrb[157].mxu0  ;;  %19288 = vmatpush3.bf16.msra.mxu1 %v19285_v24  ;;  %18340 = vmatprep.mubr.msk.f32.mxu1 %vm202_vm0, %v25475_v1  ;;  %v22039_v58 = vmul.f32 %v4136_v59, %v22029_v50  ;;  %v3992_v40 = vadd.f32 %v3919_v61, %v25477_v60  ;;  %v4204_v8 = vsel %vm4203_vm3, %v4168_v18, 0.0  ;;  %v25482_v59 = vld [vmem:[#allocation40_spill] sm:$0xff]  ;;  %v4142_v60 = vadd.f32 %v25484_v10, %v21784_v17 }
 0x344   :  { %v19289_v38 = vpack.c.bf16 %v18260_v45, %v4397_v62  ;;  %v3193_v46 = vpop.f32.mrb[124].mxu1  ;;  %v22045_v7 = vadd.f32 %v4204_v8, %v4202_v63  ;;  %v4138_v63 = vadd.f32 %v25481_v32, %v21784_v17  ;;  %v25485_v8 = vld [vmem:[#allocation43_spill] sm:$0xff]  ;;  %v25486_v25 = vsub.f32 %v21884_v43, %v21731_v26 }
 0x345   :  { %v22052_v34 = vadd.f32 %v3992_v40, %v21782_v29  ;;  %v3920_v49 = vsub.f32 %v3193_v46, %v25479_v22  ;;  %v18104_v9 = vpop.f32.mrb[125].mxu1  ;;  %19611 = vrcp.f32 %v22012_v35 }
 0x346   :  { %v18263_v23 = vpop.f32.mrb[158].mxu0  ;;  %19290 = vmatprep.subr.bf16.mxu1 %v19289_v38  ;;  %19613 = vrcp.f32 %v22019_v16 }
 0x347   :  { %v4407_v44 = vpop.f32.mrb[159].mxu0  ;;  %19292 = vmatpush3.bf16.msra.mxu1 %v19289_v38  ;;  %v22056_v20 = vmul.f32 %v4137_v6, %v22052_v34  ;;  %v3993_v21 = vadd.f32 %v3920_v49, %v25480_v13  ;;  %19615 = vrcp.f32 %v22029_v50 }
 0x348   :  { %v19293_v53 = vpack.c.bf16 %v18263_v23, %v4407_v44  ;;  %v3343_v24 = vpop.f32.mrb[126].mxu1  ;;  %v25487_v23 = vld [vmem:[#allocation45_spill] sm:$0xff]  ;;  %19617 = vrcp.f32 %v22039_v58 }
 0x349   :  { %v22064_v3 = vadd.f32 %v3993_v21, %v21782_v29  ;;  %v3924_v19 = vsub.f32 %v3343_v24, %v25482_v59  ;;  %v18132_v61 = vpop.f32.mrb[127].mxu1  ;;  %v4143_v44 = vadd.f32 %v25487_v23, %v21784_v17  ;;  %v25488_v21 = vld [vmem:[#allocation46_spill] sm:$0xff]  ;;  %19619 = vrcp.f32 %v22052_v34 }
 0x34a   :  { %v18266_v5 = vpop.f32.mrb[160].mxu0  ;;  %19294 = vmatprep.subr.bf16.mxu1 %v19293_v53  ;;  %18341 = vmatmul.mubr.msk.f32.vlgmr.msra.gmra.mrb[152].mxu1 %vm202_vm0, %v22016_v48  ;;  %v25490_v61 = vld [vmem:[#allocation20_spill] sm:$0xff]  ;;  %19621 = vrcp.f32 %v22056_v20  ;;  %v4257_v34 = vsel %vm4199_vm2, %v21907_v31, 0.0  ;;  %v4212_v20 = vsel %vm4199_vm2, %v21916_v36, 0.0  ;;  %v4259_v36 = vsel %vm4199_vm2, %v21924_v41, 0.0 }
 0x34b   :  { %v4417_v18 = vpop.f32.mrb[161].mxu0  ;;  %19296 = vmatpush3.bf16.msra.mxu1 %v19293_v53  ;;  %18351 = vmatprep.mubr.msk.f32.mxu1 %vm202_vm0, %v25475_v1  ;;  %v22072_v27 = vmul.f32 %v4138_v63, %v22064_v3  ;;  %v3997_v45 = vadd.f32 %v3924_v19, %v25483_v15  ;;  %v25492_v15 = vld [vmem:[#allocation48_spill] sm:$0xff]  ;;  %19623 = vrcp.f32 %v22064_v3  ;;  %v4214_v3 = vsel %vm4199_vm2, %v21930_v42, 0.0 }
 0x34c   :  { %v19297_v57 = vpack.c.bf16 %v18266_v5, %v4417_v18  ;;  %v3348_v62 = vpop.f32.mrb[128].mxu1  ;;  %v4057_v5 = vmul.f32 2.0, %v25490_v61  ;;  %v25491_v18 = vld [vmem:[#allocation22_spill] sm:$0xff]  ;;  %v4261_v42 = vsel %vm4203_vm3, %v21939_v39, 0.0  ;;  %v22198_v39 = vld [vmem:[#allocation10] sm:$0xff] }
 0x34d   :  { %v22080_v40 = vadd.f32 %v3997_v45, %v21782_v29  ;;  %v3925_v38 = vsub.f32 %v3348_v62, %v25485_v8  ;;  %v18135_v46 = vpop.f32.mrb[129].mxu1  ;;  %v4058_v47 = vmul.f32 2.0, %v25491_v18  ;;  %v4144_v45 = vadd.f32 %v25492_v15, %v21784_v17  ;;  %v25498_v15 = vld [vmem:[#allocation44_spill] sm:$0xff] }
 0x34e   :  { %v18269_v2 = vpop.f32.mrb[162].mxu0  ;;  %19298 = vmatprep.subr.bf16.mxu1 %v19297_v57  ;;  %v4063_v8 = vmul.f32 2.0, %v25494_v11  ;;  %v4076_v28 = vadd.f32 %v21784_v17, %v4057_v5  ;;  %19625 = vrcp.f32 %v22072_v27 }
 0x34f   :  { %v4427_v6 = vpop.f32.mrb[163].mxu0  ;;  %19300 = vmatpush3.bf16.msra.mxu1 %v19297_v57  ;;  %v22084_v22 = vmul.f32 %v4142_v60, %v22080_v40  ;;  %v3998_v55 = vadd.f32 %v3925_v38, %v25486_v25  ;;  %v25493_v60 = vld [vmem:[#allocation26_spill] sm:$0xff]  ;;  %19627 = vrcp.f32 %v22080_v40 }
 0x350   :  { %v19301_v49 = vpack.c.bf16 %v18269_v2, %v4427_v6  ;;  %v3353_v9 = vpop.f32.mrb[130].mxu1  ;;  %v4059_v30 = vmul.f32 2.0, %v25493_v60  ;;  %v25495_v6 = vld [vmem:[#allocation34_spill] sm:$0xff] }
 0x351   :  { %v22093_v13 = vadd.f32 %v3998_v55, %v21782_v29  ;;  %v3926_v53 = vsub.f32 %v3353_v9, %v25488_v21  ;;  %v18138_v24 = vpop.f32.mrb[131].mxu1  ;;  %v4064_v25 = vmul.f32 2.0, %v25495_v6  ;;  %v4077_v9 = vadd.f32 %v21784_v17, %v4058_v47 }
 0x352   :  { %v18272_v32 = vpop.f32.mrb[164].mxu0  ;;  %19302 = vmatprep.subr.bf16.mxu1 %v19301_v49  ;;  %18352 = vmatmul.mubr.msk.f32.vlgmr.msra.gmra.mrb[154].mxu1 %vm202_vm0, %v22016_v48  ;;  %v25496_v24 = vld [vmem:[#allocation37_spill] sm:$0xff]  ;;  %v4078_v35 = vadd.f32 %v21784_v17, %v4059_v30  ;;  %19629 = vrcp.f32 %v22084_v22 }
 0x353   :  { %v4437_v26 = vpop.f32.mrb[165].mxu0  ;;  %19304 = vmatpush3.bf16.msra.mxu1 %v19301_v49  ;;  %18362 = vmatprep.mubr.msk.f32.mxu1 %vm202_vm0, %v25475_v1  ;;  %v22102_v43 = vmul.f32 %v4143_v44, %v22093_v13  ;;  %v3999_v63 = vadd.f32 %v3926_v53, %v25489_v56  ;;  %v19604_v53 = vpop.eup %19603  ;;  %19631 = vrcp.f32 %v22093_v13 }
 0x354   :  { %v19305_v59 = vpack.c.bf16 %v18272_v32, %v4437_v26  ;;  %v3503_v19 = vpop.f32.mrb[132].mxu1  ;;  %v4065_v32 = vmul.f32 2.0, %v25496_v24  ;;  %v25497_v26 = vld [vmem:[#allocation41_spill] sm:$0xff]  ;;  %v19606_v47 = vpop.eup %19605 }
 0x355   :  { %v22113_v57 = vadd.f32 %v3999_v63, %v21782_v29  ;;  %v3930_v62 = vsub.f32 %v3503_v19, %v25490_v61  ;;  %v18166_v10 = vpop.f32.mrb[133].mxu1  ;;  %v4069_v56 = vmul.f32 2.0, %v25497_v26  ;;  %v22137_v19 = vadd.f32 %v21784_v17, %v4063_v8 }
 0x356   :  { %v18275_v0 = vpop.f32.mrb[166].mxu0  ;;  %19306 = vmatprep.subr.bf16.mxu1 %v19305_v59  ;;  %v22141_v10 = vadd.f32 %v21784_v17, %v4064_v25  ;;  %19633 = vrcp.f32 %v22102_v43 }
 0x357   :  { %v4447_v38 = vpop.f32.mrb[167].mxu0  ;;  %19308 = vmatpush3.bf16.msra.mxu1 %v19305_v59  ;;  %v22120_v46 = vmul.f32 %v4144_v45, %v22113_v57  ;;  %v3948_v2 = vmul.f32 2.0, %v3930_v62  ;;  %v4070_v45 = vmul.f32 2.0, %v25498_v15  ;;  %v22151_v25 = vadd.f32 %v21784_v17, %v4069_v56 }
 0x358   :  { %v19309_v55 = vpack.c.bf16 %v18275_v0, %v4447_v38  ;;  %v3508_v49 = vpop.f32.mrb[134].mxu1  ;;  %19635 = vrcp.f32 %v22113_v57 }
 0x359   :  { %v3967_v23 = vadd.f32 %v21782_v29, %v3948_v2  ;;  %v3931_v44 = vsub.f32 %v3508_v49, %v25491_v18  ;;  %v18169_v21 = vpop.f32.mrb[135].mxu1  ;;  %19637 = vrcp.f32 %v22120_v46 }
 0x35a   :  { %v18278_v63 = vpop.f32.mrb[168].mxu0  ;;  %19310 = vmatprep.subr.bf16.mxu1 %v19309_v55  ;;  %18363 = vmatmul.mubr.msk.f32.vlgmr.msra.gmra.mrb[156].mxu1 %vm202_vm0, %v22016_v48 }
 0x35b   :  { %v4457_v59 = vpop.f32.mrb[169].mxu0  ;;  %19312 = vmatpush3.bf16.msra.mxu1 %v19309_v55  ;;  %18373 = vmatprep.mubr.msk.f32.mxu1 %vm202_vm0, %v25475_v1  ;;  %v4025_v61 = vmul.f32 %v19604_v53, %v3967_v23  ;;  %v4094_v5 = vmul.f32 %v4076_v28, %v3967_v23  ;;  %v3949_v18 = vmul.f32 2.0, %v3931_v44  ;;  %v19608_v55 = vpop.eup %19607  ;;  %v22148_v23 = vadd.f32 %v21784_v17, %v4065_v32 }
 0x35c   :  { %v19313_v62 = vpack.c.bf16 %v18278_v63, %v4457_v59  ;;  %v3513_v16 = vpop.f32.mrb[136].mxu1  ;;  %v19610_v63 = vpop.eup %19609 }
 0x35d   :  { %v4170_v30 = vmul.f32 %v19606_v47, %v4094_v5  ;;  %v4251_v0 = vsel %vm4199_vm2, %v4025_v61, 0.0  ;;  %v3968_v38 = vadd.f32 %v21782_v29, %v3949_v18  ;;  %v3932_v8 = vsub.f32 %v3513_v16, %v25493_v60  ;;  %v18172_v2 = vpop.f32.mrb[137].mxu1 }
 0x35e   :  { %v18281_v49 = vpop.f32.mrb[170].mxu0  ;;  %19314 = vmatprep.subr.bf16.mxu1 %v19313_v62  ;;  %v4252_v50 = vadd.f32 %v4251_v0, %v22047_v4  ;;  %v22157_v61 = vadd.f32 %v21784_v17, %v4070_v45 }
 0x35f   :  { %v4467_v28 = vpop.f32.mrb[171].mxu0  ;;  %19316 = vmatpush3.bf16.msra.mxu1 %v19313_v62  ;;  %v4206_v44 = vsel %vm4199_vm2, %v4170_v30, 0.0  ;;  %v4027_v21 = vmul.f32 %v19608_v55, %v3968_v38  ;;  %v4095_v60 = vmul.f32 %v4077_v9, %v3968_v38  ;;  %v3950_v53 = vmul.f32 2.0, %v3932_v8  ;;  %v19612_v9 = vpop.eup %19611  ;;  %v25499_v62 = vld [vmem:[#allocation47_spill] sm:$0xff] }
 0x360   :  { %v19317_v59 = vpack.c.bf16 %v18281_v49, %v4467_v28  ;;  %v4207_v32 = vadd.f32 %v4206_v44, %v22045_v7  ;;  %v3663_v56 = vpop.f32.mrb[138].mxu1  ;;  %v22165_v16 = vmul.f32 2.0, %v25499_v62  ;;  %v19614_v2 = vpop.eup %19613 }
 0x361   :  { %v4172_v58 = vmul.f32 %v19610_v63, %v4095_v60  ;;  %v4253_v4 = vsel %vm4199_vm2, %v4027_v21, 0.0  ;;  %v3969_v5 = vadd.f32 %v21782_v29, %v3950_v53  ;;  %v3936_v18 = vsub.f32 %v3663_v56, %v25494_v11  ;;  %v18200_v47 = vpop.f32.mrb[139].mxu1  ;;  %v19616_v60 = vpop.eup %19615 }
 0x362   :  { %v18284_v30 = vpop.f32.mrb[172].mxu0  ;;  %19318 = vmatprep.subr.bf16.mxu1 %v19317_v59  ;;  %18374 = vmatmul.mubr.msk.f32.vlgmr.msra.gmra.mrb[158].mxu1 %vm202_vm0, %v22016_v48  ;;  %v4254_v7 = vadd.f32 %v4253_v4, %v4252_v50 }
 0x363   :  { %v4477_v45 = vpop.f32.mrb[173].mxu0  ;;  %19320 = vmatpush3.bf16.msra.mxu1 %v19317_v59  ;;  %18384 = vmatprep.mubr.msk.f32.mxu1 %vm202_vm0, %v25475_v1  ;;  %v4208_v11 = vsel %vm4199_vm2, %v4172_v58, 0.0  ;;  %v4029_v0 = vmul.f32 %v19612_v9, %v3969_v5  ;;  %v4096_v38 = vmul.f32 %v4078_v35, %v3969_v5  ;;  %v3954_v8 = vmul.f32 2.0, %v3936_v18  ;;  %v19618_v58 = vpop.eup %19617 }
 0x364   :  { %v19321_v55 = vpack.c.bf16 %v18284_v30, %v4477_v45  ;;  %v4209_v49 = vadd.f32 %v4208_v11, %v4207_v32  ;;  %v3668_v50 = vpop.f32.mrb[140].mxu1 }
 0x365   :  { %v4174_v31 = vmul.f32 %v19614_v2, %v4096_v38  ;;  %v4255_v28 = vsel %vm4203_vm3, %v4029_v0, 0.0  ;;  %v3973_v44 = vadd.f32 %v21782_v29, %v3954_v8  ;;  %v3937_v1 = vsub.f32 %v3668_v50, %v25495_v6  ;;  %v18203_v21 = vpop.f32.mrb[141].mxu1 }
 0x366   :  { %v18287_v35 = vpop.f32.mrb[174].mxu0  ;;  %19322 = vmatprep.subr.bf16.mxu1 %v19321_v55  ;;  %v4256_v53 = vadd.f32 %v4255_v28, %v4254_v7  ;;  %v19620_v7 = vpop.eup %19619 }
 0x367   :  { %v4487_v63 = vpop.f32.mrb[175].mxu0  ;;  %19324 = vmatpush3.bf16.msra.mxu1 %v19321_v55  ;;  %v4210_v59 = vsel %vm4203_vm3, %v4174_v31, 0.0  ;;  %v4037_v32 = vmul.f32 %v19616_v60, %v3973_v44  ;;  %v4100_v6 = vmul.f32 %v22137_v19, %v3973_v44  ;;  %v3955_v56 = vmul.f32 2.0, %v3937_v1  ;;  %v19622_v8 = vpop.eup %19621 }
 0x368   :  { %v19325_v4 = vpack.c.bf16 %v18287_v35, %v4487_v63  ;;  %v4211_v27 = vadd.f32 %v4210_v59, %v4209_v49  ;;  %v4258_v5 = vadd.f32 %v4257_v34, %v4256_v53  ;;  %v3673_v18 = vpop.f32.mrb[142].mxu1  ;;  %v4216_v19 = vsel %vm4203_vm3, %v21943_v54, 0.0  ;;  %v19624_v13 = vpop.eup %19623 }
 0x369   :  { %v4182_v47 = vmul.f32 %v19618_v58, %v4100_v6  ;;  %v3974_v41 = vadd.f32 %v21782_v29, %v3955_v56  ;;  %v3938_v9 = vsub.f32 %v3673_v18, %v25496_v24  ;;  %v18206_v30 = vpop.f32.mrb[143].mxu1  ;;  %v4263_v49 = vsel %vm4199_vm2, %v4037_v32, 0.0 }
 0x36a   :  { %v18290_v45 = vpop.f32.mrb[176].mxu0  ;;  %19326 = vmatprep.subr.bf16.mxu1 %v19325_v4  ;;  %18385 = vmatmul.mubr.msk.f32.vlgmr.msra.gmra.mrb[160].mxu1 %vm202_vm0, %v22016_v48  ;;  %v4213_v40 = vadd.f32 %v4212_v20, %v4211_v27  ;;  %v4260_v34 = vadd.f32 %v4259_v36, %v4258_v5  ;;  %v19626_v36 = vpop.eup %19625 }
 0x36b   :  { %v4497_v11 = vpop.f32.mrb[177].mxu0  ;;  %19328 = vmatpush3.bf16.msra.mxu1 %v19325_v4  ;;  %18395 = vmatprep.mubr.msk.f32.mxu1 %vm202_vm0, %v22198_v39  ;;  %v4039_v24 = vmul.f32 %v19620_v7, %v3974_v41  ;;  %v4101_v0 = vmul.f32 %v22141_v10, %v3974_v41  ;;  %v3956_v38 = vmul.f32 2.0, %v3938_v9  ;;  %v4218_v1 = vsel %vm4199_vm2, %v4182_v47, 0.0  ;;  %v19628_v5 = vpop.eup %19627 }
 0x36c   :  { %v19329_v22 = vpack.c.bf16 %v18290_v45, %v4497_v11  ;;  %v4215_v2 = vadd.f32 %v4214_v3, %v4213_v40  ;;  %v4262_v54 = vadd.f32 %v4261_v42, %v4260_v34  ;;  %v3823_v55 = vpop.f32.mrb[144].mxu1  ;;  %v4269_v42 = vsel %vm4199_vm2, %v21960_v12, 0.0  ;;  %v19630_v45 = vpop.eup %19629 }
 0x36d   :  { %v4184_v20 = vmul.f32 %v19622_v8, %v4101_v0  ;;  %v3975_v50 = vadd.f32 %v21782_v29, %v3956_v38  ;;  %v3942_v31 = vsub.f32 %v3823_v55, %v25497_v26  ;;  %v18234_v28 = vpop.f32.mrb[145].mxu1  ;;  %v4265_v60 = vsel %vm4199_vm2, %v4039_v24, 0.0  ;;  %v19632_v12 = vpop.eup %19631 }
 0x36e   :  { %v18293_v44 = vpop.f32.mrb[178].mxu0  ;;  %19330 = vmatprep.subr.bf16.mxu1 %v19329_v22  ;;  %v4217_v10 = vadd.f32 %v4216_v19, %v4215_v2  ;;  %v4264_v43 = vadd.f32 %v4263_v49, %v4262_v54  ;;  %v4271_v11 = vsel %vm4199_vm2, %v21977_v14, 0.0  ;;  %v4224_v8 = vsel %vm4199_vm2, %v21967_v51, 0.0 }
 0x36f   :  { %v4507_v21 = vpop.f32.mrb[179].mxu0  ;;  %19332 = vmatpush3.bf16.msra.mxu1 %v19329_v22  ;;  %v4041_v35 = vmul.f32 %v19624_v13, %v3975_v50  ;;  %v4102_v53 = vmul.f32 %v22148_v23, %v3975_v50  ;;  %v3960_v3 = vmul.f32 2.0, %v3942_v31  ;;  %v4220_v59 = vsel %vm4199_vm2, %v4184_v20, 0.0 }
 0x370   :  { %v19333_v26 = vpack.c.bf16 %v18293_v44, %v4507_v21  ;;  %v4219_v63 = vadd.f32 %v4218_v1, %v4217_v10  ;;  %v4266_v32 = vadd.f32 %v4265_v60, %v4264_v43  ;;  %v3828_v6 = vpop.f32.mrb[146].mxu1  ;;  %v4226_v49 = vsel %vm4199_vm2, %v21987_v52, 0.0 }
 0x371   :  { %v4186_v57 = vmul.f32 %v19626_v36, %v4102_v53  ;;  %v4267_v56 = vsel %vm4203_vm3, %v4041_v35, 0.0  ;;  %v3979_v58 = vadd.f32 %v21782_v29, %v3960_v3  ;;  %v3943_v4 = vsub.f32 %v3828_v6, %v25498_v15  ;;  %v18237_v27 = vpop.f32.mrb[147].mxu1 }
 0x372   :  { %v18296_v18 = vpop.f32.mrb[180].mxu0  ;;  %18396 = vmatmul.mubr.msk.f32.vlgmr.msra.gmra.mrb[162].mxu1 %vm202_vm0, %v22016_v48  ;;  %19334 = vmatprep.subr.bf16.mxu1 %v19333_v26  ;;  %v4221_v23 = vadd.f32 %v4220_v59, %v4219_v63  ;;  %v4268_v47 = vadd.f32 %v4267_v56, %v4266_v32  ;;  %v4090_v51 = vadd.f32 %v21784_v17, %v22165_v16 }
 0x373   :  { %v4517_v41 = vpop.f32.mrb[181].mxu0  ;;  %19336 = vmatpush3.bf16.msra.mxu1 %v19333_v26  ;;  %18406 = vmatprep.mubr.msk.f32.mxu1 %vm202_vm0, %v22198_v39  ;;  %v4222_v15 = vsel %vm4203_vm3, %v4186_v57, 0.0  ;;  %v4049_v9 = vmul.f32 %v19628_v5, %v3979_v58  ;;  %v4106_v30 = vmul.f32 %v22151_v25, %v3979_v58  ;;  %v3961_v7 = vmul.f32 2.0, %v3943_v4  ;;  %v19634_v25 = vpop.eup %19633 }
 0x374   :  { %v19337_v40 = vpack.c.bf16 %v18296_v18, %v4517_v41  ;;  %v4223_v19 = vadd.f32 %v4222_v15, %v4221_v23  ;;  %v3833_v46 = vpop.f32.mrb[148].mxu1  ;;  %v4270_v34 = vadd.f32 %v4269_v42, %v4268_v47  ;;  %v19636_v28 = vpop.eup %19635 }
 0x375   :  { %v4194_v24 = vmul.f32 %v19630_v45, %v4106_v30  ;;  %v3980_v0 = vadd.f32 %v21782_v29, %v3961_v7  ;;  %v3944_v38 = vsub.f32 %v3833_v46, %v25499_v62  ;;  %v18240_v22 = vpop.f32.mrb[149].mxu1  ;;  %v4273_v62 = vsel %vm4203_vm3, %v21996_v37, 0.0  ;;  %v19638_v3 = vpop.eup %19637  ;;  %v5622_v46 = vld [vmem:[#allocation12] sm:$0xff] }
 0x376   :  { %v18299_v2 = vpop.f32.mrb[182].mxu0  ;;  %19338 = vmatprep.subr.bf16.mxu1 %v19337_v40  ;;  %v4272_v54 = vadd.f32 %v4271_v11, %v4270_v34  ;;  %v4225_v55 = vadd.f32 %v4224_v8, %v4223_v19  ;;  %v4275_v52 = vsel %vm4199_vm2, %v4049_v9, 0.0  ;;  %v5623_v34 = vld [vmem:[#allocation12 + $0x8] sm:$0xff] }
 0x377   :  { %v4527_v20 = vpop.f32.mrb[183].mxu0  ;;  %19340 = vmatpush3.bf16.msra.mxu1 %v19337_v40  ;;  %v4107_v14 = vmul.f32 %v22157_v61, %v3980_v0  ;;  %v3962_v50 = vmul.f32 2.0, %v3944_v38  ;;  %v4051_v31 = vmul.f32 %v19632_v12, %v3980_v0  ;;  %v4228_v61 = vsel %vm4203_vm3, %v22004_v33, 0.0 }
 0x378   :  { %v19341_v13 = vpack.c.bf16 %v18299_v2, %v4527_v20  ;;  %v4274_v44 = vadd.f32 %v4273_v62, %v4272_v54  ;;  %v4227_v10 = vadd.f32 %v4226_v49, %v4225_v55  ;;  %v4230_v53 = vsel %vm4199_vm2, %v4194_v24, 0.0 }
 0x379   :  { %v3981_v1 = vadd.f32 %v21782_v29, %v3962_v50  ;;  %v4196_v43 = vmul.f32 %v19634_v25, %v4107_v14  ;;  %v4277_v16 = vsel %vm4199_vm2, %v4051_v31, 0.0  ;;  %v19373_v0 = vpack.c.bf16 %v5623_v34, %v5622_v46 }
 0x37a   :  { %v18302_v21 = vpop.f32.mrb[184].mxu0  ;;  %18407 = vmatmul.mubr.msk.f32.vlgmr.msra.gmra.mrb[164].mxu1 %vm202_vm0, %v22016_v48  ;;  %19342 = vmatprep.subr.bf16.mxu1 %v19341_v13  ;;  %v4276_v37 = vadd.f32 %v4275_v52, %v4274_v44  ;;  %v4229_v60 = vadd.f32 %v4228_v61, %v4227_v10 }
 0x37b   :  { %v4537_v35 = vpop.f32.mrb[185].mxu0  ;;  %19344 = vmatpush3.bf16.msra.mxu1 %v19341_v13  ;;  %18417 = vmatprep.mubr.msk.f32.mxu1 %vm202_vm0, %v22198_v39  ;;  %v4108_v17 = vmul.f32 %v4090_v51, %v3981_v1  ;;  %v4053_v29 = vmul.f32 %v19636_v28, %v3981_v1  ;;  %v4232_v32 = vsel %vm4199_vm2, %v4196_v43, 0.0 }
 0x37c   :  { %v19345_v33 = vpack.c.bf16 %v18302_v21, %v4537_v35  ;;  %v4278_v36 = vadd.f32 %v4277_v16, %v4276_v37  ;;  %v4231_v26 = vadd.f32 %v4230_v53, %v4229_v60 }
 0x37d   :  { %v4279_v63 = vsel %vm4203_vm3, %v4053_v29, 0.0  ;;  %v4198_v59 = vmul.f32 %v19638_v3, %v4108_v17 }
 0x37e   :  { %v18305_v6 = vpop.f32.mrb[186].mxu0  ;;  %19346 = vmatprep.subr.bf16.mxu1 %v19345_v33  ;;  %v4280_v57 = vadd.f32 %v4279_v63, %v4278_v36  ;;  %v4233_v56 = vadd.f32 %v4232_v32, %v4231_v26 }
 0x37f   :  { %v4547_v58 = vpop.f32.mrb[187].mxu0  ;;  %19348 = vmatpush3.bf16.msra.mxu1 %v19345_v33  ;;  %v4234_v4 = vsel %vm4203_vm3, %v4198_v59, 0.0 }
 0x380   :  { %v19349_v27 = vpack.c.bf16 %v18305_v6, %v4547_v58  ;;  %4281 = vadd.xlane.f32.xlu1 %v4280_v57  ;;  %v4235_v5 = vadd.f32 %v4234_v4, %v4233_v56 }
 0x382   :  { %v18308_v18 = vpop.f32.mrb[188].mxu0  ;;  %18418 = vmatmul.mubr.msk.f32.vlgmr.msra.gmra.mrb[166].mxu1 %vm202_vm0, %v22016_v48  ;;  %19350 = vmatprep.subr.bf16.mxu1 %v19349_v27 }
 0x383   :  { %v4557_v23 = vpop.f32.mrb[189].mxu0  ;;  %19352 = vmatpush3.bf16.msra.mxu1 %v19349_v27  ;;  %18428 = vmatprep.mubr.msk.f32.mxu1 %vm202_vm0, %v22198_v39 }
 0x384   :  { %v19353_v47 = vpack.c.bf16 %v18308_v18, %v4557_v23  ;;  %4236 = vadd.xlane.f32.xlu1 %v4235_v5 }
 0x386   :  { %v18311_v42 = vpop.f32.mrb[190].mxu0  ;;  %19354 = vmatprep.subr.bf16.mxu1 %v19353_v47 }
 0x387   :  { %v4567_v41 = vpop.f32.mrb[191].mxu0  ;;  %19356 = vmatpush3.bf16.msra.mxu1 %v19353_v47 }
 0x388   :  { %v19357_v15 = vpack.c.bf16 %v18311_v42, %v4567_v41 }
 0x38a   :  { %v18314_v9 = vpop.f32.mrb[192].mxu0  ;;  %18429 = vmatmul.mubr.msk.f32.vlgmr.msra.gmra.mrb[168].mxu1 %vm202_vm0, %v22016_v48  ;;  %19358 = vmatprep.subr.bf16.mxu1 %v19357_v15 }
 0x38b   :  { %v4577_v30 = vpop.f32.mrb[193].mxu0  ;;  %19360 = vmatpush3.bf16.msra.mxu1 %v19357_v15  ;;  %18439 = vmatprep.mubr.msk.f32.mxu1 %vm202_vm0, %v22198_v39 }
 0x38c   :  { %v19361_v7 = vpack.c.bf16 %v18314_v9, %v4577_v30  ;;  %v8441_v30 = vld [vmem:[%s25325_s8] sm:$0xff] }
 0x38e   :  { %v18317_v45 = vpop.f32.mrb[194].mxu0  ;;  %19362 = vmatprep.subr.bf16.mxu1 %v19361_v7 }
 0x38f   :  { %v4587_v40 = vpop.f32.mrb[195].mxu0  ;;  %19364 = vmatpush3.bf16.msra.mxu1 %v19361_v7  ;;  %v8442_v7 = vld [vmem:[%s25325_s8 + $0x8] sm:$0xff] }
 0x390   :  { %v19365_v19 = vpack.c.bf16 %v18317_v45, %v4587_v40  ;;  %v19467_v46 = vpack.c.bf16 %v8442_v7, %v8441_v30 }
 0x392   :  { %v18320_v11 = vpop.f32.mrb[196].mxu0  ;;  %18440 = vmatmul.mubr.msk.f32.vlgmr.msra.gmra.mrb[170].mxu1 %vm202_vm0, %v22016_v48  ;;  %19366 = vmatprep.subr.bf16.mxu1 %v19365_v19 }
 0x393   :  { %v4597_v12 = vpop.f32.mrb[197].mxu0  ;;  %19368 = vmatpush3.bf16.msra.mxu1 %v19365_v19  ;;  %18450 = vmatprep.mubr.msk.f32.mxu1 %vm202_vm0, %v22198_v39 }
 0x394   :  { %v19369_v24 = vpack.c.bf16 %v18320_v11, %v4597_v12 }
 0x396   :  { %19370 = vmatprep.subr.bf16.mxu1 %v19369_v24 }
 0x397   :  { %19372 = vmatpush3.bf16.msra.mxu1 %v19369_v24 }
 0x398   :  { %19374 = vmatprep.subr.bf16.mxu1 %v19373_v0 }
 0x39a   :  { %18451 = vmatmul.mubr.msk.f32.vlgmr.msra.gmra.mrb[172].mxu1 %vm202_vm0, %v22016_v48  ;;  %vm16295_vm0 = vcmask 12288  }
 0x39b   :  { %19376 = vmatpush3.bf16.msra.mxu1 %v19373_v0 }
 0x39c   :  { %19468 = vmatprep.subr.bf16.mxu1 %v19467_v46 }
 0x40d   :  { %v4282_v38 = vpop.xlane.xlu1 %4281 }
 0x40e   :  { %v4283_v8 = vrot.slane %v4282_v38, 4 }
 0x410   :  { %v4284_v22 = vadd.f32 %v4283_v8, %v4282_v38 }
 0x411   :  { %v4237_v25 = vpop.xlane.xlu1 %4236 }
 0x412   :  { %v4238_v2 = vrot.slane %v4237_v25, 4  ;;  %v4285_v54 = vrot.slane %v4284_v22, 2 }
 0x414   :  { %v4239_v55 = vadd.f32 %v4238_v2, %v4237_v25  ;;  %v4286_v39 = vadd.f32 %v4285_v54, %v4284_v22 }
 0x415   :  { %v22265_v49 = vpop.f32.mrb[150].mxu1 }
 0x416   :  { %v22267_v20 = vpop.f32.mrb[151].mxu1  ;;  %v4240_v14 = vrot.slane %v4239_v55, 2  ;;  %v4287_v50 = vrot.slane %v4286_v39, 1  ;;  %v5514_v10 = vsel %vm5512_vm4, %v22265_v49, -inf  ;;  %v5546_v35 = vsel %vm5512_vm4, %v22265_v49, inf }
 0x417   :  { %18457 = vmatprep.mubr.msk.f32.mxu1 %vm5512_vm4, %v22267_v20  ;;  %v5513_v52 = vsel %vm5512_vm4, %v22267_v20, -inf  ;;  %v5545_v61 = vsel %vm5512_vm4, %v22267_v20, inf }
 0x418   :  { %18458 = vmatmul.mubr.msk.f32.vlgmr.msra.gmra.mrb[174].mxu1 %vm5512_vm4, %v22265_v49  ;;  %v4241_v48 = vadd.f32 %v4240_v14, %v4239_v55  ;;  %v4288_v51 = vadd.f32 %v4287_v50, %v4286_v39 }
 0x419   :  { %19470 = vmatpush3.bf16.msra.mxu1 %v19467_v46 }
 0x41a   :  { %v4242_v31 = vrot.slane %v4241_v48, 1 }
 0x41c   :  { %v4243_v62 = vadd.f32 %v4242_v31, %v4241_v48 }
 0x41d   :  { %v22273_v28 = vpop.f32.mrb[152].mxu1 }
 0x41e   :  { %v22275_v13 = vpop.f32.mrb[153].mxu1  ;;  %19511 = vpush %v4243_v62  ;;  %v5516_v33 = vsel %vm5512_vm4, %v22273_v28, -inf  ;;  %v5548_v59 = vsel %vm5512_vm4, %v22273_v28, inf }
 0x41f   :  { %18460 = vmatprep.mubr.msk.f32.mxu1 %vm5512_vm4, %v22275_v13  ;;  %19513 = vpush %v4288_v51  ;;  %v5515_v26 = vsel %vm5512_vm4, %v22275_v13, -inf  ;;  %v5547_v56 = vsel %vm5512_vm4, %v22275_v13, inf }
 0x420   :  { %18461 = vmatmul.mubr.msk.f32.gmra.mrb[176].mxu1 %vm5512_vm4, %v22273_v28 }
 0x425   :  { %v22281_v44 = vpop.f32.mrb[154].mxu1 }
 0x426   :  { %v22285_v1 = vpop.f32.mrb[155].mxu1  ;;  %v5519_v43 = vsel %vm5512_vm4, %v22281_v44, -inf  ;;  %v5551_v21 = vsel %vm5512_vm4, %v22281_v44, inf }
 0x427   :  { %18463 = vmatprep.mubr.msk.f32.mxu1 %vm5512_vm4, %v22285_v1  ;;  %v5517_v37 = vsel %vm5512_vm4, %v22285_v1, -inf  ;;  %v5520_v60 = vmax.f32 %v5514_v10, %v5519_v43  ;;  %v5549_v17 = vsel %vm5512_vm4, %v22285_v1, inf  ;;  %v5552_v53 = vmin.f32 %v5546_v35, %v5551_v21 }
 0x428   :  { %18464 = vmatmul.mubr.msk.f32.gmra.mrb[178].mxu1 %vm5512_vm4, %v22281_v44  ;;  %v5518_v29 = vmax.f32 %v5513_v52, %v5517_v37  ;;  %v5550_v16 = vmin.f32 %v5545_v61, %v5549_v17 }
 0x42d   :  { %v22305_v3 = vpop.f32.mrb[156].mxu1 }
 0x42e   :  { %v22309_v36 = vpop.f32.mrb[157].mxu1  ;;  %v5523_v63 = vsel %vm5512_vm4, %v22305_v3, -inf  ;;  %v5555_v32 = vsel %vm5512_vm4, %v22305_v3, inf }
 0x42f   :  { %18466 = vmatprep.mubr.msk.f32.mxu1 %vm5512_vm4, %v22309_v36  ;;  %v5521_v6 = vsel %vm5512_vm4, %v22309_v36, -inf  ;;  %v5524_v57 = vmax.f32 %v5516_v33, %v5523_v63  ;;  %v5553_v58 = vsel %vm5512_vm4, %v22309_v36, inf  ;;  %v5556_v5 = vmin.f32 %v5548_v59, %v5555_v32 }
 0x430   :  { %18467 = vmatmul.mubr.msk.f32.gmra.mrb[180].mxu1 %vm5512_vm4, %v22305_v3  ;;  %v5522_v4 = vmax.f32 %v5515_v26, %v5521_v6  ;;  %v5554_v27 = vmin.f32 %v5547_v56, %v5553_v58 }
 0x435   :  { %v22329_v18 = vpop.f32.mrb[158].mxu1 }
 0x436   :  { %v22331_v23 = vpop.f32.mrb[159].mxu1  ;;  %v5527_v47 = vsel %vm5512_vm4, %v22329_v18, -inf  ;;  %v5559_v42 = vsel %vm5512_vm4, %v22329_v18, inf  ;;  %v5595_v7 = vmul.f32 %v22329_v18, %v22329_v18 }
 0x437   :  { %18469 = vmatprep.mubr.msk.f32.mxu1 %vm5512_vm4, %v22331_v23  ;;  %v5525_v41 = vsel %vm5512_vm4, %v22331_v23, -inf  ;;  %v5528_v15 = vmax.f32 %v5520_v60, %v5527_v47  ;;  %v5557_v9 = vsel %vm5512_vm4, %v22331_v23, inf  ;;  %v5560_v19 = vmin.f32 %v5552_v53, %v5559_v42 }
 0x438   :  { %18470 = vmatmul.mubr.msk.f32.gmra.mrb[182].mxu1 %vm5512_vm4, %v22329_v18  ;;  %v5526_v45 = vmax.f32 %v5518_v29, %v5525_v41  ;;  %v5558_v40 = vmin.f32 %v5550_v16, %v5557_v9  ;;  %v5589_v47 = vmul.f32 %v22273_v28, %v22273_v28  ;;  %v5590_v42 = vmul.f32 %v22285_v1, %v22285_v1 }
 0x439   :  { %v5591_v41 = vmul.f32 %v22281_v44, %v22281_v44  ;;  %v5593_v9 = vmul.f32 %v22305_v3, %v22305_v3  ;;  %v5594_v30 = vmul.f32 %v22331_v23, %v22331_v23 }
 0x43a   :  { %v5533_v34 = vmax.f32 %v5526_v45, %v5528_v15  ;;  %v5565_v11 = vmin.f32 %v5558_v40, %v5560_v19  ;;  %v5592_v15 = vmul.f32 %v22309_v36, %v22309_v36 }
 0x43d   :  { %v22351_v12 = vpop.f32.mrb[160].mxu1 }
 0x43e   :  { %v22353_v24 = vpop.f32.mrb[161].mxu1  ;;  %v5531_v0 = vsel %vm5512_vm4, %v22351_v12, -inf  ;;  %v5563_v38 = vsel %vm5512_vm4, %v22351_v12, inf  ;;  %v5597_v40 = vmul.f32 %v22351_v12, %v22351_v12 }
 0x43f   :  { %18472 = vmatprep.mubr.msk.f32.mxu1 %vm5512_vm4, %v22353_v24  ;;  %v5529_v8 = vsel %vm5512_vm4, %v22353_v24, -inf  ;;  %v5532_v22 = vmax.f32 %v5524_v57, %v5531_v0  ;;  %v5561_v25 = vsel %vm5512_vm4, %v22353_v24, inf  ;;  %v5564_v55 = vmin.f32 %v5556_v5, %v5563_v38 }
 0x440   :  { %18473 = vmatmul.mubr.msk.f32.gmra.mrb[184].mxu1 %vm5512_vm4, %v22351_v12  ;;  %v5530_v2 = vmax.f32 %v5522_v4, %v5529_v8  ;;  %v5562_v54 = vmin.f32 %v5554_v27, %v5561_v25  ;;  %v5586_v4 = vmul.f32 %v22267_v20, %v22267_v20  ;;  %v5587_v27 = vmul.f32 %v22265_v49, %v22265_v49 }
 0x441   :  { %v5588_v5 = vmul.f32 %v22275_v13, %v22275_v13  ;;  %v5596_v45 = vmul.f32 %v22353_v24, %v22353_v24 }
 0x442   :  { %v5534_v39 = vmax.f32 %v5530_v2, %v5532_v22  ;;  %v5566_v14 = vmin.f32 %v5562_v54, %v5564_v55 }
 0x444   :  { %v5535_v48 = vmax.f32 %v5533_v34, %v5534_v39  ;;  %v5567_v50 = vmin.f32 %v5565_v11, %v5566_v14 }
 0x445   :  { %v22367_v31 = vpop.f32.mrb[162].mxu1 }
 0x446   :  { %v22371_v62 = vmul.f32 %v22367_v31, %v22265_v49  ;;  %v22373_v51 = vpop.f32.mrb[163].mxu1  ;;  %5536 = vmax.xlane.f32.xlu0 %v5535_v48  ;;  %5568 = vmin.xlane.f32.xlu1 %v5567_v50  ;;  %v5599_v46 = vmul.f32 %v22367_v31, %v22367_v31 }
 0x447   :  { %v22377_v10 = vmul.f32 %v22373_v51, %v22267_v20  ;;  %18475 = vmatprep.mubr.msk.f32.mxu1 %vm5512_vm4, %v22373_v51  ;;  %v5598_v19 = vmul.f32 %v22373_v51, %v22373_v51 }
 0x448   :  { %18476 = vmatmul.mubr.msk.f32.gmra.mrb[186].mxu1 %vm5512_vm4, %v22367_v31 }
 0x44d   :  { %v22383_v52 = vpop.f32.mrb[164].mxu1 }
 0x44e   :  { %v22387_v43 = vmul.f32 %v22383_v52, %v22273_v28  ;;  %v22389_v61 = vpop.f32.mrb[165].mxu1  ;;  %v5601_v11 = vmul.f32 %v22383_v52, %v22383_v52 }
 0x44f   :  { %v22393_v21 = vmul.f32 %v22389_v61, %v22275_v13  ;;  %18478 = vmatprep.mubr.msk.f32.mxu1 %vm5512_vm4, %v22389_v61  ;;  %v5600_v34 = vmul.f32 %v22389_v61, %v22389_v61 }
 0x450   :  { %18479 = vmatmul.mubr.msk.f32.gmra.mrb[188].mxu1 %vm5512_vm4, %v22383_v52 }
 0x455   :  { %v22399_v37 = vpop.f32.mrb[166].mxu1 }
 0x456   :  { %v22403_v60 = vmul.f32 %v22399_v37, %v22281_v44  ;;  %v22405_v35 = vpop.f32.mrb[167].mxu1  ;;  %v5603_v38 = vmul.f32 %v22399_v37, %v22399_v37 }
 0x457   :  { %v22409_v17 = vmul.f32 %v22405_v35, %v22285_v1  ;;  %18481 = vmatprep.mubr.msk.f32.mxu1 %vm5512_vm4, %v22405_v35  ;;  %v5602_v0 = vmul.f32 %v22405_v35, %v22405_v35 }
 0x458   :  { %18482 = vmatmul.mubr.msk.f32.gmra.mrb[190].mxu1 %vm5512_vm4, %v22399_v37 }
 0x45d   :  { %v22415_v29 = vpop.f32.mrb[168].mxu1 }
 0x45e   :  { %v22419_v16 = vmul.f32 %v22415_v29, %v22305_v3  ;;  %v22421_v53 = vpop.f32.mrb[169].mxu1  ;;  %v5605_v22 = vmul.f32 %v22415_v29, %v22415_v29 }
 0x45f   :  { %v22425_v33 = vmul.f32 %v22421_v53, %v22309_v36  ;;  %18484 = vmatprep.mubr.msk.f32.mxu1 %vm5512_vm4, %v22421_v53  ;;  %v5604_v8 = vmul.f32 %v22421_v53, %v22421_v53 }
 0x460   :  { %18485 = vmatmul.mubr.msk.f32.gmra.mrb[192].mxu1 %vm5512_vm4, %v22415_v29 }
 0x465   :  { %v22431_v26 = vpop.f32.mrb[170].mxu1 }
 0x466   :  { %v22435_v63 = vmul.f32 %v22431_v26, %v22329_v18  ;;  %v22437_v59 = vpop.f32.mrb[171].mxu1  ;;  %v5607_v2 = vmul.f32 %v22431_v26, %v22431_v26 }
 0x467   :  { %v22441_v32 = vmul.f32 %v22437_v59, %v22331_v23  ;;  %18487 = vmatprep.mubr.msk.f32.mxu1 %vm5512_vm4, %v22437_v59  ;;  %v5606_v25 = vmul.f32 %v22437_v59, %v22437_v59 }
 0x468   :  { %18488 = vmatmul.mubr.msk.f32.gmra.mrb[194].mxu1 %vm5512_vm4, %v22431_v26 }
 0x46d   :  { %v22447_v6 = vpop.f32.mrb[172].mxu1 }
 0x46e   :  { %v22451_v57 = vmul.f32 %v22447_v6, %v22351_v12  ;;  %v22453_v56 = vpop.f32.mrb[173].mxu1  ;;  %v5609_v55 = vmul.f32 %v22447_v6, %v22447_v6 }
 0x46f   :  { %v5620_v58 = vmul.f32 %v22453_v56, %v22353_v24  ;;  %18490 = vmatprep.mubr.msk.f32.mxu1 %vm5512_vm4, %v22453_v56  ;;  %v5608_v54 = vmul.f32 %v22453_v56, %v22453_v56 }
 0x470   :  { %18491 = vmatmul.mubr.msk.f32.gmra.mrb[196].mxu1 %vm5512_vm4, %v22447_v6 }
 0x471   :  { %18493 = vmatprep.mubr.msk.f32.mxu1 %vm5512_vm4, %v5586_v4 }
 0x474   :  { %18494 = vmatmul.mubr.msk.f32.gmra.mrb[198].mxu1 %vm5512_vm4, %v5587_v27 }
 0x475   :  { %18496 = vmatprep.mubr.msk.f32.mxu1 %vm5512_vm4, %v5588_v5 }
 0x478   :  { %18497 = vmatmul.mubr.msk.f32.gmra.mrb[200].mxu1 %vm5512_vm4, %v5589_v47 }
 0x479   :  { %18499 = vmatprep.mubr.msk.f32.mxu1 %vm5512_vm4, %v5590_v42 }
 0x47c   :  { %18500 = vmatmul.mubr.msk.f32.gmra.mrb[202].mxu1 %vm5512_vm4, %v5591_v41 }
 0x47d   :  { %18502 = vmatprep.mubr.msk.f32.mxu1 %vm5512_vm4, %v5592_v15 }
 0x480   :  { %18503 = vmatmul.mubr.msk.f32.gmra.mrb[204].mxu1 %vm5512_vm4, %v5593_v9 }
 0x481   :  { %18505 = vmatprep.mubr.msk.f32.mxu1 %vm5512_vm4, %v5594_v30 }
 0x484   :  { %18506 = vmatmul.mubr.msk.f32.gmra.mrb[206].mxu1 %vm5512_vm4, %v5595_v7 }
 0x485   :  { %18508 = vmatprep.mubr.msk.f32.mxu1 %vm5512_vm4, %v5596_v45 }
 0x488   :  { %18509 = vmatmul.mubr.msk.f32.gmra.mrb[208].mxu1 %vm5512_vm4, %v5597_v40 }
 0x489   :  { %18511 = vmatprep.mubr.msk.f32.mxu1 %vm5512_vm4, %v5598_v19 }
 0x48c   :  { %18512 = vmatmul.mubr.msk.f32.gmra.mrb[210].mxu1 %vm5512_vm4, %v5599_v46 }
 0x48d   :  { %18514 = vmatprep.mubr.msk.f32.mxu1 %vm5512_vm4, %v5600_v34 }
 0x490   :  { %18515 = vmatmul.mubr.msk.f32.gmra.mrb[212].mxu1 %vm5512_vm4, %v5601_v11 }
 0x491   :  { %18517 = vmatprep.mubr.msk.f32.mxu1 %vm5512_vm4, %v5602_v0 }
 0x494   :  { %18518 = vmatmul.mubr.msk.f32.gmra.mrb[214].mxu1 %vm5512_vm4, %v5603_v38 }
 0x495   :  { %18520 = vmatprep.mubr.msk.f32.mxu1 %vm5512_vm4, %v5604_v8 }
 0x498   :  { %18521 = vmatmul.mubr.msk.f32.gmra.mrb[216].mxu1 %vm5512_vm4, %v5605_v22 }
 0x499   :  { %18523 = vmatprep.mubr.msk.f32.mxu1 %vm5512_vm4, %v5606_v25 }
 0x49c   :  { %18524 = vmatmul.mubr.msk.f32.gmra.mrb[218].mxu1 %vm5512_vm4, %v5607_v2 }
 0x49d   :  { %18526 = vmatprep.mubr.msk.f32.mxu1 %vm5512_vm4, %v5608_v54 }
 0x4a0   :  { %18527 = vmatmul.mubr.msk.f32.gmra.mrb[220].mxu1 %vm5512_vm4, %v5609_v55 }
 0x4a1   :  { %18529 = vmatprep.mubr.msk.f32.mxu1 %vm5512_vm4, %v22377_v10 }
 0x4a4   :  { %18530 = vmatmul.mubr.msk.f32.gmra.mrb[222].mxu1 %vm5512_vm4, %v22371_v62  ;;  %v22604_v62 = vld [vmem:[#allocation13] sm:$0x3f] }
 0x4a5   :  { %18532 = vmatprep.mubr.msk.f32.mxu1 %vm5512_vm4, %v22393_v21 }
 0x4a8   :  { %18533 = vmatmul.mubr.msk.f32.gmra.mrb[224].mxu1 %vm5512_vm4, %v22387_v43 }
 0x4a9   :  { %18535 = vmatprep.mubr.msk.f32.mxu1 %vm5512_vm4, %v22409_v17 }
 0x4ac   :  { %18536 = vmatmul.mubr.msk.f32.gmra.mrb[226].mxu1 %vm5512_vm4, %v22403_v60 }
 0x4ad   :  { %18538 = vmatprep.mubr.msk.f32.mxu1 %vm5512_vm4, %v22425_v33 }
 0x4b0   :  { %18539 = vmatmul.mubr.msk.f32.gmra.mrb[228].mxu1 %vm5512_vm4, %v22419_v16 }
 0x4b1   :  { %18541 = vmatprep.mubr.msk.f32.mxu1 %vm5512_vm4, %v22441_v32 }
 0x4b4   :  { %18542 = vmatmul.mubr.msk.f32.gmra.mrb[230].mxu1 %vm5512_vm4, %v22435_v63 }
 0x4b5   :  { %18544 = vmatprep.mubr.msk.f32.mxu1 %vm5512_vm4, %v5620_v58 }
 0x4b8   :  { %18545 = vmatmul.mubr.msk.f32.gmra.mrb[232].mxu1 %vm5512_vm4, %v22451_v57 }
 0x4b9   :  { %18761 = vmatprep.mubr.msk.f32.mxu1 %vm5512_vm4, %v22267_v20 }
 0x4bc   :  { %18762 = vmatmul.mubr.msk.f32.vlgmr.msra.gmra.mrb[234].mxu1 %vm5512_vm4, %v22265_v49 }
 0x4bd   :  { %18764 = vmatprep.mubr.msk.f32.mxu1 %vm5512_vm4, %v22275_v13 }
 0x4c0   :  { %18765 = vmatmul.mubr.msk.f32.gmra.mrb[236].mxu1 %vm5512_vm4, %v22273_v28 }
 0x4c1   :  { %18767 = vmatprep.mubr.msk.f32.mxu1 %vm5512_vm4, %v22285_v1 }
 0x4c4   :  { %18768 = vmatmul.mubr.msk.f32.gmra.mrb[238].mxu1 %vm5512_vm4, %v22281_v44 }
 0x4c5   :  { %18770 = vmatprep.mubr.msk.f32.mxu1 %vm5512_vm4, %v22309_v36 }
 0x4c8   :  { %18771 = vmatmul.mubr.msk.f32.gmra.mrb[240].mxu1 %vm5512_vm4, %v22305_v3 }
 0x4c9   :  { %18773 = vmatprep.mubr.msk.f32.mxu1 %vm5512_vm4, %v22331_v23 }
 0x4cc   :  { %18774 = vmatmul.mubr.msk.f32.gmra.mrb[242].mxu1 %vm5512_vm4, %v22329_v18 }
 0x4cd   :  { %18776 = vmatprep.mubr.msk.f32.mxu1 %vm5512_vm4, %v22353_v24 }
 0x4d0   :  { %18777 = vmatmul.mubr.msk.f32.gmra.mrb[244].mxu1 %vm5512_vm4, %v22351_v12 }
 0x4d1   :  { %18779 = vmatprep.mubr.msk.f32.mxu1 %vm5512_vm4, %v22373_v51  ;;  %v25500_v51 = vmov 0.0|0.0  }
 0x4d3   :  { %v5569_v49 = vpop.xlane.xlu1 %5568  ;;  %v5537_v20 = vpop.xlane.xlu0 %5536 }
 0x4d4   :  { %18780 = vmatmul.mubr.msk.f32.gmra.mrb[246].mxu1 %vm5512_vm4, %v22367_v31  ;;  %v5570_v28 = vrot.slane %v5569_v49, 4  ;;  %v5538_v13 = vrot.slane %v5537_v20, 4 }
 0x4d5   :  { %18782 = vmatprep.mubr.msk.f32.mxu1 %vm5512_vm4, %v22389_v61 }
 0x4d6   :  { %v5571_v44 = vmin.f32 %v5569_v49, %v5570_v28  ;;  %v5539_v1 = vmax.f32 %v5537_v20, %v5538_v13 }
 0x4d8   :  { %18783 = vmatmul.mubr.msk.f32.gmra.mrb[248].mxu1 %vm5512_vm4, %v22383_v52  ;;  %v5540_v3 = vrot.slane %v5539_v1, 2  ;;  %v5572_v36 = vrot.slane %v5571_v44, 2  ;;  %v25501_v52 = vmov 0.0  }
 0x4d9   :  { %18785 = vmatprep.mubr.msk.f32.mxu1 %vm5512_vm4, %v22405_v35 }
 0x4da   :  { %v5541_v18 = vmax.f32 %v5539_v1, %v5540_v3  ;;  %v5573_v23 = vmin.f32 %v5571_v44, %v5572_v36 }
 0x4dc   :  { %18786 = vmatmul.mubr.msk.f32.gmra.mrb[250].mxu1 %vm5512_vm4, %v22399_v37  ;;  %v5542_v12 = vrot.slane %v5541_v18, 1  ;;  %v5574_v24 = vrot.slane %v5573_v23, 1 }
 0x4dd   :  { %18788 = vmatprep.mubr.msk.f32.mxu1 %vm5512_vm4, %v22421_v53 }
 0x4de   :  { %v5543_v39 = vmax.f32 %v5541_v18, %v5542_v12  ;;  %v5575_v14 = vmin.f32 %v5573_v23, %v5574_v24 }
 0x4e0   :  { %18789 = vmatmul.mubr.msk.f32.gmra.mrb[252].mxu1 %vm5512_vm4, %v22415_v29  ;;  %19515 = vpush %v5543_v39 }
 0x4e1   :  { %18791 = vmatprep.mubr.msk.f32.mxu1 %vm5512_vm4, %v22437_v59  ;;  %19517 = vpush %v5575_v14 }
 0x4e4   :  { %18792 = vmatmul.mubr.msk.f32.gmra.mrb[254].mxu1 %vm5512_vm4, %v22431_v26 }
 0x4e5   :  { %18794 = vmatprep.mubr.msk.f32.mxu1 %vm5512_vm4, %v22453_v56 }
 0x4e8   :  { %18795 = vmatmul.mubr.msk.f32.gmra.mrb[0].mxu1 %vm5512_vm4, %v22447_v6 }
 0x4eb   :  { %v18459_v48 = vpop.f32.mrb[174].mxu1 }
 0x4ec   :  { %v5871_v50 = vpop.f32.mrb[175].mxu1 }
 0x4ed   :  { %v19378_v31 = vpack.c.bf16 %v18459_v48, %v5871_v50 }
 0x4ef   :  { %19379 = vmatpush3.bf16.msra.mxu0 %v19378_v31 }
 0x4f0   :  { %19380 = vmatprep.subr.bf16.mxu0 %v25500_v51 }
 0x4f2   :  { %18552 = vmatmul.mubr.msk.f32.vlgmr.msra.gmra.mrb[198].mxu0 %vm5512_vm4, %v22604_v62 }
 0x4f3   :  { %v18462_v10 = vpop.f32.mrb[176].mxu1  ;;  %18558 = vmatprep.mubr.msk.f32.mxu0 %vm19984_vm1, %v25501_v52 }
 0x4f4   :  { %v5881_v43 = vpop.f32.mrb[177].mxu1 }
 0x4f5   :  { %v19381_v61 = vpack.c.bf16 %v18462_v10, %v5881_v43 }
 0x4f7   :  { %19382 = vmatpush3.bf16.msra.mxu0 %v19381_v61 }
 0x4f8   :  { %19383 = vmatprep.subr.bf16.mxu0 %v25500_v51 }
 0x4fa   :  { %18559 = vmatmul.mubr.msk.f32.vlgmr.msra.gmra.mrb[200].mxu0 %vm5512_vm4, %v22604_v62 }
 0x4fb   :  { %v18465_v21 = vpop.f32.mrb[178].mxu1  ;;  %18565 = vmatprep.mubr.msk.f32.mxu0 %vm19984_vm1, %v25501_v52 }
 0x4fc   :  { %v5891_v37 = vpop.f32.mrb[179].mxu1 }
 0x4fd   :  { %v19384_v60 = vpack.c.bf16 %v18465_v21, %v5891_v37 }
 0x4ff   :  { %19385 = vmatpush3.bf16.msra.mxu0 %v19384_v60 }
 0x500   :  { %19386 = vmatprep.subr.bf16.mxu0 %v25500_v51 }
 0x502   :  { %18566 = vmatmul.mubr.msk.f32.vlgmr.msra.gmra.mrb[202].mxu0 %vm5512_vm4, %v22604_v62 }
 0x503   :  { %v18468_v35 = vpop.f32.mrb[180].mxu1  ;;  %18572 = vmatprep.mubr.msk.f32.mxu0 %vm19984_vm1, %v25501_v52 }
 0x504   :  { %v5901_v17 = vpop.f32.mrb[181].mxu1 }
 0x505   :  { %v19387_v29 = vpack.c.bf16 %v18468_v35, %v5901_v17 }
 0x507   :  { %19388 = vmatpush3.bf16.msra.mxu0 %v19387_v29 }
 0x508   :  { %19389 = vmatprep.subr.bf16.mxu0 %v25500_v51 }
 0x50a   :  { %18573 = vmatmul.mubr.msk.f32.vlgmr.msra.gmra.mrb[204].mxu0 %vm5512_vm4, %v22604_v62 }
 0x50b   :  { %v18471_v16 = vpop.f32.mrb[182].mxu1  ;;  %18579 = vmatprep.mubr.msk.f32.mxu0 %vm19984_vm1, %v25501_v52 }
 0x50c   :  { %v5911_v53 = vpop.f32.mrb[183].mxu1 }
 0x50d   :  { %v19390_v33 = vpack.c.bf16 %v18471_v16, %v5911_v53 }
 0x50f   :  { %19391 = vmatpush3.bf16.msra.mxu0 %v19390_v33 }
 0x510   :  { %19392 = vmatprep.subr.bf16.mxu0 %v25500_v51 }
 0x512   :  { %18580 = vmatmul.mubr.msk.f32.vlgmr.msra.gmra.mrb[206].mxu0 %vm5512_vm4, %v22604_v62 }
 0x513   :  { %v18474_v26 = vpop.f32.mrb[184].mxu1  ;;  %18586 = vmatprep.mubr.msk.f32.mxu0 %vm19984_vm1, %v25501_v52 }
 0x514   :  { %v5921_v63 = vpop.f32.mrb[185].mxu1 }
 0x515   :  { %v19393_v59 = vpack.c.bf16 %v18474_v26, %v5921_v63 }
 0x517   :  { %19394 = vmatpush3.bf16.msra.mxu0 %v19393_v59 }
 0x518   :  { %19395 = vmatprep.subr.bf16.mxu0 %v25500_v51 }
 0x51a   :  { %18587 = vmatmul.mubr.msk.f32.vlgmr.msra.gmra.mrb[208].mxu0 %vm5512_vm4, %v22604_v62 }
 0x51b   :  { %v18477_v32 = vpop.f32.mrb[186].mxu1  ;;  %18593 = vmatprep.mubr.msk.f32.mxu0 %vm19984_vm1, %v25501_v52 }
 0x51c   :  { %v5931_v6 = vpop.f32.mrb[187].mxu1 }
 0x51d   :  { %v19396_v57 = vpack.c.bf16 %v18477_v32, %v5931_v6 }
 0x51f   :  { %19397 = vmatpush3.bf16.msra.mxu0 %v19396_v57 }
 0x520   :  { %19398 = vmatprep.subr.bf16.mxu0 %v25500_v51 }
 0x522   :  { %18594 = vmatmul.mubr.msk.f32.vlgmr.msra.gmra.mrb[210].mxu0 %vm5512_vm4, %v22604_v62 }
 0x523   :  { %v18480_v56 = vpop.f32.mrb[188].mxu1  ;;  %18600 = vmatprep.mubr.msk.f32.mxu0 %vm19984_vm1, %v25501_v52 }
 0x524   :  { %v5941_v58 = vpop.f32.mrb[189].mxu1 }
 0x525   :  { %v19399_v4 = vpack.c.bf16 %v18480_v56, %v5941_v58 }
 0x527   :  { %19400 = vmatpush3.bf16.msra.mxu0 %v19399_v4 }
 0x528   :  { %19401 = vmatprep.subr.bf16.mxu0 %v25500_v51 }
 0x52a   :  { %18601 = vmatmul.mubr.msk.f32.vlgmr.msra.gmra.mrb[212].mxu0 %vm5512_vm4, %v22604_v62 }
 0x52b   :  { %v18483_v27 = vpop.f32.mrb[190].mxu1  ;;  %18607 = vmatprep.mubr.msk.f32.mxu0 %vm19984_vm1, %v25501_v52 }
 0x52c   :  { %v5951_v5 = vpop.f32.mrb[191].mxu1 }
 0x52d   :  { %v19402_v47 = vpack.c.bf16 %v18483_v27, %v5951_v5 }
 0x52f   :  { %19403 = vmatpush3.bf16.msra.mxu0 %v19402_v47 }
 0x530   :  { %19404 = vmatprep.subr.bf16.mxu0 %v25500_v51 }
 0x532   :  { %18608 = vmatmul.mubr.msk.f32.vlgmr.msra.gmra.mrb[214].mxu0 %vm5512_vm4, %v22604_v62 }
 0x533   :  { %v18486_v42 = vpop.f32.mrb[192].mxu1  ;;  %18614 = vmatprep.mubr.msk.f32.mxu0 %vm19984_vm1, %v25501_v52 }
 0x534   :  { %v5961_v41 = vpop.f32.mrb[193].mxu1 }
 0x535   :  { %v19405_v15 = vpack.c.bf16 %v18486_v42, %v5961_v41 }
 0x537   :  { %19406 = vmatpush3.bf16.msra.mxu0 %v19405_v15 }
 0x538   :  { %19407 = vmatprep.subr.bf16.mxu0 %v25500_v51 }
 0x53a   :  { %18615 = vmatmul.mubr.msk.f32.vlgmr.msra.gmra.mrb[216].mxu0 %vm5512_vm4, %v22604_v62 }
 0x53b   :  { %v18489_v9 = vpop.f32.mrb[194].mxu1  ;;  %18621 = vmatprep.mubr.msk.f32.mxu0 %vm19984_vm1, %v25501_v52 }
 0x53c   :  { %v5971_v30 = vpop.f32.mrb[195].mxu1 }
 0x53d   :  { %v19408_v7 = vpack.c.bf16 %v18489_v9, %v5971_v30 }
 0x53f   :  { %19409 = vmatpush3.bf16.msra.mxu0 %v19408_v7  ;;  %v22759_v7 = vld [vmem:[%s25326_s9] sm:$0xff] }
 0x540   :  { %19410 = vmatprep.subr.bf16.mxu0 %v25500_v51 }
 0x542   :  { %18622 = vmatmul.mubr.msk.f32.vlgmr.msra.gmra.mrb[218].mxu0 %vm5512_vm4, %v22604_v62 }
 0x543   :  { %v18492_v45 = vpop.f32.mrb[196].mxu1  ;;  %18628 = vmatprep.mubr.msk.f32.mxu0 %vm19984_vm1, %v25501_v52 }
 0x544   :  { %v5981_v40 = vpop.f32.mrb[197].mxu1 }
 0x545   :  { %v19411_v19 = vpack.c.bf16 %v18492_v45, %v5981_v40 }
 0x547   :  { %v18495_v46 = vpop.f32.mrb[198].mxu1  ;;  %19412 = vmatpush3.bf16.msra.mxu0 %v19411_v19 }
 0x548   :  { %v5991_v34 = vpop.f32.mrb[199].mxu1  ;;  %19413 = vmatprep.subr.bf16.mxu0 %v25500_v51 }
 0x549   :  { %v19414_v11 = vpack.c.bf16 %v18495_v46, %v5991_v34 }
 0x54a   :  { %18629 = vmatmul.mubr.msk.f32.vlgmr.msra.gmra.mrb[220].mxu0 %vm5512_vm4, %v22604_v62 }
 0x54b   :  { %v18498_v0 = vpop.f32.mrb[200].mxu1  ;;  %19415 = vmatpush3.bf16.msra.mxu0 %v19414_v11  ;;  %18635 = vmatprep.mubr.msk.f32.mxu0 %vm19984_vm1, %v25501_v52 }
 0x54c   :  { %v6001_v38 = vpop.f32.mrb[201].mxu1  ;;  %19416 = vmatprep.subr.bf16.mxu0 %v25500_v51 }
 0x54d   :  { %v19417_v8 = vpack.c.bf16 %v18498_v0, %v6001_v38 }
 0x54e   :  { %18636 = vmatmul.mubr.msk.f32.vlgmr.msra.gmra.mrb[222].mxu0 %vm5512_vm4, %v22604_v62 }
 0x54f   :  { %v18501_v22 = vpop.f32.mrb[202].mxu1  ;;  %19418 = vmatpush3.bf16.msra.mxu0 %v19417_v8  ;;  %18642 = vmatprep.mubr.msk.f32.mxu0 %vm19984_vm1, %v25501_v52 }
 0x550   :  { %v6011_v25 = vpop.f32.mrb[203].mxu1  ;;  %19419 = vmatprep.subr.bf16.mxu0 %v25500_v51 }
 0x551   :  { %v19420_v2 = vpack.c.bf16 %v18501_v22, %v6011_v25 }
 0x552   :  { %18643 = vmatmul.mubr.msk.f32.vlgmr.msra.gmra.mrb[224].mxu0 %vm5512_vm4, %v22604_v62 }
 0x553   :  { %v18504_v54 = vpop.f32.mrb[204].mxu1  ;;  %19421 = vmatpush3.bf16.msra.mxu0 %v19420_v2  ;;  %18649 = vmatprep.mubr.msk.f32.mxu0 %vm19984_vm1, %v25501_v52 }
 0x554   :  { %v6021_v55 = vpop.f32.mrb[205].mxu1  ;;  %19422 = vmatprep.subr.bf16.mxu0 %v25500_v51 }
 0x555   :  { %v19423_v49 = vpack.c.bf16 %v18504_v54, %v6021_v55 }
 0x556   :  { %18650 = vmatmul.mubr.msk.f32.vlgmr.msra.gmra.mrb[226].mxu0 %vm5512_vm4, %v22604_v62 }
 0x557   :  { %v18507_v20 = vpop.f32.mrb[206].mxu1  ;;  %19424 = vmatpush3.bf16.msra.mxu0 %v19423_v49  ;;  %18656 = vmatprep.mubr.msk.f32.mxu0 %vm19984_vm1, %v25501_v52 }
 0x558   :  { %v6031_v28 = vpop.f32.mrb[207].mxu1  ;;  %19425 = vmatprep.subr.bf16.mxu0 %v25500_v51 }
 0x559   :  { %v19426_v13 = vpack.c.bf16 %v18507_v20, %v6031_v28 }
 0x55a   :  { %18657 = vmatmul.mubr.msk.f32.vlgmr.msra.gmra.mrb[228].mxu0 %vm5512_vm4, %v22604_v62 }
 0x55b   :  { %v18510_v44 = vpop.f32.mrb[208].mxu1  ;;  %19427 = vmatpush3.bf16.msra.mxu0 %v19426_v13  ;;  %18663 = vmatprep.mubr.msk.f32.mxu0 %vm19984_vm1, %v25501_v52 }
 0x55c   :  { %v6041_v1 = vpop.f32.mrb[209].mxu1  ;;  %19428 = vmatprep.subr.bf16.mxu0 %v25500_v51 }
 0x55d   :  { %v19429_v3 = vpack.c.bf16 %v18510_v44, %v6041_v1 }
 0x55e   :  { %18664 = vmatmul.mubr.msk.f32.vlgmr.msra.gmra.mrb[230].mxu0 %vm5512_vm4, %v22604_v62 }
 0x55f   :  { %v18513_v36 = vpop.f32.mrb[210].mxu1  ;;  %19430 = vmatpush3.bf16.msra.mxu0 %v19429_v3  ;;  %18670 = vmatprep.mubr.msk.f32.mxu0 %vm19984_vm1, %v25501_v52 }
 0x560   :  { %v6051_v18 = vpop.f32.mrb[211].mxu1  ;;  %19431 = vmatprep.subr.bf16.mxu0 %v25500_v51 }
 0x561   :  { %v19432_v23 = vpack.c.bf16 %v18513_v36, %v6051_v18 }
 0x562   :  { %18671 = vmatmul.mubr.msk.f32.vlgmr.msra.gmra.mrb[232].mxu0 %vm5512_vm4, %v22604_v62 }
 0x563   :  { %v18516_v12 = vpop.f32.mrb[212].mxu1  ;;  %19433 = vmatpush3.bf16.msra.mxu0 %v19432_v23  ;;  %18677 = vmatprep.mubr.msk.f32.mxu0 %vm19984_vm1, %v25501_v52 }
 0x564   :  { %v6061_v24 = vpop.f32.mrb[213].mxu1  ;;  %19434 = vmatprep.subr.bf16.mxu0 %v25500_v51 }
 0x565   :  { %v19435_v39 = vpack.c.bf16 %v18516_v12, %v6061_v24 }
 0x566   :  { %18678 = vmatmul.mubr.msk.f32.vlgmr.msra.gmra.mrb[234].mxu0 %vm5512_vm4, %v22604_v62 }
 0x567   :  { %v18519_v14 = vpop.f32.mrb[214].mxu1  ;;  %19436 = vmatpush3.bf16.msra.mxu0 %v19435_v39  ;;  %18684 = vmatprep.mubr.msk.f32.mxu0 %vm19984_vm1, %v25501_v52 }
 0x568   :  { %v6071_v48 = vpop.f32.mrb[215].mxu1  ;;  %19437 = vmatprep.subr.bf16.mxu0 %v25500_v51 }
 0x569   :  { %v19438_v50 = vpack.c.bf16 %v18519_v14, %v6071_v48 }
 0x56a   :  { %18685 = vmatmul.mubr.msk.f32.vlgmr.msra.gmra.mrb[236].mxu0 %vm5512_vm4, %v22604_v62 }
 0x56b   :  { %v18522_v31 = vpop.f32.mrb[216].mxu1  ;;  %19439 = vmatpush3.bf16.msra.mxu0 %v19438_v50  ;;  %18691 = vmatprep.mubr.msk.f32.mxu0 %vm19984_vm1, %v25501_v52 }
 0x56c   :  { %v6081_v10 = vpop.f32.mrb[217].mxu1  ;;  %19440 = vmatprep.subr.bf16.mxu0 %v25500_v51 }
 0x56d   :  { %v19441_v43 = vpack.c.bf16 %v18522_v31, %v6081_v10 }
 0x56e   :  { %18692 = vmatmul.mubr.msk.f32.vlgmr.msra.gmra.mrb[238].mxu0 %vm5512_vm4, %v22604_v62 }
 0x56f   :  { %v18525_v61 = vpop.f32.mrb[218].mxu1  ;;  %19442 = vmatpush3.bf16.msra.mxu0 %v19441_v43  ;;  %18698 = vmatprep.mubr.msk.f32.mxu0 %vm19984_vm1, %v25501_v52 }
 0x570   :  { %v6091_v21 = vpop.f32.mrb[219].mxu1  ;;  %19443 = vmatprep.subr.bf16.mxu0 %v25500_v51 }
 0x571   :  { %v19444_v37 = vpack.c.bf16 %v18525_v61, %v6091_v21 }
 0x572   :  { %18699 = vmatmul.mubr.msk.f32.vlgmr.msra.gmra.mrb[240].mxu0 %vm5512_vm4, %v22604_v62 }
 0x573   :  { %v18528_v60 = vpop.f32.mrb[220].mxu1  ;;  %19445 = vmatpush3.bf16.msra.mxu0 %v19444_v37  ;;  %18705 = vmatprep.mubr.msk.f32.mxu0 %vm19984_vm1, %v25501_v52 }
 0x574   :  { %v6101_v35 = vpop.f32.mrb[221].mxu1  ;;  %19446 = vmatprep.subr.bf16.mxu0 %v25500_v51 }
 0x575   :  { %v19447_v17 = vpack.c.bf16 %v18528_v60, %v6101_v35 }
 0x576   :  { %18706 = vmatmul.mubr.msk.f32.vlgmr.msra.gmra.mrb[242].mxu0 %vm5512_vm4, %v22604_v62 }
 0x577   :  { %v18531_v29 = vpop.f32.mrb[222].mxu1  ;;  %19448 = vmatpush3.bf16.msra.mxu0 %v19447_v17  ;;  %18712 = vmatprep.mubr.msk.f32.mxu0 %vm19984_vm1, %v25501_v52 }
 0x578   :  { %v6111_v16 = vpop.f32.mrb[223].mxu1  ;;  %19449 = vmatprep.subr.bf16.mxu0 %v25500_v51 }
 0x579   :  { %v19450_v53 = vpack.c.bf16 %v18531_v29, %v6111_v16 }
 0x57a   :  { %18713 = vmatmul.mubr.msk.f32.vlgmr.msra.gmra.mrb[244].mxu0 %vm5512_vm4, %v22604_v62 }
 0x57b   :  { %v18534_v33 = vpop.f32.mrb[224].mxu1  ;;  %19451 = vmatpush3.bf16.msra.mxu0 %v19450_v53  ;;  %18719 = vmatprep.mubr.msk.f32.mxu0 %vm19984_vm1, %v25501_v52 }
 0x57c   :  { %v6121_v26 = vpop.f32.mrb[225].mxu1  ;;  %19452 = vmatprep.subr.bf16.mxu0 %v25500_v51 }
 0x57d   :  { %v19453_v63 = vpack.c.bf16 %v18534_v33, %v6121_v26 }
 0x57e   :  { %18720 = vmatmul.mubr.msk.f32.vlgmr.msra.gmra.mrb[246].mxu0 %vm5512_vm4, %v22604_v62 }
 0x57f   :  { %v18537_v59 = vpop.f32.mrb[226].mxu1  ;;  %19454 = vmatpush3.bf16.msra.mxu0 %v19453_v63  ;;  %18726 = vmatprep.mubr.msk.f32.mxu0 %vm19984_vm1, %v25501_v52 }
 0x580   :  { %v6131_v32 = vpop.f32.mrb[227].mxu1  ;;  %19455 = vmatprep.subr.bf16.mxu0 %v25500_v51 }
 0x581   :  { %v19456_v6 = vpack.c.bf16 %v18537_v59, %v6131_v32 }
 0x582   :  { %18727 = vmatmul.mubr.msk.f32.vlgmr.msra.gmra.mrb[248].mxu0 %vm5512_vm4, %v22604_v62 }
 0x583   :  { %v18540_v57 = vpop.f32.mrb[228].mxu1  ;;  %19457 = vmatpush3.bf16.msra.mxu0 %v19456_v6  ;;  %18733 = vmatprep.mubr.msk.f32.mxu0 %vm19984_vm1, %v25501_v52 }
 0x584   :  { %v6141_v56 = vpop.f32.mrb[229].mxu1  ;;  %19458 = vmatprep.subr.bf16.mxu0 %v25500_v51 }
 0x585   :  { %v19459_v58 = vpack.c.bf16 %v18540_v57, %v6141_v56  ;;  %v11718_v56 = vld [vmem:[%s25327_s10] sm:$0xff]  ;;  %s22881_s10 = spop %19511 }
 0x586   :  { %18734 = vmatmul.mubr.msk.f32.vlgmr.msra.gmra.mrb[250].mxu0 %vm5512_vm4, %v22604_v62  ;;  %18881 = vmatprep.subr.mxu1 %v11718_v56  ;;  %s22887_s21 = spop %19513 }
 0x587   :  { %v18543_v4 = vpop.f32.mrb[230].mxu1  ;;  %19460 = vmatpush3.bf16.msra.mxu0 %v19459_v58  ;;  %18740 = vmatprep.mubr.msk.f32.mxu0 %vm19984_vm1, %v25501_v52  ;;  %s19516_s16 = spop %19515  ;;  %s4290_s5 = smul.f32 0.00034435262, %s22887_s21 }
 0x588   :  { %v6151_v27 = vpop.f32.mrb[231].mxu1  ;;  %19461 = vmatprep.subr.bf16.mxu0 %v25500_v51  ;;  %18882 = vmatpush3.msra.mxu1 %v11718_v56  ;;  %s19518_s22 = spop %19517  ;;  %p5577_p10 = scmp.gt.f32.partialorder %s19516_s16, 128.0 }
 0x589   :  { %v19462_v5 = vpack.c.bf16 %v18543_v4, %v6151_v27  ;;  %18931 = vmatprep.subr.mxu1 %v25501_v52  ;;  %p5579_p11 = scmp.lt.f32.partialorder %s19518_s22, -0.5 }
 0x58a   :  { %18741 = vmatmul.mubr.msk.f32.vlgmr.msra.gmra.mrb[252].mxu0 %vm5512_vm4, %v22604_v62  ;;  %s5578_s2 = scalar_select %p5577_p10, 255.0, 1.0 }
 0x58b   :  { %v18546_v47 = vpop.f32.mrb[232].mxu1  ;;  %19463 = vmatpush3.bf16.msra.mxu0 %v19462_v5  ;;  %18747 = vmatprep.mubr.msk.f32.mxu0 %vm19984_vm1, %v25501_v52  ;;  %s5580_s20 = scalar_select %p5579_p11, -1.0, 0.0 }
 0x58c   :  { %v6161_v42 = vpop.f32.mrb[233].mxu1  ;;  %19464 = vmatprep.subr.bf16.mxu0 %v25500_v51 }
 0x58d   :  { %v19465_v41 = vpack.c.bf16 %v18546_v47, %v6161_v42  ;;  %s5581_s1 = ssub.f32 %s5578_s2, %s5580_s20 }
 0x58e   :  { %18748 = vmatmul.mubr.msk.f32.vlgmr.msra.gmra.mrb[254].mxu0 %vm5512_vm4, %v22604_v62 }
 0x58f   :  { %19466 = vmatpush3.bf16.msra.mxu0 %v19465_v41  ;;  %v18763_v15 = vpop.f32.mrb[234].mxu1  ;;  %18754 = vmatprep.mubr.msk.f32.mxu0 %vm19984_vm1, %v25501_v52  ;;  %s5582_s23 = smul.f32 0.01, %s5581_s1 }
 0x590   :  { %v8510_v9 = vpop.f32.mrb[235].mxu1  ;;  %19471 = vmatprep.subr.bf16.mxu0 %v25500_v51  ;;  %s5584_s6 = smul.f32 0.03, %s5581_s1 }
 0x591   :  { %v19472_v30 = vpack.c.bf16 %v18763_v15, %v8510_v9  ;;  %s5583_s25 = smul.f32 %s5582_s23, %s5582_s23 }
 0x592   :  { %18755 = vmatmul.mubr.msk.f32.vlgmr.msra.gmra.mrb[0].mxu0 %vm5512_vm4, %v22604_v62  ;;  %s5585_s7 = smul.f32 %s5584_s6, %s5584_s6 }
 0x593   :  { %19473 = vmatpush3.bf16.msra.mxu0 %v19472_v30  ;;  %18801 = vmatprep.mubr.msk.f32.mxu0 %vm19984_vm1, %v25501_v52  ;;  %v18766_v45 = vpop.f32.mrb[236].mxu1 }
 0x594   :  { %v8520_v40 = vpop.f32.mrb[237].mxu1  ;;  %19474 = vmatprep.subr.bf16.mxu0 %v25500_v51 }
 0x595   :  { %v19475_v19 = vpack.c.bf16 %v18766_v45, %v8520_v40 }
 0x596   :  { %18802 = vmatmul.mubr.msk.f32.vlgmr.msra.gmra.mrb[2].mxu0 %vm5512_vm4, %v22759_v7 }
 0x597   :  { %19476 = vmatpush3.bf16.msra.mxu0 %v19475_v19  ;;  %18808 = vmatprep.mubr.msk.f32.mxu0 %vm19984_vm1, %v25501_v52  ;;  %v18769_v62 = vpop.f32.mrb[238].mxu1 }
 0x598   :  { %v8530_v46 = vpop.f32.mrb[239].mxu1  ;;  %19477 = vmatprep.subr.bf16.mxu0 %v25500_v51 }
 0x599   :  { %v19478_v34 = vpack.c.bf16 %v18769_v62, %v8530_v46 }
 0x59a   :  { %18809 = vmatmul.mubr.msk.f32.vlgmr.msra.gmra.mrb[4].mxu0 %vm5512_vm4, %v22759_v7 }
 0x59b   :  { %19479 = vmatpush3.bf16.msra.mxu0 %v19478_v34  ;;  %v18772_v11 = vpop.f32.mrb[240].mxu1  ;;  %18815 = vmatprep.mubr.msk.f32.mxu0 %vm19984_vm1, %v25501_v52 }
 0x59c   :  { %v8540_v0 = vpop.f32.mrb[241].mxu1  ;;  %19480 = vmatprep.subr.bf16.mxu0 %v25500_v51 }
 0x59d   :  { %v19481_v38 = vpack.c.bf16 %v18772_v11, %v8540_v0 }
 0x59e   :  { %18816 = vmatmul.mubr.msk.f32.vlgmr.msra.gmra.mrb[6].mxu0 %vm5512_vm4, %v22759_v7 }
 0x59f   :  { %19482 = vmatpush3.bf16.msra.mxu0 %v19481_v38  ;;  %v18775_v8 = vpop.f32.mrb[242].mxu1  ;;  %18822 = vmatprep.mubr.msk.f32.mxu0 %vm19984_vm1, %v25501_v52 }
 0x5a0   :  { %v8550_v22 = vpop.f32.mrb[243].mxu1  ;;  %19483 = vmatprep.subr.bf16.mxu0 %v25500_v51 }
 0x5a1   :  { %v19484_v25 = vpack.c.bf16 %v18775_v8, %v8550_v22 }
 0x5a2   :  { %18823 = vmatmul.mubr.msk.f32.vlgmr.msra.gmra.mrb[8].mxu0 %vm5512_vm4, %v22759_v7 }
 0x5a3   :  { %19485 = vmatpush3.bf16.msra.mxu0 %v19484_v25  ;;  %v18778_v2 = vpop.f32.mrb[244].mxu1  ;;  %18829 = vmatprep.mubr.msk.f32.mxu0 %vm19984_vm1, %v25501_v52 }
 0x5a4   :  { %v8560_v54 = vpop.f32.mrb[245].mxu1  ;;  %19486 = vmatprep.subr.bf16.mxu0 %v25500_v51 }
 0x5a5   :  { %v19487_v55 = vpack.c.bf16 %v18778_v2, %v8560_v54 }
 0x5a6   :  { %18830 = vmatmul.mubr.msk.f32.vlgmr.msra.gmra.mrb[10].mxu0 %vm5512_vm4, %v22759_v7 }
 0x5a7   :  { %19488 = vmatpush3.bf16.msra.mxu0 %v19487_v55  ;;  %v18781_v49 = vpop.f32.mrb[246].mxu1  ;;  %18836 = vmatprep.mubr.msk.f32.mxu0 %vm19984_vm1, %v25501_v52 }
 0x5a8   :  { %v8570_v20 = vpop.f32.mrb[247].mxu1  ;;  %19489 = vmatprep.subr.bf16.mxu0 %v25500_v51 }
 0x5a9   :  { %v19490_v28 = vpack.c.bf16 %v18781_v49, %v8570_v20 }
 0x5aa   :  { %18837 = vmatmul.mubr.msk.f32.vlgmr.msra.gmra.mrb[12].mxu0 %vm5512_vm4, %v22759_v7 }
 0x5ab   :  { %19491 = vmatpush3.bf16.msra.mxu0 %v19490_v28  ;;  %v18784_v13 = vpop.f32.mrb[248].mxu1  ;;  %18843 = vmatprep.mubr.msk.f32.mxu0 %vm19984_vm1, %v25501_v52 }
 0x5ac   :  { %v8580_v44 = vpop.f32.mrb[249].mxu1  ;;  %19492 = vmatprep.subr.bf16.mxu0 %v25500_v51 }
 0x5ad   :  { %v19493_v1 = vpack.c.bf16 %v18784_v13, %v8580_v44 }
 0x5ae   :  { %18844 = vmatmul.mubr.msk.f32.vlgmr.msra.gmra.mrb[14].mxu0 %vm5512_vm4, %v22759_v7 }
 0x5af   :  { %19494 = vmatpush3.bf16.msra.mxu0 %v19493_v1  ;;  %v18787_v3 = vpop.f32.mrb[250].mxu1  ;;  %18850 = vmatprep.mubr.msk.f32.mxu0 %vm19984_vm1, %v25501_v52 }
 0x5b0   :  { %v8590_v36 = vpop.f32.mrb[251].mxu1  ;;  %19495 = vmatprep.subr.bf16.mxu0 %v25500_v51 }
 0x5b1   :  { %v19496_v18 = vpack.c.bf16 %v18787_v3, %v8590_v36 }
 0x5b2   :  { %18851 = vmatmul.mubr.msk.f32.vlgmr.msra.gmra.mrb[16].mxu0 %vm5512_vm4, %v22759_v7 }
 0x5b3   :  { %19497 = vmatpush3.bf16.msra.mxu0 %v19496_v18  ;;  %v18790_v23 = vpop.f32.mrb[252].mxu1  ;;  %18857 = vmatprep.mubr.msk.f32.mxu0 %vm19984_vm1, %v25501_v52 }
 0x5b4   :  { %v8600_v12 = vpop.f32.mrb[253].mxu1  ;;  %19498 = vmatprep.subr.bf16.mxu0 %v25500_v51 }
 0x5b5   :  { %v19499_v24 = vpack.c.bf16 %v18790_v23, %v8600_v12 }
 0x5b6   :  { %18858 = vmatmul.mubr.msk.f32.vlgmr.msra.gmra.mrb[18].mxu0 %vm5512_vm4, %v22759_v7 }
 0x5b7   :  { %19500 = vmatpush3.bf16.msra.mxu0 %v19499_v24  ;;  %v18793_v39 = vpop.f32.mrb[254].mxu1  ;;  %18864 = vmatprep.mubr.msk.f32.mxu0 %vm19984_vm1, %v25501_v52 }
 0x5b8   :  { %v8610_v14 = vpop.f32.mrb[255].mxu1  ;;  %19501 = vmatprep.subr.bf16.mxu0 %v25500_v51 }
 0x5b9   :  { %v19502_v48 = vpack.c.bf16 %v18793_v39, %v8610_v14 }
 0x5ba   :  { %18865 = vmatmul.mubr.msk.f32.vlgmr.msra.gmra.mrb[20].mxu0 %vm5512_vm4, %v22759_v7 }
 0x5bb   :  { %19503 = vmatpush3.bf16.msra.mxu0 %v19502_v48  ;;  %v18796_v50 = vpop.f32.mrb[0].mxu1  ;;  %18871 = vmatprep.mubr.msk.f32.mxu0 %vm19984_vm1, %v25501_v52 }
 0x5bc   :  { %v8620_v31 = vpop.f32.mrb[1].mxu1  ;;  %19504 = vmatprep.subr.bf16.mxu0 %v25500_v51 }
 0x5bd   :  { %v19505_v10 = vpack.c.bf16 %v18796_v50, %v8620_v31 }
 0x5be   :  { %18872 = vmatmul.mubr.msk.f32.vlgmr.msra.gmra.mrb[22].mxu0 %vm5512_vm4, %v22759_v7 }
 0x5bf   :  { %19506 = vmatpush3.bf16.msra.mxu0 %v19505_v10  ;;  %18878 = vmatprep.mubr.msk.f32.mxu0 %vm19984_vm1, %v25501_v52 }
 0x5c0   :  { %18901 = vmatprep.subr.mxu0 %v25501_v52 }
 0x5c2   :  { %18879 = vmatmul.mubr.msk.f32.vlgmr.msra.gmra.mrb[24].mxu0 %vm5512_vm4, %v22759_v7 }
 0x5c3   :  { %18903 = vmatprep.mubr.msk.f32.mxu0 %vm19984_vm1, %v25501_v52 }
 0x5c5   :  { %v6239_v43 = vpop.f32.mrb[198].mxu0 }
 0x5c6   :  { %v18553_v61 = vpop.f32.mrb[199].mxu0  ;;  %v22821_v63 = vmul.f32 %v6239_v43, %v6239_v43 }
 0x5cd   :  { %v6309_v21 = vpop.f32.mrb[200].mxu0 }
 0x5ce   :  { %v18560_v51 = vpop.f32.mrb[201].mxu0  ;;  %v22834_v4 = vmul.f32 %v6309_v21, %v6309_v21 }
 0x5d5   :  { %v6379_v37 = vpop.f32.mrb[202].mxu0 }
 0x5d6   :  { %v18567_v60 = vpop.f32.mrb[203].mxu0  ;;  %v22845_v15 = vmul.f32 %v6379_v37, %v6379_v37 }
 0x5dd   :  { %v6449_v35 = vpop.f32.mrb[204].mxu0 }
 0x5de   :  { %v18574_v17 = vpop.f32.mrb[205].mxu0  ;;  %v22855_v19 = vmul.f32 %v6449_v35, %v6449_v35 }
 0x5e5   :  { %v6519_v29 = vpop.f32.mrb[206].mxu0 }
 0x5e6   :  { %v18581_v16 = vpop.f32.mrb[207].mxu0  ;;  %v22865_v38 = vmul.f32 %v6519_v29, %v6519_v29 }
 0x5e7   :  { %v22898_v16 = vstv %s5583_s25 }
 0x5ed   :  { %v6589_v53 = vpop.f32.mrb[208].mxu0 }
 0x5ee   :  { %v18588_v33 = vpop.f32.mrb[209].mxu0  ;;  %v22875_v55 = vmul.f32 %v6589_v53, %v6589_v53 }
 0x5f5   :  { %v6659_v26 = vpop.f32.mrb[210].mxu0 }
 0x5f6   :  { %v22823_v59 = vmul.f32 %v6659_v26, %v6659_v26  ;;  %v22825_v32 = vmul.f32 %v6659_v26, %v6239_v43  ;;  %v18595_v6 = vpop.f32.mrb[211].mxu0 }
 0x5f8   :  { %v22829_v57 = vadd.f32 %v22823_v59, %v22821_v63 }
 0x5fa   :  { %v8371_v33 = vadd.f32 %v22829_v57, %v22898_v16 }
 0x5fd   :  { %v6729_v58 = vpop.f32.mrb[212].mxu0 }
 0x5fe   :  { %v22836_v27 = vmul.f32 %v6729_v58, %v6729_v58  ;;  %v22838_v5 = vmul.f32 %v6729_v58, %v6309_v21  ;;  %v18602_v47 = vpop.f32.mrb[213].mxu0 }
 0x600   :  { %v22843_v42 = vadd.f32 %v22836_v27, %v22834_v4 }
 0x605   :  { %v6799_v41 = vpop.f32.mrb[214].mxu0 }
 0x606   :  { %v22847_v9 = vmul.f32 %v6799_v41, %v6799_v41  ;;  %v22849_v30 = vmul.f32 %v6799_v41, %v6379_v37  ;;  %v18609_v7 = vpop.f32.mrb[215].mxu0 }
 0x608   :  { %v22853_v45 = vadd.f32 %v22847_v9, %v22845_v15 }
 0x60a   :  { %v8373_v57 = vadd.f32 %v22853_v45, %v22898_v16 }
 0x60d   :  { %v6869_v40 = vpop.f32.mrb[216].mxu0 }
 0x60e   :  { %v22857_v62 = vmul.f32 %v6869_v40, %v6869_v40  ;;  %v22859_v46 = vmul.f32 %v6869_v40, %v6449_v35  ;;  %v18616_v34 = vpop.f32.mrb[217].mxu0 }
 0x610   :  { %v22863_v11 = vadd.f32 %v22857_v62, %v22855_v19 }
 0x615   :  { %v6939_v0 = vpop.f32.mrb[218].mxu0 }
 0x616   :  { %v22867_v8 = vmul.f32 %v6939_v0, %v6939_v0  ;;  %v22869_v22 = vmul.f32 %v6939_v0, %v6519_v29  ;;  %v18623_v25 = vpop.f32.mrb[219].mxu0  ;;  %v22896_v29 = vstv %s5585_s7 }
 0x618   :  { %v22873_v2 = vadd.f32 %v22867_v8, %v22865_v38 }
 0x61d   :  { %v7009_v54 = vpop.f32.mrb[220].mxu0 }
 0x61e   :  { %v22877_v49 = vmul.f32 %v7009_v54, %v7009_v54  ;;  %v22879_v20 = vmul.f32 %v7009_v54, %v6589_v53  ;;  %v18630_v28 = vpop.f32.mrb[221].mxu0 }
 0x620   :  { %v22885_v13 = vadd.f32 %v22877_v49, %v22875_v55 }
 0x621   :  { %v7079_v44 = vpop.f32.mrb[222].mxu0 }
 0x622   :  { %v8291_v1 = vsub.f32 %v7079_v44, %v22821_v63  ;;  %v18637_v3 = vpop.f32.mrb[223].mxu0 }
 0x623   :  { %v8375_v3 = vadd.f32 %v22873_v2, %v22898_v16 }
 0x625   :  { %v7149_v36 = vpop.f32.mrb[224].mxu0 }
 0x626   :  { %v8292_v18 = vsub.f32 %v7149_v36, %v22834_v4  ;;  %v18644_v23 = vpop.f32.mrb[225].mxu0 }
 0x629   :  { %v7219_v12 = vpop.f32.mrb[226].mxu0 }
 0x62a   :  { %v8293_v24 = vsub.f32 %v7219_v12, %v22845_v15  ;;  %v18651_v39 = vpop.f32.mrb[227].mxu0 }
 0x62d   :  { %v7289_v14 = vpop.f32.mrb[228].mxu0 }
 0x62e   :  { %v8294_v48 = vsub.f32 %v7289_v14, %v22855_v19  ;;  %v18658_v50 = vpop.f32.mrb[229].mxu0 }
 0x631   :  { %v7359_v31 = vpop.f32.mrb[230].mxu0 }
 0x632   :  { %v8295_v10 = vsub.f32 %v7359_v31, %v22865_v38  ;;  %v18665_v43 = vpop.f32.mrb[231].mxu0 }
 0x635   :  { %v7429_v61 = vpop.f32.mrb[232].mxu0 }
 0x636   :  { %v8296_v21 = vsub.f32 %v7429_v61, %v22875_v55  ;;  %v18672_v51 = vpop.f32.mrb[233].mxu0 }
 0x639   :  { %v7499_v37 = vpop.f32.mrb[234].mxu0 }
 0x63a   :  { %v8297_v60 = vsub.f32 %v7499_v37, %v22823_v59  ;;  %v18679_v35 = vpop.f32.mrb[235].mxu0  ;;  %v8372_v59 = vadd.f32 %v22843_v42, %v22898_v16  ;;  %v8374_v42 = vadd.f32 %v22863_v11, %v22898_v16 }
 0x63b   :  { %v8348_v35 = vmul.f32 2.0, %v22849_v30 }
 0x63c   :  { %v8322_v17 = vadd.f32 %v8297_v60, %v8291_v1 }
 0x63d   :  { %v7569_v53 = vpop.f32.mrb[236].mxu0 }
 0x63e   :  { %v8328_v26 = vadd.f32 %v8322_v17, %v22896_v29  ;;  %v8298_v63 = vsub.f32 %v7569_v53, %v22836_v27  ;;  %v18686_v6 = vpop.f32.mrb[237].mxu0 }
 0x640   :  { %v8377_v56 = vmul.f32 %v8371_v33, %v8328_v26  ;;  %v8323_v58 = vadd.f32 %v8298_v63, %v8292_v18  ;;  %19639 = vrcp.f32 %v8328_v26 }
 0x641   :  { %v7639_v4 = vpop.f32.mrb[238].mxu0 }
 0x642   :  { %v8329_v47 = vadd.f32 %v8323_v58, %v22896_v29  ;;  %v8299_v41 = vsub.f32 %v7639_v4, %v22847_v9  ;;  %v18693_v15 = vpop.f32.mrb[239].mxu0  ;;  %19641 = vrcp.f32 %v8377_v56 }
 0x644   :  { %v8378_v7 = vmul.f32 %v8372_v59, %v8329_v47  ;;  %v8324_v40 = vadd.f32 %v8299_v41, %v8293_v24  ;;  %19643 = vrcp.f32 %v8329_v47  ;;  %v8376_v24 = vadd.f32 %v22885_v13, %v22898_v16 }
 0x645   :  { %v7709_v19 = vpop.f32.mrb[240].mxu0  ;;  %v8355_v47 = vadd.f32 %v22898_v16, %v8348_v35  ;;  %v8349_v41 = vmul.f32 2.0, %v22859_v46 }
 0x646   :  { %v8330_v27 = vadd.f32 %v8324_v40, %v22896_v29  ;;  %v8300_v34 = vsub.f32 %v7709_v19, %v22857_v62  ;;  %v18700_v0 = vpop.f32.mrb[241].mxu0  ;;  %19645 = vrcp.f32 %v8378_v7 }
 0x648   :  { %v8379_v38 = vmul.f32 %v8373_v57, %v8330_v27  ;;  %v8325_v25 = vadd.f32 %v8300_v34, %v8294_v48  ;;  %19647 = vrcp.f32 %v8330_v27 }
 0x649   :  { %v7779_v54 = vpop.f32.mrb[242].mxu0 }
 0x64a   :  { %v8331_v9 = vadd.f32 %v8325_v25, %v22896_v29  ;;  %v8301_v55 = vsub.f32 %v7779_v54, %v22867_v8  ;;  %v18707_v28 = vpop.f32.mrb[243].mxu0  ;;  %v8346_v8 = vmul.f32 2.0, %v22825_v32  ;;  %v19640_v13 = vpop.eup %19639  ;;  %19649 = vrcp.f32 %v8379_v38 }
 0x64b   :  { %v8356_v28 = vadd.f32 %v22898_v16, %v8349_v41 }
 0x64c   :  { %v8380_v44 = vmul.f32 %v8374_v42, %v8331_v9  ;;  %v8326_v1 = vadd.f32 %v8301_v55, %v8295_v10  ;;  %v8353_v31 = vadd.f32 %v22898_v16, %v8346_v8  ;;  %v8347_v10 = vmul.f32 2.0, %v22838_v5  ;;  %v19642_v60 = vpop.eup %19641 }
 0x64d   :  { %v7849_v45 = vpop.f32.mrb[244].mxu0  ;;  %19651 = vrcp.f32 %v8331_v9 }
 0x64e   :  { %v8332_v62 = vadd.f32 %v8326_v1, %v22896_v29  ;;  %v8302_v36 = vsub.f32 %v7849_v45, %v22877_v49  ;;  %v18714_v18 = vpop.f32.mrb[245].mxu0  ;;  %v8354_v53 = vadd.f32 %v22898_v16, %v8347_v10  ;;  %v19644_v6 = vpop.eup %19643  ;;  %19653 = vrcp.f32 %v8380_v44 }
 0x64f   :  { %v8350_v44 = vmul.f32 2.0, %v22869_v22 }
 0x650   :  { %v8381_v23 = vmul.f32 %v8375_v3, %v8332_v62  ;;  %v8327_v11 = vadd.f32 %v8302_v36, %v8296_v21  ;;  %v19646_v59 = vpop.eup %19645  ;;  %19655 = vrcp.f32 %v8332_v62 }
 0x651   :  { %v7919_v12 = vpop.f32.mrb[246].mxu0 }
 0x652   :  { %v8333_v39 = vadd.f32 %v8327_v11, %v22896_v29  ;;  %v8303_v14 = vsub.f32 %v7919_v12, %v22825_v32  ;;  %v18721_v2 = vpop.f32.mrb[247].mxu0  ;;  %v19648_v34 = vpop.eup %19647  ;;  %19657 = vrcp.f32 %v8381_v23 }
 0x654   :  { %v8382_v48 = vmul.f32 %v8376_v24, %v8333_v39  ;;  %v8309_v50 = vmul.f32 2.0, %v8303_v14  ;;  %v19650_v55 = vpop.eup %19649  ;;  %19659 = vrcp.f32 %v8333_v39  ;;  %v8357_v39 = vadd.f32 %v22898_v16, %v8350_v44 }
 0x655   :  { %v7989_v49 = vpop.f32.mrb[248].mxu0 }
 0x656   :  { %v8316_v43 = vadd.f32 %v22896_v29, %v8309_v50  ;;  %v8304_v61 = vsub.f32 %v7989_v49, %v22838_v5  ;;  %v18728_v21 = vpop.f32.mrb[249].mxu0  ;;  %19661 = vrcp.f32 %v8382_v48  ;;  %v8351_v50 = vmul.f32 2.0, %v22879_v20 }
 0x657   :  { %v19652_v23 = vpop.eup %19651 }
 0x658   :  { %v8335_v51 = vmul.f32 %v19640_v13, %v8316_v43  ;;  %v8359_v37 = vmul.f32 %v8353_v31, %v8316_v43  ;;  %v8310_v32 = vmul.f32 2.0, %v8304_v61  ;;  %v19654_v2 = vpop.eup %19653 }
 0x659   :  { %v8059_v17 = vpop.f32.mrb[250].mxu0 }
 0x65a   :  { %v8384_v33 = vmul.f32 %v19642_v60, %v8359_v37  ;;  %v8317_v26 = vadd.f32 %v22896_v29, %v8310_v32  ;;  %v8305_v63 = vsub.f32 %v8059_v17, %v22849_v30  ;;  %v18735_v5 = vpop.f32.mrb[251].mxu0  ;;  %v8417_v15 = vsel %vm8395_vm5, %v8335_v51, 0.0  ;;  %v19656_v21 = vpop.eup %19655 }
 0x65c   :  { %v8337_v56 = vmul.f32 %v19644_v6, %v8317_v26  ;;  %v8360_v58 = vmul.f32 %v8354_v53, %v8317_v26  ;;  %v8311_v4 = vmul.f32 2.0, %v8305_v63  ;;  %v8396_v0 = vsel %vm8395_vm5, %v8384_v33, 0.0  ;;  %v19658_v35 = vpop.eup %19657 }
 0x65d   :  { %v8129_v7 = vpop.f32.mrb[252].mxu0  ;;  %v8358_v33 = vadd.f32 %v22898_v16, %v8351_v50 }
 0x65e   :  { %v8386_v40 = vmul.f32 %v19646_v59, %v8360_v58  ;;  %v8418_v19 = vsel %vm8395_vm5, %v8337_v56, 0.0  ;;  %v8318_v30 = vadd.f32 %v22896_v29, %v8311_v4  ;;  %v8306_v57 = vsub.f32 %v8129_v7, %v22859_v46  ;;  %v18742_v27 = vpop.f32.mrb[253].mxu0  ;;  %v19660_v5 = vpop.eup %19659 }
 0x65f   :  { %v8419_v38 = vadd.f32 %v8418_v19, %v8417_v15 }
 0x660   :  { %v8397_v25 = vsel %vm8395_vm5, %v8386_v40, 0.0  ;;  %v8339_v54 = vmul.f32 %v19648_v34, %v8318_v30  ;;  %v8361_v42 = vmul.f32 %v8355_v47, %v8318_v30  ;;  %v8312_v9 = vmul.f32 2.0, %v8306_v57  ;;  %v19662_v59 = vpop.eup %19661 }
 0x661   :  { %v8199_v1 = vpop.f32.mrb[254].mxu0  ;;  %v8398_v45 = vadd.f32 %v8397_v25, %v8396_v0 }
 0x662   :  { %v8388_v46 = vmul.f32 %v19650_v55, %v8361_v42  ;;  %v8420_v3 = vsel %vm8395_vm5, %v8339_v54, 0.0  ;;  %v8319_v62 = vadd.f32 %v22896_v29, %v8312_v9  ;;  %v8307_v36 = vsub.f32 %v8199_v1, %v22869_v22  ;;  %v18749_v18 = vpop.f32.mrb[255].mxu0 }
 0x663   :  { %v8421_v11 = vadd.f32 %v8420_v3, %v8419_v38 }
 0x664   :  { %v8341_v12 = vmul.f32 %v19652_v23, %v8319_v62  ;;  %v8362_v8 = vmul.f32 %v8356_v28, %v8319_v62  ;;  %v8313_v24 = vmul.f32 2.0, %v8307_v36  ;;  %v8399_v14 = vsel %vm8395_vm5, %v8388_v46, 0.0 }
 0x665   :  { %v8269_v49 = vpop.f32.mrb[0].mxu0  ;;  %v8400_v31 = vadd.f32 %v8399_v14, %v8398_v45 }
 0x666   :  { %v8390_v10 = vmul.f32 %v19654_v2, %v8362_v8  ;;  %v8320_v43 = vadd.f32 %v22896_v29, %v8313_v24  ;;  %v8308_v22 = vsub.f32 %v8269_v49, %v22879_v20  ;;  %v18756_v61 = vpop.f32.mrb[1].mxu0  ;;  %v8422_v48 = vsel %vm8395_vm5, %v8341_v12, 0.0 }
 0x667   :  { %v8423_v13 = vadd.f32 %v8422_v48, %v8421_v11 }
 0x668   :  { %v8343_v51 = vmul.f32 %v19656_v21, %v8320_v43  ;;  %v8363_v37 = vmul.f32 %v8357_v39, %v8320_v43  ;;  %v8314_v32 = vmul.f32 2.0, %v8308_v22  ;;  %v8401_v60 = vsel %vm8395_vm5, %v8390_v10, 0.0 }
 0x669   :  { %v22953_v17 = vpop.f32.mrb[2].mxu0  ;;  %v8402_v53 = vadd.f32 %v8401_v60, %v8400_v31 }
 0x66a   :  { %v8321_v26 = vadd.f32 %v22896_v29, %v8314_v32  ;;  %v9570_v20 = vmul.f32 0.03635177, %v22953_v17  ;;  %v10110_v63 = vmul.f32 0.26860526, %v22953_v17  ;;  %18883 = vmatprep.mubr.msk.f32.mxu1 %vm9472_vm6, %v22953_v17  ;;  %v18803_v6 = vpop.f32.mrb[3].mxu0  ;;  %v8424_v56 = vsel %vm8395_vm5, %v8343_v51, 0.0 }
 0x66b   :  { %v8392_v58 = vmul.f32 %v19658_v35, %v8363_v37  ;;  %v8425_v16 = vadd.f32 %v8424_v56, %v8423_v13  ;;  %v9750_v15 = vmul.f32 0.110426925, %v22953_v17  ;;  %v22970_v7 = vmul.f32 %v22953_v17, %v22953_v17 }
 0x66c   :  { %v8364_v4 = vmul.f32 %v8358_v33, %v8321_v26  ;;  %9630 = vrot.lane.b32.xlu0 %v9570_v20, %s19986_s26  ;;  %10170 = vrot.lane.b32.xlu1 %v10110_v63, %s19987_s30  ;;  %v8345_v29 = vmul.f32 %v19660_v5, %v8321_v26  ;;  %v9930_v38 = vmul.f32 0.21508227, %v22953_v17  ;;  %v9493_v62 = vsel %vm9472_vm6, %v22953_v17, inf }
 0x66d   :  { %v22964_v47 = vpop.f32.mrb[4].mxu0  ;;  %v8403_v41 = vsel %vm8395_vm5, %v8392_v58, 0.0  ;;  %v9942_v25 = vmul.f32 0.21508227, %v22970_v7  ;;  %v9473_v12 = vsel %vm9472_vm6, %v22953_v17, -inf }
 0x66e   :  { %18884 = vmatmul.mubr.msk.f32.vlgmr.msra.gmra.mrb[2].mxu1 %vm9472_vm6, %v22964_v47  ;;  %v8394_v40 = vmul.f32 %v19662_v59, %v8364_v4  ;;  %v8426_v19 = vsel %vm8395_vm5, %v8345_v29, 0.0  ;;  %v8404_v30 = vadd.f32 %v8403_v41, %v8402_v53  ;;  %v18810_v57 = vpop.f32.mrb[5].mxu0  ;;  %v9571_v28 = vmul.f32 0.03635177, %v22964_v47 }
 0x66f   :  { %v22977_v27 = vadd.f32 %v8426_v19, %v8425_v16  ;;  %v9582_v14 = vmul.f32 0.03635177, %v22970_v7  ;;  %v9751_v50 = vmul.f32 0.110426925, %v22964_v47  ;;  %v9494_v31 = vsel %vm9472_vm6, %v22964_v47, inf }
 0x670   :  { %9810 = vrot.lane.b32.xlu0 %v9750_v15, %s19988_s27  ;;  %10410 = vrot.lane.b32.xlu1 %v9750_v15, %s19989_s29  ;;  %v8405_v34 = vsel %vm8395_vm5, %v8394_v40, 0.0  ;;  %v9474_v22 = vsel %vm9472_vm6, %v22964_v47, -inf  ;;  %v9762_v51 = vmul.f32 0.110426925, %v22970_v7  ;;  %v9931_v37 = vmul.f32 0.21508227, %v22964_v47 }
 0x671   :  { %v22980_v0 = vpop.f32.mrb[6].mxu0  ;;  %v22984_v54 = vadd.f32 %v8405_v34, %v8404_v30  ;;  %v10111_v41 = vmul.f32 0.26860526, %v22964_v47  ;;  %v23095_v30 = vmul.f32 %v22964_v47, %v22964_v47 }
 0x672   :  { %18886 = vmatprep.mubr.msk.f32.mxu1 %vm9472_vm6, %v22980_v0  ;;  %v18817_v42 = vpop.f32.mrb[7].mxu0  ;;  %v9495_v55 = vsel %vm9472_vm6, %v22980_v0, inf  ;;  %v9475_v23 = vsel %vm9472_vm6, %v22980_v0, -inf }
 0x673   :  { %v9763_v42 = vmul.f32 0.110426925, %v23095_v30 }
 0x674   :  { %9990 = vrot.lane.b32.xlu0 %v9930_v38, %s19990_s0  ;;  %10014 = vrot.lane.b32.xlu1 %v9942_v25, %s19990_s0 }
 0x675   :  { %v22990_v9 = vpop.f32.mrb[8].mxu0 }
 0x676   :  { %18887 = vmatmul.mubr.msk.f32.gmra.mrb[4].mxu1 %vm9472_vm6, %v22990_v9  ;;  %v18824_v44 = vpop.f32.mrb[9].mxu0  ;;  %v9496_v1 = vsel %vm9472_vm6, %v22990_v9, inf  ;;  %v9476_v11 = vsel %vm9472_vm6, %v22990_v9, -inf }
 0x677   :  { %v9502_v46 = vmin.f32 %v9495_v55, %v9496_v1  ;;  %v9482_v24 = vmax.f32 %v9475_v23, %v9476_v11  ;;  %v10123_v55 = vmul.f32 0.26860526, %v23095_v30  ;;  %v23126_v44 = vmul.f32 %v22980_v0, %v22980_v0 }
 0x678   :  { %10290 = vrot.lane.b32.xlu0 %v9930_v38, %s19991_s28  ;;  %10314 = vrot.lane.b32.xlu1 %v9942_v25, %s19991_s28  ;;  %v9943_v38 = vmul.f32 0.21508227, %v23095_v30  ;;  %v9583_v25 = vmul.f32 0.03635177, %v23095_v30  ;;  %v23142_v23 = vmul.f32 0.110426925, %v22990_v9 }
 0x679   :  { %v23001_v45 = vpop.f32.mrb[10].mxu0  ;;  %v10124_v1 = vmul.f32 0.26860526, %v23126_v44 }
 0x67a   :  { %v18831_v3 = vpop.f32.mrb[11].mxu0  ;;  %v9497_v36 = vsel %vm9472_vm6, %v23001_v45, inf  ;;  %18889 = vmatprep.mubr.msk.f32.mxu1 %vm9472_vm6, %v23001_v45  ;;  %v9477_v8 = vsel %vm9472_vm6, %v23001_v45, -inf }
 0x67b   :  { %v9498_v18 = vmin.f32 %v9493_v62, %v9497_v36  ;;  %v9478_v39 = vmax.f32 %v9473_v12, %v9477_v8  ;;  %v23135_v3 = vmul.f32 0.03635177, %v22990_v9  ;;  %v9540_v36 = vmul.f32 0.0076728435, %v22953_v17 }
 0x67c   :  { %10530 = vrot.lane.b32.xlu0 %v9570_v20, %s19992_s15  ;;  %9632 = vrot.lane.b32.xlu1 %v9571_v28, %s19986_s26  ;;  %v10122_v20 = vmul.f32 0.26860526, %v22970_v7 }
 0x67d   :  { %v23020_v2 = vpop.f32.mrb[12].mxu0 }
 0x67e   :  { %v18838_v49 = vpop.f32.mrb[13].mxu0  ;;  %v9499_v10 = vsel %vm9472_vm6, %v23020_v2, inf  ;;  %18890 = vmatmul.mubr.msk.f32.gmra.mrb[6].mxu1 %vm9472_vm6, %v23020_v2  ;;  %v9479_v61 = vsel %vm9472_vm6, %v23020_v2, -inf }
 0x67f   :  { %v9500_v43 = vmin.f32 %v9494_v31, %v9499_v10  ;;  %v9480_v48 = vmax.f32 %v9474_v22, %v9479_v61  ;;  %v10113_v31 = vmul.f32 0.26860526, %v22990_v9  ;;  %v9764_v10 = vmul.f32 0.110426925, %v23126_v44 }
 0x680   :  { %9654 = vrot.lane.b32.xlu0 %v9582_v14, %s19986_s26  ;;  %9812 = vrot.lane.b32.xlu1 %v9751_v50, %s19988_s27 }
 0x681   :  { %v23035_v21 = vpop.f32.mrb[14].mxu0  ;;  %v9501_v13 = vmin.f32 %v9498_v18, %v9500_v43  ;;  %v9481_v53 = vmax.f32 %v9478_v39, %v9480_v48  ;;  %v9584_v39 = vmul.f32 0.03635177, %v23126_v44  ;;  %v23155_v43 = vmul.f32 %v22990_v9, %v22990_v9 }
 0x682   :  { %v23041_v32 = vmul.f32 %v23035_v21, %v22953_v17  ;;  %18892 = vmatprep.mubr.msk.f32.mxu1 %vm9472_vm6, %v23035_v21  ;;  %v18845_v35 = vpop.f32.mrb[15].mxu0 }
 0x683   :  { %v23045_v60 = vmin.f32 %v9501_v13, %v9502_v46  ;;  %v23051_v26 = vmax.f32 %v9481_v53, %v9482_v24  ;;  %v10112_v46 = vmul.f32 0.26860526, %v22980_v0 }
 0x684   :  { %9834 = vrot.lane.b32.xlu0 %v9762_v51, %s19988_s27  ;;  %9992 = vrot.lane.b32.xlu1 %v9931_v37, %s19990_s0 }
 0x685   :  { %v23049_v33 = vpop.f32.mrb[16].mxu0 }
 0x686   :  { %v23056_v63 = vmul.f32 %v23049_v33, %v22964_v47  ;;  %18893 = vmatmul.mubr.msk.f32.gmra.mrb[8].mxu1 %vm9472_vm6, %v23049_v33  ;;  %v18852_v5 = vpop.f32.mrb[17].mxu0 }
 0x687   :  { %v23169_v5 = vmul.f32 0.110426925, %v23155_v43 }
 0x688   :  { %10194 = vrot.lane.b32.xlu0 %v10122_v20, %s19987_s30  ;;  %10292 = vrot.lane.b32.xlu1 %v9931_v37, %s19991_s28  ;;  %v9944_v37 = vmul.f32 0.21508227, %v23126_v44 }
 0x689   :  { %v23062_v6 = vpop.f32.mrb[18].mxu0 }
 0x68a   :  { %v23066_v56 = vmul.f32 %v23062_v6, %v22980_v0  ;;  %v18859_v58 = vpop.f32.mrb[19].mxu0  ;;  %18895 = vmatprep.mubr.msk.f32.mxu1 %vm9472_vm6, %v23062_v6 }
 0x68b   :  { %v9552_v58 = vmul.f32 0.0076728435, %v22970_v7 }
 0x68c   :  { %10434 = vrot.lane.b32.xlu0 %v9762_v51, %s19989_s29  ;;  %10532 = vrot.lane.b32.xlu1 %v9571_v28, %s19992_s15  ;;  %v9932_v28 = vmul.f32 0.21508227, %v22980_v0  ;;  %v23160_v51 = vmul.f32 0.03635177, %v23155_v43 }
 0x68d   :  { %v23072_v4 = vpop.f32.mrb[20].mxu0 }
 0x68e   :  { %v23076_v29 = vmul.f32 %v23072_v4, %v22990_v9  ;;  %18896 = vmatmul.mubr.msk.f32.gmra.mrb[10].mxu1 %vm9472_vm6, %v23072_v4  ;;  %v18866_v16 = vpop.f32.mrb[21].mxu0 }
 0x68f   :  { %v23177_v16 = vmul.f32 %v23001_v45, %v23001_v45 }
 0x690   :  { %25502 = vst [vmem:[#allocation49_spill] sm:$0xff] %v23076_v29  ;;  %10554 = vrot.lane.b32.xlu0 %v9582_v14, %s19992_s15  ;;  %v9933_v14 = vmul.f32 0.21508227, %v22990_v9 }
 0x691   :  { %v23081_v59 = vpop.f32.mrb[22].mxu0  ;;  %v23184_v7 = vmul.f32 0.03635177, %v23177_v16 }
 0x692   :  { %25503 = vst [vmem:[#allocation21_spill] sm:$0xff] %v23081_v59  ;;  %v23086_v15 = vmul.f32 %v23081_v59, %v23001_v45  ;;  %v18873_v40 = vpop.f32.mrb[23].mxu0  ;;  %18898 = vmatprep.mubr.msk.f32.mxu1 %vm9472_vm6, %v23081_v59 }
 0x694   :  { %25504 = vst [vmem:[#allocation23_spill] sm:$0xff] %v23086_v15  ;;  %10172 = vrot.lane.b32.xlu0 %v10111_v41, %s19987_s30 }
 0x695   :  { %v23091_v19 = vpop.f32.mrb[24].mxu0 }
 0x696   :  { %v23099_v57 = vmul.f32 %v23091_v19, %v23020_v2  ;;  %18899 = vmatmul.mubr.msk.f32.gmra.mrb[12].mxu1 %vm9472_vm6, %v23091_v19  ;;  %v18880_v34 = vpop.f32.mrb[25].mxu0 }
 0x697   :  { %18933 = vmatprep.mubr.msk.f32.mxu1 %vm19984_vm1, %v25501_v52 }
 0x698   :  { %25505 = vst [vmem:[#allocation25_spill] sm:$0xff] %v23099_v57  ;;  %10412 = vrot.lane.b32.xlu0 %v9751_v50, %s19989_s29 }
 0x69c   :  { %10016 = vrot.lane.b32.xlu0 %v9943_v38, %s19990_s0 }
 0x6a0   :  { %10316 = vrot.lane.b32.xlu0 %v9943_v38, %s19991_s28 }
 0x6b0   :  { %8428 = vadd.xlane.f32.xlu1 %v22977_v27  ;;  %v9572_v27 = vmul.f32 0.03635177, %v22980_v0 }
 0x6bf   :  { %8407 = vadd.xlane.f32.xlu0 %v22984_v54  ;;  %v9752_v54 = vmul.f32 0.110426925, %v22980_v0 }
 0x6c1   :  { %9656 = vrot.lane.b32.xlu1 %v9583_v25, %s19986_s26 }
 0x6c5   :  { %9836 = vrot.lane.b32.xlu1 %v9763_v42, %s19988_s27 }
 0x6c9   :  { %10196 = vrot.lane.b32.xlu1 %v10123_v55, %s19987_s30 }
 0x6cd   :  { %10436 = vrot.lane.b32.xlu1 %v9763_v42, %s19989_s29 }
 0x6d1   :  { %10556 = vrot.lane.b32.xlu1 %v9583_v25, %s19992_s15  ;;  %v9945_v25 = vmul.f32 0.21508227, %v23155_v43 }
 0x6d5   :  { %9634 = vrot.lane.b32.xlu1 %v9572_v27, %s19986_s26  ;;  %9814 = vrot.lane.b32.xlu0 %v9752_v54, %s19988_s27 }
 0x6d9   :  { %10294 = vrot.lane.b32.xlu1 %v9932_v28, %s19991_s28  ;;  %9994 = vrot.lane.b32.xlu0 %v9932_v28, %s19990_s0 }
 0x6dd   :  { %10198 = vrot.lane.b32.xlu1 %v10124_v1, %s19987_s30  ;;  %10174 = vrot.lane.b32.xlu0 %v10112_v46, %s19987_s30 }
 0x6de   :  { %v9631_v62 = vpop.permute.xlu0 %9630  ;;  %v10171_v8 = vpop.permute.xlu1 %10170 }
 0x6df   :  { %v9720_v11 = vadd.f32 %v9631_v62, %v9540_v36 }
 0x6e1   :  { %9636 = vrot.lane.b32.xlu1 %v23135_v3, %s19986_s26  ;;  %10414 = vrot.lane.b32.xlu0 %v9752_v54, %s19989_s29 }
 0x6e2   :  { %v9811_v18 = vpop.permute.xlu0 %9810  ;;  %v10411_v61 = vpop.permute.xlu1 %10410 }
 0x6e3   :  { %v9900_v12 = vadd.f32 %v9811_v18, %v9720_v11  ;;  %v9575_v11 = vmul.f32 0.03635177, %v23020_v2 }
 0x6e5   :  { %9816 = vrot.lane.b32.xlu1 %v23142_v23, %s19988_s27  ;;  %10534 = vrot.lane.b32.xlu0 %v9572_v27, %s19992_s15 }
 0x6e6   :  { %v9991_v24 = vpop.permute.xlu0 %9990  ;;  %v10015_v34 = vpop.permute.xlu1 %10014 }
 0x6e7   :  { %v10080_v50 = vadd.f32 %v9991_v24, %v9900_v12 }
 0x6e9   :  { %9996 = vrot.lane.b32.xlu1 %v9933_v14, %s19990_s0  ;;  %9658 = vrot.lane.b32.xlu0 %v9584_v39, %s19986_s26  ;;  %v10260_v17 = vadd.f32 %v10171_v8, %v10080_v50 }
 0x6ea   :  { %v10291_v49 = vpop.permute.xlu0 %10290  ;;  %v10315_v18 = vpop.permute.xlu1 %10314 }
 0x6eb   :  { %v10380_v22 = vadd.f32 %v10291_v49, %v10260_v17 }
 0x6ed   :  { %10176 = vrot.lane.b32.xlu1 %v10113_v31, %s19987_s30  ;;  %9838 = vrot.lane.b32.xlu0 %v9764_v10, %s19988_s27  ;;  %v10500_v48 = vadd.f32 %v10411_v61, %v10380_v22  ;;  %v23193_v22 = vmul.f32 0.110426925, %v23020_v2 }
 0x6ee   :  { %v10531_v13 = vpop.permute.xlu0 %10530 }
 0x6ef   :  { %v10620_v35 = vadd.f32 %v10531_v13, %v10500_v48 }
 0x6f1   :  { %9660 = vrot.lane.b32.xlu1 %v23160_v51, %s19986_s26  ;;  %10018 = vrot.lane.b32.xlu0 %v9944_v37, %s19990_s0  ;;  %v23166_v53 = vmul.f32 0.03635177, %v10620_v35  ;;  %v10650_v42 = vmul.f32 0.0076728435, %v10620_v35  ;;  %v10830_v55 = vmul.f32 0.110426925, %v10620_v35 }
 0x6f2   :  { %v9655_v20 = vpop.permute.xlu0 %9654  ;;  %v10980_v62 = vmul.f32 0.21508227, %v10620_v35  ;;  %v11130_v17 = vmul.f32 0.26860526, %v10620_v35  ;;  %v23200_v35 = vmul.f32 0.21508227, %v23020_v2 }
 0x6f3   :  { %v10740_v41 = vrot.slane %v23166_v53, 1  ;;  %v9732_v40 = vadd.f32 %v9655_v20, %v9552_v58  ;;  %v10890_v46 = vrot.slane %v10830_v55, 2 }
 0x6f4   :  { %v11040_v50 = vrot.slane %v10980_v62, 3  ;;  %v11190_v61 = vrot.slane %v11130_v17, 4 }
 0x6f5   :  { %9840 = vrot.lane.b32.xlu1 %v23169_v5, %s19988_s27  ;;  %10318 = vrot.lane.b32.xlu0 %v9944_v37, %s19991_s28  ;;  %v10800_v54 = vadd.f32 %v10740_v41, %v10650_v42  ;;  %v10125_v42 = vmul.f32 0.26860526, %v23155_v43 }
 0x6f6   :  { %v9835_v38 = vpop.permute.xlu0 %9834 }
 0x6f7   :  { %v9912_v27 = vadd.f32 %v9835_v38, %v9732_v40  ;;  %v10950_v12 = vadd.f32 %v10890_v46, %v10800_v54  ;;  %v11370_v54 = vrot.slane %v10830_v55, 6 }
 0x6f9   :  { %10020 = vrot.lane.b32.xlu1 %v9945_v25, %s19990_s0  ;;  %10438 = vrot.lane.b32.xlu0 %v9764_v10, %s19989_s29  ;;  %v10092_v28 = vadd.f32 %v10015_v34, %v9912_v27  ;;  %v11100_v49 = vadd.f32 %v11040_v50, %v10950_v12  ;;  %v23209_v27 = vmul.f32 %v23020_v2, %v23020_v2 }
 0x6fa   :  { %v10195_v1 = vpop.permute.xlu0 %10194 }
 0x6fb   :  { %v10272_v36 = vadd.f32 %v10195_v1, %v10092_v28 }
 0x6fd   :  { %10562 = vrot.lane.b32.xlu1 %v23184_v7, %s19992_s15  ;;  %10558 = vrot.lane.b32.xlu0 %v9584_v39, %s19992_s15  ;;  %v10392_v8 = vadd.f32 %v10315_v18, %v10272_v36  ;;  %v11250_v39 = vadd.f32 %v11190_v61, %v11100_v49  ;;  %v9587_v36 = vmul.f32 0.03635177, %v23209_v27  ;;  %v11460_v18 = vrot.slane %v23166_v53, 7  ;;  %v9633_v61 = vpop.permute.xlu1 %9632 }
 0x6fe   :  { %v10435_v24 = vpop.permute.xlu0 %10434 }
 0x6ff   :  { %v10512_v31 = vadd.f32 %v10435_v24, %v10392_v8 }
 0x701   :  { %9640 = vrot.lane.b32.xlu1 %v9575_v11, %s19986_s26  ;;  %10296 = vrot.lane.b32.xlu0 %v9933_v14, %s19991_s28  ;;  %v11280_v14 = vrot.slane %v10980_v62, 5 }
 0x702   :  { %v10555_v10 = vpop.permute.xlu0 %10554 }
 0x703   :  { %v10632_v48 = vadd.f32 %v10555_v10, %v10512_v31  ;;  %v11340_v40 = vadd.f32 %v11280_v14, %v11250_v39  ;;  %v9574_v10 = vmul.f32 0.03635177, %v23001_v45  ;;  %v23242_v39 = vmul.f32 0.110426925, %v23035_v21 }
 0x704   :  { %v10114_v14 = vmul.f32 0.26860526, %v23001_v45 }
 0x705   :  { %9820 = vrot.lane.b32.xlu1 %v23193_v22, %s19988_s27  ;;  %10416 = vrot.lane.b32.xlu0 %v23142_v23, %s19989_s29  ;;  %v10692_v13 = vmul.f32 0.03635177, %v10632_v48  ;;  %v10842_v37 = vmul.f32 0.110426925, %v10632_v48  ;;  %v10662_v20 = vmul.f32 0.0076728435, %v10632_v48  ;;  %v11430_v46 = vadd.f32 %v11370_v54, %v11340_v40 }
 0x706   :  { %v10992_v41 = vmul.f32 0.21508227, %v10632_v48  ;;  %v11142_v23 = vmul.f32 0.26860526, %v10632_v48  ;;  %v9754_v48 = vmul.f32 0.110426925, %v23001_v45  ;;  %v10173_v40 = vpop.permute.xlu0 %10172 }
 0x707   :  { %v10752_v58 = vrot.slane %v10692_v13, 1  ;;  %v10902_v38 = vrot.slane %v10842_v37, 2  ;;  %v23217_v55 = vadd.f32 %v11460_v18, %v11430_v46  ;;  %v11382_v50 = vrot.slane %v10842_v37, 6 }
 0x708   :  { %v11052_v1 = vrot.slane %v10992_v41, 3  ;;  %v11292_v8 = vrot.slane %v10992_v41, 5  ;;  %v11472_v49 = vrot.slane %v10692_v13, 7  ;;  %v9813_v13 = vpop.permute.xlu1 %9812  ;;  %v9541_v37 = vmul.f32 0.0076728435, %v22964_v47 }
 0x709   :  { %10000 = vrot.lane.b32.xlu1 %v23200_v35, %s19990_s0  ;;  %10536 = vrot.lane.b32.xlu0 %v23135_v3, %s19992_s15  ;;  %v10812_v34 = vadd.f32 %v10752_v58, %v10662_v20  ;;  %v11202_v3 = vrot.slane %v11142_v23, 4  ;;  %v23225_v53 = vmul.f32 %v23217_v55, %v23217_v55 }
 0x70a   :  { %v9721_v20 = vadd.f32 %v9633_v61, %v9541_v37  ;;  %v10413_v54 = vpop.permute.xlu0 %10412 }
 0x70b   :  { %v10962_v28 = vadd.f32 %v10902_v38, %v10812_v34 }
 0x70c   :  { %v9993_v58 = vpop.permute.xlu1 %9992  ;;  %v9901_v41 = vadd.f32 %v9813_v13, %v9721_v20 }
 0x70d   :  { %10540 = vrot.lane.b32.xlu1 %v9575_v11, %s19992_s15  ;;  %10200 = vrot.lane.b32.xlu0 %v10125_v42, %s19987_s30  ;;  %v11112_v62 = vadd.f32 %v11052_v1, %v10962_v28  ;;  %v9767_v11 = vmul.f32 0.110426925, %v23209_v27  ;;  %v9766_v1 = vmul.f32 0.110426925, %v23177_v16 }
 0x70e   :  { %v10081_v34 = vadd.f32 %v9993_v58, %v9901_v41 }
 0x70f   :  { %v11262_v12 = vadd.f32 %v11202_v3, %v11112_v62 }
 0x710   :  { %v10261_v38 = vadd.f32 %v10173_v40, %v10081_v34  ;;  %v10293_v23 = vpop.permute.xlu1 %10292 }
 0x711   :  { %9664 = vrot.lane.b32.xlu1 %v9587_v36, %s19986_s26  ;;  %10320 = vrot.lane.b32.xlu0 %v9945_v25, %s19991_s28  ;;  %v11352_v24 = vadd.f32 %v11292_v8, %v11262_v12  ;;  %v10017_v12 = vpop.permute.xlu0 %10016  ;;  %v9553_v8 = vmul.f32 0.0076728435, %v23095_v30 }
 0x712   :  { %v10381_v42 = vadd.f32 %v10293_v23, %v10261_v38 }
 0x713   :  { %v11442_v17 = vadd.f32 %v11382_v50, %v11352_v24 }
 0x714   :  { %v10501_v47 = vadd.f32 %v10413_v54, %v10381_v42  ;;  %v10533_v28 = vpop.permute.xlu1 %10532 }
 0x715   :  { %9844 = vrot.lane.b32.xlu1 %v9767_v11, %s19988_s27  ;;  %10440 = vrot.lane.b32.xlu0 %v23169_v5, %s19989_s29  ;;  %v23227_v31 = vadd.f32 %v11472_v49, %v11442_v17  ;;  %v10116_v5 = vmul.f32 0.26860526, %v23035_v21  ;;  %v10126_v17 = vmul.f32 0.26860526, %v23177_v16  ;;  %v10317_v37 = vpop.permute.xlu0 %10316 }
 0x716   :  { %v10621_v46 = vadd.f32 %v10533_v28, %v10501_v47 }
 0x718   :  { %v23258_v3 = vmul.f32 0.03635177, %v10621_v46  ;;  %v23270_v61 = vmul.f32 0.110426925, %v10621_v46  ;;  %v10981_v58 = vmul.f32 0.21508227, %v10621_v46 }
 0x719   :  { %10444 = vrot.lane.b32.xlu1 %v9767_v11, %s19989_s29  ;;  %10560 = vrot.lane.b32.xlu0 %v23160_v51, %s19992_s15  ;;  %v9934_v51 = vmul.f32 0.21508227, %v23001_v45  ;;  %v11131_v28 = vmul.f32 0.26860526, %v10621_v46 }
 0x71a   :  { %v10741_v11 = vrot.slane %v23258_v3, 1  ;;  %v10891_v20 = vrot.slane %v23270_v61, 2 }
 0x71d   :  { %10564 = vrot.lane.b32.xlu1 %v9587_v36, %s19992_s15  ;;  %9638 = vrot.lane.b32.xlu0 %v9574_v10, %s19986_s26  ;;  %v9946_v36 = vmul.f32 0.21508227, %v23177_v16 }
 0x721   :  { %10182 = vrot.lane.b32.xlu1 %v10116_v5, %s19987_s30  ;;  %9818 = vrot.lane.b32.xlu0 %v9754_v48, %s19988_s27  ;;  %v10651_v5 = vmul.f32 0.0076728435, %v10621_v46  ;;  %v11191_v46 = vrot.slane %v11131_v28, 4 }
 0x723   :  { %v10801_v13 = vadd.f32 %v10741_v11, %v10651_v5 }
 0x725   :  { %10422 = vrot.lane.b32.xlu1 %v23242_v39, %s19989_s29  ;;  %9998 = vrot.lane.b32.xlu0 %v9934_v51, %s19990_s0  ;;  %v10951_v23 = vadd.f32 %v10891_v20, %v10801_v13 }
 0x729   :  { %10178 = vrot.lane.b32.xlu0 %v10114_v14, %s19987_s30 }
 0x72d   :  { %10298 = vrot.lane.b32.xlu0 %v9934_v51, %s19991_s28 }
 0x731   :  { %10418 = vrot.lane.b32.xlu0 %v9754_v48, %s19989_s29 }
 0x735   :  { %10538 = vrot.lane.b32.xlu0 %v9574_v10, %s19992_s15 }
 0x739   :  { %9662 = vrot.lane.b32.xlu0 %v23184_v7, %s19986_s26  ;;  %v23266_v7 = vld [vmem:[%s25328_s11] sm:$0xf]  ;;  %s4245_s11 = smul.f32 0.00034435262, %s22881_s10 }
 0x73d   :  { %v8429_v62 = vpop.xlane.xlu1 %8428  ;;  %9842 = vrot.lane.b32.xlu0 %v9766_v1, %s19988_s27 }
 0x73e   :  { %v8430_v50 = vrot.slane %v8429_v62, 4 }
 0x740   :  { %v8431_v51 = vadd.f32 %v8430_v50, %v8429_v62 }
 0x741   :  { %10022 = vrot.lane.b32.xlu0 %v9946_v36, %s19990_s0  ;;  %v9657_v18 = vpop.permute.xlu1 %9656  ;;  %v18885_v24 = vpop.f32.mrb[2].mxu1 }
 0x742   :  { %v11822_v49 = vpop.f32.mrb[3].mxu1  ;;  %v9733_v10 = vadd.f32 %v9657_v18, %v9553_v8  ;;  %v8432_v42 = vrot.slane %v8431_v51, 2  ;;  %v10115_v8 = vmul.f32 0.26860526, %v23020_v2 }
 0x743   :  { %18902 = vmatpush3.msra.mxu0 %v11822_v49 }
 0x744   :  { %18904 = vmatmul.mubr.msk.f32.vlgmr.msra.gmra.mrb[26].mxu0 %vm9472_vm6, %v23266_v7  ;;  %18906 = vmatprep.subr.mxu0 %v25501_v52 }
 0x745   :  { %10202 = vrot.lane.b32.xlu0 %v10126_v17, %s19987_s30  ;;  %v9837_v30 = vpop.permute.xlu1 %9836  ;;  %18908 = vmatprep.mubr.msk.f32.mxu0 %vm19984_vm1, %v25501_v52 }
 0x746   :  { %v9913_v48 = vadd.f32 %v9837_v30, %v9733_v10  ;;  %18907 = vmatpush3.msra.mxu0 %v18885_v24  ;;  %v8433_v24 = vadd.f32 %v8432_v42, %v8431_v51 }
 0x747   :  { %18911 = vmatprep.subr.mxu0 %v25501_v52 }
 0x748   :  { %v10093_v14 = vadd.f32 %v10017_v12, %v9913_v48  ;;  %18909 = vmatmul.mubr.msk.f32.vlgmr.msra.gmra.mrb[28].mxu0 %vm9472_vm6, %v23266_v7  ;;  %v8434_v30 = vrot.slane %v8433_v24, 1  ;;  %v23299_v48 = vmul.f32 %v23035_v21, %v23035_v21 }
 0x749   :  { %9504 = vmin.xlane.f32.xlu1 %v23045_v60  ;;  %10322 = vrot.lane.b32.xlu0 %v9946_v36, %s19991_s28  ;;  %v10197_v41 = vpop.permute.xlu1 %10196  ;;  %v18888_v40 = vpop.f32.mrb[4].mxu1  ;;  %v11041_v60 = vrot.slane %v10981_v58, 3 }
 0x74a   :  { %v10273_v34 = vadd.f32 %v10197_v41, %v10093_v14  ;;  %v11832_v38 = vpop.f32.mrb[5].mxu1  ;;  %18913 = vmatprep.mubr.msk.f32.mxu0 %vm19984_vm1, %v25501_v52  ;;  %v11281_v14 = vrot.slane %v10981_v58, 5  ;;  %v9542_v41 = vmul.f32 0.0076728435, %v22980_v0 }
 0x74b   :  { %18912 = vmatpush3.msra.mxu0 %v11832_v38  ;;  %v11101_v18 = vadd.f32 %v11041_v60, %v10951_v23  ;;  %v9948_v60 = vmul.f32 0.21508227, %v23299_v48 }
 0x74c   :  { %v8408_v54 = vpop.xlane.xlu0 %8407  ;;  %v10393_v47 = vadd.f32 %v10317_v37, %v10273_v34  ;;  %18916 = vmatprep.subr.mxu0 %v25501_v52  ;;  %18914 = vmatmul.mubr.msk.f32.vlgmr.msra.gmra.mrb[30].mxu0 %vm9472_vm6, %v23266_v7 }
 0x74d   :  { %v8409_v62 = vrot.slane %v8408_v54, 4  ;;  %10442 = vrot.lane.b32.xlu0 %v9766_v1, %s19989_s29  ;;  %v10437_v36 = vpop.permute.xlu1 %10436  ;;  %18917 = vmatpush3.msra.mxu0 %v18888_v40  ;;  %v11251_v10 = vadd.f32 %v11191_v46, %v11101_v18  ;;  %v9947_v46 = vmul.f32 0.21508227, %v23209_v27 }
 0x74e   :  { %18918 = vmatprep.mubr.msk.f32.mxu0 %vm19984_vm1, %v25501_v52  ;;  %v10513_v11 = vadd.f32 %v10437_v36, %v10393_v47  ;;  %18921 = vmatprep.subr.mxu0 %v25501_v52  ;;  %v8435_v47 = vadd.f32 %v8434_v30, %v8433_v24 }
 0x74f   :  { %v8410_v12 = vadd.f32 %v8409_v62, %v8408_v54  ;;  %v11341_v42 = vadd.f32 %v11281_v14, %v11251_v10 }
 0x750   :  { %v9815_v50 = vpop.permute.xlu0 %9814  ;;  %18919 = vmatmul.mubr.msk.f32.vlgmr.msra.gmra.mrb[32].mxu0 %vm9472_vm6, %v23266_v7 }
 0x751   :  { %10180 = vrot.lane.b32.xlu0 %v10115_v8, %s19987_s30  ;;  %v10557_v1 = vpop.permute.xlu1 %10556  ;;  %v8411_v17 = vrot.slane %v8410_v12, 2  ;;  %18923 = vmatprep.mubr.msk.f32.mxu0 %vm19984_vm1, %v25501_v52 }
 0x752   :  { %v10633_v49 = vadd.f32 %v10557_v1, %v10513_v11  ;;  %v18891_v11 = vpop.f32.mrb[6].mxu1 }
 0x753   :  { %v8412_v5 = vadd.f32 %v8411_v17, %v8410_v12  ;;  %v11842_v1 = vpop.f32.mrb[7].mxu1 }
 0x754   :  { %v9995_v51 = vpop.permute.xlu0 %9994  ;;  %v23303_v13 = vmul.f32 0.03635177, %v10633_v49  ;;  %v10843_v37 = vmul.f32 0.110426925, %v10633_v49  ;;  %v10663_v34 = vmul.f32 0.0076728435, %v10633_v49  ;;  %18922 = vmatpush3.msra.mxu0 %v11842_v1 }
 0x755   :  { %10300 = vrot.lane.b32.xlu0 %v23200_v35, %s19991_s28  ;;  %v8413_v20 = vrot.slane %v8412_v5, 1  ;;  %v9635_v40 = vpop.permute.xlu1 %9634  ;;  %v10993_v23 = vmul.f32 0.21508227, %v10633_v49  ;;  %v11143_v36 = vmul.f32 0.26860526, %v10633_v49  ;;  %v11371_v35 = vrot.slane %v23270_v61, 6  ;;  %18924 = vmatmul.mubr.msk.f32.vlgmr.msra.gmra.mrb[34].mxu0 %vm9472_vm6, %v23266_v7 }
 0x756   :  { %v10753_v38 = vrot.slane %v23303_v13, 1  ;;  %v10903_v62 = vrot.slane %v10843_v37, 2  ;;  %v9722_v18 = vadd.f32 %v9635_v40, %v9542_v41  ;;  %18926 = vmatprep.subr.mxu0 %v25501_v52  ;;  %v10134_v41 = vmul.f32 0.26860526, %v23041_v32  ;;  %18928 = vmatprep.mubr.msk.f32.mxu0 %vm19984_vm1, %v25501_v52 }
 0x757   :  { %v8414_v54 = vadd.f32 %v8413_v20, %v8412_v5  ;;  %v11053_v8 = vrot.slane %v10993_v23, 3  ;;  %v11431_v17 = vadd.f32 %v11371_v35, %v11341_v42  ;;  %v11203_v10 = vrot.slane %v11143_v36, 4  ;;  %18927 = vmatpush3.msra.mxu0 %v18891_v11 }
 0x758   :  { %v10813_v28 = vadd.f32 %v10753_v38, %v10663_v34  ;;  %v10175_v58 = vpop.permute.xlu0 %10174  ;;  %v9902_v24 = vadd.f32 %v9815_v50, %v9722_v18  ;;  %v11293_v14 = vrot.slane %v10993_v23, 5  ;;  %v10127_v20 = vmul.f32 0.26860526, %v23209_v27  ;;  %18936 = vmatprep.subr.mxu0 %v25501_v52 }
 0x759   :  { %10420 = vrot.lane.b32.xlu0 %v23193_v22, %s19989_s29  ;;  %19519 = vpush %v8414_v54  ;;  %v10295_v0 = vpop.permute.xlu1 %10294  ;;  %v11461_v22 = vrot.slane %v23258_v3, 7  ;;  %v11383_v3 = vrot.slane %v10843_v37, 6  ;;  %18929 = vmatmul.mubr.msk.f32.vlgmr.msra.gmra.mrb[36].mxu0 %vm9472_vm6, %v23266_v7  ;;  %v11473_v54 = vrot.slane %v23303_v13, 7  ;;  %v9577_v18 = vmul.f32 0.03635177, %v23049_v33 }
 0x75a   :  { %v10963_v12 = vadd.f32 %v10903_v62, %v10813_v28  ;;  %19521 = vpush %v8435_v47  ;;  %10026 = vrot.lane.b32.xlu1 %v9948_v60, %s19990_s0  ;;  %v10082_v30 = vadd.f32 %v9995_v51, %v9902_v24  ;;  %18938 = vmatprep.mubr.msk.f32.mxu0 %vm19984_vm1, %v25501_v52  ;;  %v23342_v62 = vmul.f32 0.21508227, %v23041_v32  ;;  %v9576_v35 = vmul.f32 0.03635177, %v23035_v21 }
 0x75b   :  { %v23325_v40 = vadd.f32 %v11461_v22, %v11431_v17  ;;  %v23357_v11 = vmul.f32 0.110426925, %v23049_v33  ;;  %v9936_v22 = vmul.f32 0.21508227, %v23035_v21 }
 0x75c   :  { %v11113_v49 = vadd.f32 %v11053_v8, %v10963_v12  ;;  %v10415_v5 = vpop.permute.xlu0 %10414  ;;  %v10262_v50 = vadd.f32 %v10175_v58, %v10082_v30  ;;  %v9937_v30 = vmul.f32 0.21508227, %v23049_v33 }
 0x75d   :  { %10024 = vrot.lane.b32.xlu0 %v9947_v46, %s19990_s0  ;;  %v10199_v51 = vpop.permute.xlu1 %10198  ;;  %v23339_v37 = vmul.f32 %v23325_v40, %v23325_v40 }
 0x75e   :  { %v11263_v61 = vadd.f32 %v11203_v10, %v11113_v49  ;;  %10326 = vrot.lane.b32.xlu1 %v9948_v60, %s19991_s28  ;;  %v10382_v23 = vadd.f32 %v10295_v0, %v10262_v50  ;;  %v9554_v0 = vmul.f32 0.0076728435, %v23126_v44 }
 0x760   :  { %v11353_v34 = vadd.f32 %v11293_v14, %v11263_v61  ;;  %v10535_v38 = vpop.permute.xlu0 %10534  ;;  %v10502_v47 = vadd.f32 %v10415_v5, %v10382_v23 }
 0x761   :  { %10204 = vrot.lane.b32.xlu0 %v10127_v20, %s19987_s30  ;;  %v9637_v13 = vpop.permute.xlu1 %9636 }
 0x762   :  { %v11443_v42 = vadd.f32 %v11383_v3, %v11353_v34  ;;  %10218 = vrot.lane.b32.xlu1 %v10134_v41, %s19987_s30  ;;  %v10622_v36 = vadd.f32 %v10535_v38, %v10502_v47 }
 0x764   :  { %v23335_v60 = vadd.f32 %v11473_v54, %v11443_v42  ;;  %v9659_v28 = vpop.permute.xlu0 %9658  ;;  %v23352_v12 = vmul.f32 0.03635177, %v10622_v36  ;;  %v10652_v44 = vmul.f32 0.0076728435, %v10622_v36  ;;  %v10832_v5 = vmul.f32 0.110426925, %v10622_v36 }
 0x765   :  { %10324 = vrot.lane.b32.xlu0 %v9947_v46, %s19991_s28  ;;  %v9734_v24 = vadd.f32 %v9659_v28, %v9554_v0  ;;  %v9817_v17 = vpop.permute.xlu1 %9816  ;;  %v10982_v20 = vmul.f32 0.21508227, %v10622_v36  ;;  %v11132_v23 = vmul.f32 0.26860526, %v10622_v36  ;;  %v9543_v54 = vmul.f32 0.0076728435, %v22990_v9 }
 0x766   :  { %25506 = vst [vmem:[#allocation50_spill] sm:$0xff] %v23335_v60  ;;  %10338 = vrot.lane.b32.xlu1 %v23342_v62, %s19991_s28  ;;  %v10742_v1 = vrot.slane %v23352_v12, 1  ;;  %v10892_v50 = vrot.slane %v10832_v5, 2 }
 0x767   :  { %v11042_v38 = vrot.slane %v10982_v20, 3 }
 0x768   :  { %v9839_v8 = vpop.permute.xlu0 %9838  ;;  %v10802_v61 = vadd.f32 %v10742_v1, %v10652_v44 }
 0x769   :  { %9642 = vrot.lane.b32.xlu0 %v9576_v35, %s19986_s26  ;;  %v9914_v46 = vadd.f32 %v9839_v8, %v9734_v24  ;;  %v9997_v34 = vpop.permute.xlu1 %9996  ;;  %v9723_v24 = vadd.f32 %v9637_v13, %v9543_v54 }
 0x76a   :  { %9644 = vrot.lane.b32.xlu1 %v9577_v18, %s19986_s26 }
 0x76b   :  { %v9903_v36 = vadd.f32 %v9817_v17, %v9723_v24 }
 0x76c   :  { %v10019_v49 = vpop.permute.xlu0 %10018 }
 0x76d   :  { %v10094_v10 = vadd.f32 %v10019_v49, %v9914_v46  ;;  %9822 = vrot.lane.b32.xlu0 %v23242_v39, %s19988_s27  ;;  %v10952_v39 = vadd.f32 %v10892_v50, %v10802_v61  ;;  %v10177_v0 = vpop.permute.xlu1 %10176  ;;  %v11192_v46 = vrot.slane %v11132_v23, 4  ;;  %v11282_v61 = vrot.slane %v10982_v20, 5 }
 0x76e   :  { %9824 = vrot.lane.b32.xlu1 %v23357_v11, %s19988_s27  ;;  %v23383_v23 = vmul.f32 0.03635177, %v23056_v63 }
 0x76f   :  { %v10274_v41 = vadd.f32 %v10199_v51, %v10094_v10  ;;  %v11102_v47 = vadd.f32 %v11042_v38, %v10952_v39  ;;  %v23373_v51 = vmul.f32 %v23049_v33, %v23049_v33 }
 0x770   :  { %v10319_v14 = vpop.permute.xlu0 %10318 }
 0x771   :  { %10002 = vrot.lane.b32.xlu0 %v9936_v22, %s19990_s0  ;;  %v10394_v42 = vadd.f32 %v10319_v14, %v10274_v41  ;;  %v11252_v49 = vadd.f32 %v11192_v46, %v11102_v47  ;;  %v9661_v13 = vpop.permute.xlu1 %9660 }
 0x772   :  { %10004 = vrot.lane.b32.xlu1 %v9937_v30, %s19990_s0 }
 0x773   :  { %v11342_v39 = vadd.f32 %v11282_v61, %v11252_v49 }
 0x774   :  { %v10439_v3 = vpop.permute.xlu0 %10438 }
 0x775   :  { %10302 = vrot.lane.b32.xlu0 %v9936_v22, %s19991_s28  ;;  %v10514_v28 = vadd.f32 %v10439_v3, %v10394_v42  ;;  %v10083_v22 = vadd.f32 %v9997_v34, %v9903_v36  ;;  %v11372_v42 = vrot.slane %v10832_v5, 6  ;;  %v9841_v24 = vpop.permute.xlu1 %9840  ;;  %v11462_v36 = vrot.slane %v23352_v12, 7 }
 0x776   :  { %10304 = vrot.lane.b32.xlu1 %v9937_v30, %s19991_s28  ;;  %v23378_v30 = vmul.f32 0.03635177, %v23373_v51 }
 0x777   :  { %v11432_v47 = vadd.f32 %v11372_v42, %v11342_v39 }
 0x778   :  { %v10559_v8 = vpop.permute.xlu0 %10558 }
 0x779   :  { %10542 = vrot.lane.b32.xlu0 %v9576_v35, %s19992_s15  ;;  %v10634_v1 = vadd.f32 %v10559_v8, %v10514_v28  ;;  %v10263_v35 = vadd.f32 %v10177_v0, %v10083_v22 }
 0x77a   :  { %10544 = vrot.lane.b32.xlu1 %v9577_v18, %s19992_s15 }
 0x77b   :  { %v10694_v10 = vmul.f32 0.03635177, %v10634_v1  ;;  %v10844_v44 = vmul.f32 0.110426925, %v10634_v1  ;;  %v10664_v14 = vmul.f32 0.0076728435, %v10634_v1 }
 0x77c   :  { %v10297_v9 = vpop.permute.xlu0 %10296  ;;  %v10994_v41 = vmul.f32 0.21508227, %v10634_v1  ;;  %v11144_v3 = vmul.f32 0.26860526, %v10634_v1  ;;  %v9769_v1 = vmul.f32 0.110426925, %v23373_v51 }
 0x77d   :  { %v10754_v50 = vrot.slane %v10694_v10, 1  ;;  %v10904_v17 = vrot.slane %v10844_v44, 2  ;;  %v10383_v20 = vadd.f32 %v10297_v9, %v10263_v35  ;;  %v9555_v9 = vmul.f32 0.0076728435, %v23155_v43  ;;  %v10021_v43 = vpop.permute.xlu1 %10020 }
 0x77e   :  { %9668 = vrot.lane.b32.xlu1 %v23378_v30, %s19986_s26  ;;  %v11054_v34 = vrot.slane %v10994_v41, 3  ;;  %v11204_v8 = vrot.slane %v11144_v3, 4  ;;  %v11294_v22 = vrot.slane %v10994_v41, 5  ;;  %v23393_v35 = vadd.f32 %v11462_v36, %v11432_v47 }
 0x77f   :  { %v10814_v18 = vadd.f32 %v10754_v50, %v10664_v14  ;;  %v11384_v14 = vrot.slane %v10844_v44, 6  ;;  %v11474_v12 = vrot.slane %v10694_v10, 7  ;;  %v4292_v36 = vstv %s4290_s5 }
 0x780   :  { %v10417_v38 = vpop.permute.xlu0 %10416  ;;  %25507 = vst [vmem:[#allocation24_spill] sm:$0xff] %v23393_v35  ;;  %v23409_v10 = vmul.f32 %v23393_v35, %v23393_v35 }
 0x781   :  { %v10964_v54 = vadd.f32 %v10904_v17, %v10814_v18  ;;  %v10503_v0 = vadd.f32 %v10417_v38, %v10383_v20  ;;  %v23397_v18 = vmul.f32 0.110426925, %v23056_v63  ;;  %v9735_v17 = vadd.f32 %v9661_v13, %v9555_v9 }
 0x782   :  { %9680 = vrot.lane.b32.xlu1 %v23383_v23, %s19986_s26  ;;  %25509 = vst [vmem:[#allocation29_spill] sm:$0xff] %v23409_v10  ;;  %v10129_v20 = vmul.f32 0.26860526, %v23373_v51 }
 0x783   :  { %v11114_v28 = vadd.f32 %v11054_v34, %v10964_v54  ;;  %v9915_v44 = vadd.f32 %v9841_v24, %v9735_v17 }
 0x784   :  { %v10537_v46 = vpop.permute.xlu0 %10536 }
 0x785   :  { %v11264_v49 = vadd.f32 %v11204_v8, %v11114_v28  ;;  %v10623_v5 = vadd.f32 %v10537_v46, %v10503_v0  ;;  %v10095_v47 = vadd.f32 %v10021_v43, %v9915_v44  ;;  %v4291_v46 = vstv %s4245_s11 }
 0x786   :  { %9848 = vrot.lane.b32.xlu1 %v9769_v1, %s19988_s27  ;;  %v4294_v17 = vsel %vm4293_vm7, %v4291_v46, %v4292_v36 }
 0x787   :  { %v11354_v61 = vadd.f32 %v11294_v22, %v11264_v49  ;;  %v23391_v50 = vmul.f32 0.03635177, %v10623_v5  ;;  %v10653_v3 = vmul.f32 0.0076728435, %v10623_v5  ;;  %v23400_v42 = vmul.f32 0.110426925, %v10623_v5 }
 0x788   :  { %v10201_v39 = vpop.permute.xlu0 %10200  ;;  %v10983_v0 = vmul.f32 0.21508227, %v10623_v5 }
 0x789   :  { %v11444_v41 = vadd.f32 %v11384_v14, %v11354_v61  ;;  %v10743_v38 = vrot.slane %v23391_v50, 1  ;;  %v10893_v8 = vrot.slane %v23400_v42, 2  ;;  %v10275_v61 = vadd.f32 %v10201_v39, %v10095_v47 }
 0x78a   :  { %9860 = vrot.lane.b32.xlu1 %v23397_v18, %s19988_s27  ;;  %s19520_s4 = spop %19519 }
 0x78b   :  { %v23405_v54 = vadd.f32 %v11474_v12, %v11444_v41  ;;  %s8416_s3 = smul.f32 0.0046296297, %s19520_s4  ;;  %s19522_s8 = spop %19521  ;;  %v10803_v34 = vadd.f32 %v10743_v38, %v10653_v3  ;;  %v11043_v41 = vrot.slane %v10983_v0, 3  ;;  %v11133_v3 = vmul.f32 0.26860526, %v10623_v5 }
 0x78c   :  { %s8437_s24 = smul.f32 0.0046296297, %s19522_s8  ;;  %v10321_v13 = vpop.permute.xlu0 %10320 }
 0x78d   :  { %25508 = vst [vmem:[#allocation27_spill] sm:$0xff] %v23405_v54  ;;  %v8438_v28 = vstv %s8416_s3  ;;  %v10953_v9 = vadd.f32 %v10893_v8, %v10803_v34  ;;  %v10395_v38 = vadd.f32 %v10321_v13, %v10275_v61  ;;  %v23427_v13 = vmul.f32 0.21508227, %v23056_v63 }
 0x78e   :  { %v8439_v49 = vstv %s8437_s24  ;;  %10208 = vrot.lane.b32.xlu1 %v10129_v20, %s19987_s30  ;;  %v11193_v20 = vrot.slane %v11133_v3, 4 }
 0x78f   :  { %v8440_v22 = vsel %vm4293_vm7, %v8438_v28, %v8439_v49  ;;  %v11103_v44 = vadd.f32 %v11043_v41, %v10953_v9  ;;  %v23421_v28 = vpop.permute.xlu1 %10562 }
 0x790   :  { %v16277_v14 = vrot.slane %v8440_v22, 7  ;;  %v10441_v12 = vpop.permute.xlu0 %10440 }
 0x791   :  { %v10515_v24 = vadd.f32 %v10441_v12, %v10395_v38  ;;  %v11253_v39 = vadd.f32 %v11193_v20, %v11103_v44 }
 0x792   :  { %v23418_v43 = vsel %vm16288_vm8, %v4294_v17, %v16277_v14  ;;  %10448 = vrot.lane.b32.xlu1 %v9769_v1, %s19989_s29  ;;  %v11283_v1 = vrot.slane %v10983_v0, 5 }
 0x793   :  { %25510 = vst [vmem:[#allocation28_spill] sm:$0xff] %v23418_v43 }
 0x794   :  { %v10561_v58 = vpop.permute.xlu0 %10560  ;;  %v11343_v22 = vadd.f32 %v11283_v1, %v11253_v39 }
 0x795   :  { %v10635_v25 = vadd.f32 %v10561_v58, %v10515_v24 }
 0x796   :  { %10568 = vrot.lane.b32.xlu1 %v23378_v30, %s19992_s15  ;;  %v23431_v30 = vpop.permute.xlu1 %9640 }
 0x797   :  { %v10695_v34 = vmul.f32 0.03635177, %v10635_v25  ;;  %v10845_v47 = vmul.f32 0.110426925, %v10635_v25  ;;  %v10665_v8 = vmul.f32 0.0076728435, %v10635_v25 }
 0x798   :  { %9484 = vmax.xlane.f32.xlu0 %v23051_v26  ;;  %v9639_v5 = vpop.permute.xlu0 %9638  ;;  %v10995_v36 = vmul.f32 0.21508227, %v10635_v25  ;;  %v11145_v49 = vmul.f32 0.26860526, %v10635_v25  ;;  %v11373_v26 = vrot.slane %v23400_v42, 6  ;;  %v11463_v25 = vrot.slane %v23391_v50, 7 }
 0x799   :  { %v10755_v46 = vrot.slane %v10695_v34, 1  ;;  %v10905_v24 = vrot.slane %v10845_v47, 2  ;;  %v10118_v42 = vmul.f32 0.26860526, %v23062_v6  ;;  %v11385_v39 = vrot.slane %v10845_v47, 6 }
 0x79a   :  { %10040 = vrot.lane.b32.xlu1 %v23427_v13, %s19990_s0  ;;  %v11055_v14 = vrot.slane %v10995_v36, 3  ;;  %v11205_v12 = vrot.slane %v11145_v49, 4  ;;  %v11433_v17 = vadd.f32 %v11373_v26, %v11343_v22  ;;  %v11295_v38 = vrot.slane %v10995_v36, 5  ;;  %v23436_v44 = vpop.permute.xlu1 %9820 }
 0x79b   :  { %v10815_v58 = vadd.f32 %v10755_v46, %v10665_v8  ;;  %v11475_v46 = vrot.slane %v10695_v34, 7  ;;  %v23455_v22 = vmul.f32 0.110426925, %v23062_v6 }
 0x79c   :  { %v9819_v9 = vpop.permute.xlu0 %9818  ;;  %v23442_v1 = vadd.f32 %v11463_v25, %v11433_v17 }
 0x79d   :  { %v10965_v61 = vadd.f32 %v10905_v24, %v10815_v58  ;;  %v9544_v58 = vmul.f32 0.0076728435, %v23001_v45  ;;  %v18894_v24 = vpop.f32.mrb[8].mxu1  ;;  %v23545_v45 = vmul.f32 0.21508227, %v23066_v56 }
 0x79e   :  { %10460 = vrot.lane.b32.xlu1 %v23397_v18, %s19989_s29  ;;  %25511 = vst [vmem:[#allocation31_spill] sm:$0xff] %v23442_v1  ;;  %v23446_v36 = vpop.permute.xlu1 %10000  ;;  %v11852_v26 = vpop.f32.mrb[9].mxu1  ;;  %18937 = vmatpush3.msra.mxu0 %v18894_v24  ;;  %v23510_v24 = vmul.f32 0.110426925, %v23041_v32 }
 0x79f   :  { %v11115_v0 = vadd.f32 %v11055_v14, %v10965_v61  ;;  %v9724_v49 = vadd.f32 %v9639_v5, %v9544_v58  ;;  %18932 = vmatpush3.msra.mxu1 %v11852_v26  ;;  %18939 = vmatmul.mubr.msk.f32.vlgmr.msra.gmra.mrb[38].mxu0 %vm9472_vm6, %v23266_v7  ;;  %v23470_v5 = vmul.f32 %v23062_v6, %v23062_v6 }
 0x7a0   :  { %v9999_v41 = vpop.permute.xlu0 %9998  ;;  %18934 = vmatmul.mubr.msk.f32.vlgmr.msra.gmra.mrb[14].mxu1 %vm9472_vm6, %v23266_v7  ;;  %18946 = vmatprep.subr.mxu0 %v25501_v52 }
 0x7a1   :  { %v11265_v3 = vadd.f32 %v11205_v12, %v11115_v0  ;;  %v9904_v34 = vadd.f32 %v9819_v9, %v9724_v49  ;;  %18948 = vmatprep.mubr.msk.f32.mxu0 %vm19984_vm1, %v25501_v52  ;;  %v23473_v0 = vmul.f32 0.03635177, %v23062_v6  ;;  %v23476_v9 = vmul.f32 0.03635177, %v23299_v48  ;;  %18941 = vmatprep.subr.mxu1 %v25501_v52 }
 0x7a2   :  { %10580 = vrot.lane.b32.xlu1 %v23383_v23, %s19992_s15  ;;  %v23452_v23 = vmul.f32 %v23442_v1, %v23442_v1  ;;  %18943 = vmatprep.mubr.msk.f32.mxu1 %vm19984_vm1, %v25501_v52  ;;  %v23485_v17 = vpop.permute.xlu1 %10540  ;;  %v9950_v25 = vmul.f32 0.21508227, %v23470_v5 }
 0x7a3   :  { %v11355_v20 = vadd.f32 %v11295_v38, %v11265_v3  ;;  %v10084_v61 = vadd.f32 %v9999_v41, %v9904_v34  ;;  %v18897_v41 = vpop.f32.mrb[10].mxu1  ;;  %v23515_v34 = vmul.f32 0.110426925, %v23470_v5 }
 0x7a4   :  { %v10179_v18 = vpop.permute.xlu0 %10178  ;;  %25513 = vst [vmem:[#allocation39_spill] sm:$0xff] %v23452_v23  ;;  %18947 = vmatpush3.msra.mxu0 %v18897_v41 }
 0x7a5   :  { %v11445_v8 = vadd.f32 %v11385_v39, %v11355_v20  ;;  %v10264_v12 = vadd.f32 %v10179_v18, %v10084_v61  ;;  %v11862_v20 = vpop.f32.mrb[11].mxu1  ;;  %18949 = vmatmul.mubr.msk.f32.vlgmr.msra.gmra.mrb[40].mxu0 %vm9472_vm6, %v23266_v7  ;;  %18956 = vmatprep.subr.mxu0 %v25501_v52 }
 0x7a6   :  { %10186 = vrot.lane.b32.xlu1 %v10118_v42, %s19987_s30  ;;  %v23489_v42 = vmul.f32 0.03635177, %v23041_v32  ;;  %18942 = vmatpush3.msra.mxu1 %v11862_v20  ;;  %v23500_v58 = vpop.permute.xlu1 %9664  ;;  %v18900_v49 = vpop.f32.mrb[12].mxu1 }
 0x7a7   :  { %v23448_v50 = vadd.f32 %v11475_v46, %v11445_v8  ;;  %18944 = vmatmul.mubr.msk.f32.vlgmr.msra.gmra.mrb[16].mxu1 %vm9472_vm6, %v23266_v7  ;;  %v9768_v46 = vmul.f32 0.110426925, %v23299_v48  ;;  %18958 = vmatprep.mubr.msk.f32.mxu0 %vm19984_vm1, %v25501_v52  ;;  %v11872_v61 = vpop.f32.mrb[13].mxu1 }
 0x7a8   :  { %v10299_v47 = vpop.permute.xlu0 %10298  ;;  %18951 = vmatprep.subr.mxu1 %v25501_v52  ;;  %18953 = vmatprep.mubr.msk.f32.mxu1 %vm19984_vm1, %v25501_v52 }
 0x7a9   :  { %25512 = vst [vmem:[#allocation33_spill] sm:$0xff] %v23448_v50  ;;  %v10384_v3 = vadd.f32 %v10299_v47, %v10264_v12  ;;  %18957 = vmatpush3.msra.mxu0 %v18900_v49  ;;  %18952 = vmatpush3.msra.mxu1 %v11872_v61 }
 0x7aa   :  { %10426 = vrot.lane.b32.xlu1 %v23455_v22, %s19989_s29  ;;  %18959 = vmatmul.mubr.msk.f32.vlgmr.msra.gmra.mrb[42].mxu0 %vm9472_vm6, %v23266_v7 }
 0x7ab   :  { %18954 = vmatmul.mubr.msk.f32.vlgmr.msra.gmra.mrb[18].mxu1 %vm9472_vm6, %v23266_v7  ;;  %18961 = vmatprep.subr.mxu1 %v25501_v52 }
 0x7ac   :  { %v10419_v14 = vpop.permute.xlu0 %10418  ;;  %18966 = vmatprep.subr.mxu0 %v25501_v52  ;;  %18963 = vmatprep.mubr.msk.f32.mxu1 %vm19984_vm1, %v25501_v52 }
 0x7ad   :  { %v10504_v39 = vadd.f32 %v10419_v14, %v10384_v3  ;;  %v23523_v14 = vpop.permute.xlu1 %9844  ;;  %v23530_v3 = vmul.f32 0.03635177, %v23470_v5  ;;  %18968 = vmatprep.mubr.msk.f32.mxu0 %vm19984_vm1, %v25501_v52  ;;  %v9557_v52 = vmul.f32 0.0076728435, %v23209_v27 }
 0x7ae   :  { %10546 = vrot.lane.b32.xlu1 %v23473_v0, %s19992_s15  ;;  %9666 = vrot.lane.b32.xlu0 %v23476_v9, %s19986_s26 }
 0x7b0   :  { %v10539_v38 = vpop.permute.xlu0 %10538 }
 0x7b1   :  { %v10624_v18 = vadd.f32 %v10539_v38, %v10504_v39  ;;  %v10128_v38 = vmul.f32 0.26860526, %v23299_v48  ;;  %v23547_v43 = vpop.permute.xlu1 %10444 }
 0x7b2   :  { %10030 = vrot.lane.b32.xlu1 %v9950_v25, %s19990_s0  ;;  %9678 = vrot.lane.b32.xlu0 %v23489_v42, %s19986_s26 }
 0x7b3   :  { %v23512_v47 = vmul.f32 0.03635177, %v10624_v18  ;;  %v10654_v7 = vmul.f32 0.0076728435, %v10624_v18  ;;  %v23539_v20 = vmul.f32 0.110426925, %v10624_v18 }
 0x7b4   :  { %v9663_v8 = vpop.permute.xlu0 %9662  ;;  %v10984_v23 = vmul.f32 0.21508227, %v10624_v18 }
 0x7b5   :  { %v10744_v12 = vrot.slane %v23512_v47, 1  ;;  %v10894_v50 = vrot.slane %v23539_v20, 2 }
 0x7b6   :  { %10330 = vrot.lane.b32.xlu1 %v9950_v25, %s19991_s28  ;;  %9846 = vrot.lane.b32.xlu0 %v9768_v46, %s19988_s27  ;;  %v9556_v25 = vmul.f32 0.0076728435, %v23177_v16 }
 0x7b7   :  { %v10804_v49 = vadd.f32 %v10744_v12, %v10654_v7  ;;  %v11134_v7 = vmul.f32 0.26860526, %v10624_v18 }
 0x7b8   :  { %v9843_v26 = vpop.permute.xlu0 %9842  ;;  %v9736_v39 = vadd.f32 %v9663_v8, %v9556_v25  ;;  %v23554_v8 = vmul.f32 0.110426925, %v23066_v56  ;;  %v11044_v25 = vrot.slane %v10984_v23, 3 }
 0x7b9   :  { %v10954_v54 = vadd.f32 %v10894_v50, %v10804_v49  ;;  %v23563_v50 = vmul.f32 0.03635177, %v23066_v56 }
 0x7ba   :  { %10450 = vrot.lane.b32.xlu1 %v23515_v34, %s19989_s29  ;;  %9858 = vrot.lane.b32.xlu0 %v23510_v24, %s19988_s27  ;;  %v9916_v16 = vadd.f32 %v9843_v26, %v9736_v39  ;;  %v23560_v26 = vpop.permute.xlu1 %10564 }
 0x7bb   :  { %v11104_v10 = vadd.f32 %v11044_v25, %v10954_v54 }
 0x7bc   :  { %v10023_v41 = vpop.permute.xlu0 %10022 }
 0x7bd   :  { %v10096_v1 = vadd.f32 %v10023_v41, %v9916_v16  ;;  %v9545_v41 = vmul.f32 0.0076728435, %v23020_v2  ;;  %v23573_v16 = vmul.f32 0.03635177, %v23072_v4 }
 0x7be   :  { %10570 = vrot.lane.b32.xlu1 %v23530_v3, %s19992_s15  ;;  %10206 = vrot.lane.b32.xlu0 %v10128_v38, %s19987_s30 }
 0x7c0   :  { %v10203_v61 = vpop.permute.xlu0 %10202 }
 0x7c1   :  { %v10276_v12 = vadd.f32 %v10203_v61, %v10096_v1  ;;  %v11194_v1 = vrot.slane %v11134_v7, 4  ;;  %v11284_v7 = vrot.slane %v10984_v23, 5 }
 0x7c2   :  { %10342 = vrot.lane.b32.xlu1 %v23545_v45, %s19991_s28  ;;  %10446 = vrot.lane.b32.xlu0 %v9768_v46, %s19989_s29 }
 0x7c3   :  { %v11254_v61 = vadd.f32 %v11194_v1, %v11104_v10 }
 0x7c4   :  { %v10323_v38 = vpop.permute.xlu0 %10322 }
 0x7c5   :  { %v10396_v39 = vadd.f32 %v10323_v38, %v10276_v12  ;;  %v23575_v38 = vpop.permute.xlu1 %10182 }
 0x7c6   :  { %10462 = vrot.lane.b32.xlu1 %v23554_v8, %s19989_s29  ;;  %10566 = vrot.lane.b32.xlu0 %v23476_v9, %s19992_s15  ;;  %v9725_v9 = vadd.f32 %v23431_v30, %v9545_v41  ;;  %v9759_v41 = vmul.f32 0.110426925, %v23072_v4 }
 0x7c8   :  { %v10443_v46 = vpop.permute.xlu0 %10442  ;;  %v9905_v2 = vadd.f32 %v23436_v44, %v9725_v9 }
 0x7c9   :  { %v10516_v49 = vadd.f32 %v10443_v46, %v10396_v39  ;;  %v11344_v39 = vadd.f32 %v11284_v7, %v11254_v61  ;;  %v23585_v23 = vpop.permute.xlu1 %10422  ;;  %v9939_v7 = vmul.f32 0.21508227, %v23072_v4 }
 0x7ca   :  { %10582 = vrot.lane.b32.xlu1 %v23563_v50, %s19992_s15  ;;  %10038 = vrot.lane.b32.xlu0 %v23342_v62, %s19990_s0  ;;  %v10085_v62 = vadd.f32 %v23446_v36, %v9905_v2  ;;  %v11374_v36 = vrot.slane %v23539_v20, 6 }
 0x7cb   :  { %v10636_v18 = vadd.f32 %v23421_v28, %v10516_v49 }
 0x7cc   :  { %v10181_v54 = vpop.permute.xlu0 %10180 }
 0x7cd   :  { %v10696_v12 = vmul.f32 0.03635177, %v10636_v18  ;;  %v10846_v25 = vmul.f32 0.110426925, %v10636_v18  ;;  %v10666_v10 = vmul.f32 0.0076728435, %v10636_v18  ;;  %v10265_v9 = vadd.f32 %v10181_v54, %v10085_v62 }
 0x7ce   :  { %9648 = vrot.lane.b32.xlu1 %v23573_v16, %s19986_s26  ;;  %10458 = vrot.lane.b32.xlu0 %v23510_v24, %s19989_s29  ;;  %v10996_v30 = vmul.f32 0.21508227, %v10636_v18  ;;  %v11146_v1 = vmul.f32 0.26860526, %v10636_v18 }
 0x7cf   :  { %v10756_v28 = vrot.slane %v10696_v12, 1  ;;  %v10906_v44 = vrot.slane %v10846_v25, 2 }
 0x7d0   :  { %v10301_v46 = vpop.permute.xlu0 %10300  ;;  %v11056_v2 = vrot.slane %v10996_v30, 3  ;;  %v11206_v54 = vrot.slane %v11146_v1, 4  ;;  %v11386_v1 = vrot.slane %v10846_v25, 6 }
 0x7d1   :  { %v10816_v49 = vadd.f32 %v10756_v28, %v10666_v10  ;;  %v10385_v35 = vadd.f32 %v10301_v46, %v10265_v9  ;;  %v10117_v10 = vmul.f32 0.26860526, %v23049_v33  ;;  %v11434_v28 = vadd.f32 %v11374_v36, %v11344_v39 }
 0x7d2   :  { %9828 = vrot.lane.b32.xlu1 %v9759_v41, %s19988_s27  ;;  %10578 = vrot.lane.b32.xlu0 %v23489_v42, %s19992_s15  ;;  %v11464_v42 = vrot.slane %v23512_v47, 7  ;;  %v11296_v46 = vrot.slane %v10996_v30, 5 }
 0x7d3   :  { %v10966_v24 = vadd.f32 %v10906_v44, %v10816_v49  ;;  %v9737_v44 = vadd.f32 %v23500_v58, %v9557_v52  ;;  %v11476_v52 = vrot.slane %v10696_v12, 7 }
 0x7d4   :  { %v10421_v61 = vpop.permute.xlu0 %10420  ;;  %v23602_v27 = vadd.f32 %v11464_v42, %v11434_v28 }
 0x7d5   :  { %v11116_v18 = vadd.f32 %v11056_v2, %v10966_v24  ;;  %v10505_v62 = vadd.f32 %v10421_v61, %v10385_v35  ;;  %v9917_v36 = vadd.f32 %v23523_v14, %v9737_v44  ;;  %v9949_v2 = vmul.f32 0.21508227, %v23373_v51 }
 0x7d6   :  { %10008 = vrot.lane.b32.xlu1 %v9939_v7, %s19990_s0  ;;  %v23594_v60 = vpop.xlane.xlu1 %9504  ;;  %10184 = vrot.lane.b32.xlu0 %v10117_v10, %s19987_s30  ;;  %25514 = vst [vmem:[#allocation32_spill] sm:$0xff] %v23602_v27 }
 0x7d7   :  { %v11266_v20 = vadd.f32 %v11206_v54, %v11116_v18  ;;  %v10625_v49 = vadd.f32 %v23485_v17, %v10505_v62  ;;  %v23629_v62 = vmul.f32 %v23072_v4, %v23072_v4 }
 0x7d8   :  { %v10025_v39 = vpop.permute.xlu0 %10024 }
 0x7d9   :  { %v11356_v9 = vadd.f32 %v11296_v46, %v11266_v20  ;;  %v23600_v35 = vmul.f32 0.03635177, %v10625_v49  ;;  %v23605_v24 = vmul.f32 0.110426925, %v10625_v49  ;;  %v10655_v58 = vmul.f32 0.0076728435, %v10625_v49 }
 0x7da   :  { %10308 = vrot.lane.b32.xlu1 %v9939_v7, %s19991_s28  ;;  %v23608_v47 = vpop.permute.xlu1 %10026  ;;  %10424 = vrot.lane.b32.xlu0 %v23357_v11, %s19989_s29  ;;  %v10097_v10 = vadd.f32 %v10025_v39, %v9917_v36  ;;  %v23618_v7 = vmul.f32 %v23602_v27, %v23602_v27  ;;  %v10985_v18 = vmul.f32 0.21508227, %v10625_v49  ;;  %25517 = vst [vmem:[#allocation38_spill] sm:$0xff] %v23629_v62  ;;  %v11135_v39 = vmul.f32 0.26860526, %v10625_v49 }
 0x7db   :  { %v11446_v17 = vadd.f32 %v11386_v1, %v11356_v9  ;;  %v10745_v25 = vrot.slane %v23600_v35, 1  ;;  %v10895_v28 = vrot.slane %v23605_v24, 2 }
 0x7dc   :  { %v10205_v30 = vpop.permute.xlu0 %10204  ;;  %25516 = vst [vmem:[#allocation36_spill] sm:$0xff] %v23618_v7  ;;  %v11045_v44 = vrot.slane %v10985_v18, 3 }
 0x7dd   :  { %v23614_v61 = vadd.f32 %v11476_v52, %v11446_v17  ;;  %v10805_v14 = vadd.f32 %v10745_v25, %v10655_v58  ;;  %v10277_v12 = vadd.f32 %v10205_v30, %v10097_v10  ;;  %v23638_v17 = vmul.f32 0.03635177, %v23629_v62 }
 0x7de   :  { %10428 = vrot.lane.b32.xlu1 %v9759_v41, %s19989_s29  ;;  %v23622_v11 = vpop.permute.xlu1 %10326  ;;  %10028 = vrot.lane.b32.xlu0 %v9949_v2, %s19990_s0  ;;  %v10135_v52 = vmul.f32 0.26860526, %v23056_v63  ;;  %v11195_v25 = vrot.slane %v11135_v39, 4  ;;  %v23649_v10 = vmul.f32 0.03635177, %v23076_v29 }
 0x7df   :  { %25515 = vst [vmem:[#allocation35_spill] sm:$0xff] %v23614_v61  ;;  %v10955_v42 = vadd.f32 %v10895_v28, %v10805_v14 }
 0x7e0   :  { %v10325_v20 = vpop.permute.xlu0 %10324 }
 0x7e1   :  { %v10397_v46 = vadd.f32 %v10325_v20, %v10277_v12  ;;  %v11105_v1 = vadd.f32 %v11045_v44, %v10955_v42  ;;  %v11285_v20 = vrot.slane %v10985_v18, 5  ;;  %v11375_v18 = vrot.slane %v23605_v24, 6 }
 0x7e2   :  { %10548 = vrot.lane.b32.xlu1 %v23573_v16, %s19992_s15  ;;  %v23633_v41 = vpop.permute.xlu1 %10218  ;;  %10328 = vrot.lane.b32.xlu0 %v9949_v2, %s19991_s28 }
 0x7e3   :  { %v10517_v9 = vadd.f32 %v23547_v43, %v10397_v46  ;;  %v9546_v43 = vmul.f32 0.0076728435, %v23035_v21  ;;  %v11255_v2 = vadd.f32 %v11195_v25, %v11105_v1 }
 0x7e4   :  { %v9643_v36 = vpop.permute.xlu0 %9642 }
 0x7e5   :  { %v10637_v58 = vadd.f32 %v23560_v26, %v10517_v9  ;;  %v9726_v42 = vadd.f32 %v9643_v36, %v9546_v43  ;;  %v11345_v25 = vadd.f32 %v11285_v20, %v11255_v2 }
 0x7e6   :  { %9672 = vrot.lane.b32.xlu1 %v23638_v17, %s19986_s26  ;;  %v23644_v16 = vpop.permute.xlu1 %10338  ;;  %10220 = vrot.lane.b32.xlu0 %v10135_v52, %s19987_s30  ;;  %v9771_v52 = vmul.f32 0.110426925, %v23629_v62 }
 0x7e7   :  { %v10697_v49 = vmul.f32 0.03635177, %v10637_v58  ;;  %v10847_v30 = vmul.f32 0.110426925, %v10637_v58  ;;  %v10667_v28 = vmul.f32 0.0076728435, %v10637_v58  ;;  %v11435_v2 = vadd.f32 %v11375_v18, %v11345_v25 }
 0x7e8   :  { %v9823_v14 = vpop.permute.xlu0 %9822  ;;  %v10997_v26 = vmul.f32 0.21508227, %v10637_v58  ;;  %v11147_v39 = vmul.f32 0.26860526, %v10637_v58 }
 0x7e9   :  { %v10757_v12 = vrot.slane %v10697_v49, 1  ;;  %v10907_v21 = vrot.slane %v10847_v30, 2  ;;  %v9906_v9 = vadd.f32 %v9823_v14, %v9726_v42  ;;  %v11477_v25 = vrot.slane %v10697_v49, 7 }
 0x7ea   :  { %9684 = vrot.lane.b32.xlu1 %v23649_v10, %s19986_s26  ;;  %v23653_v46 = vpop.permute.xlu1 %9644  ;;  %10340 = vrot.lane.b32.xlu0 %v23427_v13, %s19991_s28  ;;  %v11057_v61 = vrot.slane %v10997_v26, 3  ;;  %v11297_v20 = vrot.slane %v10997_v26, 5  ;;  %v9938_v26 = vmul.f32 0.21508227, %v23062_v6 }
 0x7eb   :  { %v10817_v44 = vadd.f32 %v10757_v12, %v10667_v28  ;;  %v11207_v28 = vrot.slane %v11147_v39, 4  ;;  %v23666_v12 = vmul.f32 0.110426925, %v23076_v29  ;;  %v10131_v39 = vmul.f32 0.26860526, %v23629_v62 }
 0x7ec   :  { %v10003_v1 = vpop.permute.xlu0 %10002 }
 0x7ed   :  { %v10967_v54 = vadd.f32 %v10907_v21, %v10817_v44  ;;  %v10086_v36 = vadd.f32 %v10003_v1, %v9906_v9 }
 0x7ee   :  { %9852 = vrot.lane.b32.xlu1 %v9771_v52, %s19988_s27  ;;  %v23660_v43 = vpop.permute.xlu1 %9824  ;;  %9646 = vrot.lane.b32.xlu0 %v23473_v0, %s19986_s26  ;;  %v11465_v0 = vrot.slane %v23600_v35, 7 }
 0x7ef   :  { %v11117_v13 = vadd.f32 %v11057_v61, %v10967_v54  ;;  %v10266_v58 = vadd.f32 %v23575_v38, %v10086_v36  ;;  %v11387_v38 = vrot.slane %v10847_v30, 6 }
 0x7f0   :  { %v10303_v14 = vpop.permute.xlu0 %10302  ;;  %v23678_v9 = vadd.f32 %v11465_v0, %v11435_v2 }
 0x7f1   :  { %v11267_v42 = vadd.f32 %v11207_v28, %v11117_v13  ;;  %v10386_v44 = vadd.f32 %v10303_v14, %v10266_v58 }
 0x7f2   :  { %9864 = vrot.lane.b32.xlu1 %v23666_v12, %s19988_s27  ;;  %v23670_v24 = vpop.permute.xlu1 %10004  ;;  %9826 = vrot.lane.b32.xlu0 %v23455_v22, %s19988_s27  ;;  %25518 = vst [vmem:[#allocation40_spill] sm:$0xff] %v23678_v9  ;;  %v23691_v13 = vmul.f32 %v23678_v9, %v23678_v9 }
 0x7f3   :  { %v11357_v61 = vadd.f32 %v11297_v20, %v11267_v42  ;;  %v10506_v54 = vadd.f32 %v23585_v23, %v10386_v44  ;;  %v23687_v23 = vmul.f32 0.21508227, %v23629_v62 }
 0x7f4   :  { %v10543_v21 = vpop.permute.xlu0 %10542  ;;  %25520 = vst [vmem:[#allocation43_spill] sm:$0xff] %v23691_v13  ;;  %v10138_v13 = vmul.f32 0.26860526, %v23086_v15 }
 0x7f5   :  { %v11447_v1 = vadd.f32 %v11387_v38, %v11357_v61  ;;  %v10626_v36 = vadd.f32 %v10543_v21, %v10506_v54 }
 0x7f6   :  { %10212 = vrot.lane.b32.xlu1 %v10131_v39, %s19987_s30  ;;  %v23681_v18 = vpop.permute.xlu1 %10304  ;;  %10006 = vrot.lane.b32.xlu0 %v9938_v26, %s19990_s0 }
 0x7f7   :  { %v10686_v22 = vmul.f32 0.03635177, %v10626_v36  ;;  %v10836_v35 = vmul.f32 0.110426925, %v10626_v36  ;;  %v23684_v30 = vadd.f32 %v11477_v25, %v11447_v1  ;;  %v10656_v28 = vmul.f32 0.0076728435, %v10626_v36 }
 0x7f8   :  { %v10986_v58 = vmul.f32 0.21508227, %v10626_v36  ;;  %v11136_v44 = vmul.f32 0.26860526, %v10626_v36 }
 0x7f9   :  { %25519 = vst [vmem:[#allocation42_spill] sm:$0xff] %v23684_v30  ;;  %v10746_v49 = vrot.slane %v10686_v22, 1  ;;  %v10896_v20 = vrot.slane %v10836_v35, 2  ;;  %v11376_v36 = vrot.slane %v10836_v35, 6 }
 0x7fa   :  { %10332 = vrot.lane.b32.xlu1 %v23687_v23, %s19991_s28  ;;  %v23695_v14 = vpop.permute.xlu1 %10544  ;;  %10306 = vrot.lane.b32.xlu0 %v9938_v26, %s19991_s28  ;;  %v11046_v61 = vrot.slane %v10986_v58, 3  ;;  %v11196_v21 = vrot.slane %v11136_v44, 4  ;;  %v11286_v1 = vrot.slane %v10986_v58, 5  ;;  %v9760_v44 = vmul.f32 0.110426925, %v23081_v59 }
 0x7fb   :  { %v10806_v42 = vadd.f32 %v10746_v49, %v10656_v28  ;;  %v11466_v49 = vrot.slane %v10686_v22, 7 }
 0x7fd   :  { %v10956_v0 = vadd.f32 %v10896_v20, %v10806_v42  ;;  %v10130_v20 = vmul.f32 0.26860526, %v23470_v5 }
 0x7fe   :  { %10452 = vrot.lane.b32.xlu1 %v9771_v52, %s19989_s29  ;;  %v23701_v38 = vpop.permute.xlu1 %9668  ;;  %9670 = vrot.lane.b32.xlu0 %v23530_v3, %s19986_s26  ;;  %v9957_v52 = vmul.f32 0.21508227, %v23076_v29 }
 0x7ff   :  { %v11106_v54 = vadd.f32 %v11046_v61, %v10956_v0  ;;  %v23749_v0 = vmul.f32 %v23081_v59, %v23081_v59  ;;  %v9580_v61 = vmul.f32 0.03635177, %v23081_v59 }
 0x801   :  { %v11256_v39 = vadd.f32 %v11196_v21, %v11106_v54  ;;  %25521 = vst [vmem:[#allocation45_spill] sm:$0xff] %v23749_v0  ;;  %v10136_v54 = vmul.f32 0.26860526, %v23066_v56 }
 0x802   :  { %10572 = vrot.lane.b32.xlu1 %v23638_v17, %s19992_s15  ;;  %v23707_v26 = vpop.permute.xlu1 %9680  ;;  %9682 = vrot.lane.b32.xlu0 %v23563_v50, %s19986_s26  ;;  %v10120_v17 = vmul.f32 0.26860526, %v23081_v59 }
 0x803   :  { %v11346_v25 = vadd.f32 %v11286_v1, %v11256_v39  ;;  %v9952_v39 = vmul.f32 0.21508227, %v23749_v0  ;;  %v10119_v1 = vmul.f32 0.26860526, %v23072_v4 }
 0x805   :  { %v11436_v28 = vadd.f32 %v11376_v36, %v11346_v25  ;;  %v10132_v25 = vmul.f32 0.26860526, %v23749_v0  ;;  %v9506_v36 = vrot.slane %v23594_v60, 4 }
 0x806   :  { %10044 = vrot.lane.b32.xlu1 %v9957_v52, %s19990_s0  ;;  %v23713_v3 = vpop.permute.xlu1 %9848  ;;  %9850 = vrot.lane.b32.xlu0 %v23515_v34, %s19988_s27  ;;  %v23733_v34 = vmul.f32 0.21508227, %v23081_v59 }
 0x807   :  { %v11526_v58 = vadd.f32 %v11466_v49, %v11436_v28  ;;  %v10137_v49 = vmul.f32 0.26860526, %v23076_v29 }
 0x809   :  { %v23718_v42 = vmul.f32 %v11526_v58, %v11526_v58  ;;  %v23721_v50 = vmul.f32 %v11526_v58, %v23217_v55  ;;  %v9507_v58 = vmin.f32 %v23594_v60, %v9506_v36 }
 0x80a   :  { %10190 = vrot.lane.b32.xlu1 %v10120_v17, %s19987_s30  ;;  %v23724_v35 = vpop.permute.xlu1 %9860  ;;  %9862 = vrot.lane.b32.xlu0 %v23554_v8, %s19988_s27 }
 0x80b   :  { %v23730_v22 = vadd.f32 %v23718_v42, %v23225_v53 }
 0x80e   :  { %10310 = vrot.lane.b32.xlu1 %v23733_v34, %s19991_s28  ;;  %v23738_v55 = vpop.permute.xlu1 %10208  ;;  %10210 = vrot.lane.b32.xlu0 %v10130_v20, %s19987_s30  ;;  %v23777_v20 = vmul.f32 0.110426925, %v23749_v0 }
 0x812   :  { %10430 = vrot.lane.b32.xlu1 %v9760_v44, %s19989_s29  ;;  %v23743_v8 = vpop.permute.xlu1 %10448  ;;  %10042 = vrot.lane.b32.xlu0 %v23545_v45, %s19990_s0 }
 0x816   :  { %10550 = vrot.lane.b32.xlu1 %v9580_v61, %s19992_s15  ;;  %v23754_v21 = vpop.permute.xlu1 %10568  ;;  %10222 = vrot.lane.b32.xlu0 %v10136_v54, %s19987_s30 }
 0x81a   :  { %10034 = vrot.lane.b32.xlu1 %v9952_v39, %s19990_s0  ;;  %v23760_v45 = vpop.permute.xlu1 %10040  ;;  %10188 = vrot.lane.b32.xlu0 %v10119_v1, %s19987_s30  ;;  %v9508_v1 = vrot.slane %v9507_v58, 2 }
 0x81c   :  { %v9509_v2 = vmin.f32 %v9507_v58, %v9508_v1 }
 0x81e   :  { %10214 = vrot.lane.b32.xlu1 %v10132_v25, %s19987_s30  ;;  %v23766_v28 = vpop.permute.xlu1 %10460  ;;  %10032 = vrot.lane.b32.xlu0 %v23687_v23, %s19990_s0  ;;  %v9510_v27 = vrot.slane %v9509_v2, 1 }
 0x820   :  { %v9511_v59 = vmin.f32 %v9509_v2, %v9510_v27  ;;  %v23808_v27 = vmul.f32 0.03635177, %v23091_v19 }
 0x822   :  { %10334 = vrot.lane.b32.xlu1 %v9952_v39, %s19991_s28  ;;  %v23773_v17 = vpop.permute.xlu1 %10580  ;;  %10224 = vrot.lane.b32.xlu0 %v10137_v49, %s19987_s30  ;;  %v9958_v39 = vmul.f32 0.21508227, %v23086_v15 }
 0x825   :  { %v9485_v54 = vpop.xlane.xlu0 %9484 }
 0x826   :  { %v9486_v25 = vrot.slane %v9485_v54, 4  ;;  %10454 = vrot.lane.b32.xlu1 %v23777_v20, %s19989_s29  ;;  %v23781_v23 = vpop.permute.xlu1 %10186  ;;  %10344 = vrot.lane.b32.xlu0 %v9957_v52, %s19991_s28 }
 0x828   :  { %v9487_v60 = vmax.f32 %v9485_v54, %v9486_v25  ;;  %v9558_v54 = vmul.f32 0.0076728435, %v23299_v48 }
 0x829   :  { %v9667_v36 = vpop.permute.xlu0 %9666 }
 0x82a   :  { %10046 = vrot.lane.b32.xlu1 %v9958_v39, %s19990_s0  ;;  %v23786_v49 = vpop.permute.xlu1 %10426  ;;  %10464 = vrot.lane.b32.xlu0 %v23666_v12, %s19989_s29  ;;  %v9488_v30 = vrot.slane %v9487_v60, 2  ;;  %v9738_v12 = vadd.f32 %v9667_v36, %v9558_v54  ;;  %v9941_v54 = vmul.f32 0.21508227, %v23091_v19 }
 0x82c   :  { %v9489_v9 = vmax.f32 %v9487_v60, %v9488_v30 }
 0x82d   :  { %v9679_v7 = vpop.permute.xlu0 %9678 }
 0x82e   :  { %10226 = vrot.lane.b32.xlu1 %v10138_v13, %s19987_s30  ;;  %v23792_v52 = vpop.permute.xlu1 %10546  ;;  %10584 = vrot.lane.b32.xlu0 %v23649_v10, %s19992_s15  ;;  %v9490_v58 = vrot.slane %v9489_v9, 1  ;;  %v9778_v13 = vmul.f32 0.110426925, %v23086_v15 }
 0x830   :  { %v9491_v1 = vmax.f32 %v9489_v9, %v9490_v58 }
 0x831   :  { %v9847_v25 = vpop.permute.xlu0 %9846 }
 0x832   :  { %10346 = vrot.lane.b32.xlu1 %v9958_v39, %s19991_s28  ;;  %v23798_v29 = vpop.permute.xlu1 %10030  ;;  %9650 = vrot.lane.b32.xlu0 %v9580_v61, %s19986_s26  ;;  %19523 = vpush %v9491_v1  ;;  %v9918_v30 = vadd.f32 %v9847_v25, %v9738_v12  ;;  %v9761_v39 = vmul.f32 0.110426925, %v23091_v19  ;;  %v9598_v1 = vmul.f32 0.03635177, %v23086_v15 }
 0x833   :  { %19525 = vpush %v9511_v59 }
 0x834   :  { %v10098_v48 = vadd.f32 %v23608_v47, %v9918_v30 }
 0x835   :  { %v9859_v60 = vpop.permute.xlu0 %9858 }
 0x836   :  { %10466 = vrot.lane.b32.xlu1 %v9778_v13, %s19989_s29  ;;  %v23803_v10 = vpop.permute.xlu1 %10330  ;;  %9830 = vrot.lane.b32.xlu0 %v9760_v44, %s19988_s27  ;;  %v9592_v44 = vmul.f32 0.03635177, %v23749_v0 }
 0x837   :  { %25522 = vst [vmem:[#allocation46_spill] sm:$0xff] %v23803_v10 }
 0x839   :  { %v10207_v9 = vpop.permute.xlu0 %10206 }
 0x83a   :  { %v10278_v2 = vadd.f32 %v10207_v9, %v10098_v48  ;;  %9652 = vrot.lane.b32.xlu1 %v23808_v27, %s19986_s26  ;;  %v23812_v59 = vpop.permute.xlu1 %10450  ;;  %10010 = vrot.lane.b32.xlu0 %v23733_v34, %s19990_s0  ;;  %v9564_v34 = vmul.f32 0.0076728435, %v23041_v32 }
 0x83b   :  { %25523 = vst [vmem:[#allocation20_spill] sm:$0xff] %v23812_v59 }
 0x83c   :  { %v10398_v61 = vadd.f32 %v23622_v11, %v10278_v2  ;;  %v9744_v30 = vadd.f32 %v9679_v7, %v9564_v34  ;;  %v10121_v2 = vmul.f32 0.26860526, %v23091_v19 }
 0x83d   :  { %v10447_v47 = vpop.permute.xlu0 %10446 }
 0x83e   :  { %9832 = vrot.lane.b32.xlu1 %v9761_v39, %s19988_s27  ;;  %v23820_v36 = vpop.permute.xlu1 %10570  ;;  %9674 = vrot.lane.b32.xlu0 %v9592_v44, %s19986_s26  ;;  %v10518_v58 = vadd.f32 %v10447_v47, %v10398_v61  ;;  %v9924_v61 = vadd.f32 %v9859_v60, %v9744_v30  ;;  %v9547_v60 = vmul.f32 0.0076728435, %v23049_v33 }
 0x83f   :  { %25524 = vst [vmem:[#allocation22_spill] sm:$0xff] %v23820_v36 }
 0x841   :  { %v10567_v25 = vpop.permute.xlu0 %10566 }
 0x842   :  { %v10638_v11 = vadd.f32 %v10567_v25, %v10518_v58  ;;  %10012 = vrot.lane.b32.xlu1 %v9941_v54, %s19990_s0  ;;  %v23827_v12 = vpop.permute.xlu1 %10342  ;;  %9686 = vrot.lane.b32.xlu0 %v9598_v1, %s19986_s26 }
 0x843   :  { %25525 = vst [vmem:[#allocation48_spill] sm:$0xff] %v23827_v12 }
 0x844   :  { %v10698_v48 = vmul.f32 0.03635177, %v10638_v11  ;;  %v10848_v9 = vmul.f32 0.110426925, %v10638_v11  ;;  %v10668_v0 = vmul.f32 0.0076728435, %v10638_v11 }
 0x845   :  { %v10039_v47 = vpop.permute.xlu0 %10038  ;;  %v10998_v15 = vmul.f32 0.21508227, %v10638_v11  ;;  %v11148_v7 = vmul.f32 0.26860526, %v10638_v11 }
 0x846   :  { %v10758_v62 = vrot.slane %v10698_v48, 1  ;;  %10192 = vrot.lane.b32.xlu1 %v10121_v2, %s19987_s30  ;;  %v23832_v32 = vpop.permute.xlu1 %10462  ;;  %9854 = vrot.lane.b32.xlu0 %v23777_v20, %s19988_s27  ;;  %v10104_v58 = vadd.f32 %v10039_v47, %v9924_v61  ;;  %v10908_v12 = vrot.slane %v10848_v9, 2 }
 0x847   :  { %v11058_v59 = vrot.slane %v10998_v15, 3  ;;  %v11208_v20 = vrot.slane %v11148_v7, 4 }
 0x848   :  { %v10818_v25 = vadd.f32 %v10758_v62, %v10668_v0  ;;  %v10284_v34 = vadd.f32 %v23633_v41, %v10104_v58  ;;  %v23845_v62 = vmul.f32 %v23091_v19, %v23091_v19  ;;  %v9727_v0 = vadd.f32 %v23653_v46, %v9547_v60 }
 0x849   :  { %v10459_v36 = vpop.permute.xlu0 %10458 }
 0x84a   :  { %v10968_v30 = vadd.f32 %v10908_v12, %v10818_v25  ;;  %10312 = vrot.lane.b32.xlu1 %v9941_v54, %s19991_s28  ;;  %v23839_v10 = vpop.permute.xlu1 %10582  ;;  %9866 = vrot.lane.b32.xlu0 %v9778_v13, %s19988_s27  ;;  %v10404_v2 = vadd.f32 %v23644_v16, %v10284_v34  ;;  %v9907_v12 = vadd.f32 %v23660_v43, %v9727_v0  ;;  %v11298_v54 = vrot.slane %v10998_v15, 5 }
 0x84b   :  { %v11388_v25 = vrot.slane %v10848_v9, 6  ;;  %v9593_v46 = vmul.f32 0.03635177, %v23845_v62  ;;  %v11478_v34 = vrot.slane %v10698_v48, 7  ;;  %v9559_v9 = vmul.f32 0.0076728435, %v23373_v51 }
 0x84c   :  { %v11118_v41 = vadd.f32 %v11058_v59, %v10968_v30  ;;  %v10524_v11 = vadd.f32 %v10459_v36, %v10404_v2  ;;  %v10087_v13 = vadd.f32 %v23670_v24, %v9907_v12  ;;  %v23864_v2 = vmul.f32 0.03635177, %v23099_v57 }
 0x84d   :  { %v10579_v33 = vpop.permute.xlu0 %10578 }
 0x84e   :  { %v11268_v61 = vadd.f32 %v11208_v20, %v11118_v41  ;;  %10432 = vrot.lane.b32.xlu1 %v9761_v39, %s19989_s29  ;;  %v23850_v47 = vpop.permute.xlu1 %9648  ;;  %10574 = vrot.lane.b32.xlu0 %v9592_v44, %s19992_s15  ;;  %v10644_v16 = vadd.f32 %v10579_v33, %v10524_v11  ;;  %v9739_v33 = vadd.f32 %v23701_v38, %v9559_v9  ;;  %v9773_v38 = vmul.f32 0.110426925, %v23845_v62 }
 0x850   :  { %v11358_v58 = vadd.f32 %v11298_v54, %v11268_v61  ;;  %v23855_v59 = vmul.f32 0.03635177, %v10644_v16  ;;  %v10854_v36 = vmul.f32 0.110426925, %v10644_v16  ;;  %v10674_v44 = vmul.f32 0.0076728435, %v10644_v16 }
 0x851   :  { %v10185_v7 = vpop.permute.xlu0 %10184  ;;  %v11004_v60 = vmul.f32 0.21508227, %v10644_v16  ;;  %v11154_v48 = vmul.f32 0.26860526, %v10644_v16  ;;  %v9919_v16 = vadd.f32 %v23713_v3, %v9739_v33 }
 0x852   :  { %v11448_v43 = vadd.f32 %v11388_v25, %v11358_v58  ;;  %v10267_v15 = vadd.f32 %v10185_v7, %v10087_v13  ;;  %9676 = vrot.lane.b32.xlu1 %v9593_v46, %s19986_s26  ;;  %v23858_v39 = vpop.permute.xlu1 %9828  ;;  %10586 = vrot.lane.b32.xlu0 %v9598_v1, %s19992_s15  ;;  %v10764_v24 = vrot.slane %v23855_v59, 1  ;;  %v10914_v41 = vrot.slane %v10854_v36, 2 }
 0x853   :  { %v11064_v61 = vrot.slane %v11004_v60, 3  ;;  %v11214_v58 = vrot.slane %v11154_v48, 4 }
 0x854   :  { %v11538_v30 = vadd.f32 %v11478_v34, %v11448_v43  ;;  %v10824_v0 = vadd.f32 %v10764_v24, %v10674_v44  ;;  %v10387_v20 = vadd.f32 %v23681_v18, %v10267_v15  ;;  %v25526_v18 = vsub.f32 %v23227_v31, %v23225_v53 }
 0x855   :  { %v10425_v11 = vpop.permute.xlu0 %10424  ;;  %v11304_v34 = vrot.slane %v11004_v60, 5  ;;  %v9565_v31 = vmul.f32 0.0076728435, %v23056_v63  ;;  %v11394_v44 = vrot.slane %v10854_v36, 6  ;;  %v11484_v60 = vrot.slane %v23855_v59, 7 }
 0x856   :  { %v11574_v1 = vsub.f32 %v11538_v30, %v23718_v42  ;;  %9688 = vrot.lane.b32.xlu1 %v23864_v2, %s19986_s26  ;;  %v23871_v12 = vpop.permute.xlu1 %10008  ;;  %10552 = vrot.lane.b32.xlu0 %v23808_v27, %s19992_s15  ;;  %v10974_v51 = vadd.f32 %v10914_v41, %v10824_v0  ;;  %v10507_v54 = vadd.f32 %v10425_v11, %v10387_v20 }
 0x857   :  { %v9745_v20 = vadd.f32 %v23707_v26, %v9565_v31  ;;  %v9959_v26 = vmul.f32 0.21508227, %v23099_v57 }
 0x858   :  { %v23879_v13 = vadd.f32 %v11574_v1, %v25526_v18  ;;  %v11124_v42 = vadd.f32 %v11064_v61, %v10974_v51  ;;  %v10627_v25 = vadd.f32 %v23695_v14, %v10507_v54  ;;  %v23892_v14 = vmul.f32 0.110426925, %v23099_v57 }
 0x859   :  { %v10029_v7 = vpop.permute.xlu0 %10028  ;;  %v9925_v51 = vadd.f32 %v23724_v35, %v9745_v20  ;;  %v9953_v61 = vmul.f32 0.21508227, %v23845_v62 }
 0x85a   :  { %v10099_v43 = vadd.f32 %v10029_v7, %v9919_v16  ;;  %9856 = vrot.lane.b32.xlu1 %v9773_v38, %s19988_s27  ;;  %v23884_v27 = vpop.permute.xlu1 %10308  ;;  %10456 = vrot.lane.b32.xlu0 %v9773_v38, %s19989_s29  ;;  %v11274_v3 = vadd.f32 %v11214_v58, %v11124_v42  ;;  %v23887_v15 = vmul.f32 0.03635177, %v10627_v25  ;;  %v10837_v53 = vmul.f32 0.110426925, %v10627_v25 }
 0x85b   :  { %v10657_v30 = vmul.f32 0.0076728435, %v10627_v25  ;;  %v10987_v41 = vmul.f32 0.21508227, %v10627_v25  ;;  %v11137_v11 = vmul.f32 0.26860526, %v10627_v25  ;;  %v10105_v42 = vadd.f32 %v23760_v45, %v9925_v51 }
 0x85c   :  { %v10279_v24 = vadd.f32 %v23738_v55, %v10099_v43  ;;  %v11364_v9 = vadd.f32 %v11304_v34, %v11274_v3  ;;  %v10747_v0 = vrot.slane %v23887_v15, 1  ;;  %v10897_v33 = vrot.slane %v10837_v53, 2 }
 0x85d   :  { %v10329_v48 = vpop.permute.xlu0 %10328  ;;  %v11047_v16 = vrot.slane %v10987_v41, 3  ;;  %v11197_v58 = vrot.slane %v11137_v11, 4  ;;  %v10139_v45 = vmul.f32 0.26860526, %v23099_v57  ;;  %v11287_v34 = vrot.slane %v10987_v41, 5 }
 0x85e   :  { %9868 = vrot.lane.b32.xlu1 %v23892_v14, %s19988_s27  ;;  %v23899_v63 = vpop.permute.xlu1 %10428  ;;  %10576 = vrot.lane.b32.xlu0 %v9593_v46, %s19992_s15  ;;  %v11454_v55 = vadd.f32 %v11394_v44, %v11364_v9  ;;  %v10807_v36 = vadd.f32 %v10747_v0, %v10657_v30  ;;  %v10399_v1 = vadd.f32 %v10329_v48, %v10279_v24  ;;  %v11377_v9 = vrot.slane %v10837_v53, 6 }
 0x85f   :  { %v11467_v41 = vrot.slane %v23887_v15, 7 }
 0x860   :  { %v23905_v54 = vadd.f32 %v11484_v60, %v11454_v55  ;;  %v10957_v59 = vadd.f32 %v10897_v33, %v10807_v36  ;;  %v10519_v18 = vadd.f32 %v23743_v8, %v10399_v1  ;;  %v10133_v8 = vmul.f32 0.26860526, %v23845_v62 }
 0x861   :  { %v10221_v38 = vpop.permute.xlu0 %10220 }
 0x862   :  { %10036 = vrot.lane.b32.xlu1 %v9953_v61, %s19990_s0  ;;  %v23910_v46 = vpop.permute.xlu1 %10548  ;;  %10048 = vrot.lane.b32.xlu0 %v9959_v26, %s19990_s0  ;;  %v11107_v35 = vadd.f32 %v11047_v16, %v10957_v59  ;;  %v10639_v25 = vadd.f32 %v23754_v21, %v10519_v18  ;;  %v11580_v7 = vsub.f32 %v23905_v54, %v23721_v50 }
 0x863   :  { %s19524_s9 = spop %19523  ;;  %v10285_v43 = vadd.f32 %v10221_v38, %v10105_v42  ;;  %v9548_v38 = vmul.f32 0.0076728435, %v23062_v6 }
 0x864   :  { %p9513_p12 = scmp.gt.f32.partialorder %s19524_s9, 128.0  ;;  %s19526_s19 = spop %19525  ;;  %v11257_v3 = vadd.f32 %v11197_v58, %v11107_v35  ;;  %v23918_v31 = vmul.f32 0.03635177, %v10639_v25  ;;  %v23920_v44 = vmul.f32 0.110426925, %v10639_v25 }
 0x865   :  { %v10341_v24 = vpop.permute.xlu0 %10340  ;;  %v10669_v48 = vmul.f32 0.0076728435, %v10639_v25  ;;  %v10999_v60 = vmul.f32 0.21508227, %v10639_v25  ;;  %p9515_p13 = scmp.lt.f32.partialorder %s19526_s19, -0.5 }
 0x866   :  { %s9514_s10 = scalar_select %p9513_p12, 255.0, 1.0  ;;  %v10405_v21 = vadd.f32 %v10341_v24, %v10285_v43  ;;  %10216 = vrot.lane.b32.xlu1 %v10133_v8, %s19987_s30  ;;  %v23923_v30 = vpop.permute.xlu1 %9672  ;;  %10228 = vrot.lane.b32.xlu0 %v10139_v45, %s19987_s30  ;;  %v11347_v0 = vadd.f32 %v11287_v34, %v11257_v3  ;;  %v10759_v20 = vrot.slane %v23918_v31, 1  ;;  %v11149_v11 = vmul.f32 0.26860526, %v10639_v25 }
 0x867   :  { %v10909_v53 = vrot.slane %v23920_v44, 2  ;;  %s9516_s21 = scalar_select %p9515_p13, -1.0, 0.0  ;;  %v11059_v16 = vrot.slane %v10999_v60, 3  ;;  %v11299_v58 = vrot.slane %v10999_v60, 5  ;;  %v11389_v24 = vrot.slane %v23920_v44, 6 }
 0x868   :  { %v11437_v55 = vadd.f32 %v11377_v9, %v11347_v0  ;;  %v10819_v36 = vadd.f32 %v10759_v20, %v10669_v48  ;;  %v10525_v33 = vadd.f32 %v23766_v28, %v10405_v21  ;;  %v11209_v18 = vrot.slane %v11149_v11, 4 }
 0x869   :  { %v9647_v1 = vpop.permute.xlu0 %9646  ;;  %s9517_s16 = ssub.f32 %s9514_s10, %s9516_s21  ;;  %v11586_v0 = vmul.f32 2.0, %v11580_v7 }
 0x86a   :  { %10336 = vrot.lane.b32.xlu1 %v9953_v61, %s19991_s28  ;;  %v23931_v51 = vpop.permute.xlu1 %9684  ;;  %10348 = vrot.lane.b32.xlu0 %v9959_v26, %s19991_s28  ;;  %v11527_v54 = vadd.f32 %v11467_v41, %v11437_v55  ;;  %v10969_v59 = vadd.f32 %v10909_v53, %v10819_v36  ;;  %v10645_v15 = vadd.f32 %v23773_v17, %v10525_v33  ;;  %v11479_v41 = vrot.slane %v23918_v31, 7 }
 0x86b   :  { %s9518_s22 = smul.f32 0.01, %s9517_s16  ;;  %v9728_v26 = vadd.f32 %v9647_v1, %v9548_v38  ;;  %v11623_v36 = vmul.f32 2.0, %v23721_v50  ;;  %v23963_v1 = vpop.f32.mrb[26].mxu0 }
 0x86c   :  { %v11557_v42 = vmul.f32 %v11527_v54, %v11527_v54  ;;  %v11119_v35 = vadd.f32 %v11059_v16, %v10969_v59  ;;  %v23936_v28 = vmul.f32 0.03635177, %v10645_v15  ;;  %s9520_s2 = smul.f32 0.03, %s9517_s16  ;;  %v10675_v25 = vmul.f32 0.0076728435, %v10645_v15 }
 0x86d   :  { %v9827_v61 = vpop.permute.xlu0 %9826  ;;  %v23938_v43 = vmul.f32 0.110426925, %v10645_v15  ;;  %v23945_v17 = vmul.f32 %v11527_v54, %v23325_v40  ;;  %s9519_s20 = smul.f32 %s9518_s22, %s9518_s22  ;;  %v11005_v34 = vmul.f32 0.21508227, %v10645_v15  ;;  %v11155_v9 = vmul.f32 0.26860526, %v10645_v15 }
 0x86e   :  { %10468 = vrot.lane.b32.xlu1 %v23892_v14, %s19989_s29  ;;  %v23942_v8 = vpop.permute.xlu1 %9852  ;;  %v23948_v6 = vadd.f32 %v11557_v42, %v23339_v37  ;;  %v11269_v45 = vadd.f32 %v11209_v18, %v11119_v35  ;;  %v10765_v3 = vrot.slane %v23936_v28, 1  ;;  %s9521_s1 = smul.f32 %s9520_s2, %s9520_s2  ;;  %v9908_v21 = vadd.f32 %v9827_v61, %v9728_v26  ;;  %v18905_v59 = vpop.f32.mrb[27].mxu0 }
 0x86f   :  { %v23952_v48 = vstv %s9519_s20  ;;  %v10915_v40 = vrot.slane %v23938_v43, 2  ;;  %v11065_v33 = vrot.slane %v11005_v34, 3  ;;  %v11215_v38 = vrot.slane %v11155_v9, 4  ;;  %v23972_v35 = vpop.f32.mrb[28].mxu0 }
 0x870   :  { %v11359_v14 = vadd.f32 %v11299_v58, %v11269_v45  ;;  %v10825_v20 = vadd.f32 %v10765_v3, %v10675_v25  ;;  %v23956_v11 = vstv %s9521_s1  ;;  %v11648_v58 = vadd.f32 %v23730_v22, %v23952_v48  ;;  %v18910_v26 = vpop.f32.mrb[29].mxu0 }
 0x871   :  { %v10007_v60 = vpop.permute.xlu0 %10006  ;;  %v23966_v54 = vadd.f32 %v23956_v11, %v11586_v0  ;;  %v11605_v16 = vadd.f32 %v23879_v13, %v23956_v11  ;;  %v11305_v3 = vrot.slane %v11005_v34, 5  ;;  %v25529_v59 = vmov 0.0  }
 0x872   :  { %v10088_v55 = vadd.f32 %v10007_v60, %v9908_v21  ;;  %10588 = vrot.lane.b32.xlu1 %v23864_v2, %s19992_s15  ;;  %v23960_v44 = vpop.permute.xlu1 %9864  ;;  %v11449_v7 = vadd.f32 %v11389_v24, %v11359_v14  ;;  %v10975_v53 = vadd.f32 %v10915_v40, %v10825_v20  ;;  %v11630_v2 = vadd.f32 %v23952_v48, %v11623_v36  ;;  %v23981_v24 = vpop.f32.mrb[30].mxu0  ;;  %v25527_v14 = vld [vmem:[#allocation50_spill] sm:$0xff] }
 0x873   :  { %19663 = vrcp.f32 %v11605_v16  ;;  %v11654_v9 = vmul.f32 %v11648_v58, %v11605_v16  ;;  %v18915_v0 = vpop.f32.mrb[31].mxu0  ;;  %v25528_v22 = vsub.f32 %v25527_v14, %v23339_v37  ;;  %v11395_v60 = vrot.slane %v23938_v43, 6  ;;  %v23997_v37 = vld [vmem:[%s25329_s12] sm:$0xf] }
 0x874   :  { %v10268_v31 = vadd.f32 %v23781_v23, %v10088_v55  ;;  %v11539_v15 = vadd.f32 %v11479_v41, %v11449_v7  ;;  %v11125_v18 = vadd.f32 %v11065_v33, %v10975_v53  ;;  %v23979_v23 = vmul.f32 %v11630_v2, %v23966_v54  ;;  %v23988_v55 = vpop.f32.mrb[32].mxu0  ;;  %18962 = vmatpush3.msk.msra.mxu1 %vm13895_vm9, %v23997_v37 }
 0x875   :  { %v10307_v50 = vpop.permute.xlu0 %10306  ;;  %19665 = vrcp.f32 %v11654_v9  ;;  %v18920_v36 = vpop.f32.mrb[33].mxu0  ;;  %18967 = vmatpush3.msk.msra.mxu0 %vm13895_vm9, %v23997_v37  ;;  %18971 = vmatprep.subr.mxu1 %v25529_v59  ;;  %v11649_v58 = vadd.f32 %v23948_v6, %v23952_v48 }
 0x876   :  { %v10388_v61 = vadd.f32 %v10307_v50, %v10268_v31  ;;  %v23976_v25 = vpop.permute.xlu1 %10212  ;;  %v11575_v13 = vsub.f32 %v11539_v15, %v11557_v42  ;;  %v11275_v45 = vadd.f32 %v11215_v38, %v11125_v18  ;;  %v23999_v53 = vpop.f32.mrb[34].mxu0  ;;  %18976 = vmatprep.subr.mxu0 %v25529_v59  ;;  %18964 = vmatmul.mubr.msk.f32.vlgmr.msra.gmra.mrb[20].mxu1 %vm13891_vm10, %v23963_v1 }
 0x877   :  { %v18925_v16 = vpop.f32.mrb[35].mxu0  ;;  %18969 = vmatmul.mubr.msk.f32.vlgmr.msra.gmra.mrb[44].mxu0 %vm13891_vm10, %v23972_v35  ;;  %18972 = vmatpush3.msk.msra.mxu1 %vm13895_vm9, %v23997_v37 }
 0x878   :  { %v10508_v21 = vadd.f32 %v23786_v49, %v10388_v61  ;;  %v11600_v20 = vadd.f32 %v11575_v13, %v25528_v22  ;;  %v11365_v40 = vadd.f32 %v11305_v3, %v11275_v45  ;;  %v11485_v49 = vrot.slane %v23936_v28, 7  ;;  %18973 = vmatprep.mubr.msk.f32.mxu1 %vm19984_vm1, %v25529_v59  ;;  %18977 = vmatpush3.msk.msra.mxu0 %vm13895_vm9, %v23997_v37 }
 0x879   :  { %v9671_v41 = vpop.permute.xlu0 %9670  ;;  %v9560_v28 = vmul.f32 0.0076728435, %v23470_v5  ;;  %v24022_v5 = vpop.f32.mrb[36].mxu0  ;;  %v11624_v13 = vmul.f32 2.0, %v23945_v17  ;;  %18978 = vmatprep.mubr.msk.f32.mxu0 %vm19984_vm1, %v25529_v59  ;;  %18981 = vmatprep.subr.mxu1 %v25529_v59 }
 0x87a   :  { %v10628_v42 = vadd.f32 %v23792_v52, %v10508_v21  ;;  %v23991_v34 = vpop.permute.xlu1 %10332  ;;  %v11455_v7 = vadd.f32 %v11395_v60, %v11365_v40  ;;  %v11606_v52 = vadd.f32 %v11600_v20, %v23956_v11  ;;  %v18930_v45 = vpop.f32.mrb[37].mxu0  ;;  %18986 = vmatprep.subr.mxu0 %v25529_v59  ;;  %18974 = vmatmul.mubr.msk.f32.vlgmr.msra.gmra.mrb[22].mxu1 %vm13891_vm10, %v23981_v24 }
 0x87b   :  { %v9740_v0 = vadd.f32 %v9671_v41, %v9560_v28  ;;  %18979 = vmatmul.mubr.msk.f32.vlgmr.msra.gmra.mrb[46].mxu0 %vm13891_vm10, %v23988_v55  ;;  %18982 = vmatpush3.msk.msra.mxu1 %vm13895_vm9, %v23997_v37 }
 0x87c   :  { %v24001_v43 = vmul.f32 0.03635177, %v10628_v42  ;;  %v24003_v33 = vmul.f32 0.110426925, %v10628_v42  ;;  %v11545_v2 = vadd.f32 %v11485_v49, %v11455_v7  ;;  %v10658_v15 = vmul.f32 0.0076728435, %v10628_v42  ;;  %18983 = vmatprep.mubr.msk.f32.mxu1 %vm19984_vm1, %v25529_v59  ;;  %18987 = vmatpush3.msk.msra.mxu0 %vm13895_vm9, %v23997_v37 }
 0x87d   :  { %v24011_v31 = vpop.permute.xlu0 %9682  ;;  %v10988_v38 = vmul.f32 0.21508227, %v10628_v42  ;;  %v11138_v26 = vmul.f32 0.26860526, %v10628_v42  ;;  %v19664_v3 = vpop.eup %19663  ;;  %19667 = vrcp.f32 %v11606_v52  ;;  %v11655_v21 = vmul.f32 %v11649_v58, %v11606_v52  ;;  %18988 = vmatprep.mubr.msk.f32.mxu0 %vm19984_vm1, %v25529_v59  ;;  %18991 = vmatprep.subr.mxu1 %v25529_v59 }
 0x87e   :  { %v10748_v18 = vrot.slane %v24001_v43, 1  ;;  %v24016_v50 = vpop.permute.xlu1 %10452  ;;  %v10898_v61 = vrot.slane %v24003_v33, 2  ;;  %v11581_v6 = vsub.f32 %v11545_v2, %v23945_v17  ;;  %v24040_v22 = vmul.f32 %v19664_v3, %v23966_v54  ;;  %v24053_v42 = vpop.f32.mrb[14].mxu1  ;;  %18996 = vmatprep.subr.mxu0 %v25529_v59  ;;  %18984 = vmatmul.mubr.msk.f32.vlgmr.msra.gmra.mrb[24].mxu1 %vm13891_vm10, %v23999_v53 }
 0x87f   :  { %v11048_v40 = vrot.slane %v10988_v38, 3  ;;  %19669 = vrcp.f32 %v11655_v21  ;;  %v19666_v41 = vpop.eup %19665  ;;  %v11631_v54 = vadd.f32 %v23952_v48, %v11624_v13  ;;  %25530 = vst [vmem:[#allocation26_spill] sm:$0xff] %v24053_v42  ;;  %v11198_v7 = vrot.slane %v11138_v26, 4  ;;  %v18935_v28 = vpop.f32.mrb[15].mxu1  ;;  %18989 = vmatmul.mubr.msk.f32.vlgmr.msra.gmra.mrb[48].mxu0 %vm13891_vm10, %v24022_v5  ;;  %18992 = vmatpush3.msk.msra.mxu1 %vm13895_vm9, %v23997_v37 }
 0x880   :  { %v10808_v9 = vadd.f32 %v10748_v18, %v10658_v15  ;;  %v11587_v17 = vmul.f32 2.0, %v11581_v6  ;;  %v11661_v2 = vmul.f32 %v19666_v41, %v23979_v23  ;;  %v24064_v15 = vmul.f32 %v24053_v42, %v23963_v1  ;;  %18993 = vmatprep.mubr.msk.f32.mxu1 %vm19984_vm1, %v25529_v59  ;;  %v24077_v23 = vpop.f32.mrb[38].mxu0  ;;  %18997 = vmatpush3.msk.msra.mxu0 %vm13895_vm9, %v23997_v37 }
 0x881   :  { %v9851_v14 = vpop.permute.xlu0 %9850  ;;  %v11288_v58 = vrot.slane %v10988_v38, 5  ;;  %25532 = vst [vmem:[#allocation34_spill] sm:$0xff] %v24077_v23  ;;  %v11378_v38 = vrot.slane %v24003_v33, 6  ;;  %v24083_v3 = vmul.f32 %v24077_v23, %v23972_v35  ;;  %18998 = vmatprep.mubr.msk.f32.mxu0 %vm19984_vm1, %v25529_v59  ;;  %v9566_v6 = vmul.f32 0.0076728435, %v23066_v56  ;;  %19006 = vmatprep.subr.mxu0 %v25529_v59 }
 0x882   :  { %v10958_v20 = vadd.f32 %v10898_v61, %v10808_v9  ;;  %v24042_v60 = vpop.permute.xlu1 %10572  ;;  %v9920_v49 = vadd.f32 %v9851_v14, %v9740_v0  ;;  %v11594_v52 = vadd.f32 %v23956_v11, %v11587_v17  ;;  %25531 = vst [vmem:[#allocation30_spill] sm:$0xff] %v24064_v15  ;;  %v18940_v9 = vpop.f32.mrb[39].mxu0  ;;  %19001 = vmatprep.subr.mxu1 %v25529_v59  ;;  %v11468_v0 = vrot.slane %v24001_v43, 7 }
 0x883   :  { %25533 = vst [vmem:[#allocation37_spill] sm:$0xff] %v24083_v3  ;;  %18994 = vmatmul.mubr.msk.f32.vlgmr.msra.gmra.mrb[26].mxu1 %vm13891_vm10, %v24053_v42  ;;  %18999 = vmatmul.mubr.msk.f32.vlgmr.msra.gmra.mrb[50].mxu0 %vm13891_vm10, %v24077_v23  ;;  %v9549_v56 = vmul.f32 0.0076728435, %v23072_v4  ;;  %v24105_v43 = vpop.f32.mrb[16].mxu1 }
 0x884   :  { %v11108_v36 = vadd.f32 %v11048_v40, %v10958_v20  ;;  %v11637_v26 = vmul.f32 %v11631_v54, %v11594_v52  ;;  %v10100_v45 = vadd.f32 %v23798_v29, %v9920_v49  ;;  %v9746_v40 = vadd.f32 %v24011_v31, %v9566_v6  ;;  %19007 = vmatpush3.msk.msra.mxu0 %vm13895_vm9, %v23997_v37  ;;  %v25535_v54 = vld [vmem:[#allocation46_spill] sm:$0xff]  ;;  %v18945_v4 = vpop.f32.mrb[17].mxu1  ;;  %v25538_v6 = vld [vmem:[#allocation24_spill] sm:$0xff] }
 0x885   :  { %v9863_v16 = vpop.permute.xlu0 %9862  ;;  %19008 = vmatprep.mubr.msk.f32.mxu0 %vm19984_vm1, %v25529_v59  ;;  %25534 = vst [vmem:[#allocation41_spill] sm:$0xff] %v24105_v43  ;;  %v24110_v49 = vmul.f32 %v24105_v43, %v23981_v24  ;;  %19002 = vmatpush3.msk.msra.mxu1 %vm13895_vm9, %v23997_v37  ;;  %v9729_v31 = vadd.f32 %v23850_v47, %v9549_v56  ;;  %v11694_v47 = vsel %vm11672_vm11, %v24040_v22, 0.0  ;;  %v25541_v56 = vld [vmem:[#allocation29_spill] sm:$0xff] }
 0x886   :  { %v11258_v18 = vadd.f32 %v11198_v7, %v11108_v36  ;;  %v24067_v61 = vpop.permute.xlu1 %10044  ;;  %19003 = vmatprep.mubr.msk.f32.mxu1 %vm19984_vm1, %v25529_v59  ;;  %19016 = vmatprep.subr.mxu0 %v25529_v59 }
 0x887   :  { %v19668_v33 = vpop.eup %19667  ;;  %25536 = vst [vmem:[#allocation44_spill] sm:$0xff] %v24110_v49  ;;  %19011 = vmatprep.subr.mxu1 %v25529_v59  ;;  %19004 = vmatmul.mubr.msk.f32.vlgmr.msra.gmra.mrb[28].mxu1 %vm13891_vm10, %v24105_v43 }
 0x888   :  { %v11348_v13 = vadd.f32 %v11288_v58, %v11258_v18  ;;  %v11614_v17 = vmul.f32 %v19668_v33, %v11594_v52  ;;  %v9926_v52 = vadd.f32 %v9863_v16, %v9746_v40  ;;  %v11673_v33 = vsel %vm11672_vm11, %v11661_v2, 0.0  ;;  %19012 = vmatpush3.msk.msra.mxu1 %vm13895_vm9, %v23997_v37  ;;  %19013 = vmatprep.mubr.msk.f32.mxu1 %vm19984_vm1, %v25529_v59 }
 0x889   :  { %v10211_v21 = vpop.permute.xlu0 %10210  ;;  %v19670_v41 = vpop.eup %19669  ;;  %19021 = vmatprep.subr.mxu1 %v25529_v59 }
 0x88a   :  { %v11438_v29 = vadd.f32 %v11378_v38, %v11348_v13  ;;  %v10280_v14 = vadd.f32 %v10211_v21, %v10100_v45  ;;  %v24093_v20 = vpop.permute.xlu1 %10190  ;;  %v11695_v18 = vsel %vm11672_vm11, %v11614_v17, 0.0  ;;  %v11663_v58 = vmul.f32 %v19670_v41, %v11637_v26  ;;  %v25537_v13 = vld [vmem:[#allocation20_spill] sm:$0xff] }
 0x88b   :  { %v24132_v26 = vadd.f32 %v11695_v18, %v11694_v47  ;;  %v25543_v18 = vld [vmem:[#allocation38_spill] sm:$0xff] }
 0x88c   :  { %v10400_v36 = vadd.f32 %v25535_v54, %v10280_v14  ;;  %v11528_v7 = vadd.f32 %v11468_v0, %v11438_v29  ;;  %v11674_v29 = vsel %vm11672_vm11, %v11663_v58, 0.0  ;;  %v24136_v0 = vpop.f32.mrb[40].mxu0  ;;  %v25540_v14 = vld [vmem:[#allocation22_spill] sm:$0xff]  ;;  %v9561_v58 = vmul.f32 0.0076728435, %v25543_v18 }
 0x88d   :  { %v10043_v28 = vpop.permute.xlu0 %10042  ;;  %25539 = vst [vmem:[#allocation47_spill] sm:$0xff] %v24136_v0  ;;  %v24147_v17 = vadd.f32 %v11674_v29, %v11673_v33  ;;  %19009 = vmatmul.mubr.msk.f32.vlgmr.msra.gmra.mrb[52].mxu0 %vm13891_vm10, %v24136_v0  ;;  %v18950_v2 = vpop.f32.mrb[41].mxu0  ;;  %v24154_v54 = vmul.f32 %v24136_v0, %v23988_v55  ;;  %v25545_v33 = vld [vmem:[#allocation48_spill] sm:$0xff] }
 0x88e   :  { %v10520_v38 = vadd.f32 %v25537_v13, %v10400_v36  ;;  %v24121_v45 = vpop.permute.xlu1 %10310  ;;  %v24123_v9 = vmul.f32 %v11528_v7, %v11528_v7  ;;  %v24126_v21 = vmul.f32 %v11528_v7, %v25538_v6  ;;  %v10106_v16 = vadd.f32 %v10043_v28, %v9926_v52  ;;  %19017 = vmatpush3.msk.msra.mxu0 %vm13895_vm9, %v23997_v37  ;;  %v24169_v13 = vpop.f32.mrb[18].mxu1 }
 0x88f   :  { %25542 = vst [vmem:[#allocation50_spill] sm:$0xff] %v24154_v54  ;;  %19018 = vmatprep.mubr.msk.f32.mxu0 %vm19984_vm1, %v25529_v59  ;;  %v9909_v36 = vadd.f32 %v23858_v39, %v9729_v31  ;;  %19026 = vmatprep.subr.mxu0 %v25529_v59  ;;  %25544 = vst [vmem:[#allocation46_spill] sm:$0xff] %v24169_v13  ;;  %v18955_v39 = vpop.f32.mrb[19].mxu1  ;;  %v9741_v31 = vadd.f32 %v23923_v30, %v9561_v58 }
 0x890   :  { %v10640_v22 = vadd.f32 %v25540_v14, %v10520_v38  ;;  %v24145_v40 = vadd.f32 %v24123_v9, %v25541_v56  ;;  %19014 = vmatmul.mubr.msk.f32.vlgmr.msra.gmra.mrb[30].mxu1 %vm13891_vm10, %v24169_v13  ;;  %v24184_v18 = vmul.f32 %v24169_v13, %v23999_v53  ;;  %v25547_v39 = vld [vmem:[#allocation49_spill] sm:$0xff] }
 0x891   :  { %v10223_v41 = vpop.permute.xlu0 %10222  ;;  %v10089_v37 = vadd.f32 %v23871_v12, %v9909_v36  ;;  %19023 = vmatprep.mubr.msk.f32.mxu1 %vm19984_vm1, %v25529_v59  ;;  %v9567_v49 = vmul.f32 0.0076728435, %v25547_v39  ;;  %v9921_v30 = vadd.f32 %v23942_v8, %v9741_v31 }
 0x892   :  { %v24161_v7 = vmul.f32 0.03635177, %v10640_v22  ;;  %v24163_v4 = vmul.f32 0.110426925, %v10640_v22  ;;  %v10286_v52 = vadd.f32 %v10223_v41, %v10106_v16  ;;  %v24165_v28 = vpop.permute.xlu1 %10430  ;;  %v10670_v38 = vmul.f32 0.0076728435, %v10640_v22 }
 0x893   :  { %v11000_v47 = vmul.f32 0.21508227, %v10640_v22  ;;  %v11150_v16 = vmul.f32 0.26860526, %v10640_v22  ;;  %25546 = vst [vmem:[#allocation20_spill] sm:$0xff] %v24184_v18 }
 0x894   :  { %v10760_v6 = vrot.slane %v24161_v7, 1  ;;  %v10406_v29 = vadd.f32 %v25545_v33, %v10286_v52  ;;  %v10910_v12 = vrot.slane %v24163_v4, 2  ;;  %v24189_v52 = vpop.f32.mrb[42].mxu0 }
 0x895   :  { %v10189_v14 = vpop.permute.xlu0 %10188  ;;  %25548 = vst [vmem:[#allocation24_spill] sm:$0xff] %v24189_v52  ;;  %v11060_v33 = vrot.slane %v11000_v47, 3  ;;  %19019 = vmatmul.mubr.msk.f32.vlgmr.msra.gmra.mrb[54].mxu0 %vm13891_vm10, %v24189_v52 }
 0x896   :  { %v10820_v2 = vadd.f32 %v10760_v6, %v10670_v38  ;;  %v10269_v41 = vadd.f32 %v10189_v14, %v10089_v37  ;;  %v24180_v36 = vpop.permute.xlu1 %10550  ;;  %v10526_v22 = vadd.f32 %v23832_v32, %v10406_v29  ;;  %v24194_v37 = vmul.f32 %v24189_v52, %v24022_v5  ;;  %v18960_v6 = vpop.f32.mrb[43].mxu0  ;;  %19028 = vmatprep.mubr.msk.f32.mxu0 %vm19984_vm1, %v25529_v59  ;;  %v25553_v59 = vld [vmem:[#allocation31_spill] sm:$0xff] }
 0x897   :  { %v9747_v14 = vadd.f32 %v23931_v51, %v9567_v49  ;;  %v11210_v29 = vrot.slane %v11150_v16, 4  ;;  %v25550_v6 = vld [vmem:[#allocation21_spill] sm:$0xff]  ;;  %v11300_v49 = vrot.slane %v11000_v47, 5 }
 0x898   :  { %v10970_v58 = vadd.f32 %v10910_v12, %v10820_v2  ;;  %v10389_v38 = vadd.f32 %v23884_v27, %v10269_v41  ;;  %25549 = vst [vmem:[#allocation22_spill] sm:$0xff] %v24194_v37  ;;  %v10646_v8 = vadd.f32 %v23839_v10, %v10526_v22  ;;  %v24210_v18 = vmul.f32 0.0076728435, %v25550_v6 }
 0x899   :  { %v10033_v31 = vpop.permute.xlu0 %10032  ;;  %v9927_v10 = vadd.f32 %v23960_v44, %v9747_v14 }
 0x89a   :  { %v11120_v32 = vadd.f32 %v11060_v33, %v10970_v58  ;;  %v10509_v27 = vadd.f32 %v23899_v63, %v10389_v38  ;;  %v10101_v2 = vadd.f32 %v10033_v31, %v9921_v30  ;;  %v24203_v12 = vpop.permute.xlu1 %10034  ;;  %v24205_v41 = vmul.f32 0.03635177, %v10646_v8 }
 0x89b   :  { %v24207_v39 = vmul.f32 0.110426925, %v10646_v8  ;;  %v10676_v58 = vmul.f32 0.0076728435, %v10646_v8  ;;  %v11006_v63 = vmul.f32 0.21508227, %v10646_v8 }
 0x89c   :  { %v11270_v51 = vadd.f32 %v11210_v29, %v11120_v32  ;;  %v10629_v22 = vadd.f32 %v23910_v46, %v10509_v27  ;;  %v10766_v16 = vrot.slane %v24205_v41, 1  ;;  %v10281_v30 = vadd.f32 %v23976_v25, %v10101_v2 }
 0x89d   :  { %v10225_v33 = vpop.permute.xlu0 %10224  ;;  %v11390_v31 = vrot.slane %v24163_v4, 6  ;;  %v11156_v37 = vmul.f32 0.26860526, %v10646_v8  ;;  %v10916_v44 = vrot.slane %v24207_v39, 2  ;;  %v11480_v32 = vrot.slane %v24161_v7, 7 }
 0x89e   :  { %v11360_v38 = vadd.f32 %v11300_v49, %v11270_v51  ;;  %v24217_v13 = vpop.permute.xlu1 %10214  ;;  %v10826_v6 = vadd.f32 %v10766_v16, %v10676_v58  ;;  %v24220_v47 = vmul.f32 0.03635177, %v10629_v22  ;;  %v24222_v46 = vmul.f32 0.110426925, %v10629_v22 }
 0x89f   :  { %v10989_v29 = vmul.f32 0.21508227, %v10629_v22  ;;  %v10401_v25 = vadd.f32 %v23991_v34, %v10281_v30  ;;  %v11066_v2 = vrot.slane %v11006_v63, 3  ;;  %v10659_v4 = vmul.f32 0.0076728435, %v10629_v22 }
 0x8a0   :  { %v11450_v14 = vadd.f32 %v11390_v31, %v11360_v38  ;;  %v10976_v27 = vadd.f32 %v10916_v44, %v10826_v6  ;;  %v10749_v8 = vrot.slane %v24220_v47, 1  ;;  %v10107_v49 = vadd.f32 %v24067_v61, %v9927_v10 }
 0x8a1   :  { %v10345_v51 = vpop.permute.xlu0 %10344  ;;  %v11216_v16 = vrot.slane %v11156_v37, 4  ;;  %v11139_v52 = vmul.f32 0.26860526, %v10629_v22  ;;  %v10899_v7 = vrot.slane %v24222_v46, 2  ;;  %v10521_v31 = vadd.f32 %v24016_v50, %v10401_v25  ;;  %v25551_v25 = vld [vmem:[#allocation27_spill] sm:$0xff] }
 0x8a2   :  { %v11540_v58 = vadd.f32 %v11480_v32, %v11450_v14  ;;  %v24228_v54 = vpop.permute.xlu1 %10334  ;;  %v11126_v43 = vadd.f32 %v11066_v2, %v10976_v27  ;;  %v10809_v38 = vadd.f32 %v10749_v8, %v10659_v4  ;;  %v11049_v34 = vrot.slane %v10989_v29, 3 }
 0x8a3   :  { %v24234_v6 = vmul.f32 2.0, %v24126_v21  ;;  %v24238_v61 = vsel %vm12724_vm12, %v23963_v1, -inf  ;;  %v10641_v22 = vadd.f32 %v24042_v60, %v10521_v31  ;;  %v10287_v44 = vadd.f32 %v10225_v33, %v10107_v49 }
 0x8a4   :  { %v11576_v30 = vsub.f32 %v11540_v58, %v24123_v9  ;;  %v11276_v37 = vadd.f32 %v11216_v16, %v11126_v43  ;;  %v10959_v10 = vadd.f32 %v10899_v7, %v10809_v38  ;;  %v11306_v32 = vrot.slane %v11006_v63, 5 }
 0x8a5   :  { %v10465_v14 = vpop.permute.xlu0 %10464  ;;  %v11199_v27 = vrot.slane %v11139_v52, 4  ;;  %v11289_v2 = vrot.slane %v10989_v29, 5  ;;  %v25552_v9 = vsub.f32 %v25551_v25, %v25541_v56  ;;  %v24246_v58 = vmul.f32 0.03635177, %v10641_v22 }
 0x8a6   :  { %v24241_v50 = vpop.permute.xlu1 %10454  ;;  %v11109_v8 = vadd.f32 %v11049_v34, %v10959_v10  ;;  %v10851_v0 = vmul.f32 0.110426925, %v10641_v22  ;;  %v10407_v15 = vadd.f32 %v10345_v51, %v10287_v44  ;;  %v10671_v43 = vmul.f32 0.0076728435, %v10641_v22 }
 0x8a7   :  { %v11601_v4 = vadd.f32 %v11576_v30, %v25552_v9  ;;  %v11001_v16 = vmul.f32 0.21508227, %v10641_v22  ;;  %v11151_v38 = vmul.f32 0.26860526, %v10641_v22  ;;  %v11650_v60 = vadd.f32 %v24145_v40, %v23952_v48 }
 0x8a8   :  { %v11259_v63 = vadd.f32 %v11199_v27, %v11109_v8  ;;  %v10761_v52 = vrot.slane %v24246_v58, 1  ;;  %v10527_v33 = vadd.f32 %v10465_v14, %v10407_v15  ;;  %v11366_v49 = vadd.f32 %v11306_v32, %v11276_v37 }
 0x8a9   :  { %v10585_v29 = vpop.permute.xlu0 %10584  ;;  %v11396_v56 = vrot.slane %v24207_v39, 6  ;;  %v11379_v7 = vrot.slane %v24222_v46, 6  ;;  %v11469_v51 = vrot.slane %v24220_v47, 7  ;;  %v11486_v34 = vrot.slane %v24205_v41, 7 }
 0x8aa   :  { %v24253_v31 = vpop.permute.xlu1 %10046  ;;  %v10821_v30 = vadd.f32 %v10761_v52, %v10671_v43  ;;  %v10911_v10 = vrot.slane %v10851_v0, 2  ;;  %v10647_v22 = vadd.f32 %v10585_v29, %v10527_v33  ;;  %v11349_v40 = vadd.f32 %v11289_v2, %v11259_v63 }
 0x8ab   :  { %v11061_v44 = vrot.slane %v11001_v16, 3  ;;  %v11211_v27 = vrot.slane %v11151_v38, 4  ;;  %v11301_v25 = vrot.slane %v11001_v16, 5  ;;  %v11391_v15 = vrot.slane %v10851_v0, 6 }
 0x8ac   :  { %v10971_v14 = vadd.f32 %v10911_v10, %v10821_v30  ;;  %v24257_v37 = vmul.f32 0.03635177, %v10647_v22  ;;  %v10857_v39 = vmul.f32 0.110426925, %v10647_v22  ;;  %v11456_v46 = vadd.f32 %v11396_v56, %v11366_v49 }
 0x8ad   :  { %v9651_v32 = vpop.permute.xlu0 %9650  ;;  %v11481_v9 = vrot.slane %v24246_v58, 7  ;;  %v11007_v8 = vmul.f32 0.21508227, %v10647_v22  ;;  %v11439_v41 = vadd.f32 %v11379_v7, %v11349_v40  ;;  %v11607_v43 = vadd.f32 %v11601_v4, %v23956_v11 }
 0x8ae   :  { %v24260_v47 = vpop.permute.xlu1 %10226  ;;  %v11121_v52 = vadd.f32 %v11061_v44, %v10971_v14  ;;  %v10677_v2 = vmul.f32 0.0076728435, %v10647_v22  ;;  %v10767_v38 = vrot.slane %v24257_v37, 1  ;;  %v12726_v0 = vsel %vm12724_vm12, %v23972_v35, -inf }
 0x8af   :  { %v10917_v16 = vrot.slane %v10857_v39, 2  ;;  %v11157_v63 = vmul.f32 0.26860526, %v10647_v22  ;;  %v12727_v33 = vsel %vm12724_vm12, %v23981_v24, -inf  ;;  %v12728_v58 = vsel %vm12724_vm12, %v23988_v55, -inf }
 0x8b0   :  { %v11271_v29 = vadd.f32 %v11211_v27, %v11121_v52  ;;  %v10827_v49 = vadd.f32 %v10767_v38, %v10677_v2  ;;  %v11529_v7 = vadd.f32 %v11469_v51, %v11439_v41  ;;  %v11546_v4 = vadd.f32 %v11486_v34, %v11456_v46 }
 0x8b1   :  { %v9831_v56 = vpop.permute.xlu0 %9830  ;;  %v11067_v30 = vrot.slane %v11007_v8, 3  ;;  %v9730_v10 = vadd.f32 %v9651_v32, %v24210_v18  ;;  %19671 = vrcp.f32 %v11607_v43  ;;  %v11656_v44 = vmul.f32 %v11650_v60, %v11607_v43  ;;  %v25554_v32 = vld [vmem:[#allocation39_spill] sm:$0xff] }
 0x8b2   :  { %v24271_v40 = vpop.permute.xlu1 %10346  ;;  %v11361_v14 = vadd.f32 %v11301_v25, %v11271_v29  ;;  %v10977_v22 = vadd.f32 %v10917_v16, %v10827_v49  ;;  %v11559_v3 = vmul.f32 %v11529_v7, %v11529_v7  ;;  %v24274_v23 = vmul.f32 %v11529_v7, %v25553_v59 }
 0x8b3   :  { %v11217_v42 = vrot.slane %v11157_v63, 4  ;;  %v9910_v57 = vadd.f32 %v9831_v56, %v9730_v10  ;;  %v11582_v27 = vsub.f32 %v11546_v4, %v24126_v21  ;;  %v12729_v51 = vsel %vm12724_vm12, %v23999_v53, -inf }
 0x8b4   :  { %v11451_v34 = vadd.f32 %v11391_v15, %v11361_v14  ;;  %v11127_v46 = vadd.f32 %v11067_v30, %v10977_v22  ;;  %v11645_v41 = vadd.f32 %v11559_v3, %v25554_v32  ;;  %v12731_v60 = vsel %vm12724_vm12, %v24022_v5, -inf }
 0x8b5   :  { %v10011_v18 = vpop.permute.xlu0 %10010  ;;  %v11588_v59 = vmul.f32 2.0, %v11582_v27  ;;  %v11632_v52 = vadd.f32 %v23952_v48, %v24234_v6  ;;  %v12730_v21 = vmax.f32 %v24238_v61, %v12729_v51  ;;  %v11307_v38 = vrot.slane %v11007_v8, 5 }
 0x8b6   :  { %v10090_v25 = vadd.f32 %v10011_v18, %v9910_v57  ;;  %v24282_v43 = vpop.permute.xlu1 %10466  ;;  %v11277_v2 = vadd.f32 %v11217_v42, %v11127_v46  ;;  %v11541_v16 = vadd.f32 %v11481_v9, %v11451_v34  ;;  %19673 = vrcp.f32 %v11656_v44  ;;  %v25555_v9 = vld [vmem:[#allocation33_spill] sm:$0xff] }
 0x8b7   :  { %v11595_v63 = vadd.f32 %v23956_v11, %v11588_v59  ;;  %v12732_v29 = vmax.f32 %v12726_v0, %v12731_v60  ;;  %v12734_v49 = vmax.f32 %v12727_v33, %v12728_v58  ;;  %v11397_v57 = vrot.slane %v10857_v39, 6  ;;  %v25557_v46 = vld [vmem:[#allocation45_spill] sm:$0xff] }
 0x8b8   :  { %v10270_v15 = vadd.f32 %v24093_v20, %v10090_v25  ;;  %v11367_v56 = vadd.f32 %v11307_v38, %v11277_v2  ;;  %v11577_v4 = vsub.f32 %v11541_v16, %v11559_v3  ;;  %v24292_v42 = vsel %vm12724_vm12, %v23963_v1, inf  ;;  %v25558_v16 = vld [vmem:[#allocation23_spill] sm:$0xff] }
 0x8b9   :  { %v9675_v7 = vpop.permute.xlu0 %9674  ;;  %v11638_v6 = vmul.f32 %v11632_v52, %v11595_v63  ;;  %v12733_v14 = vmax.f32 %v12730_v21, %v12732_v29  ;;  %v11487_v20 = vrot.slane %v24257_v37, 7  ;;  %v25556_v8 = vsub.f32 %v25555_v9, %v25554_v32 }
 0x8ba   :  { %v10390_v30 = vadd.f32 %v24121_v45, %v10270_v15  ;;  %v9653_v10 = vpop.permute.xlu1 %9652  ;;  %v11457_v61 = vadd.f32 %v11397_v57, %v11367_v56  ;;  %v24300_v39 = vsel %vm12724_vm12, %v23981_v24, inf  ;;  %v24307_v58 = vsel %vm12724_vm12, %v23988_v55, inf }
 0x8bb   :  { %v11602_v0 = vadd.f32 %v11577_v4, %v25556_v8  ;;  %v19672_v3 = vpop.eup %19671  ;;  %v24303_v33 = vmax.f32 %v12733_v14, %v12734_v49  ;;  %v24311_v37 = vsel %vm12724_vm12, %v23999_v53, inf  ;;  %v9562_v18 = vmul.f32 0.0076728435, %v25557_v46 }
 0x8bc   :  { %v10510_v45 = vadd.f32 %v24165_v28, %v10390_v30  ;;  %v11547_v22 = vadd.f32 %v11487_v20, %v11457_v61  ;;  %v11616_v51 = vmul.f32 %v19672_v3, %v11595_v63  ;;  %v12750_v34 = vmin.f32 %v24292_v42, %v24311_v37 }
 0x8bd   :  { %v9687_v44 = vpop.permute.xlu0 %9686  ;;  %v11608_v27 = vadd.f32 %v11602_v0, %v23956_v11  ;;  %v11626_v60 = vmul.f32 2.0, %v24274_v23  ;;  %v12754_v25 = vmin.f32 %v24300_v39, %v24307_v58  ;;  %v11651_v21 = vadd.f32 %v11645_v41, %v23952_v48 }
 0x8be   :  { %v10630_v28 = vadd.f32 %v24180_v36, %v10510_v45  ;;  %v9833_v32 = vpop.permute.xlu1 %9832  ;;  %v11583_v59 = vsub.f32 %v11547_v22, %v24274_v23  ;;  %v11697_v52 = vsel %vm11672_vm11, %v11616_v51, 0.0  ;;  %v9742_v2 = vadd.f32 %v9675_v7, %v9562_v18 }
 0x8bf   :  { %19675 = vrcp.f32 %v11608_v27  ;;  %v9551_v38 = vmul.f32 0.0076728435, %v23091_v19  ;;  %v9568_v36 = vmul.f32 0.0076728435, %v25558_v16  ;;  %v11698_v15 = vadd.f32 %v11697_v52, %v24132_v26 }
 0x8c0   :  { %v19674_v63 = vpop.eup %19673  ;;  %v24327_v29 = vmul.f32 0.110426925, %v10630_v28  ;;  %v24329_v56 = vmul.f32 0.03635177, %v10630_v28  ;;  %v11589_v57 = vmul.f32 2.0, %v11583_v59  ;;  %v11657_v23 = vmul.f32 %v11651_v21, %v11608_v27 }
 0x8c1   :  { %v9855_v49 = vpop.permute.xlu0 %9854  ;;  %v9731_v4 = vadd.f32 %v9653_v10, %v9551_v38  ;;  %v11633_v41 = vadd.f32 %v23952_v48, %v11626_v60  ;;  %v12746_v19 = vsel %vm12724_vm12, %v23972_v35, inf  ;;  %v10660_v7 = vmul.f32 0.0076728435, %v10630_v28 }
 0x8c2   :  { %v9922_v30 = vadd.f32 %v9855_v49, %v9742_v2  ;;  %v10013_v14 = vpop.permute.xlu1 %10012  ;;  %v10990_v42 = vmul.f32 0.21508227, %v10630_v28  ;;  %v9748_v61 = vadd.f32 %v9687_v44, %v9568_v36  ;;  %v10750_v26 = vrot.slane %v24329_v56, 1 }
 0x8c3   :  { %v11596_v9 = vadd.f32 %v23956_v11, %v11589_v57  ;;  %v11665_v8 = vmul.f32 %v19674_v63, %v11638_v6  ;;  %v12751_v10 = vsel %vm12724_vm12, %v24022_v5, inf  ;;  %v10900_v0 = vrot.slane %v24327_v29, 2 }
 0x8c4   :  { %v10102_v20 = vadd.f32 %v24203_v12, %v9922_v30  ;;  %v11140_v39 = vmul.f32 0.26860526, %v10630_v28  ;;  %v10810_v45 = vadd.f32 %v10750_v26, %v10660_v7  ;;  %19677 = vrcp.f32 %v11657_v23 }
 0x8c5   :  { %v9867_v3 = vpop.permute.xlu0 %9866  ;;  %v11639_v22 = vmul.f32 %v11633_v41, %v11596_v9  ;;  %v11676_v27 = vsel %vm11672_vm11, %v11665_v8, 0.0  ;;  %v11050_v12 = vrot.slane %v10990_v42, 3  ;;  %v9911_v51 = vadd.f32 %v9833_v32, %v9731_v4 }
 0x8c6   :  { %v10282_v58 = vadd.f32 %v24217_v13, %v10102_v20  ;;  %v9928_v37 = vadd.f32 %v9867_v3, %v9748_v61  ;;  %v10193_v44 = vpop.permute.xlu1 %10192  ;;  %v10960_v46 = vadd.f32 %v10900_v0, %v10810_v45  ;;  %v24343_v6 = vadd.f32 %v11676_v27, %v24147_v17 }
 0x8c7   :  { %v12752_v60 = vmin.f32 %v12746_v19, %v12751_v10  ;;  %v11200_v52 = vrot.slane %v11140_v39, 4  ;;  %v10091_v21 = vadd.f32 %v10013_v14, %v9911_v51  ;;  %v11290_v57 = vrot.slane %v10990_v42, 5 }
 0x8c8   :  { %v10108_v18 = vadd.f32 %v24253_v31, %v9928_v37  ;;  %v10402_v28 = vadd.f32 %v24228_v54, %v10282_v58  ;;  %v11110_v2 = vadd.f32 %v11050_v12, %v10960_v46  ;;  %v11380_v42 = vrot.slane %v24327_v29, 6 }
 0x8c9   :  { %v19676_v59 = vpop.eup %19675  ;;  %v10575_v13 = vpop.permute.xlu0 %10574  ;;  %v12753_v63 = vmin.f32 %v12750_v34, %v12752_v60  ;;  %v10271_v49 = vadd.f32 %v10193_v44, %v10091_v21 }
 0x8ca   :  { %v10288_v38 = vadd.f32 %v24260_v47, %v10108_v18  ;;  %v10522_v16 = vadd.f32 %v24241_v50, %v10402_v28  ;;  %v10313_v36 = vpop.permute.xlu1 %10312  ;;  %v11618_v32 = vmul.f32 %v19676_v59, %v11596_v9  ;;  %v11260_v17 = vadd.f32 %v11200_v52, %v11110_v2 }
 0x8cb   :  { %v24351_v4 = vmin.f32 %v12753_v63, %v12754_v25  ;;  %v10391_v30 = vadd.f32 %v10313_v36, %v10271_v49 }
 0x8cc   :  { %v10642_v23 = vadd.f32 %v10575_v13, %v10522_v16  ;;  %v10408_v31 = vadd.f32 %v24271_v40, %v10288_v38  ;;  %v11699_v54 = vsel %vm11672_vm11, %v11618_v32, 0.0  ;;  %v11350_v41 = vadd.f32 %v11290_v57, %v11260_v17 }
 0x8cd   :  { %v10587_v14 = vpop.permute.xlu0 %10586  ;;  %v24353_v19 = vadd.f32 %v11699_v54, %v11698_v15  ;;  %v11470_v15 = vrot.slane %v24329_v56, 7 }
 0x8ce   :  { %v24355_v47 = vmul.f32 0.03635177, %v10642_v23  ;;  %v10852_v50 = vmul.f32 0.110426925, %v10642_v23  ;;  %v10528_v34 = vadd.f32 %v24282_v43, %v10408_v31  ;;  %v10433_v7 = vpop.permute.xlu1 %10432  ;;  %v19678_v61 = vpop.eup %19677  ;;  %v10672_v40 = vmul.f32 0.0076728435, %v10642_v23 }
 0x8cf   :  { %v10511_v26 = vadd.f32 %v10433_v7, %v10391_v30  ;;  %v11002_v25 = vmul.f32 0.21508227, %v10642_v23  ;;  %v11440_v9 = vadd.f32 %v11380_v42, %v11350_v41  ;;  %v11152_v3 = vmul.f32 0.26860526, %v10642_v23 }
 0x8d0   :  { %v10762_v20 = vrot.slane %v24355_v47, 1  ;;  %v10648_v8 = vadd.f32 %v10587_v14, %v10528_v34  ;;  %v10912_v39 = vrot.slane %v10852_v50, 2  ;;  %v11667_v43 = vmul.f32 %v19678_v61, %v11639_v22 }
 0x8d1   :  { %v10553_v10 = vpop.permute.xlu0 %10552  ;;  %v11062_v27 = vrot.slane %v11002_v25, 3  ;;  %v11530_v12 = vadd.f32 %v11470_v15, %v11440_v9  ;;  %v11212_v60 = vrot.slane %v11152_v3, 4  ;;  %v11392_v59 = vrot.slane %v10852_v50, 6 }
 0x8d2   :  { %v10822_v0 = vadd.f32 %v10762_v20, %v10672_v40  ;;  %v24361_v45 = vpop.permute.xlu1 %9676  ;;  %v24363_v58 = vmul.f32 0.03635177, %v10648_v8  ;;  %v10858_v29 = vmul.f32 0.110426925, %v10648_v8  ;;  %v10631_v37 = vadd.f32 %v10553_v10, %v10511_v26  ;;  %v25559_v40 = vld [vmem:[#allocation32_spill] sm:$0xff] }
 0x8d3   :  { %v10678_v51 = vmul.f32 0.0076728435, %v10648_v8  ;;  %v11008_v18 = vmul.f32 0.21508227, %v10648_v8  ;;  %v11158_v52 = vmul.f32 0.26860526, %v10648_v8  ;;  %v11560_v63 = vmul.f32 %v11530_v12, %v11530_v12 }
 0x8d4   :  { %v10972_v44 = vadd.f32 %v10912_v39, %v10822_v0  ;;  %v10768_v46 = vrot.slane %v24363_v58, 1  ;;  %v10918_v22 = vrot.slane %v10858_v29, 2  ;;  %v24368_v2 = vmul.f32 0.03635177, %v10631_v37 }
 0x8d5   :  { %v24366_v28 = vpop.permute.xlu0 %10456  ;;  %v10841_v38 = vmul.f32 0.110426925, %v10631_v37  ;;  %v11302_v36 = vrot.slane %v11002_v25, 5  ;;  %v10661_v32 = vmul.f32 0.0076728435, %v10631_v37  ;;  %v11068_v17 = vrot.slane %v11008_v18, 3 }
 0x8d6   :  { %v11122_v56 = vadd.f32 %v11062_v27, %v10972_v44  ;;  %v9689_v21 = vpop.permute.xlu1 %9688  ;;  %v10828_v13 = vadd.f32 %v10768_v46, %v10678_v51  ;;  %v10751_v57 = vrot.slane %v24368_v2, 1  ;;  %v10991_v23 = vmul.f32 0.21508227, %v10631_v37  ;;  %v25560_v25 = vld [vmem:[#allocation36_spill] sm:$0xff] }
 0x8d7   :  { %v11482_v54 = vrot.slane %v24355_v47, 7  ;;  %v11218_v30 = vrot.slane %v11158_v52, 4  ;;  %v11308_v14 = vrot.slane %v11008_v18, 5  ;;  %v10901_v7 = vrot.slane %v10841_v38, 2  ;;  %v25561_v18 = vld [vmem:[#allocation25_spill] sm:$0xff] }
 0x8d8   :  { %v11272_v16 = vadd.f32 %v11212_v60, %v11122_v56  ;;  %v10978_v49 = vadd.f32 %v10918_v22, %v10828_v13  ;;  %v10811_v34 = vadd.f32 %v10751_v57, %v10661_v32  ;;  %v11141_v42 = vmul.f32 0.26860526, %v10631_v37 }
 0x8d9   :  { %v10577_v61 = vpop.permute.xlu0 %10576  ;;  %v11566_v20 = vmul.f32 %v11530_v12, %v25559_v40  ;;  %v11646_v9 = vadd.f32 %v11560_v63, %v25560_v25  ;;  %v11678_v8 = vsel %vm11672_vm11, %v11667_v43, 0.0  ;;  %v11051_v0 = vrot.slane %v10991_v23, 3 }
 0x8da   :  { %v11362_v31 = vadd.f32 %v11302_v36, %v11272_v16  ;;  %v9857_v41 = vpop.permute.xlu1 %9856  ;;  %v11128_v50 = vadd.f32 %v11068_v17, %v10978_v49  ;;  %v10961_v15 = vadd.f32 %v10901_v7, %v10811_v34  ;;  %v24376_v47 = vadd.f32 %v11678_v8, %v24343_v6  ;;  %v25562_v16 = vld [vmem:[#allocation35_spill] sm:$0xff] }
 0x8db   :  { %v11398_v27 = vrot.slane %v10858_v29, 6  ;;  %v11201_v37 = vrot.slane %v11141_v42, 4  ;;  %v9563_v46 = vmul.f32 0.0076728435, %v23845_v62  ;;  %v9569_v12 = vmul.f32 0.0076728435, %v25561_v18 }
 0x8dc   :  { %v11452_v26 = vadd.f32 %v11392_v59, %v11362_v31  ;;  %v11278_v10 = vadd.f32 %v11218_v30, %v11128_v50  ;;  %v11111_v51 = vadd.f32 %v11051_v0, %v10961_v15  ;;  %v11488_v60 = vrot.slane %v24363_v58, 7 }
 0x8dd   :  { %v11291_v59 = vrot.slane %v10991_v23, 5  ;;  %v10049_v52 = vpop.permute.xlu0 %10048  ;;  %v9749_v22 = vadd.f32 %v9689_v21, %v9569_v12  ;;  %v25563_v36 = vsub.f32 %v25562_v16, %v25560_v25  ;;  %v11381_v49 = vrot.slane %v10841_v38, 6 }
 0x8de   :  { %v11542_v39 = vadd.f32 %v11482_v54, %v11452_v26  ;;  %v9869_v3 = vpop.permute.xlu1 %9868  ;;  %v11368_v44 = vadd.f32 %v11308_v14, %v11278_v10  ;;  %v11261_v43 = vadd.f32 %v11201_v37, %v11111_v51  ;;  %v9743_v17 = vadd.f32 %v24361_v45, %v9563_v46  ;;  %v25565_v10 = vld [vmem:[#allocation43_spill] sm:$0xff] }
 0x8df   :  { %v9929_v57 = vadd.f32 %v9869_v3, %v9749_v22  ;;  %v11627_v31 = vmul.f32 2.0, %v11566_v20  ;;  %v11652_v58 = vadd.f32 %v11646_v9, %v23952_v48  ;;  %v11471_v23 = vrot.slane %v24368_v2, 7  ;;  %v25564_v9 = vld [vmem:[#allocation40_spill] sm:$0xff] }
 0x8e0   :  { %v11578_v56 = vsub.f32 %v11542_v39, %v11560_v63  ;;  %v11458_v13 = vadd.f32 %v11398_v27, %v11368_v44  ;;  %v11351_v29 = vadd.f32 %v11291_v59, %v11261_v43  ;;  %v9923_v54 = vadd.f32 %v9857_v41, %v9743_v17 }
 0x8e1   :  { %v10229_v34 = vpop.permute.xlu0 %10228  ;;  %v10109_v45 = vadd.f32 %v10049_v52, %v9929_v57  ;;  %v11634_v26 = vadd.f32 %v23952_v48, %v11627_v31 }
 0x8e2   :  { %v10037_v6 = vpop.permute.xlu1 %10036  ;;  %v11603_v32 = vadd.f32 %v11578_v56, %v25563_v36  ;;  %v11548_v62 = vadd.f32 %v11488_v60, %v11458_v13  ;;  %v11441_v21 = vadd.f32 %v11381_v49, %v11351_v29 }
 0x8e3   :  { %v10103_v7 = vadd.f32 %v10037_v6, %v9923_v54  ;;  %v10289_v39 = vadd.f32 %v10229_v34, %v10109_v45 }
 0x8e4   :  { %v11609_v63 = vadd.f32 %v11603_v32, %v23956_v11  ;;  %v11584_v30 = vsub.f32 %v11548_v62, %v11566_v20  ;;  %v11531_v38 = vadd.f32 %v11471_v23, %v11441_v21 }
 0x8e5   :  { %v10349_v3 = vpop.permute.xlu0 %10348 }
 0x8e6   :  { %v10217_v14 = vpop.permute.xlu1 %10216  ;;  %19679 = vrcp.f32 %v11609_v63  ;;  %v11658_v50 = vmul.f32 %v11652_v58, %v11609_v63  ;;  %v11590_v42 = vmul.f32 2.0, %v11584_v30  ;;  %v24389_v25 = vmul.f32 %v11531_v38, %v11531_v38 }
 0x8e7   :  { %v10283_v40 = vadd.f32 %v10217_v14, %v10103_v7  ;;  %v24392_v8 = vmul.f32 %v11531_v38, %v25564_v9  ;;  %v10409_v46 = vadd.f32 %v10349_v3, %v10289_v39 }
 0x8e8   :  { %19681 = vrcp.f32 %v11658_v50  ;;  %v11597_v2 = vadd.f32 %v23956_v11, %v11590_v42  ;;  %v11647_v15 = vadd.f32 %v24389_v25, %v25565_v10 }
 0x8ea   :  { %v10337_v41 = vpop.permute.xlu1 %10336  ;;  %v11640_v0 = vmul.f32 %v11634_v26, %v11597_v2 }
 0x8eb   :  { %v10403_v20 = vadd.f32 %v10337_v41, %v10283_v40 }
 0x8ed   :  { %v10523_v44 = vadd.f32 %v24366_v28, %v10403_v20 }
 0x8ee   :  { %v10469_v27 = vpop.permute.xlu1 %10468 }
 0x8ef   :  { %v10643_v51 = vadd.f32 %v10577_v61, %v10523_v44  ;;  %v10529_v43 = vadd.f32 %v10469_v27, %v10409_v46 }
 0x8f0   :  { %v19680_v37 = vpop.eup %19679 }
 0x8f1   :  { %v10703_v18 = vmul.f32 0.03635177, %v10643_v51  ;;  %v10853_v12 = vmul.f32 0.110426925, %v10643_v51  ;;  %v11620_v56 = vmul.f32 %v19680_v37, %v11597_v2  ;;  %v10673_v52 = vmul.f32 0.0076728435, %v10643_v51 }
 0x8f2   :  { %v19682_v60 = vpop.eup %19681  ;;  %v10589_v59 = vpop.permute.xlu1 %10588  ;;  %v11003_v22 = vmul.f32 0.21508227, %v10643_v51  ;;  %v11153_v6 = vmul.f32 0.26860526, %v10643_v51 }
 0x8f3   :  { %v10763_v13 = vrot.slane %v10703_v18, 1  ;;  %v10649_v16 = vadd.f32 %v10589_v59, %v10529_v43  ;;  %v10913_v32 = vrot.slane %v10853_v12, 2  ;;  %v11701_v29 = vsel %vm11672_vm11, %v11620_v56, 0.0 }
 0x8f4   :  { %v11669_v28 = vmul.f32 %v19682_v60, %v11640_v0  ;;  %v11702_v17 = vadd.f32 %v11701_v29, %v24353_v19  ;;  %v11063_v57 = vrot.slane %v11003_v22, 3  ;;  %v11213_v21 = vrot.slane %v11153_v6, 4 }
 0x8f5   :  { %v10823_v36 = vadd.f32 %v10763_v13, %v10673_v52  ;;  %v10709_v49 = vmul.f32 0.03635177, %v10649_v16  ;;  %v10859_v61 = vmul.f32 0.110426925, %v10649_v16  ;;  %v10679_v31 = vmul.f32 0.0076728435, %v10649_v16 }
 0x8f6   :  { %v11680_v63 = vsel %vm11672_vm11, %v11669_v28, 0.0  ;;  %v11009_v23 = vmul.f32 0.21508227, %v10649_v16  ;;  %v11159_v50 = vmul.f32 0.26860526, %v10649_v16  ;;  %v11303_v38 = vrot.slane %v11003_v22, 5 }
 0x8f7   :  { %v10973_v62 = vadd.f32 %v10913_v32, %v10823_v36  ;;  %v10769_v58 = vrot.slane %v10709_v49, 1  ;;  %v10919_v14 = vrot.slane %v10859_v61, 2  ;;  %v11681_v34 = vadd.f32 %v11680_v63, %v24376_v47  ;;  %v25566_v47 = vld [vmem:[#allocation42_spill] sm:$0xff] }
 0x8f8   :  { %v11069_v45 = vrot.slane %v11009_v23, 3  ;;  %v11393_v19 = vrot.slane %v10853_v12, 6  ;;  %v11219_v9 = vrot.slane %v11159_v50, 4  ;;  %v11483_v41 = vrot.slane %v10703_v18, 7 }
 0x8f9   :  { %v11123_v54 = vadd.f32 %v11063_v57, %v10973_v62  ;;  %v10829_v30 = vadd.f32 %v10769_v58, %v10679_v31  ;;  %v11309_v0 = vrot.slane %v11009_v23, 5  ;;  %v11399_v3 = vrot.slane %v10859_v61, 6  ;;  %v25568_v58 = vld [vmem:[#allocation26_spill] sm:$0xff] }
 0x8fa   :  { %v11489_v37 = vrot.slane %v10709_v49, 7  ;;  %v25567_v46 = vsub.f32 %v25566_v47, %v25565_v10  ;;  %v11653_v43 = vadd.f32 %v11647_v15, %v23952_v48  ;;  %v11628_v59 = vmul.f32 2.0, %v24392_v8 }
 0x8fb   :  { %v11273_v7 = vadd.f32 %v11213_v21, %v11123_v54  ;;  %v10979_v42 = vadd.f32 %v10919_v14, %v10829_v30  ;;  %v12823_v49 = vmul.f32 0.26579726, %v23972_v35  ;;  %v24421_v61 = vmul.f32 %v23972_v35, %v23972_v35  ;;  %v25569_v21 = vld [vmem:[#allocation34_spill] sm:$0xff] }
 0x8fc   :  { %v11635_v22 = vadd.f32 %v23952_v48, %v11628_v59  ;;  %v12822_v48 = vmul.f32 0.26579726, %v23963_v1  ;;  %v24431_v57 = vmul.f32 %v23963_v1, %v23963_v1  ;;  %v24440_v23 = vmul.f32 0.26579726, %v25568_v58 }
 0x8fd   :  { %v11363_v26 = vadd.f32 %v11303_v38, %v11273_v7  ;;  %v11129_v40 = vadd.f32 %v11069_v45, %v10979_v42  ;;  %v12835_v62 = vmul.f32 0.26579726, %v24421_v61  ;;  %v13015_v63 = vmul.f32 0.33194062, %v24421_v61 }
 0x8fe   :  { %v12834_v31 = vmul.f32 0.26579726, %v24431_v57  ;;  %v13014_v54 = vmul.f32 0.33194062, %v24431_v57  ;;  %v12829_v30 = vmul.f32 0.26579726, %v25569_v21  ;;  %v24456_v7 = vmul.f32 %v25569_v21, %v25569_v21 }
 0x8ff   :  { %v11453_v2 = vadd.f32 %v11393_v19, %v11363_v26  ;;  %v11279_v20 = vadd.f32 %v11219_v9, %v11129_v40  ;;  %v13009_v14 = vmul.f32 0.33194062, %v25569_v21  ;;  %v12824_v50 = vmul.f32 0.26579726, %v23981_v24 }
 0x900   :  { %v24462_v38 = vmul.f32 %v23981_v24, %v23981_v24  ;;  %v12841_v42 = vmul.f32 0.26579726, %v24456_v7  ;;  %v13021_v26 = vmul.f32 0.33194062, %v24456_v7  ;;  %v12825_v47 = vmul.f32 0.26579726, %v23988_v55 }
 0x901   :  { %v11543_v39 = vadd.f32 %v11483_v41, %v11453_v2  ;;  %v11369_v44 = vadd.f32 %v11309_v0, %v11279_v20  ;;  %v24477_v41 = vld [vmem:[%s25330_s13] sm:$0x3]  ;;  %v25570_v0 = vmov 0.0   ;;  %v13005_v59 = vmul.f32 0.33194062, %v23988_v55 }
 0x902   :  { %v12836_v45 = vmul.f32 0.26579726, %v24462_v38  ;;  %v13016_v40 = vmul.f32 0.33194062, %v24462_v38 }
 0x903   :  { %v11579_v27 = vsub.f32 %v11543_v39, %v24389_v25  ;;  %v11459_v51 = vadd.f32 %v11399_v3, %v11369_v44  ;;  %v25571_v44 = vld [vmem:[#allocation37_spill] sm:$0xff] }
 0x905   :  { %v11604_v56 = vadd.f32 %v11579_v27, %v25567_v46  ;;  %v11549_v60 = vadd.f32 %v11489_v37, %v11459_v51  ;;  %v24490_v27 = vmul.f32 0.26579726, %v25571_v44 }
 0x907   :  { %v11610_v12 = vadd.f32 %v11604_v56, %v23956_v11  ;;  %v11585_v18 = vsub.f32 %v11549_v60, %v24392_v8  ;;  %v25572_v60 = vld [vmem:[#allocation30_spill] sm:$0xff] }
 0x909   :  { %19683 = vrcp.f32 %v11610_v12  ;;  %v11659_v52 = vmul.f32 %v11653_v43, %v11610_v12  ;;  %v11591_v13 = vmul.f32 2.0, %v11585_v18  ;;  %v13026_v12 = vmul.f32 0.33194062, %v25572_v60 }
 0x90b   :  { %19685 = vrcp.f32 %v11659_v52  ;;  %v11598_v25 = vadd.f32 %v23956_v11, %v11591_v13  ;;  %v13003_v11 = vmul.f32 0.33194062, %v23972_v35 }
 0x90d   :  { %v11641_v6 = vmul.f32 %v11635_v22, %v11598_v25 }
 0x913   :  { %v19684_v10 = vpop.eup %19683 }
 0x914   :  { %v11622_v16 = vmul.f32 %v19684_v10, %v11598_v25  ;;  %v24519_v25 = vmul.f32 0.26579726, %v25572_v60  ;;  %v24532_v10 = vmul.f32 %v23988_v55, %v23988_v55 }
 0x915   :  { %v19686_v36 = vpop.eup %19685 }
 0x916   :  { %v11703_v32 = vsel %vm11672_vm11, %v11622_v16, 0.0  ;;  %v11671_v29 = vmul.f32 %v19686_v36, %v11641_v6 }
 0x917   :  { %v11704_v15 = vadd.f32 %v11703_v32, %v11702_v17  ;;  %v13002_v17 = vmul.f32 0.33194062, %v23963_v1  ;;  %v25573_v32 = vld [vmem:[#allocation47_spill] sm:$0xff] }
 0x918   :  { %v11682_v28 = vsel %vm11672_vm11, %v11671_v29, 0.0  ;;  %v12831_v29 = vmul.f32 0.26579726, %v25573_v32 }
 0x919   :  { %11705 = vadd.xlane.f32.xlu1 %v11704_v15  ;;  %v11683_v8 = vadd.f32 %v11682_v28, %v11681_v34  ;;  %v13004_v34 = vmul.f32 0.33194062, %v23981_v24 }
 0x91b   :  { %11684 = vadd.xlane.f32.xlu0 %v11683_v8  ;;  %v12837_v8 = vmul.f32 0.26579726, %v24532_v10 }
 0x92a   :  { %12884 = vrot.lane.b32.xlu1 %v12823_v49, %s19986_s26 }
 0x92e   :  { %13064 = vrot.lane.b32.xlu1 %v13003_v11, %s19988_s27 }
 0x931   :  { %12882 = vrot.lane.b32.xlu0 %v12822_v48, %s19986_s26 }
 0x932   :  { %13184 = vrot.lane.b32.xlu1 %v12823_v49, %s19990_s0 }
 0x935   :  { %13062 = vrot.lane.b32.xlu0 %v13002_v17, %s19988_s27 }
 0x936   :  { %12908 = vrot.lane.b32.xlu1 %v12835_v62, %s19986_s26 }
 0x939   :  { %13182 = vrot.lane.b32.xlu0 %v12822_v48, %s19990_s0  ;;  %v13011_v48 = vmul.f32 0.33194062, %v25573_v32 }
 0x93a   :  { %13088 = vrot.lane.b32.xlu1 %v13015_v63, %s19988_s27  ;;  %v13017_v63 = vmul.f32 0.33194062, %v24532_v10 }
 0x93d   :  { %12906 = vrot.lane.b32.xlu0 %v12834_v31, %s19986_s26 }
 0x93e   :  { %13208 = vrot.lane.b32.xlu1 %v12835_v62, %s19990_s0 }
 0x941   :  { %13086 = vrot.lane.b32.xlu0 %v13014_v54, %s19988_s27 }
 0x942   :  { %12894 = vrot.lane.b32.xlu1 %v24440_v23, %s19986_s26 }
 0x945   :  { %13206 = vrot.lane.b32.xlu0 %v12834_v31, %s19990_s0  ;;  %v25574_v31 = vld [vmem:[#allocation41_spill] sm:$0xff] }
 0x946   :  { %12896 = vrot.lane.b32.xlu1 %v12829_v30, %s19986_s26  ;;  %v12830_v54 = vmul.f32 0.26579726, %v25574_v31 }
 0x949   :  { %12886 = vrot.lane.b32.xlu0 %v12824_v50, %s19986_s26  ;;  %v13965_v19 = vpop.f32.mrb[20].mxu1 }
 0x94a   :  { %13076 = vrot.lane.b32.xlu1 %v13009_v14, %s19988_s27  ;;  %v14038_v9 = vpop.f32.mrb[44].mxu0  ;;  %19022 = vmatpush3.msk.msra.mxu1 %vm13895_vm9, %v13965_v19  ;;  %v18965_v2 = vpop.f32.mrb[21].mxu1  ;;  %v13010_v14 = vmul.f32 0.33194062, %v25574_v31 }
 0x94b   :  { %19027 = vmatpush3.msk.msra.mxu0 %vm13895_vm9, %v14038_v9  ;;  %v18970_v20 = vpop.f32.mrb[45].mxu0  ;;  %19031 = vmatprep.subr.mxu1 %v25570_v0  ;;  %v24608_v9 = vmul.f32 0.26579726, %v24022_v5  ;;  %v24612_v2 = vmul.f32 %v25574_v31, %v25574_v31 }
 0x94c   :  { %19024 = vmatmul.mubr.msk.f32.vlgmr.msra.gmra.mrb[32].mxu1 %vm13891_vm10, %v24477_v41  ;;  %19029 = vmatmul.mubr.msk.f32.vlgmr.msra.gmra.mrb[56].mxu0 %vm13891_vm10, %v24477_v41 }
 0x94d   :  { %13066 = vrot.lane.b32.xlu0 %v13004_v34, %s19988_s27  ;;  %v14111_v39 = vpop.f32.mrb[22].mxu1  ;;  %19036 = vmatprep.subr.mxu0 %v25570_v0  ;;  %v24586_v34 = vmul.f32 %v25573_v32, %v25573_v32 }
 0x94e   :  { %13196 = vrot.lane.b32.xlu1 %v12829_v30, %s19990_s0  ;;  %v14184_v3 = vpop.f32.mrb[46].mxu0  ;;  %19033 = vmatprep.mubr.msk.f32.mxu1 %vm19984_vm1, %v25570_v0  ;;  %v18975_v51 = vpop.f32.mrb[23].mxu1  ;;  %v12826_v30 = vmul.f32 0.26579726, %v23999_v53 }
 0x94f   :  { %19032 = vmatpush3.msk.msra.mxu1 %vm13895_vm9, %v14111_v39  ;;  %19037 = vmatpush3.msk.msra.mxu0 %vm13895_vm9, %v14184_v3  ;;  %v18980_v37 = vpop.f32.mrb[47].mxu0  ;;  %v13023_v19 = vmul.f32 0.33194062, %v24586_v34  ;;  %v24624_v39 = vmul.f32 %v24022_v5, %v24022_v5  ;;  %v12842_v3 = vmul.f32 0.26579726, %v24612_v2 }
 0x950   :  { %19038 = vmatprep.mubr.msk.f32.mxu0 %vm19984_vm1, %v25570_v0  ;;  %19034 = vmatmul.mubr.msk.f32.vlgmr.msra.gmra.mrb[34].mxu1 %vm13891_vm10, %v24477_v41  ;;  %v13022_v37 = vmul.f32 0.33194062, %v24612_v2 }
 0x951   :  { %13186 = vrot.lane.b32.xlu0 %v12824_v50, %s19990_s0  ;;  %19039 = vmatmul.mubr.msk.f32.vlgmr.msra.gmra.mrb[58].mxu0 %vm13891_vm10, %v24477_v41  ;;  %v14257_v46 = vpop.f32.mrb[24].mxu1  ;;  %v13006_v50 = vmul.f32 0.33194062, %v23999_v53  ;;  %v24630_v51 = vmul.f32 0.26579726, %v24624_v39 }
 0x952   :  { %12920 = vrot.lane.b32.xlu1 %v12841_v42, %s19986_s26  ;;  %v14330_v56 = vpop.f32.mrb[48].mxu0  ;;  %19041 = vmatprep.subr.mxu1 %v25570_v0  ;;  %v18985_v43 = vpop.f32.mrb[25].mxu1 }
 0x953   :  { %19046 = vmatprep.subr.mxu0 %v25570_v0  ;;  %19042 = vmatpush3.msk.msra.mxu1 %vm13895_vm9, %v14257_v46  ;;  %v18990_v18 = vpop.f32.mrb[49].mxu0  ;;  %v25576_v46 = vld [vmem:[#allocation44_spill] sm:$0xff] }
 0x954   :  { %19043 = vmatprep.mubr.msk.f32.mxu1 %vm19984_vm1, %v25570_v0  ;;  %19047 = vmatpush3.msk.msra.mxu0 %vm13895_vm9, %v14330_v56  ;;  %v24640_v56 = vmul.f32 0.26579726, %v25576_v46 }
 0x955   :  { %12910 = vrot.lane.b32.xlu0 %v12836_v45, %s19986_s26  ;;  %19048 = vmatprep.mubr.msk.f32.mxu0 %vm19984_vm1, %v25570_v0 }
 0x956   :  { %13100 = vrot.lane.b32.xlu1 %v13021_v26, %s19988_s27  ;;  %19044 = vmatmul.mubr.msk.f32.vlgmr.msra.gmra.mrb[36].mxu1 %vm13891_vm10, %v24477_v41  ;;  %v14403_v52 = vpop.f32.mrb[26].mxu1  ;;  %v14476_v13 = vpop.f32.mrb[50].mxu0 }
 0x957   :  { %19049 = vmatmul.mubr.msk.f32.vlgmr.msra.gmra.mrb[60].mxu0 %vm13891_vm10, %v24477_v41  ;;  %19051 = vmatprep.subr.mxu1 %v25570_v0  ;;  %v19000_v22 = vpop.f32.mrb[51].mxu0  ;;  %v18995_v6 = vpop.f32.mrb[27].mxu1 }
 0x958   :  { %19052 = vmatpush3.msk.msra.mxu1 %vm13895_vm9, %v14403_v52  ;;  %19053 = vmatprep.mubr.msk.f32.mxu1 %vm19984_vm1, %v25570_v0 }
 0x959   :  { %13090 = vrot.lane.b32.xlu0 %v13016_v40, %s19988_s27  ;;  %19056 = vmatprep.subr.mxu0 %v25570_v0 }
 0x95a   :  { %13220 = vrot.lane.b32.xlu1 %v12841_v42, %s19990_s0  ;;  %19054 = vmatmul.mubr.msk.f32.vlgmr.msra.gmra.mrb[38].mxu1 %vm13891_vm10, %v24477_v41  ;;  %v14549_v36 = vpop.f32.mrb[28].mxu1  ;;  %v24592_v42 = vmul.f32 %v23999_v53, %v23999_v53 }
 0x95b   :  { %19057 = vmatpush3.msk.msra.mxu0 %vm13895_vm9, %v14476_v13  ;;  %19058 = vmatprep.mubr.msk.f32.mxu0 %vm19984_vm1, %v25570_v0  ;;  %v19005_v28 = vpop.f32.mrb[29].mxu1 }
 0x95c   :  { %19059 = vmatmul.mubr.msk.f32.vlgmr.msra.gmra.mrb[62].mxu0 %vm13891_vm10, %v24477_v41  ;;  %19066 = vmatprep.subr.mxu0 %v25570_v0  ;;  %v24598_v26 = vmul.f32 0.26579726, %v24592_v42  ;;  %v13018_v40 = vmul.f32 0.33194062, %v24592_v42 }
 0x95d   :  { %13210 = vrot.lane.b32.xlu0 %v12836_v45, %s19990_s0  ;;  %19068 = vmatprep.mubr.msk.f32.mxu0 %vm19984_vm1, %v25570_v0  ;;  %v12843_v45 = vmul.f32 0.26579726, %v24586_v34 }
 0x95e   :  { %12932 = vrot.lane.b32.xlu1 %v24490_v27, %s19986_s26  ;;  %19061 = vmatprep.subr.mxu1 %v25570_v0 }
 0x95f   :  { %19063 = vmatprep.mubr.msk.f32.mxu1 %vm19984_vm1, %v25570_v0  ;;  %19062 = vmatpush3.msk.msra.mxu1 %vm13895_vm9, %v14549_v36 }
 0x960   :  { %v14622_v16 = vpop.f32.mrb[52].mxu0  ;;  %19064 = vmatmul.mubr.msk.f32.vlgmr.msra.gmra.mrb[40].mxu1 %vm13891_vm10, %v24477_v41  ;;  %19071 = vmatprep.subr.mxu1 %v25570_v0 }
 0x961   :  { %12888 = vrot.lane.b32.xlu0 %v12825_v47, %s19986_s26  ;;  %v19010_v15 = vpop.f32.mrb[53].mxu0  ;;  %19067 = vmatpush3.msk.msra.mxu0 %vm13895_vm9, %v14622_v16 }
 0x962   :  { %13110 = vrot.lane.b32.xlu1 %v13026_v12, %s19988_s27  ;;  %19069 = vmatmul.mubr.msk.f32.vlgmr.msra.gmra.mrb[64].mxu0 %vm13891_vm10, %v24477_v41  ;;  %v25577_v12 = vld [vmem:[#allocation24_spill] sm:$0xff]  ;;  %v25578_v15 = vld [vmem:[#allocation46_spill] sm:$0xff] }
 0x963   :  { %v14695_v11 = vpop.f32.mrb[30].mxu1  ;;  %19076 = vmatprep.subr.mxu0 %v25570_v0  ;;  %19078 = vmatprep.mubr.msk.f32.mxu0 %vm19984_vm1, %v25570_v0  ;;  %v12833_v43 = vmul.f32 0.26579726, %v25577_v12  ;;  %v13013_v18 = vmul.f32 0.33194062, %v25577_v12 }
 0x964   :  { %v19015_v17 = vpop.f32.mrb[31].mxu1  ;;  %19072 = vmatpush3.msk.msra.mxu1 %vm13895_vm9, %v14695_v11  ;;  %19073 = vmatprep.mubr.msk.f32.mxu1 %vm19984_vm1, %v25570_v0  ;;  %v13007_v0 = vmul.f32 0.33194062, %v24022_v5  ;;  %v12832_v28 = vmul.f32 0.26579726, %v25578_v15 }
 0x965   :  { %13068 = vrot.lane.b32.xlu0 %v13005_v59, %s19988_s27  ;;  %19074 = vmatmul.mubr.msk.f32.vlgmr.msra.gmra.mrb[42].mxu1 %vm13891_vm10, %v24477_v41 }
 0x966   :  { %13230 = vrot.lane.b32.xlu1 %v24519_v25, %s19990_s0 }
 0x968   :  { %v14768_v49 = vpop.f32.mrb[54].mxu0 }
 0x969   :  { %13188 = vrot.lane.b32.xlu0 %v12825_v47, %s19990_s0  ;;  %v19020_v62 = vpop.f32.mrb[55].mxu0  ;;  %19077 = vmatpush3.msk.msra.mxu0 %vm13895_vm9, %v14768_v49  ;;  %v13008_v47 = vmul.f32 0.33194062, %v25568_v58 }
 0x96a   :  { %12900 = vrot.lane.b32.xlu1 %v12831_v29, %s19986_s26  ;;  %19079 = vmatmul.mubr.msk.f32.vlgmr.msra.gmra.mrb[66].mxu0 %vm13891_vm10, %v24477_v41  ;;  %v25575_v41 = vld [vmem:[#allocation50_spill] sm:$0xff]  ;;  %v12792_v62 = vmul.f32 0.13646486, %v23963_v1 }
 0x96b   :  { %v24615_v20 = vmul.f32 0.26579726, %v25575_v41 }
 0x96d   :  { %12912 = vrot.lane.b32.xlu0 %v12837_v8, %s19986_s26 }
 0x96e   :  { %13080 = vrot.lane.b32.xlu1 %v13011_v48, %s19988_s27 }
 0x971   :  { %13092 = vrot.lane.b32.xlu0 %v13017_v63, %s19988_s27 }
 0x972   :  { %13200 = vrot.lane.b32.xlu1 %v12831_v29, %s19990_s0 }
 0x975   :  { %13212 = vrot.lane.b32.xlu0 %v12837_v8, %s19990_s0  ;;  %v12793_v8 = vmul.f32 0.13646486, %v23972_v35 }
 0x976   :  { %12898 = vrot.lane.b32.xlu1 %v12830_v54, %s19986_s26 }
 0x979   :  { %12890 = vrot.lane.b32.xlu0 %v12826_v30, %s19986_s26 }
 0x97a   :  { %13078 = vrot.lane.b32.xlu1 %v13010_v14, %s19988_s27 }
 0x97d   :  { %13070 = vrot.lane.b32.xlu0 %v13006_v50, %s19988_s27 }
 0x97e   :  { %13198 = vrot.lane.b32.xlu1 %v12830_v54, %s19990_s0 }
 0x981   :  { %13190 = vrot.lane.b32.xlu0 %v12826_v30, %s19990_s0  ;;  %v13012_v30 = vmul.f32 0.33194062, %v25578_v15 }
 0x982   :  { %12924 = vrot.lane.b32.xlu1 %v12843_v45, %s19986_s26 }
 0x985   :  { %12914 = vrot.lane.b32.xlu0 %v24598_v26, %s19986_s26 }
 0x986   :  { %13104 = vrot.lane.b32.xlu1 %v13023_v19, %s19988_s27 }
 0x989   :  { %13094 = vrot.lane.b32.xlu0 %v13018_v40, %s19988_s27 }
 0x98a   :  { %13224 = vrot.lane.b32.xlu1 %v12843_v45, %s19990_s0 }
 0x98d   :  { %12892 = vrot.lane.b32.xlu0 %v24608_v9, %s19986_s26 }
 0x98e   :  { %12936 = vrot.lane.b32.xlu1 %v24615_v20, %s19986_s26 }
 0x991   :  { %13072 = vrot.lane.b32.xlu0 %v13007_v0, %s19988_s27 }
 0x992   :  { %12922 = vrot.lane.b32.xlu1 %v12842_v3, %s19986_s26 }
 0x995   :  { %12916 = vrot.lane.b32.xlu0 %v24630_v51, %s19986_s26 }
 0x996   :  { %13102 = vrot.lane.b32.xlu1 %v13022_v37, %s19988_s27  ;;  %v24659_v37 = vmul.f32 %v25577_v12, %v25577_v12 }
 0x999   :  { %13074 = vrot.lane.b32.xlu0 %v13008_v47, %s19988_s27 }
 0x99a   :  { %13222 = vrot.lane.b32.xlu1 %v12842_v3, %s19990_s0 }
 0x99d   :  { %13194 = vrot.lane.b32.xlu0 %v24440_v23, %s19990_s0 }
 0x99e   :  { %13234 = vrot.lane.b32.xlu1 %v24640_v56, %s19990_s0 }
 0x9a2   :  { %12904 = vrot.lane.b32.xlu1 %v12833_v43, %s19986_s26 }
 0x9a6   :  { %v11706_v59 = vpop.xlane.xlu1 %11705  ;;  %13084 = vrot.lane.b32.xlu1 %v13013_v18, %s19988_s27 }
 0x9a7   :  { %v11707_v52 = vrot.slane %v11706_v59, 4 }
 0x9a8   :  { %v11685_v13 = vpop.xlane.xlu0 %11684 }
 0x9a9   :  { %v11708_v22 = vadd.f32 %v11707_v52, %v11706_v59  ;;  %v11686_v6 = vrot.slane %v11685_v13, 4 }
 0x9aa   :  { %v12885_v16 = vpop.permute.xlu1 %12884  ;;  %13204 = vrot.lane.b32.xlu1 %v12833_v43, %s19990_s0 }
 0x9ab   :  { %v11687_v23 = vadd.f32 %v11686_v6, %v11685_v13  ;;  %v11709_v36 = vrot.slane %v11708_v22, 2  ;;  %v12973_v17 = vadd.f32 %v12885_v16, %v12793_v8  ;;  %v12805_v16 = vmul.f32 0.13646486, %v24421_v61 }
 0x9ac   :  { %v12883_v29 = vpop.permute.xlu0 %12882 }
 0x9ad   :  { %v11688_v49 = vrot.slane %v11687_v23, 2  ;;  %v11710_v11 = vadd.f32 %v11709_v36, %v11708_v22  ;;  %v12972_v50 = vadd.f32 %v12883_v29, %v12792_v62  ;;  %v12845_v22 = vmul.f32 0.26579726, %v24659_v37 }
 0x9ae   :  { %v13065_v48 = vpop.permute.xlu1 %13064  ;;  %12902 = vrot.lane.b32.xlu1 %v12832_v28, %s19986_s26 }
 0x9af   :  { %v11689_v63 = vadd.f32 %v11688_v49, %v11687_v23  ;;  %v11711_v14 = vrot.slane %v11710_v11, 1  ;;  %v13153_v45 = vadd.f32 %v13065_v48, %v12973_v17  ;;  %v12804_v49 = vmul.f32 0.13646486, %v24431_v57 }
 0x9b0   :  { %v13063_v54 = vpop.permute.xlu0 %13062  ;;  %v24671_v57 = vmul.f32 %v25578_v15, %v25578_v15 }
 0x9b1   :  { %v11690_v19 = vrot.slane %v11689_v63, 1  ;;  %v13152_v35 = vadd.f32 %v13063_v54, %v12972_v50  ;;  %v11712_v1 = vadd.f32 %v11711_v14, %v11710_v11 }
 0x9b2   :  { %v13185_v40 = vpop.permute.xlu1 %13184  ;;  %13082 = vrot.lane.b32.xlu1 %v13012_v30, %s19988_s27 }
 0x9b3   :  { %v13273_v0 = vadd.f32 %v13185_v40, %v13153_v45  ;;  %v11691_v3 = vadd.f32 %v11690_v19, %v11689_v63 }
 0x9b4   :  { %v13183_v47 = vpop.permute.xlu0 %13182 }
 0x9b5   :  { %v13333_v43 = vmul.f32 0.26579726, %v13273_v0  ;;  %v13272_v18 = vadd.f32 %v13183_v47, %v13152_v35  ;;  %19527 = vpush %v11691_v3  ;;  %v13303_v36 = vmul.f32 0.13646486, %v13273_v0  ;;  %v13483_v29 = vmul.f32 0.33194062, %v13273_v0 }
 0x9b6   :  { %19529 = vpush %v11712_v1  ;;  %v12909_v59 = vpop.permute.xlu1 %12908  ;;  %13202 = vrot.lane.b32.xlu1 %v12832_v28, %s19990_s0  ;;  %v13025_v28 = vmul.f32 0.33194062, %v24659_v37 }
 0x9b7   :  { %v13332_v52 = vmul.f32 0.26579726, %v13272_v18  ;;  %v13393_v6 = vrot.slane %v13333_v43, 1  ;;  %v12985_v8 = vadd.f32 %v12909_v59, %v12805_v16  ;;  %v13302_v54 = vmul.f32 0.13646486, %v13272_v18 }
 0x9b8   :  { %v12907_v13 = vpop.permute.xlu0 %12906  ;;  %v13482_v30 = vmul.f32 0.33194062, %v13272_v18  ;;  %v13543_v14 = vrot.slane %v13483_v29, 2  ;;  %v13633_v18 = vrot.slane %v13333_v43, 3  ;;  %v12844_v29 = vmul.f32 0.26579726, %v24671_v57 }
 0x9b9   :  { %v13392_v11 = vrot.slane %v13332_v52, 1  ;;  %v13453_v17 = vadd.f32 %v13393_v6, %v13303_v36  ;;  %v12984_v62 = vadd.f32 %v12907_v13, %v12804_v49 }
 0x9ba   :  { %v13089_v23 = vpop.permute.xlu1 %13088  ;;  %12928 = vrot.lane.b32.xlu1 %v12845_v22, %s19986_s26  ;;  %v13542_v47 = vrot.slane %v13482_v30, 2 }
 0x9bb   :  { %v13165_v63 = vadd.f32 %v13089_v23, %v12985_v8  ;;  %v13452_v19 = vadd.f32 %v13392_v11, %v13302_v54  ;;  %v13603_v40 = vadd.f32 %v13543_v14, %v13453_v17  ;;  %v13632_v11 = vrot.slane %v13332_v52, 3 }
 0x9bc   :  { %12736 = vmax.xlane.f32.xlu0 %v24303_v33  ;;  %v13087_v48 = vpop.permute.xlu0 %13086  ;;  %v13024_v14 = vmul.f32 0.33194062, %v24671_v57 }
 0x9bd   :  { %v13164_v50 = vadd.f32 %v13087_v48, %v12984_v62  ;;  %v13602_v6 = vadd.f32 %v13542_v47, %v13452_v19  ;;  %v12794_v62 = vmul.f32 0.13646486, %v23981_v24  ;;  %v12799_v19 = vmul.f32 0.13646486, %v25569_v21 }
 0x9be   :  { %v13209_v61 = vpop.permute.xlu1 %13208  ;;  %13108 = vrot.lane.b32.xlu1 %v13025_v28, %s19988_s27 }
 0x9bf   :  { %v13285_v45 = vadd.f32 %v13209_v61, %v13165_v63  ;;  %v24682_v63 = vadd.f32 %v13632_v11, %v13602_v6 }
 0x9c0   :  { %12756 = vmin.xlane.f32.xlu0 %v24351_v4  ;;  %v13207_v33 = vpop.permute.xlu0 %13206  ;;  %v24678_v4 = vadd.f32 %v13633_v18, %v13603_v40 }
 0x9c1   :  { %v13345_v35 = vmul.f32 0.26579726, %v13285_v45  ;;  %v13495_v0 = vmul.f32 0.33194062, %v13285_v45  ;;  %v13284_v3 = vadd.f32 %v13207_v33, %v13164_v50  ;;  %v13315_v59 = vmul.f32 0.13646486, %v13285_v45 }
 0x9c2   :  { %v24674_v1 = vpop.permute.xlu1 %12894  ;;  %13228 = vrot.lane.b32.xlu1 %v12845_v22, %s19990_s0  ;;  %v24687_v50 = vmul.f32 %v24678_v4, %v24678_v4  ;;  %v24697_v47 = vmul.f32 %v24682_v63, %v24682_v63 }
 0x9c3   :  { %v13405_v13 = vrot.slane %v13345_v35, 1  ;;  %v13344_v16 = vmul.f32 0.26579726, %v13284_v3  ;;  %v13494_v23 = vmul.f32 0.33194062, %v13284_v3  ;;  %v13555_v49 = vrot.slane %v13495_v0, 2 }
 0x9c4   :  { %v12887_v36 = vpop.permute.xlu0 %12886  ;;  %v13314_v48 = vmul.f32 0.13646486, %v13284_v3  ;;  %v13645_v43 = vrot.slane %v13345_v35, 3 }
 0x9c5   :  { %v13465_v8 = vadd.f32 %v13405_v13, %v13315_v59  ;;  %v13404_v28 = vrot.slane %v13344_v16, 1  ;;  %v13554_v30 = vrot.slane %v13494_v23, 2  ;;  %v12974_v45 = vadd.f32 %v12887_v36, %v12794_v62 }
 0x9c6   :  { %v12897_v17 = vpop.permute.xlu1 %12896  ;;  %12926 = vrot.lane.b32.xlu1 %v12844_v29, %s19986_s26  ;;  %v13644_v40 = vrot.slane %v13344_v16, 3  ;;  %v13019_v62 = vmul.f32 0.33194062, %v24624_v39 }
 0x9c7   :  { %v13615_v22 = vadd.f32 %v13555_v49, %v13465_v8  ;;  %v13464_v54 = vadd.f32 %v13404_v28, %v13314_v48  ;;  %v12979_v0 = vadd.f32 %v12897_v17, %v12799_v19  ;;  %v25579_v49 = vld [vmem:[#allocation22_spill] sm:$0xff] }
 0x9c8   :  { %v13067_v61 = vpop.permute.xlu0 %13066  ;;  %v13031_v11 = vmul.f32 0.33194062, %v25579_v49 }
 0x9c9   :  { %v24689_v52 = vadd.f32 %v13645_v43, %v13615_v22  ;;  %v13614_v33 = vadd.f32 %v13554_v30, %v13464_v54  ;;  %v13154_v3 = vadd.f32 %v13067_v61, %v12974_v45  ;;  %v12806_v43 = vmul.f32 0.13646486, %v24462_v38 }
 0x9ca   :  { %v13077_v35 = vpop.permute.xlu1 %13076  ;;  %13106 = vrot.lane.b32.xlu1 %v13024_v14, %s19988_s27  ;;  %v25580_v14 = vld [vmem:[#allocation20_spill] sm:$0xff] }
 0x9cb   :  { %v13741_v24 = vsub.f32 %v24689_v52, %v24687_v50  ;;  %v24699_v18 = vadd.f32 %v13644_v40, %v13614_v33  ;;  %v13159_v13 = vadd.f32 %v13077_v35, %v12979_v0  ;;  %v12811_v40 = vmul.f32 0.13646486, %v24456_v7 }
 0x9cc   :  { %v13187_v59 = vpop.permute.xlu0 %13186  ;;  %v13030_v21 = vmul.f32 0.33194062, %v25580_v14 }
 0x9cd   :  { %v13274_v6 = vadd.f32 %v13187_v59, %v13154_v3 }
 0x9ce   :  { %v13197_v16 = vpop.permute.xlu1 %13196  ;;  %13226 = vrot.lane.b32.xlu1 %v12844_v29, %s19990_s0  ;;  %v24709_v29 = vmul.f32 0.26579726, %v25580_v14 }
 0x9cf   :  { %v13334_v23 = vmul.f32 0.26579726, %v13274_v6  ;;  %v13279_v36 = vadd.f32 %v13197_v16, %v13159_v13  ;;  %v13304_v45 = vmul.f32 0.13646486, %v13274_v6  ;;  %v13484_v19 = vmul.f32 0.33194062, %v13274_v6 }
 0x9d0   :  { %v12911_v8 = vpop.permute.xlu0 %12910 }
 0x9d1   :  { %v13339_v48 = vmul.f32 0.26579726, %v13279_v36  ;;  %v13489_v28 = vmul.f32 0.33194062, %v13279_v36  ;;  %v13394_v22 = vrot.slane %v13334_v23, 1  ;;  %v12986_v33 = vadd.f32 %v12911_v8, %v12806_v43 }
 0x9d2   :  { %v12921_v17 = vpop.permute.xlu1 %12920  ;;  %13120 = vrot.lane.b32.xlu1 %v13031_v11, %s19988_s27  ;;  %v13309_v54 = vmul.f32 0.13646486, %v13279_v36  ;;  %v13544_v6 = vrot.slane %v13484_v19, 2  ;;  %v13634_v19 = vrot.slane %v13334_v23, 3  ;;  %v12795_v23 = vmul.f32 0.13646486, %v23988_v55 }
 0x9d3   :  { %v13399_v30 = vrot.slane %v13339_v48, 1  ;;  %v13549_v0 = vrot.slane %v13489_v28, 2  ;;  %v13454_v38 = vadd.f32 %v13394_v22, %v13304_v45  ;;  %v12991_v59 = vadd.f32 %v12921_v17, %v12811_v40 }
 0x9d4   :  { %v13091_v61 = vpop.permute.xlu0 %13090  ;;  %v13639_v36 = vrot.slane %v13339_v48, 3  ;;  %v24723_v45 = vmul.f32 0.26579726, %v25579_v49 }
 0x9d5   :  { %v13459_v35 = vadd.f32 %v13399_v30, %v13309_v54  ;;  %v13166_v13 = vadd.f32 %v13091_v61, %v12986_v33 }
 0x9d6   :  { %13096 = vrot.lane.b32.xlu0 %v13019_v62, %s19988_s27  ;;  %v13101_v3 = vpop.permute.xlu1 %13100  ;;  %12938 = vrot.lane.b32.xlu1 %v24709_v29, %s19986_s26  ;;  %v13604_v62 = vadd.f32 %v13544_v6, %v13454_v38 }
 0x9d7   :  { %v13609_v16 = vadd.f32 %v13549_v0, %v13459_v35  ;;  %v13171_v8 = vadd.f32 %v13101_v3, %v12991_v59  ;;  %v24739_v59 = vmul.f32 %v25568_v58, %v25568_v58 }
 0x9d8   :  { %v13211_v11 = vpop.permute.xlu0 %13210 }
 0x9d9   :  { %v13286_v43 = vadd.f32 %v13211_v11, %v13166_v13  ;;  %v13699_v7 = vadd.f32 %v13639_v36, %v13609_v16 }
 0x9da   :  { %13192 = vrot.lane.b32.xlu0 %v24608_v9, %s19990_s0  ;;  %v13221_v28 = vpop.permute.xlu1 %13220  ;;  %13118 = vrot.lane.b32.xlu1 %v13030_v21, %s19988_s27 }
 0x9db   :  { %v13346_v54 = vmul.f32 0.26579726, %v13286_v43  ;;  %v13496_v22 = vmul.f32 0.33194062, %v13286_v43  ;;  %v13291_v17 = vadd.f32 %v13221_v28, %v13171_v8  ;;  %v13729_v30 = vmul.f32 %v13699_v7, %v13699_v7 }
 0x9dc   :  { %v24720_v48 = vmul.f32 %v13699_v7, %v24678_v4  ;;  %v12889_v61 = vpop.permute.xlu0 %12888  ;;  %v13316_v33 = vmul.f32 0.13646486, %v13286_v43  ;;  %v24734_v4 = vadd.f32 %v13634_v19, %v13604_v62 }
 0x9dd   :  { %v13406_v40 = vrot.slane %v13346_v54, 1  ;;  %v24726_v9 = vadd.f32 %v13729_v30, %v24687_v50  ;;  %v13351_v35 = vmul.f32 0.26579726, %v13291_v17  ;;  %v13501_v21 = vmul.f32 0.33194062, %v13291_v17 }
 0x9de   :  { %13214 = vrot.lane.b32.xlu0 %v24598_v26, %s19990_s0  ;;  %v24730_v0 = vpop.permute.xlu1 %12932  ;;  %13240 = vrot.lane.b32.xlu1 %v24723_v45, %s19990_s0  ;;  %v13556_v38 = vrot.slane %v13496_v22, 2  ;;  %v13321_v13 = vmul.f32 0.13646486, %v13291_v17  ;;  %v13646_v26 = vrot.slane %v13346_v54, 3  ;;  %v12975_v6 = vadd.f32 %v12889_v61, %v12795_v23 }
 0x9df   :  { %25581 = vst [vmem:[#allocation29_spill] sm:$0xff] %v24726_v9  ;;  %v13466_v3 = vadd.f32 %v13406_v40, %v13316_v33  ;;  %v13411_v16 = vrot.slane %v13351_v35, 1  ;;  %v13561_v43 = vrot.slane %v13501_v21, 2  ;;  %v24747_v55 = vmul.f32 %v24734_v4, %v24734_v4 }
 0x9e0   :  { %v13069_v36 = vpop.permute.xlu0 %13068  ;;  %v13651_v17 = vrot.slane %v13351_v35, 3  ;;  %v12840_v54 = vmul.f32 0.26579726, %v24739_v59  ;;  %v13020_v35 = vmul.f32 0.33194062, %v24739_v59 }
 0x9e1   :  { %v13616_v11 = vadd.f32 %v13556_v38, %v13466_v3  ;;  %v13471_v8 = vadd.f32 %v13411_v16, %v13321_v13  ;;  %v13155_v62 = vadd.f32 %v13069_v36, %v12975_v6  ;;  %v12807_v23 = vmul.f32 0.13646486, %v24532_v10 }
 0x9e2   :  { %13216 = vrot.lane.b32.xlu0 %v24630_v51, %s19990_s0  ;;  %v24743_v7 = vpop.permute.xlu1 %13110  ;;  %v12801_v13 = vmul.f32 0.13646486, %v25573_v32 }
 0x9e3   :  { %v24749_v28 = vadd.f32 %v13646_v26, %v13616_v11  ;;  %v13621_v22 = vadd.f32 %v13561_v43, %v13471_v8 }
 0x9e4   :  { %v13189_v19 = vpop.permute.xlu0 %13188 }
 0x9e5   :  { %v13275_v33 = vadd.f32 %v13189_v19, %v13155_v62  ;;  %v13711_v40 = vadd.f32 %v13651_v17, %v13621_v22 }
 0x9e6   :  { %12918 = vrot.lane.b32.xlu0 %v12840_v54, %s19986_s26  ;;  %s19528_s13 = spop %19527  ;;  %v24755_v51 = vpop.permute.xlu1 %13230 }
 0x9e7   :  { %v13335_v21 = vmul.f32 0.26579726, %v13275_v33  ;;  %s19530_s7 = spop %19529  ;;  %v13747_v3 = vsub.f32 %v13711_v40, %v13729_v30  ;;  %s11693_s30 = smul.f32 0.16666667, %s19528_s13  ;;  %v13305_v10 = vmul.f32 0.13646486, %v13275_v33 }
 0x9e8   :  { %v12913_v38 = vpop.permute.xlu0 %12912  ;;  %s11714_s29 = smul.f32 0.16666667, %s19530_s7  ;;  %v13485_v22 = vmul.f32 0.33194062, %v13275_v33 }
 0x9e9   :  { %v24763_v16 = vadd.f32 %v13747_v3, %v13741_v24  ;;  %v11715_v36 = vstv %s11693_s30  ;;  %v13395_v26 = vrot.slane %v13335_v21, 1  ;;  %v12987_v6 = vadd.f32 %v12913_v38, %v12807_v23  ;;  %v25582_v24 = vld [vmem:[#allocation28_spill] sm:$0xff] }
 0x9ea   :  { %13098 = vrot.lane.b32.xlu0 %v13020_v35, %s19988_s27  ;;  %v12901_v11 = vpop.permute.xlu1 %12900  ;;  %v11716_v30 = vstv %s11714_s29  ;;  %v13545_v35 = vrot.slane %v13485_v22, 2 }
 0x9eb   :  { %v12981_v8 = vadd.f32 %v12901_v11, %v12801_v13  ;;  %v11717_v43 = vsel %vm4293_vm7, %v11715_v36, %v11716_v30  ;;  %v13455_v52 = vadd.f32 %v13395_v26, %v13305_v10  ;;  %v12796_v30 = vmul.f32 0.13646486, %v23999_v53 }
 0x9ec   :  { %v13093_v62 = vpop.permute.xlu0 %13092  ;;  %v16280_v32 = vrot.slane %v11717_v43, 6  ;;  %v13027_v26 = vmul.f32 0.33194062, %v25571_v44 }
 0x9ed   :  { %v13167_v17 = vadd.f32 %v13093_v62, %v12987_v6  ;;  %v13605_v13 = vadd.f32 %v13545_v35, %v13455_v52  ;;  %v13635_v6 = vrot.slane %v13335_v21, 3 }
 0x9ee   :  { %13218 = vrot.lane.b32.xlu0 %v12840_v54, %s19990_s0  ;;  %v13081_v50 = vpop.permute.xlu1 %13080  ;;  %v24769_v19 = vsel %vm16290_vm13, %v25582_v24, %v16280_v32 }
 0x9ef   :  { %25583 = vst [vmem:[#allocation38_spill] sm:$0xff] %v24769_v19  ;;  %v13161_v40 = vadd.f32 %v13081_v50, %v12981_v8  ;;  %v12800_v8 = vmul.f32 0.13646486, %v25574_v31 }
 0x9f0   :  { %v13213_v3 = vpop.permute.xlu0 %13212 }
 0x9f1   :  { %v13287_v38 = vadd.f32 %v13213_v3, %v13167_v17  ;;  %v13695_v17 = vadd.f32 %v13635_v6, %v13605_v13 }
 0x9f2   :  { %12930 = vrot.lane.b32.xlu0 %v24519_v25, %s19986_s26  ;;  %v13201_v23 = vpop.permute.xlu1 %13200 }
 0x9f3   :  { %v13347_v36 = vmul.f32 0.26579726, %v13287_v38  ;;  %v13497_v33 = vmul.f32 0.33194062, %v13287_v38  ;;  %v13281_v11 = vadd.f32 %v13201_v23, %v13161_v40  ;;  %v13317_v43 = vmul.f32 0.13646486, %v13287_v38 }
 0x9f4   :  { %v12891_v54 = vpop.permute.xlu0 %12890 }
 0x9f5   :  { %v13407_v62 = vrot.slane %v13347_v36, 1  ;;  %v13341_v10 = vmul.f32 0.26579726, %v13281_v11  ;;  %v13491_v22 = vmul.f32 0.33194062, %v13281_v11  ;;  %v12976_v32 = vadd.f32 %v12891_v54, %v12796_v30 }
 0x9f6   :  { %13112 = vrot.lane.b32.xlu0 %v13027_v26, %s19988_s27  ;;  %v12899_v25 = vpop.permute.xlu1 %12898  ;;  %v13557_v52 = vrot.slane %v13497_v33, 2  ;;  %v13311_v40 = vmul.f32 0.13646486, %v13281_v11  ;;  %v13647_v23 = vrot.slane %v13347_v36, 3  ;;  %v24779_v30 = vmul.f32 %v13695_v17, %v13695_v17 }
 0x9f7   :  { %v13467_v50 = vadd.f32 %v13407_v62, %v13317_v43  ;;  %v12980_v24 = vadd.f32 %v12899_v25, %v12800_v8  ;;  %v13401_v53 = vrot.slane %v13341_v10, 1  ;;  %v13551_v61 = vrot.slane %v13491_v22, 2 }
 0x9f8   :  { %v13071_v3 = vpop.permute.xlu0 %13070  ;;  %v13641_v33 = vrot.slane %v13341_v10, 3  ;;  %v13029_v11 = vmul.f32 0.33194062, %v25575_v41  ;;  %v12813_v10 = vmul.f32 0.13646486, %v24586_v34 }
 0x9f9   :  { %v13617_v35 = vadd.f32 %v13557_v52, %v13467_v50  ;;  %v13156_v21 = vadd.f32 %v13071_v3, %v12976_v32  ;;  %v13461_v38 = vadd.f32 %v13401_v53, %v13311_v40 }
 0x9fa   :  { %13232 = vrot.lane.b32.xlu0 %v24490_v27, %s19990_s0  ;;  %v13079_v31 = vpop.permute.xlu1 %13078 }
 0x9fb   :  { %v24781_v54 = vadd.f32 %v13647_v23, %v13617_v35  ;;  %v13160_v13 = vadd.f32 %v13079_v31, %v12980_v24  ;;  %v13611_v26 = vadd.f32 %v13551_v61, %v13461_v38  ;;  %v12808_v61 = vmul.f32 0.13646486, %v24592_v42 }
 0x9fc   :  { %v13191_v6 = vpop.permute.xlu0 %13190 }
 0x9fd   :  { %v13743_v36 = vsub.f32 %v24781_v54, %v24779_v30  ;;  %v24786_v43 = vadd.f32 %v13191_v6, %v13156_v21  ;;  %v13701_v62 = vadd.f32 %v13641_v33, %v13611_v26  ;;  %v13028_v6 = vmul.f32 0.33194062, %v25576_v46 }
 0x9fe   :  { %13116 = vrot.lane.b32.xlu0 %v13029_v11, %s19988_s27  ;;  %v13199_v27 = vpop.permute.xlu1 %13198 }
 0x9ff   :  { %v13280_v8 = vadd.f32 %v13199_v27, %v13160_v13  ;;  %v13731_v22 = vmul.f32 %v13701_v62, %v13701_v62  ;;  %v24789_v32 = vmul.f32 %v13701_v62, %v13695_v17  ;;  %v12797_v13 = vmul.f32 0.13646486, %v24022_v5 }
 0xa00   :  { %v12915_v25 = vpop.permute.xlu0 %12914 }
 0xa01   :  { %v24794_v50 = vadd.f32 %v13731_v22, %v24779_v30  ;;  %v13340_v52 = vmul.f32 0.26579726, %v13280_v8  ;;  %v13490_v24 = vmul.f32 0.33194062, %v13280_v8  ;;  %v12988_v53 = vadd.f32 %v12915_v25, %v12808_v61 }
 0xa02   :  { %13236 = vrot.lane.b32.xlu0 %v24615_v20, %s19990_s0  ;;  %v12925_v40 = vpop.permute.xlu1 %12924  ;;  %v13310_v35 = vmul.f32 0.13646486, %v13280_v8 }
 0xa03   :  { %25584 = vst [vmem:[#allocation48_spill] sm:$0xff] %v24794_v50  ;;  %v12993_v3 = vadd.f32 %v12925_v40, %v12813_v10  ;;  %v13400_v23 = vrot.slane %v13340_v52, 1  ;;  %v13550_v42 = vrot.slane %v13490_v24, 2  ;;  %v13640_v33 = vrot.slane %v13340_v52, 3 }
 0xa04   :  { %v13095_v17 = vpop.permute.xlu0 %13094 }
 0xa05   :  { %v24798_v21 = vadd.f32 %v13095_v17, %v12988_v53  ;;  %v13460_v38 = vadd.f32 %v13400_v23, %v13310_v35 }
 0xa06   :  { %12934 = vrot.lane.b32.xlu0 %v24640_v56, %s19986_s26  ;;  %v13105_v34 = vpop.permute.xlu1 %13104 }
 0xa07   :  { %v13173_v31 = vadd.f32 %v13105_v34, %v12993_v3  ;;  %v13610_v26 = vadd.f32 %v13550_v42, %v13460_v38 }
 0xa08   :  { %v12893_v20 = vpop.permute.xlu0 %12892 }
 0xa09   :  { %v12977_v11 = vadd.f32 %v12893_v20, %v12797_v13  ;;  %v13700_v62 = vadd.f32 %v13640_v33, %v13610_v26  ;;  %v12812_v26 = vmul.f32 0.13646486, %v24612_v2 }
 0xa0a   :  { %13114 = vrot.lane.b32.xlu0 %v13028_v6, %s19988_s27  ;;  %v13225_v27 = vpop.permute.xlu1 %13224 }
 0xa0b   :  { %v13293_v8 = vadd.f32 %v13225_v27, %v13173_v31  ;;  %v13730_v25 = vmul.f32 %v13700_v62, %v13700_v62  ;;  %v24806_v61 = vmul.f32 %v13700_v62, %v24734_v4  ;;  %v12798_v4 = vmul.f32 0.13646486, %v25568_v58 }
 0xa0c   :  { %v13073_v56 = vpop.permute.xlu0 %13072 }
 0xa0d   :  { %25585 = vst [vmem:[#allocation49_spill] sm:$0xff] %v24806_v61  ;;  %v13353_v10 = vmul.f32 0.26579726, %v13293_v8  ;;  %v13503_v24 = vmul.f32 0.33194062, %v13293_v8  ;;  %v24808_v40 = vadd.f32 %v13073_v56, %v12977_v11  ;;  %v24811_v5 = vadd.f32 %v13730_v25, %v24747_v55 }
 0xa0e   :  { %12940 = vrot.lane.b32.xlu0 %v24723_v45, %s19986_s26  ;;  %v24815_v52 = vpop.permute.xlu1 %12936  ;;  %v13323_v53 = vmul.f32 0.13646486, %v13293_v8  ;;  %v12978_v42 = vadd.f32 %v24674_v1, %v12798_v4 }
 0xa0f   :  { %25586 = vst [vmem:[#allocation21_spill] sm:$0xff] %v24811_v5  ;;  %v13413_v3 = vrot.slane %v13353_v10, 1  ;;  %v13563_v17 = vrot.slane %v13503_v24, 2  ;;  %v13653_v31 = vrot.slane %v13353_v10, 3 }
 0xa10   :  { %v24817_v35 = vpop.permute.xlu0 %12916 }
 0xa11   :  { %v13473_v23 = vadd.f32 %v13413_v3, %v13323_v53 }
 0xa12   :  { %13238 = vrot.lane.b32.xlu0 %v24709_v29, %s19990_s0  ;;  %v12923_v38 = vpop.permute.xlu1 %12922 }
 0xa13   :  { %v13623_v34 = vadd.f32 %v13563_v17, %v13473_v23  ;;  %v12992_v11 = vadd.f32 %v12923_v38, %v12812_v26 }
 0xa14   :  { %v13075_v13 = vpop.permute.xlu0 %13074 }
 0xa15   :  { %v13713_v45 = vadd.f32 %v13653_v31, %v13623_v34  ;;  %v13158_v33 = vadd.f32 %v13075_v13, %v12978_v42 }
 0xa16   :  { %v13103_v20 = vpop.permute.xlu1 %13102 }
 0xa17   :  { %v13749_v6 = vsub.f32 %v13713_v45, %v13731_v22  ;;  %v13172_v29 = vadd.f32 %v13103_v20, %v12992_v11 }
 0xa18   :  { %v13195_v62 = vpop.permute.xlu0 %13194 }
 0xa19   :  { %v24827_v58 = vadd.f32 %v13749_v6, %v13743_v36  ;;  %v13278_v27 = vadd.f32 %v13195_v62, %v13158_v33 }
 0xa1a   :  { %v13223_v8 = vpop.permute.xlu1 %13222 }
 0xa1b   :  { %v13338_v1 = vmul.f32 0.26579726, %v13278_v27  ;;  %v13488_v56 = vmul.f32 0.33194062, %v13278_v27  ;;  %v13292_v10 = vadd.f32 %v13223_v8, %v13172_v29  ;;  %v13308_v24 = vmul.f32 0.13646486, %v13278_v27 }
 0xa1c   :  { %v13336_v29 = vmul.f32 0.26579726, %v24786_v43  ;;  %v25588_v27 = vsub.f32 %v24749_v28, %v24747_v55 }
 0xa1d   :  { %v13398_v53 = vrot.slane %v13338_v1, 1  ;;  %v13352_v3 = vmul.f32 0.26579726, %v13292_v10  ;;  %v13502_v2 = vmul.f32 0.33194062, %v13292_v10  ;;  %v13548_v23 = vrot.slane %v13488_v56, 2 }
 0xa1e   :  { %v24829_v4 = vpop.permute.xlu1 %13234  ;;  %v13322_v17 = vmul.f32 0.13646486, %v13292_v10  ;;  %v13638_v30 = vrot.slane %v13338_v1, 3  ;;  %v12803_v56 = vmul.f32 0.13646486, %v25577_v12 }
 0xa1f   :  { %v13458_v22 = vadd.f32 %v13398_v53, %v13308_v24  ;;  %v13412_v38 = vrot.slane %v13352_v3, 1  ;;  %v13562_v36 = vrot.slane %v13502_v2, 2  ;;  %v13652_v45 = vrot.slane %v13352_v3, 3  ;;  %v24847_v10 = vpop.f32.mrb[32].mxu1  ;;  %v24849_v3 = vpop.f32.mrb[56].mxu0 }
 0xa20   :  { %25589 = vst [vmem:[#allocation31_spill] sm:$0xff] %v24847_v10  ;;  %v13306_v2 = vmul.f32 0.13646486, %v24786_v43  ;;  %v15672_v50 = vsel %vm15651_vm14, %v24847_v10, inf }
 0xa21   :  { %v13608_v42 = vadd.f32 %v13548_v23, %v13458_v22  ;;  %v13472_v54 = vadd.f32 %v13412_v38, %v13322_v17  ;;  %v19025_v23 = vpop.f32.mrb[33].mxu1  ;;  %v19030_v17 = vpop.f32.mrb[57].mxu0  ;;  %v12802_v38 = vmul.f32 0.13646486, %v25578_v15  ;;  %v12815_v15 = vmul.f32 0.13646486, %v24659_v37 }
 0xa22   :  { %v12905_v34 = vpop.permute.xlu1 %12904 }
 0xa23   :  { %v13698_v31 = vadd.f32 %v13638_v30, %v13608_v42  ;;  %v13622_v13 = vadd.f32 %v13562_v36, %v13472_v54  ;;  %v12983_v24 = vadd.f32 %v12905_v34, %v12803_v56  ;;  %v24854_v42 = vpop.f32.mrb[34].mxu1 }
 0xa24   :  { %25590 = vst [vmem:[#allocation39_spill] sm:$0xff] %v24854_v42  ;;  %v24856_v30 = vpop.f32.mrb[58].mxu0  ;;  %v19035_v34 = vpop.f32.mrb[35].mxu1  ;;  %v15674_v5 = vsel %vm15651_vm14, %v24854_v42, inf }
 0xa25   :  { %v24831_v26 = vmul.f32 %v13698_v31, %v13698_v31  ;;  %v24834_v33 = vmul.f32 %v13698_v31, %v24682_v63  ;;  %v13712_v20 = vadd.f32 %v13652_v45, %v13622_v13  ;;  %v13396_v63 = vrot.slane %v13336_v29, 1  ;;  %25591 = vst [vmem:[#allocation33_spill] sm:$0xff] %v24856_v30  ;;  %v19040_v31 = vpop.f32.mrb[59].mxu0 }
 0xa26   :  { %v13085_v6 = vpop.permute.xlu1 %13084 }
 0xa27   :  { %v24838_v11 = vadd.f32 %v24831_v26, %v24697_v47  ;;  %v13748_v62 = vsub.f32 %v13712_v20, %v13730_v25  ;;  %v13486_v25 = vmul.f32 0.33194062, %v24786_v43  ;;  %v13163_v22 = vadd.f32 %v13085_v6, %v12983_v24 }
 0xa28   :  { %v13456_v55 = vadd.f32 %v13396_v63, %v13306_v2 }
 0xa29   :  { %25587 = vst [vmem:[#allocation27_spill] sm:$0xff] %v24838_v11  ;;  %v24844_v8 = vadd.f32 %v13748_v62, %v25588_v27  ;;  %v13546_v54 = vrot.slane %v13486_v25, 2  ;;  %v24860_v6 = vpop.f32.mrb[36].mxu1  ;;  %v13636_v62 = vrot.slane %v13336_v29, 3  ;;  %v15653_v29 = vsel %vm15651_vm14, %v24849_v3, -inf }
 0xa2a   :  { %v13205_v1 = vpop.permute.xlu1 %13204  ;;  %25592 = vst [vmem:[#allocation45_spill] sm:$0xff] %v24860_v6  ;;  %v19045_v56 = vpop.f32.mrb[37].mxu1  ;;  %v15656_v37 = vsel %vm15651_vm14, %v24860_v6, -inf }
 0xa2b   :  { %v13283_v28 = vadd.f32 %v13205_v1, %v13163_v22  ;;  %v13606_v13 = vadd.f32 %v13546_v54, %v13456_v55  ;;  %v24863_v1 = vpop.f32.mrb[60].mxu0  ;;  %v15652_v55 = vsel %vm15651_vm14, %v24847_v10, -inf }
 0xa2c   :  { %25593 = vst [vmem:[#allocation23_spill] sm:$0xff] %v24863_v1 }
 0xa2d   :  { %v24858_v45 = vmul.f32 0.26579726, %v13283_v28  ;;  %v13313_v63 = vmul.f32 0.13646486, %v13283_v28  ;;  %v13493_v24 = vmul.f32 0.33194062, %v13283_v28  ;;  %v13696_v2 = vadd.f32 %v13636_v62, %v13606_v13 }
 0xa2e   :  { %v12903_v53 = vpop.permute.xlu1 %12902  ;;  %v15658_v28 = vsel %vm15651_vm14, %v24863_v1, -inf  ;;  %v15654_v13 = vsel %vm15651_vm14, %v24854_v42, -inf }
 0xa2f   :  { %v12982_v36 = vadd.f32 %v12903_v53, %v12802_v38  ;;  %v19050_v53 = vpop.f32.mrb[61].mxu0  ;;  %v13403_v25 = vrot.slane %v24858_v45, 1  ;;  %v24874_v38 = vpop.f32.mrb[38].mxu1  ;;  %v15659_v62 = vmax.f32 %v15653_v29, %v15658_v28  ;;  %v15676_v29 = vsel %vm15651_vm14, %v24860_v6, inf }
 0xa30   :  { %v19055_v31 = vpop.f32.mrb[39].mxu1  ;;  %v24880_v56 = vpop.f32.mrb[62].mxu0  ;;  %v24900_v61 = vmul.f32 %v24874_v38, %v24847_v10 }
 0xa32   :  { %v13083_v12 = vpop.permute.xlu1 %13082  ;;  %25594 = vst [vmem:[#allocation32_spill] sm:$0xff] %v24900_v61 }
 0xa33   :  { %v13162_v43 = vadd.f32 %v13083_v12, %v12982_v36 }
 0xa36   :  { %v13203_v20 = vpop.permute.xlu1 %13202 }
 0xa37   :  { %v13282_v27 = vadd.f32 %v13203_v20, %v13162_v43  ;;  %v15655_v43 = vsel %vm15651_vm14, %v24856_v30, -inf  ;;  %v15657_v20 = vmax.f32 %v15652_v55, %v15656_v37  ;;  %v15675_v55 = vsel %vm15651_vm14, %v24856_v30, inf }
 0xa38   :  { %v15661_v19 = vmax.f32 %v15654_v13, %v15655_v43  ;;  %v13463_v13 = vadd.f32 %v13403_v25, %v13313_v63  ;;  %v13553_v63 = vrot.slane %v13493_v24, 2 }
 0xa39   :  { %v13342_v22 = vmul.f32 0.26579726, %v13282_v27  ;;  %v13492_v23 = vmul.f32 0.33194062, %v13282_v27  ;;  %v13312_v12 = vmul.f32 0.13646486, %v13282_v27  ;;  %v15660_v31 = vmax.f32 %v15657_v20, %v15659_v62 }
 0xa3a   :  { %v12929_v17 = vpop.permute.xlu1 %12928  ;;  %v15673_v27 = vsel %vm15651_vm14, %v24849_v3, inf  ;;  %v15681_v20 = vmin.f32 %v15674_v5, %v15675_v55 }
 0xa3b   :  { %v13402_v54 = vrot.slane %v13342_v22, 1  ;;  %v13552_v36 = vrot.slane %v13492_v23, 2  ;;  %v13642_v34 = vrot.slane %v13342_v22, 3  ;;  %v19060_v22 = vpop.f32.mrb[63].mxu0  ;;  %v12995_v28 = vadd.f32 %v12929_v17, %v12815_v15 }
 0xa3c   :  { %v24894_v43 = vmax.f32 %v15660_v31, %v15661_v19  ;;  %v24896_v62 = vpop.f32.mrb[64].mxu0  ;;  %v24904_v15 = vmul.f32 %v24880_v56, %v24849_v3  ;;  %v24906_v17 = vmul.f32 %v13696_v2, %v13696_v2 }
 0xa3d   :  { %v13462_v53 = vadd.f32 %v13402_v54, %v13312_v12  ;;  %v15677_v12 = vmin.f32 %v15672_v50, %v15676_v29  ;;  %v15678_v54 = vsel %vm15651_vm14, %v24863_v1, inf  ;;  %v19070_v50 = vpop.f32.mrb[65].mxu0  ;;  %v13613_v29 = vadd.f32 %v13553_v63, %v13463_v13 }
 0xa3e   :  { %v13109_v23 = vpop.permute.xlu1 %13108  ;;  %v15679_v22 = vmin.f32 %v15673_v27, %v15678_v54  ;;  %25595 = vst [vmem:[#allocation36_spill] sm:$0xff] %v24904_v15  ;;  %v24916_v27 = vmul.f32 %v24896_v62, %v24856_v30  ;;  %v24924_v24 = vpop.f32.mrb[66].mxu0  ;;  %v12814_v50 = vmul.f32 0.13646486, %v24671_v57 }
 0xa3f   :  { %v13612_v37 = vadd.f32 %v13552_v36, %v13462_v53  ;;  %v13175_v11 = vadd.f32 %v13109_v23, %v12995_v28  ;;  %v24908_v36 = vpop.f32.mrb[40].mxu1  ;;  %25599 = vst [vmem:[#allocation43_spill] sm:$0xff] %v24924_v24 }
 0xa40   :  { %v15680_v25 = vmin.f32 %v15677_v12, %v15679_v22  ;;  %25596 = vst [vmem:[#allocation25_spill] sm:$0xff] %v24908_v36  ;;  %25597 = vst [vmem:[#allocation35_spill] sm:$0xff] %v24916_v27  ;;  %v19065_v23 = vpop.f32.mrb[41].mxu1  ;;  %v24922_v55 = vmul.f32 %v24908_v36, %v24854_v42  ;;  %v13643_v12 = vrot.slane %v24858_v45, 3 }
 0xa41   :  { %v13702_v9 = vadd.f32 %v13642_v34, %v13612_v37 }
 0xa42   :  { %v13229_v19 = vpop.permute.xlu1 %13228  ;;  %v24918_v31 = vmin.f32 %v15680_v25, %v15681_v20  ;;  %25598 = vst [vmem:[#allocation40_spill] sm:$0xff] %v24922_v55  ;;  %v24931_v20 = vpop.f32.mrb[42].mxu1  ;;  %v24938_v63 = vadd.f32 %v13643_v12, %v13613_v29 }
 0xa43   :  { %v24910_v5 = vmul.f32 %v13702_v9, %v13702_v9  ;;  %v24912_v34 = vmul.f32 %v13702_v9, %v13696_v2  ;;  %v13295_v53 = vadd.f32 %v13229_v19, %v13175_v11  ;;  %v19080_v11 = vpop.f32.mrb[67].mxu0  ;;  %25600 = vst [vmem:[#allocation42_spill] sm:$0xff] %v24931_v20  ;;  %v24936_v19 = vmul.f32 %v24924_v24, %v24863_v1  ;;  %v19075_v13 = vpop.f32.mrb[43].mxu1 }
 0xa44   :  { %v24942_v55 = vmul.f32 %v24931_v20, %v24860_v6  ;;  %v24946_v1 = vmul.f32 %v24938_v63, %v24938_v63 }
 0xa45   :  { %v24928_v37 = vadd.f32 %v24910_v5, %v24906_v17  ;;  %v13355_v9 = vmul.f32 0.26579726, %v13295_v53  ;;  %v13505_v2 = vmul.f32 0.33194062, %v13295_v53  ;;  %v13325_v54 = vmul.f32 0.13646486, %v13295_v53 }
 0xa46   :  { %v12927_v28 = vpop.permute.xlu1 %12926  ;;  %25601 = vst [vmem:[#allocation26_spill] sm:$0xff] %v24936_v19  ;;  %25602 = vst [vmem:[#allocation34_spill] sm:$0xff] %v24942_v55 }
 0xa47   :  { %v13415_v22 = vrot.slane %v13355_v9, 1  ;;  %v13565_v23 = vrot.slane %v13505_v2, 2  ;;  %v13655_v27 = vrot.slane %v13355_v9, 3  ;;  %v12994_v15 = vadd.f32 %v12927_v28, %v12814_v50 }
 0xa49   :  { %v13475_v25 = vadd.f32 %v13415_v22, %v13325_v54  ;;  %v12737_v11 = vpop.xlane.xlu0 %12736 }
 0xa4a   :  { %v12738_v45 = vrot.slane %v12737_v11, 4  ;;  %v13107_v53 = vpop.permute.xlu1 %13106 }
 0xa4b   :  { %v13625_v61 = vadd.f32 %v13565_v23, %v13475_v25  ;;  %v13174_v29 = vadd.f32 %v13107_v53, %v12994_v15 }
 0xa4c   :  { %v12739_v57 = vmax.f32 %v12737_v11, %v12738_v45 }
 0xa4d   :  { %v24948_v13 = vadd.f32 %v13655_v27, %v13625_v61  ;;  %v12757_v12 = vpop.xlane.xlu0 %12756 }
 0xa4e   :  { %v12740_v2 = vrot.slane %v12739_v57, 2  ;;  %v12758_v54 = vrot.slane %v12757_v12, 4  ;;  %v13227_v22 = vpop.permute.xlu1 %13226 }
 0xa4f   :  { %v13294_v19 = vadd.f32 %v13227_v22, %v13174_v29 }
 0xa50   :  { %v12759_v6 = vmin.f32 %v12757_v12, %v12758_v54  ;;  %v12741_v25 = vmax.f32 %v12739_v57, %v12740_v2  ;;  %v12809_v54 = vmul.f32 0.13646486, %v24624_v39 }
 0xa51   :  { %v13354_v9 = vmul.f32 0.26579726, %v13294_v19  ;;  %v13504_v28 = vmul.f32 0.33194062, %v13294_v19  ;;  %v13097_v50 = vpop.permute.xlu0 %13096  ;;  %v13324_v45 = vmul.f32 0.13646486, %v13294_v19 }
 0xa52   :  { %v12760_v23 = vrot.slane %v12759_v6, 2  ;;  %v12742_v11 = vrot.slane %v12741_v25, 1 }
 0xa53   :  { %v13414_v20 = vrot.slane %v13354_v9, 1  ;;  %v13564_v53 = vrot.slane %v13504_v28, 2  ;;  %v13654_v29 = vrot.slane %v13354_v9, 3 }
 0xa54   :  { %v12743_v61 = vmax.f32 %v12741_v25, %v12742_v11  ;;  %v12761_v27 = vmin.f32 %v12759_v6, %v12760_v23 }
 0xa55   :  { %v13474_v15 = vadd.f32 %v13414_v20, %v13324_v45  ;;  %v13193_v24 = vpop.permute.xlu0 %13192  ;;  %v12989_v20 = vadd.f32 %v24817_v35, %v12809_v54  ;;  %v12810_v54 = vmul.f32 0.13646486, %v24739_v59  ;;  %v25603_v59 = vsub.f32 %v24948_v13, %v24946_v1 }
 0xa56   :  { %v13277_v30 = vadd.f32 %v13193_v24, %v24808_v40  ;;  %19531 = vpush %v12743_v61  ;;  %v12762_v42 = vrot.slane %v12761_v27, 1 }
 0xa57   :  { %v13624_v55 = vadd.f32 %v13564_v53, %v13474_v15  ;;  %v13169_v23 = vadd.f32 %v13097_v50, %v12989_v20 }
 0xa58   :  { %v13337_v12 = vmul.f32 0.26579726, %v13277_v30  ;;  %v13487_v57 = vmul.f32 0.33194062, %v13277_v30  ;;  %v12763_v2 = vmin.f32 %v12761_v27, %v12762_v42  ;;  %v13307_v19 = vmul.f32 0.13646486, %v13277_v30 }
 0xa59   :  { %v13714_v22 = vadd.f32 %v13654_v29, %v13624_v55  ;;  %v13215_v36 = vpop.permute.xlu0 %13214 }
 0xa5a   :  { %v13397_v10 = vrot.slane %v13337_v12, 1  ;;  %v13288_v6 = vadd.f32 %v13215_v36, %v24798_v21  ;;  %19533 = vpush %v12763_v2  ;;  %v13547_v25 = vrot.slane %v13487_v57, 2  ;;  %v13637_v45 = vrot.slane %v13337_v12, 3 }
 0xa5b   :  { %v13750_v40 = vsub.f32 %v13714_v22, %v24910_v5 }
 0xa5c   :  { %v13457_v24 = vadd.f32 %v13397_v10, %v13307_v19  ;;  %v13348_v28 = vmul.f32 0.26579726, %v13288_v6  ;;  %v13498_v9 = vmul.f32 0.33194062, %v13288_v6  ;;  %v13318_v39 = vmul.f32 0.13646486, %v13288_v6 }
 0xa5d   :  { %v13217_v11 = vpop.permute.xlu0 %13216 }
 0xa5e   :  { %v13607_v42 = vadd.f32 %v13547_v25, %v13457_v24  ;;  %v13408_v55 = vrot.slane %v13348_v28, 1  ;;  %v13289_v61 = vadd.f32 %v13217_v11, %v13169_v23  ;;  %v13558_v15 = vrot.slane %v13498_v9, 2 }
 0xa5f   :  { %v13648_v29 = vrot.slane %v13348_v28, 3 }
 0xa60   :  { %v13697_v30 = vadd.f32 %v13637_v45, %v13607_v42  ;;  %v13468_v27 = vadd.f32 %v13408_v55, %v13318_v39  ;;  %v13349_v21 = vmul.f32 0.26579726, %v13289_v61  ;;  %v13499_v36 = vmul.f32 0.33194062, %v13289_v61 }
 0xa61   :  { %v12919_v53 = vpop.permute.xlu0 %12918  ;;  %v13319_v57 = vmul.f32 0.13646486, %v13289_v61 }
 0xa62   :  { %v13727_v35 = vmul.f32 %v13697_v30, %v13697_v30  ;;  %v24958_v5 = vmul.f32 %v24938_v63, %v13697_v30  ;;  %v13618_v10 = vadd.f32 %v13558_v15, %v13468_v27  ;;  %v13409_v50 = vrot.slane %v13349_v21, 1 }
 0xa63   :  { %v13559_v19 = vrot.slane %v13499_v36, 2  ;;  %v12990_v24 = vadd.f32 %v12919_v53, %v12810_v54  ;;  %v13649_v9 = vrot.slane %v13349_v21, 3 }
 0xa64   :  { %v24961_v2 = vadd.f32 %v24946_v1, %v13727_v35  ;;  %v13708_v12 = vadd.f32 %v13648_v29, %v13618_v10  ;;  %v13469_v22 = vadd.f32 %v13409_v50, %v13319_v57  ;;  %v12816_v10 = vmul.f32 0.13646486, %v25572_v60 }
 0xa65   :  { %v13099_v6 = vpop.permute.xlu0 %13098  ;;  %v25604_v1 = vsub.f32 %v24699_v18, %v24697_v47 }
 0xa66   :  { %v13744_v20 = vsub.f32 %v13708_v12, %v24906_v17  ;;  %v13619_v25 = vadd.f32 %v13559_v19, %v13469_v22  ;;  %v13170_v23 = vadd.f32 %v13099_v6, %v12990_v24  ;;  %v12819_v12 = vmul.f32 0.13646486, %v25575_v41  ;;  %v13121_v6 = vpop.permute.xlu1 %13120 }
 0xa68   :  { %v24965_v63 = vadd.f32 %v13750_v40, %v13744_v20  ;;  %v13709_v28 = vadd.f32 %v13649_v9, %v13619_v25  ;;  %v12999_v19 = vadd.f32 %v24815_v52, %v12819_v12 }
 0xa69   :  { %v13219_v11 = vpop.permute.xlu0 %13218 }
 0xa6a   :  { %v13290_v42 = vadd.f32 %v13219_v11, %v13170_v23  ;;  %v13745_v45 = vsub.f32 %v13709_v28, %v13727_v35  ;;  %v12939_v28 = vpop.permute.xlu1 %12938 }
 0xa6c   :  { %v13350_v39 = vmul.f32 0.26579726, %v13290_v42  ;;  %v13500_v55 = vmul.f32 0.33194062, %v13290_v42  ;;  %v24970_v61 = vadd.f32 %v25603_v59, %v13745_v45  ;;  %v13320_v27 = vmul.f32 0.13646486, %v13290_v42 }
 0xa6d   :  { %v12931_v30 = vpop.permute.xlu0 %12930  ;;  %v12818_v42 = vmul.f32 0.13646486, %v25576_v46 }
 0xa6e   :  { %v13410_v17 = vrot.slane %v13350_v39, 1  ;;  %v13560_v36 = vrot.slane %v13500_v55, 2  ;;  %v13650_v53 = vrot.slane %v13350_v39, 3  ;;  %v12996_v57 = vadd.f32 %v12931_v30, %v12816_v10 }
 0xa70   :  { %v13470_v15 = vadd.f32 %v13410_v17, %v13320_v27  ;;  %v13176_v54 = vadd.f32 %v24743_v7, %v12996_v57 }
 0xa71   :  { %v13113_v21 = vpop.permute.xlu0 %13112 }
 0xa72   :  { %v13620_v40 = vadd.f32 %v13560_v36, %v13470_v15  ;;  %v13296_v60 = vadd.f32 %v24755_v51, %v13176_v54 }
 0xa74   :  { %v13710_v29 = vadd.f32 %v13650_v53, %v13620_v40  ;;  %v13356_v9 = vmul.f32 0.26579726, %v13296_v60  ;;  %v13326_v59 = vmul.f32 0.13646486, %v13296_v60  ;;  %v13119_v40 = vpop.permute.xlu1 %13118 }
 0xa75   :  { %v13233_v35 = vpop.permute.xlu0 %13232 }
 0xa76   :  { %v13746_v50 = vsub.f32 %v13710_v29, %v24831_v26  ;;  %v12817_v26 = vmul.f32 0.13646486, %v25571_v44  ;;  %v13416_v45 = vrot.slane %v13356_v9, 1  ;;  %v13506_v44 = vmul.f32 0.33194062, %v13296_v60 }
 0xa77   :  { %v12821_v29 = vmul.f32 0.13646486, %v25579_v49  ;;  %v13656_v49 = vrot.slane %v13356_v9, 3 }
 0xa78   :  { %v24978_v13 = vadd.f32 %v13746_v50, %v25604_v1  ;;  %v12997_v23 = vadd.f32 %v24730_v0, %v12817_v26  ;;  %v12820_v0 = vmul.f32 0.13646486, %v25580_v14  ;;  %v13476_v53 = vadd.f32 %v13416_v45, %v13326_v59 }
 0xa79   :  { %v13117_v22 = vpop.permute.xlu0 %13116  ;;  %v13566_v50 = vrot.slane %v13506_v44, 2 }
 0xa7a   :  { %v13179_v20 = vadd.f32 %v13117_v22, %v12999_v19  ;;  %v13177_v52 = vadd.f32 %v13113_v21, %v12997_v23 }
 0xa7b   :  { %v13626_v22 = vadd.f32 %v13566_v50, %v13476_v53  ;;  %v13799_v53 = vmul.f32 2.0, %v24912_v34 }
 0xa7c   :  { %v13297_v30 = vadd.f32 %v13233_v35, %v13177_v52  ;;  %v13000_v35 = vadd.f32 %v12939_v28, %v12820_v0 }
 0xa7d   :  { %v13237_v24 = vpop.permute.xlu0 %13236 }
 0xa7e   :  { %v13299_v25 = vadd.f32 %v13237_v24, %v13179_v20  ;;  %v24990_v21 = vmul.f32 0.26579726, %v13297_v30  ;;  %v13180_v54 = vadd.f32 %v13119_v40, %v13000_v35  ;;  %v13241_v20 = vpop.permute.xlu1 %13240  ;;  %v13327_v24 = vmul.f32 0.13646486, %v13297_v30 }
 0xa7f   :  { %v13507_v26 = vmul.f32 0.33194062, %v13297_v30  ;;  %v13798_v40 = vmul.f32 2.0, %v24789_v32 }
 0xa80   :  { %v13359_v41 = vmul.f32 0.26579726, %v13299_v25  ;;  %v13509_v47 = vmul.f32 0.33194062, %v13299_v25  ;;  %v13329_v11 = vmul.f32 0.13646486, %v13299_v25 }
 0xa81   :  { %v12935_v18 = vpop.permute.xlu0 %12934  ;;  %v13417_v19 = vrot.slane %v24990_v21, 1  ;;  %v13567_v9 = vrot.slane %v13507_v26, 2 }
 0xa82   :  { %v13419_v7 = vrot.slane %v13359_v41, 1  ;;  %v13569_v51 = vrot.slane %v13509_v47, 2  ;;  %v12998_v55 = vadd.f32 %v12935_v18, %v12818_v42  ;;  %v13659_v15 = vrot.slane %v13359_v41, 3 }
 0xa83   :  { %v13716_v47 = vadd.f32 %v13656_v49, %v13626_v22 }
 0xa84   :  { %v13479_v39 = vadd.f32 %v13419_v7, %v13329_v11  ;;  %v13477_v7 = vadd.f32 %v13417_v19, %v13327_v24  ;;  %v13800_v19 = vmul.f32 2.0, %v24958_v5 }
 0xa85   :  { %v13115_v27 = vpop.permute.xlu0 %13114  ;;  %v13752_v30 = vsub.f32 %v13716_v47, %v24834_v33 }
 0xa86   :  { %v13629_v17 = vadd.f32 %v13569_v51, %v13479_v39  ;;  %v13178_v36 = vadd.f32 %v13115_v27, %v12998_v55 }
 0xa87   :  { %s19532_s27 = spop %19531 }
 0xa88   :  { %v24987_v10 = vadd.f32 %v13659_v15, %v13629_v17  ;;  %v13298_v46 = vadd.f32 %v24829_v4, %v13178_v36  ;;  %p12765_p0 = scmp.gt.f32.partialorder %s19532_s27, 128.0  ;;  %v13627_v17 = vadd.f32 %v13567_v9, %v13477_v7 }
 0xa89   :  { %v12941_v57 = vpop.permute.xlu0 %12940 }
 0xa8a   :  { %v13755_v12 = vsub.f32 %v24987_v10, %v24789_v32  ;;  %v24995_v1 = vmul.f32 0.26579726, %v13298_v46  ;;  %v13001_v14 = vadd.f32 %v12941_v57, %v12821_v29  ;;  %s12766_s28 = scalar_select %p12765_p0, 255.0, 1.0  ;;  %v13328_v18 = vmul.f32 0.13646486, %v13298_v46 }
 0xa8b   :  { %s19534_s0 = spop %19533  ;;  %v13508_v42 = vmul.f32 0.33194062, %v13298_v46  ;;  %v13657_v29 = vrot.slane %v24990_v21, 3 }
 0xa8c   :  { %v13181_v4 = vadd.f32 %v13121_v6, %v13001_v14  ;;  %p12767_p1 = scmp.lt.f32.partialorder %s19534_s0, -0.5  ;;  %v13418_v41 = vrot.slane %v24995_v1, 1  ;;  %v13758_v14 = vmul.f32 2.0, %v13752_v30 }
 0xa8d   :  { %v13239_v60 = vpop.permute.xlu0 %13238  ;;  %v13568_v15 = vrot.slane %v13508_v42, 2 }
 0xa8e   :  { %v13300_v25 = vadd.f32 %v13239_v60, %v13180_v54  ;;  %v13301_v23 = vadd.f32 %v13241_v20, %v13181_v4  ;;  %s12768_s15 = scalar_select %p12767_p1, -1.0, 0.0  ;;  %v13478_v51 = vadd.f32 %v13418_v41, %v13328_v18  ;;  %v13717_v4 = vadd.f32 %v13657_v29, %v13627_v17 }
 0xa8f   :  { %v13761_v60 = vmul.f32 2.0, %v13755_v12  ;;  %v13658_v20 = vrot.slane %v24995_v1, 3 }
 0xa90   :  { %v13360_v28 = vmul.f32 0.26579726, %v13300_v25  ;;  %v13510_v11 = vmul.f32 0.33194062, %v13300_v25  ;;  %v13361_v52 = vmul.f32 0.26579726, %v13301_v23  ;;  %s12769_s17 = ssub.f32 %s12766_s28, %s12768_s15  ;;  %v13628_v57 = vadd.f32 %v13568_v15, %v13478_v51 }
 0xa91   :  { %v13511_v6 = vmul.f32 0.33194062, %v13301_v23  ;;  %v13330_v45 = vmul.f32 0.13646486, %v13300_v25  ;;  %v13331_v55 = vmul.f32 0.13646486, %v13301_v23 }
 0xa92   :  { %v13420_v39 = vrot.slane %v13360_v28, 1  ;;  %v13421_v59 = vrot.slane %v13361_v52, 1  ;;  %s12770_s18 = smul.f32 0.01, %s12769_s17  ;;  %v13570_v44 = vrot.slane %v13510_v11, 2  ;;  %v13660_v46 = vrot.slane %v13360_v28, 3 }
 0xa93   :  { %s12772_s11 = smul.f32 0.03, %s12769_s17  ;;  %v13571_v0 = vrot.slane %v13511_v6, 2  ;;  %v13661_v50 = vrot.slane %v13361_v52, 3  ;;  %v13718_v26 = vadd.f32 %v13658_v20, %v13628_v57  ;;  %v25608_v51 = vld [vmem:[#allocation21_spill] sm:$0xff] }
 0xa94   :  { %v13480_v27 = vadd.f32 %v13420_v39, %v13330_v45  ;;  %v13481_v36 = vadd.f32 %v13421_v59, %v13331_v55  ;;  %s12771_s5 = smul.f32 %s12770_s18, %s12770_s18  ;;  %v25607_v39 = vld [vmem:[#allocation29_spill] sm:$0xff]  ;;  %v25609_v59 = vld [vmem:[#allocation48_spill] sm:$0xff] }
 0xa95   :  { %s12773_s4 = smul.f32 %s12772_s11, %s12772_s11 }
 0xa96   :  { %v13630_v10 = vadd.f32 %v13570_v44, %v13480_v27  ;;  %v13631_v35 = vadd.f32 %v13571_v0, %v13481_v36  ;;  %v25005_v49 = vstv %s12771_s5 }
 0xa97   :  { %v13764_v54 = vstv %s12773_s4  ;;  %v13807_v42 = vadd.f32 %v25005_v49, %v13800_v19  ;;  %v13821_v9 = vadd.f32 %v25607_v39, %v25005_v49  ;;  %v13822_v55 = vadd.f32 %v25608_v51, %v25005_v49 }
 0xa98   :  { %v13720_v22 = vadd.f32 %v13660_v46, %v13630_v10  ;;  %v13721_v32 = vadd.f32 %v13661_v50, %v13631_v35  ;;  %v13777_v25 = vadd.f32 %v24978_v13, %v13764_v54  ;;  %v13778_v21 = vadd.f32 %v24763_v16, %v13764_v54 }
 0xa99   :  { %v13779_v23 = vadd.f32 %v24844_v8, %v13764_v54  ;;  %v13780_v47 = vadd.f32 %v24827_v58, %v13764_v54  ;;  %v13768_v12 = vadd.f32 %v13764_v54, %v13761_v60  ;;  %v13781_v1 = vadd.f32 %v24965_v63, %v13764_v54  ;;  %v25605_v8 = vld [vmem:[#allocation49_spill] sm:$0xff] }
 0xa9a   :  { %v13756_v24 = vsub.f32 %v13720_v22, %v24912_v34  ;;  %v13757_v41 = vsub.f32 %v13721_v32, %v24958_v5  ;;  %19687 = vrcp.f32 %v13777_v25  ;;  %v13782_v11 = vadd.f32 %v24970_v61, %v13764_v54  ;;  %v25606_v61 = vld [vmem:[#allocation27_spill] sm:$0xff] }
 0xa9b   :  { %19689 = vrcp.f32 %v13778_v21  ;;  %v13805_v34 = vadd.f32 %v25005_v49, %v13798_v40  ;;  %v13753_v16 = vsub.f32 %v13717_v4, %v24720_v48  ;;  %v13806_v5 = vadd.f32 %v25005_v49, %v13799_v53 }
 0xa9c   :  { %v13762_v18 = vmul.f32 2.0, %v13756_v24  ;;  %v13763_v28 = vmul.f32 2.0, %v13757_v41  ;;  %19691 = vrcp.f32 %v13779_v23  ;;  %v13754_v7 = vsub.f32 %v13718_v26, %v25605_v8 }
 0xa9d   :  { %19693 = vrcp.f32 %v13780_v47  ;;  %v25020_v63 = vmul.f32 %v13805_v34, %v13768_v12  ;;  %v13820_v6 = vadd.f32 %v25606_v61, %v25005_v49  ;;  %v13823_v30 = vadd.f32 %v25609_v59, %v25005_v49 }
 0xa9e   :  { %v13769_v13 = vadd.f32 %v13764_v54, %v13762_v18  ;;  %v13770_v58 = vadd.f32 %v13764_v54, %v13763_v28  ;;  %19695 = vrcp.f32 %v13781_v1  ;;  %v13824_v27 = vadd.f32 %v24928_v37, %v25005_v49 }
 0xa9f   :  { %19697 = vrcp.f32 %v13782_v11  ;;  %v13825_v44 = vadd.f32 %v24961_v2, %v25005_v49  ;;  %v13826_v17 = vmul.f32 %v13820_v6, %v13777_v25  ;;  %v13759_v15 = vmul.f32 2.0, %v13753_v16 }
 0xaa0   :  { %v25022_v52 = vmul.f32 %v13806_v5, %v13769_v13  ;;  %v25026_v45 = vmul.f32 %v13807_v42, %v13770_v58  ;;  %v13760_v36 = vmul.f32 2.0, %v13754_v7  ;;  %v13827_v0 = vmul.f32 %v13821_v9, %v13778_v21 }
 0xaa1   :  { %v13828_v40 = vmul.f32 %v13822_v55, %v13779_v23  ;;  %v13829_v53 = vmul.f32 %v13823_v30, %v13780_v47  ;;  %v13830_v10 = vmul.f32 %v13824_v27, %v13781_v1  ;;  %v13831_v46 = vmul.f32 %v13825_v44, %v13782_v11 }
 0xaa2   :  { %19699 = vrcp.f32 %v13826_v17  ;;  %v13765_v29 = vadd.f32 %v13764_v54, %v13758_v14  ;;  %v13766_v35 = vadd.f32 %v13764_v54, %v13759_v15  ;;  %v13795_v37 = vmul.f32 2.0, %v24834_v33 }
 0xaa3   :  { %19701 = vrcp.f32 %v13827_v0  ;;  %v13767_v22 = vadd.f32 %v13764_v54, %v13760_v36  ;;  %v13796_v4 = vmul.f32 2.0, %v24720_v48  ;;  %v13797_v60 = vmul.f32 2.0, %v25605_v8 }
 0xaa4   :  { %v19688_v57 = vpop.eup %19687  ;;  %19703 = vrcp.f32 %v13828_v40  ;;  %v13802_v25 = vadd.f32 %v25005_v49, %v13795_v37  ;;  %v25072_v37 = vmul.f32 %v24880_v56, %v24880_v56 }
 0xaa5   :  { %v19690_v50 = vpop.eup %19689  ;;  %v13784_v19 = vmul.f32 %v19688_v57, %v13765_v29  ;;  %19705 = vrcp.f32 %v13829_v53  ;;  %v13803_v54 = vadd.f32 %v25005_v49, %v13796_v4  ;;  %v13804_v47 = vadd.f32 %v25005_v49, %v13797_v60  ;;  %v25611_v60 = vld [vmem:[#allocation25_spill] sm:$0xff] }
 0xaa6   :  { %v19692_v2 = vpop.eup %19691  ;;  %v13786_v20 = vmul.f32 %v19690_v50, %v13766_v35  ;;  %19707 = vrcp.f32 %v13830_v10  ;;  %v13808_v11 = vmul.f32 %v13802_v25, %v13765_v29  ;;  %v25068_v50 = vmul.f32 %v24849_v3, %v24849_v3 }
 0xaa7   :  { %v19694_v32 = vpop.eup %19693  ;;  %v13788_v24 = vmul.f32 %v19692_v2, %v13767_v22  ;;  %v13865_v14 = vsel %vm11672_vm11, %v13784_v19, 0.0  ;;  %19709 = vrcp.f32 %v13831_v46  ;;  %v13809_v5 = vmul.f32 %v13803_v54, %v13766_v35  ;;  %v25610_v19 = vld [vmem:[#allocation31_spill] sm:$0xff]  ;;  %v25613_v54 = vld [vmem:[#allocation33_spill] sm:$0xff] }
 0xaa8   :  { %v19696_v21 = vpop.eup %19695  ;;  %v13790_v26 = vmul.f32 %v19694_v32, %v13768_v12  ;;  %v13866_v33 = vsel %vm11672_vm11, %v13786_v20, 0.0  ;;  %v13810_v7 = vmul.f32 %v13804_v47, %v13767_v22  ;;  %v15756_v35 = vmul.f32 0.5553281, %v24880_v56  ;;  %v25612_v32 = vld [vmem:[#allocation39_spill] sm:$0xff] }
 0xaa9   :  { %v19698_v41 = vpop.eup %19697  ;;  %v13792_v23 = vmul.f32 %v19696_v21, %v13769_v13  ;;  %v13867_v48 = vadd.f32 %v13866_v33, %v13865_v14  ;;  %v13868_v1 = vsel %vm11672_vm11, %v13788_v24, 0.0  ;;  %v15758_v22 = vmul.f32 0.5553281, %v24896_v62 }
 0xaaa   :  { %v13794_v18 = vmul.f32 %v19698_v41, %v13770_v58  ;;  %v13870_v16 = vsel %vm11672_vm11, %v13790_v26, 0.0  ;;  %v15749_v2 = vmul.f32 0.5553281, %v25610_v19  ;;  %v25083_v4 = vmul.f32 %v24896_v62, %v24896_v62 }
 0xaab   :  { %v13869_v28 = vadd.f32 %v13868_v1, %v13867_v48  ;;  %v13872_v6 = vsel %vm11672_vm11, %v13792_v23, 0.0  ;;  %v15757_v20 = vmul.f32 0.5553281, %v25611_v60  ;;  %v15751_v24 = vmul.f32 0.5553281, %v25612_v32  ;;  %v25614_v48 = vld [vmem:[#allocation43_spill] sm:$0xff] }
 0xaac   :  { %v19700_v34 = vpop.eup %19699  ;;  %v13874_v55 = vsel %vm11672_vm11, %v13794_v18, 0.0  ;;  %v25091_v14 = vmul.f32 %v25610_v19, %v25610_v19  ;;  %v25095_v25 = vmul.f32 %v25611_v60, %v25611_v60  ;;  %v15770_v21 = vmul.f32 0.5553281, %v25083_v4  ;;  %v25615_v1 = vld [vmem:[#allocation42_spill] sm:$0xff] }
 0xaad   :  { %v19702_v8 = vpop.eup %19701  ;;  %v13871_v12 = vadd.f32 %v13870_v16, %v13869_v28  ;;  %v13833_v42 = vmul.f32 %v19700_v34, %v13808_v11  ;;  %v15752_v41 = vmul.f32 0.5553281, %v25613_v54  ;;  %v25107_v23 = vmul.f32 %v25612_v32, %v25612_v32  ;;  %v25616_v34 = vld [vmem:[#allocation45_spill] sm:$0xff] }
 0xaae   :  { %v19704_v61 = vpop.eup %19703  ;;  %v13835_v13 = vmul.f32 %v19702_v8, %v13809_v5  ;;  %v15761_v26 = vmul.f32 0.5553281, %v25091_v14  ;;  %v15769_v33 = vmul.f32 0.5553281, %v25095_v25  ;;  %v15760_v47 = vmul.f32 0.5553281, %v25614_v48 }
 0xaaf   :  { %v19706_v39 = vpop.eup %19705  ;;  %v13873_v9 = vadd.f32 %v13872_v6, %v13871_v12  ;;  %v13837_v49 = vmul.f32 %v19704_v61, %v13810_v7  ;;  %v13844_v58 = vsel %vm11672_vm11, %v13833_v42, 0.0  ;;  %v15763_v18 = vmul.f32 0.5553281, %v25107_v23  ;;  %v25617_v6 = vld [vmem:[#allocation23_spill] sm:$0xff] }
 0xab0   :  { %v19708_v51 = vpop.eup %19707  ;;  %v13839_v59 = vmul.f32 %v19706_v39, %v25020_v63  ;;  %v13845_v30 = vsel %vm11672_vm11, %v13835_v13, 0.0  ;;  %v25116_v28 = vmul.f32 %v25615_v1, %v25615_v1  ;;  %v15759_v11 = vmul.f32 0.5553281, %v25615_v1 }
 0xab1   :  { %v19710_v27 = vpop.eup %19709  ;;  %v13875_v44 = vadd.f32 %v13874_v55, %v13873_v9  ;;  %v13841_v17 = vmul.f32 %v19708_v51, %v25022_v52  ;;  %v13846_v15 = vadd.f32 %v13845_v30, %v13844_v58  ;;  %v13847_v0 = vsel %vm11672_vm11, %v13837_v49, 0.0  ;;  %v25618_v9 = vld [vmem:[#allocation36_spill] sm:$0xff]  ;;  %v25619_v51 = vld [vmem:[#allocation35_spill] sm:$0xff] }
 0xab2   :  { %v13843_v36 = vmul.f32 %v19710_v27, %v25026_v45  ;;  %v13849_v53 = vsel %vm11672_vm11, %v13839_v59, 0.0  ;;  %v15750_v52 = vmul.f32 0.5553281, %v24849_v3  ;;  %v15755_v45 = vmul.f32 0.5553281, %v24874_v38  ;;  %v25620_v27 = vld [vmem:[#allocation26_spill] sm:$0xff] }
 0xab3   :  { %13876 = vadd.xlane.f32.xlu1 %v13875_v44  ;;  %v13848_v40 = vadd.f32 %v13847_v0, %v13846_v15  ;;  %v13851_v46 = vsel %vm11672_vm11, %v13841_v17, 0.0  ;;  %v15753_v16 = vmul.f32 0.5553281, %v25616_v34  ;;  %v25123_v5 = vmul.f32 %v25613_v54, %v25613_v54  ;;  %v25621_v15 = vld [vmem:[#allocation32_spill] sm:$0xff] }
 0xab4   :  { %v13853_v63 = vsel %vm11672_vm11, %v13843_v36, 0.0  ;;  %v25127_v8 = vmul.f32 %v25614_v48, %v25614_v48  ;;  %v15771_v12 = vmul.f32 0.5553281, %v25116_v28  ;;  %v25137_v61 = vmul.f32 %v24874_v38, %v24874_v38  ;;  %v25622_v0 = vld [vmem:[#allocation40_spill] sm:$0xff] }
 0xab5   :  { %v13850_v10 = vadd.f32 %v13849_v53, %v13848_v40  ;;  %v15764_v7 = vmul.f32 0.5553281, %v25123_v5  ;;  %v15754_v13 = vmul.f32 0.5553281, %v25617_v6  ;;  %v15774_v49 = vmul.f32 0.5553281, %v25618_v9 }
 0xab6   :  { %v15772_v42 = vmul.f32 0.5553281, %v25127_v8  ;;  %v15767_v39 = vmul.f32 0.5553281, %v25137_v61  ;;  %v25147_v58 = vmul.f32 %v25616_v34, %v25616_v34  ;;  %v15776_v55 = vmul.f32 0.5553281, %v25619_v51 }
 0xab7   :  { %v13852_v29 = vadd.f32 %v13851_v46, %v13850_v10  ;;  %v25155_v30 = vmul.f32 %v25617_v6, %v25617_v6  ;;  %v15778_v44 = vmul.f32 0.5553281, %v25620_v27  ;;  %v15773_v36 = vmul.f32 0.5553281, %v25621_v15  ;;  %v25623_v53 = vld [vmem:[#allocation34_spill] sm:$0xff] }
 0xab8   :  { %v15765_v59 = vmul.f32 0.5553281, %v25147_v58  ;;  %v15775_v40 = vmul.f32 0.5553281, %v25622_v0  ;;  %v15777_v10 = vmul.f32 0.5553281, %v25623_v53 }
 0xab9   :  { %v13854_v57 = vadd.f32 %v13853_v63, %v13852_v29  ;;  %v15766_v17 = vmul.f32 0.5553281, %v25155_v30  ;;  %v15720_v63 = vmul.f32 0.44467193, %v24849_v3 }
 0xabb   :  { %13855 = vadd.xlane.f32.xlu0 %v13854_v57 }
 0xabf   :  { %15663 = vmax.xlane.f32.xlu0 %v24894_v43  ;;  %v15762_v43 = vmul.f32 0.5553281, %v25068_v50 }
 0xac3   :  { %15683 = vmin.xlane.f32.xlu0 %v24918_v31  ;;  %v15768_v31 = vmul.f32 0.5553281, %v25072_v37 }
 0xac4   :  { %15811 = vrot.lane.b32.xlu1 %v15750_v52, %s19986_s26 }
 0xac8   :  { %15821 = vrot.lane.b32.xlu1 %v15755_v45, %s19986_s26 }
 0xacc   :  { %15823 = vrot.lane.b32.xlu1 %v15756_v35, %s19986_s26 }
 0xad0   :  { %15835 = vrot.lane.b32.xlu1 %v15762_v43, %s19986_s26 }
 0xad4   :  { %15847 = vrot.lane.b32.xlu1 %v15768_v31, %s19986_s26 }
 0xad8   :  { %15827 = vrot.lane.b32.xlu1 %v15758_v22, %s19986_s26  ;;  %v15725_v22 = vmul.f32 0.44467193, %v24874_v38 }
 0xad9   :  { %15809 = vrot.lane.b32.xlu0 %v15749_v2, %s19986_s26 }
 0xadc   :  { %15825 = vrot.lane.b32.xlu1 %v15757_v20, %s19986_s26 }
 0xadd   :  { %15813 = vrot.lane.b32.xlu0 %v15751_v24, %s19986_s26 }
 0xae0   :  { %15851 = vrot.lane.b32.xlu1 %v15770_v21, %s19986_s26 }
 0xae1   :  { %15833 = vrot.lane.b32.xlu0 %v15761_v26, %s19986_s26  ;;  %v15726_v26 = vmul.f32 0.44467193, %v24880_v56  ;;  %v15732_v56 = vmul.f32 0.44467193, %v25068_v50 }
 0xae4   :  { %15849 = vrot.lane.b32.xlu1 %v15769_v33, %s19986_s26 }
 0xae5   :  { %15815 = vrot.lane.b32.xlu0 %v15752_v41, %s19986_s26 }
 0xae8   :  { %15831 = vrot.lane.b32.xlu1 %v15760_v47, %s19986_s26 }
 0xae9   :  { %15837 = vrot.lane.b32.xlu0 %v15763_v18, %s19986_s26 }
 0xaec   :  { %15829 = vrot.lane.b32.xlu1 %v15759_v11, %s19986_s26 }
 0xaed   :  { %15817 = vrot.lane.b32.xlu0 %v15753_v16, %s19986_s26 }
 0xaf0   :  { %15853 = vrot.lane.b32.xlu1 %v15771_v12, %s19986_s26 }
 0xaf1   :  { %15839 = vrot.lane.b32.xlu0 %v15764_v7, %s19986_s26 }
 0xaf4   :  { %15855 = vrot.lane.b32.xlu1 %v15772_v42, %s19986_s26 }
 0xaf5   :  { %15819 = vrot.lane.b32.xlu0 %v15754_v13, %s19986_s26 }
 0xaf8   :  { %15859 = vrot.lane.b32.xlu1 %v15774_v49, %s19986_s26 }
 0xaf9   :  { %15845 = vrot.lane.b32.xlu0 %v15767_v39, %s19986_s26  ;;  %v15719_v39 = vmul.f32 0.44467193, %v25610_v19 }
 0xafc   :  { %15863 = vrot.lane.b32.xlu1 %v15776_v55, %s19986_s26 }
 0xafd   :  { %15841 = vrot.lane.b32.xlu0 %v15765_v59, %s19986_s26 }
 0xb00   :  { %15867 = vrot.lane.b32.xlu1 %v15778_v44, %s19986_s26 }
 0xb01   :  { %15843 = vrot.lane.b32.xlu0 %v15766_v17, %s19986_s26 }
 0xb05   :  { %15857 = vrot.lane.b32.xlu0 %v15773_v36, %s19986_s26 }
 0xb09   :  { %15861 = vrot.lane.b32.xlu0 %v15775_v40, %s19986_s26 }
 0xb0d   :  { %15865 = vrot.lane.b32.xlu0 %v15777_v10, %s19986_s26 }
 0xb40   :  { %v13877_v46 = vpop.xlane.xlu1 %13876 }
 0xb41   :  { %v13878_v29 = vrot.slane %v13877_v46, 4 }
 0xb43   :  { %v13879_v57 = vadd.f32 %v13878_v29, %v13877_v46 }
 0xb44   :  { %v15812_v52 = vpop.permute.xlu1 %15811 }
 0xb45   :  { %v15900_v45 = vadd.f32 %v15812_v52, %v15720_v63  ;;  %v13880_v35 = vrot.slane %v13879_v57, 2  ;;  %v15721_v63 = vmul.f32 0.44467193, %v25612_v32  ;;  %v15738_v52 = vmul.f32 0.44467193, %v25072_v37 }
 0xb47   :  { %v15960_v31 = vmul.f32 0.5553281, %v15900_v45  ;;  %v13881_v47 = vadd.f32 %v13880_v35, %v13879_v57  ;;  %v15930_v12 = vmul.f32 0.44467193, %v15900_v45 }
 0xb48   :  { %v13856_v43 = vpop.xlane.xlu0 %13855  ;;  %v15822_v2 = vpop.permute.xlu1 %15821 }
 0xb49   :  { %v13857_v20 = vrot.slane %v13856_v43, 4  ;;  %v15905_v24 = vadd.f32 %v15822_v2, %v15725_v22  ;;  %v16020_v41 = vrot.slane %v15960_v31, 1  ;;  %v13882_v59 = vrot.slane %v13881_v47, 1 }
 0xb4b   :  { %v13858_v21 = vadd.f32 %v13857_v20, %v13856_v43  ;;  %v15965_v7 = vmul.f32 0.5553281, %v15905_v24  ;;  %v16080_v55 = vadd.f32 %v16020_v41, %v15930_v12  ;;  %v13883_v22 = vadd.f32 %v13882_v59, %v13881_v47 }
 0xb4c   :  { %v15664_v33 = vpop.xlane.xlu0 %15663  ;;  %v15824_v18 = vpop.permute.xlu1 %15823  ;;  %v15935_v2 = vmul.f32 0.44467193, %v15905_v24  ;;  %v15728_v24 = vmul.f32 0.44467193, %v24896_v62  ;;  %v15722_v62 = vmul.f32 0.44467193, %v25613_v54 }
 0xb4d   :  { %v13859_v11 = vrot.slane %v13858_v21, 2  ;;  %v15665_v3 = vrot.slane %v15664_v33, 4  ;;  %v15906_v16 = vadd.f32 %v15824_v18, %v15726_v26  ;;  %v16025_v29 = vrot.slane %v15965_v7, 1 }
 0xb4e   :  { %v25176_v31 = vmul.f32 %v16080_v55, %v16080_v55 }
 0xb4f   :  { %v15666_v42 = vmax.f32 %v15664_v33, %v15665_v3  ;;  %v13860_v13 = vadd.f32 %v13859_v11, %v13858_v21  ;;  %v15966_v38 = vmul.f32 0.5553281, %v15906_v16  ;;  %v15936_v44 = vmul.f32 0.44467193, %v15906_v16 }
 0xb50   :  { %v15684_v49 = vpop.xlane.xlu0 %15683  ;;  %v15836_v17 = vpop.permute.xlu1 %15835  ;;  %v16085_v16 = vadd.f32 %v16025_v29, %v15935_v2 }
 0xb51   :  { %v15667_v36 = vrot.slane %v15666_v42, 2  ;;  %v15685_v40 = vrot.slane %v15684_v49, 4  ;;  %v13861_v10 = vrot.slane %v13860_v13, 1  ;;  %v16026_v46 = vrot.slane %v15966_v38, 1 }
 0xb52   :  { %v15912_v57 = vadd.f32 %v15836_v17, %v15732_v56 }
 0xb53   :  { %v15686_v45 = vmin.f32 %v15684_v49, %v15685_v40  ;;  %v13862_v19 = vadd.f32 %v13861_v10, %v13860_v13  ;;  %v16086_v35 = vadd.f32 %v16026_v46, %v15936_v44  ;;  %v15668_v43 = vmax.f32 %v15666_v42, %v15667_v36 }
 0xb54   :  { %v15810_v50 = vpop.permute.xlu0 %15809  ;;  %v15972_v20 = vmul.f32 0.5553281, %v15912_v57  ;;  %v15848_v21 = vpop.permute.xlu1 %15847  ;;  %v15942_v37 = vmul.f32 0.44467193, %v15912_v57  ;;  %v15731_v40 = vmul.f32 0.44467193, %v25091_v14 }
 0xb55   :  { %v15687_v26 = vrot.slane %v15686_v45, 2  ;;  %19535 = vpush %v13862_v19  ;;  %v15899_v33 = vadd.f32 %v15810_v50, %v15719_v39  ;;  %v16116_v41 = vmul.f32 %v16086_v35, %v16086_v35  ;;  %v25178_v18 = vmul.f32 %v16086_v35, %v16080_v55 }
 0xb56   :  { %19537 = vpush %v13883_v22  ;;  %v15669_v32 = vrot.slane %v15668_v43, 1  ;;  %v16032_v11 = vrot.slane %v15972_v20, 1  ;;  %v15918_v3 = vadd.f32 %v15848_v21, %v15738_v52  ;;  %v15727_v35 = vmul.f32 0.44467193, %v25611_v60 }
 0xb57   :  { %v15959_v12 = vmul.f32 0.5553281, %v15899_v33  ;;  %v25181_v7 = vadd.f32 %v16116_v41, %v25176_v31  ;;  %v15929_v47 = vmul.f32 0.44467193, %v15899_v33  ;;  %v15688_v13 = vmin.f32 %v15686_v45, %v15687_v26 }
 0xb58   :  { %v15670_v42 = vmax.f32 %v15668_v43, %v15669_v32  ;;  %v15814_v38 = vpop.permute.xlu0 %15813  ;;  %v16092_v39 = vadd.f32 %v16032_v11, %v15942_v37  ;;  %v15828_v49 = vpop.permute.xlu1 %15827  ;;  %v15978_v44 = vmul.f32 0.5553281, %v15918_v3  ;;  %v15948_v45 = vmul.f32 0.44467193, %v15918_v3 }
 0xb59   :  { %v16019_v55 = vrot.slane %v15959_v12, 1  ;;  %v15901_v59 = vadd.f32 %v15814_v38, %v15721_v63  ;;  %v15908_v56 = vadd.f32 %v15828_v49, %v15728_v24  ;;  %v15689_v17 = vrot.slane %v15688_v13, 1 }
 0xb5a   :  { %19539 = vpush %v15670_v42  ;;  %v16128_v36 = vsub.f32 %v16092_v39, %v25176_v31  ;;  %v16038_v29 = vrot.slane %v15978_v44, 1  ;;  %v25188_v43 = vmul.f32 %v16085_v16, %v16085_v16  ;;  %v15733_v20 = vmul.f32 0.44467193, %v25107_v23 }
 0xb5b   :  { %v16079_v10 = vadd.f32 %v16019_v55, %v15929_v47  ;;  %v15961_v46 = vmul.f32 0.5553281, %v15901_v59  ;;  %v15690_v57 = vmin.f32 %v15688_v13, %v15689_v17  ;;  %v15968_v19 = vmul.f32 0.5553281, %v15908_v56 }
 0xb5c   :  { %v15834_v52 = vpop.permute.xlu0 %15833  ;;  %v15826_v63 = vpop.permute.xlu1 %15825  ;;  %v16098_v50 = vadd.f32 %v16038_v29, %v15948_v45  ;;  %v15723_v60 = vmul.f32 0.44467193, %v25616_v34  ;;  %v15740_v33 = vmul.f32 0.44467193, %v25083_v4  ;;  %v15931_v32 = vmul.f32 0.44467193, %v15901_v59 }
 0xb5d   :  { %v25190_v22 = vmul.f32 %v16079_v10, %v16079_v10  ;;  %v25192_v2 = vmul.f32 %v16085_v16, %v16079_v10  ;;  %v15911_v31 = vadd.f32 %v15834_v52, %v15731_v40  ;;  %19541 = vpush %v15690_v57  ;;  %v16021_v14 = vrot.slane %v15961_v46, 1 }
 0xb5e   :  { %v15907_v54 = vadd.f32 %v15826_v63, %v15727_v35  ;;  %v16028_v26 = vrot.slane %v15968_v19, 1  ;;  %v16134_v11 = vsub.f32 %v16098_v50, %v16116_v41  ;;  %v15739_v12 = vmul.f32 0.44467193, %v25095_v25 }
 0xb5f   :  { %v25197_v21 = vadd.f32 %v25188_v43, %v25190_v22  ;;  %v15971_v37 = vmul.f32 0.5553281, %v15911_v31  ;;  %v15938_v47 = vmul.f32 0.44467193, %v15908_v56  ;;  %v16081_v13 = vadd.f32 %v16021_v14, %v15931_v32 }
 0xb60   :  { %v15816_v3 = vpop.permute.xlu0 %15815  ;;  %v15852_v16 = vpop.permute.xlu1 %15851  ;;  %v15967_v23 = vmul.f32 0.5553281, %v15907_v54  ;;  %v15941_v38 = vmul.f32 0.44467193, %v15911_v31  ;;  %v25202_v49 = vadd.f32 %v16134_v11, %v16128_v36  ;;  %v15937_v44 = vmul.f32 0.44467193, %v15907_v54 }
 0xb61   :  { %v15902_v24 = vadd.f32 %v15816_v3, %v15722_v62  ;;  %v15920_v42 = vadd.f32 %v15852_v16, %v15740_v33  ;;  %v16031_v39 = vrot.slane %v15971_v37, 1  ;;  %v16088_v34 = vadd.f32 %v16028_v26, %v15938_v47 }
 0xb62   :  { %v16027_v4 = vrot.slane %v15967_v23, 1  ;;  %v15730_v25 = vmul.f32 0.44467193, %v25614_v48  ;;  %v16111_v57 = vmul.f32 %v16081_v13, %v16081_v13 }
 0xb63   :  { %v15962_v55 = vmul.f32 0.5553281, %v15902_v24  ;;  %v25204_v59 = vadd.f32 %v16031_v39, %v15941_v38  ;;  %v15932_v41 = vmul.f32 0.44467193, %v15902_v24  ;;  %v15980_v40 = vmul.f32 0.5553281, %v15920_v42 }
 0xb64   :  { %v15838_v17 = vpop.permute.xlu0 %15837  ;;  %v15850_v10 = vpop.permute.xlu1 %15849  ;;  %v16087_v29 = vadd.f32 %v16027_v4, %v15937_v44  ;;  %v15950_v52 = vmul.f32 0.44467193, %v15920_v42  ;;  %v25209_v35 = vmul.f32 %v16088_v34, %v16088_v34  ;;  %v15734_v42 = vmul.f32 0.44467193, %v25123_v5 }
 0xb65   :  { %v16022_v56 = vrot.slane %v15962_v55, 1  ;;  %v15913_v46 = vadd.f32 %v15838_v17, %v15733_v20  ;;  %v15919_v62 = vadd.f32 %v15850_v10, %v15739_v12  ;;  %v16127_v36 = vsub.f32 %v25204_v59, %v25190_v22 }
 0xb66   :  { %v16040_v45 = vrot.slane %v15980_v40, 1  ;;  %v16117_v31 = vmul.f32 %v16087_v29, %v16087_v29  ;;  %v25211_v50 = vmul.f32 %v16087_v29, %v16081_v13  ;;  %v15729_v44 = vmul.f32 0.44467193, %v25615_v1 }
 0xb67   :  { %v16082_v19 = vadd.f32 %v16022_v56, %v15932_v41  ;;  %v15973_v63 = vmul.f32 0.5553281, %v15913_v46  ;;  %v15943_v14 = vmul.f32 0.44467193, %v15913_v46  ;;  %v15979_v20 = vmul.f32 0.5553281, %v15919_v62 }
 0xb68   :  { %v15818_v54 = vpop.permute.xlu0 %15817  ;;  %v25213_v48 = vadd.f32 %v16040_v45, %v15950_v52  ;;  %v15832_v26 = vpop.permute.xlu1 %15831  ;;  %v25217_v11 = vadd.f32 %v16117_v31, %v16111_v57  ;;  %v15949_v12 = vmul.f32 0.44467193, %v15919_v62  ;;  %v15735_v40 = vmul.f32 0.44467193, %v25147_v58 }
 0xb69   :  { %v16112_v33 = vmul.f32 %v16082_v19, %v16082_v19  ;;  %v25215_v32 = vmul.f32 %v16088_v34, %v16082_v19  ;;  %v16033_v37 = vrot.slane %v15973_v63, 1  ;;  %v15903_v3 = vadd.f32 %v15818_v54, %v15723_v60 }
 0xb6a   :  { %v16136_v16 = vsub.f32 %v25213_v48, %v25209_v35  ;;  %v16039_v24 = vrot.slane %v15979_v20, 1  ;;  %v15910_v13 = vadd.f32 %v15832_v26, %v15730_v25  ;;  %v15724_v34 = vmul.f32 0.44467193, %v25617_v6 }
 0xb6b   :  { %v25222_v47 = vadd.f32 %v25209_v35, %v16112_v33  ;;  %v16093_v23 = vadd.f32 %v16033_v37, %v15943_v14  ;;  %v15963_v38 = vmul.f32 0.5553281, %v15903_v3  ;;  %v15933_v10 = vmul.f32 0.44467193, %v15903_v3 }
 0xb6c   :  { %v15840_v39 = vpop.permute.xlu0 %15839  ;;  %v16099_v55 = vadd.f32 %v16039_v24, %v15949_v12  ;;  %v15830_v60 = vpop.permute.xlu1 %15829  ;;  %v15970_v17 = vmul.f32 0.5553281, %v15910_v13  ;;  %v15741_v25 = vmul.f32 0.44467193, %v25116_v28  ;;  %v15940_v19 = vmul.f32 0.44467193, %v15910_v13 }
 0xb6d   :  { %v16129_v4 = vsub.f32 %v16093_v23, %v16111_v57  ;;  %v15914_v41 = vadd.f32 %v15840_v39, %v15734_v42  ;;  %v16023_v56 = vrot.slane %v15963_v38, 1  ;;  %v15909_v29 = vadd.f32 %v15830_v60, %v15729_v44 }
 0xb6e   :  { %v16135_v46 = vsub.f32 %v16099_v55, %v16117_v31  ;;  %v16030_v5 = vrot.slane %v15970_v17, 1  ;;  %v15737_v58 = vmul.f32 0.44467193, %v25137_v61  ;;  %v15742_v28 = vmul.f32 0.44467193, %v25127_v8 }
 0xb6f   :  { %v15974_v62 = vmul.f32 0.5553281, %v15914_v41  ;;  %v16083_v52 = vadd.f32 %v16023_v56, %v15933_v10  ;;  %v15969_v1 = vmul.f32 0.5553281, %v15909_v29  ;;  %v15944_v57 = vmul.f32 0.44467193, %v15914_v41 }
 0xb70   :  { %v25229_v45 = vadd.f32 %v16135_v46, %v16129_v4  ;;  %v15820_v6 = vpop.permute.xlu0 %15819  ;;  %v15854_v35 = vpop.permute.xlu1 %15853  ;;  %v15939_v48 = vmul.f32 0.44467193, %v15909_v29  ;;  %v16090_v37 = vadd.f32 %v16030_v5, %v15940_v19  ;;  %v15744_v10 = vmul.f32 0.44467193, %v25618_v9 }
 0xb71   :  { %v16034_v63 = vrot.slane %v15974_v62, 1  ;;  %v15904_v14 = vadd.f32 %v15820_v6, %v15724_v34  ;;  %v15921_v54 = vadd.f32 %v15854_v35, %v15741_v25  ;;  %v16029_v31 = vrot.slane %v15969_v1, 1 }
 0xb72   :  { %v25233_v3 = vmul.f32 %v16083_v52, %v16083_v52  ;;  %v25240_v56 = vmul.f32 %v16090_v37, %v16090_v37  ;;  %v15736_v1 = vmul.f32 0.44467193, %v25155_v30 }
 0xb73   :  { %v16094_v20 = vadd.f32 %v16034_v63, %v15944_v57  ;;  %v15964_v26 = vmul.f32 0.5553281, %v15904_v14  ;;  %v15934_v12 = vmul.f32 0.44467193, %v15904_v14  ;;  %v16089_v23 = vadd.f32 %v16029_v31, %v15939_v48 }
 0xb74   :  { %v15846_v24 = vpop.permute.xlu0 %15845  ;;  %v15981_v42 = vmul.f32 0.5553281, %v15921_v54  ;;  %v15856_v13 = vpop.permute.xlu1 %15855  ;;  %v15951_v34 = vmul.f32 0.44467193, %v15921_v54  ;;  %v15743_v14 = vmul.f32 0.44467193, %v25621_v15 }
 0xb75   :  { %v16130_v38 = vsub.f32 %v16094_v20, %v16112_v33  ;;  %v16024_v39 = vrot.slane %v15964_v26, 1  ;;  %v15917_v55 = vadd.f32 %v15846_v24, %v15737_v58  ;;  %v16119_v44 = vmul.f32 %v16089_v23, %v16089_v23 }
 0xb76   :  { %v25235_v61 = vmul.f32 %v16089_v23, %v16083_v52  ;;  %v16041_v60 = vrot.slane %v15981_v42, 1  ;;  %v15922_v4 = vadd.f32 %v15856_v13, %v15742_v28  ;;  %v15746_v54 = vmul.f32 0.44467193, %v25619_v51 }
 0xb77   :  { %v25237_v41 = vadd.f32 %v16136_v16, %v16130_v38  ;;  %v16084_v17 = vadd.f32 %v16024_v39, %v15934_v12  ;;  %v15977_v8 = vmul.f32 0.5553281, %v15917_v55  ;;  %v15947_v46 = vmul.f32 0.44467193, %v15917_v55 }
 0xb78   :  { %v25243_v29 = vadd.f32 %v16119_v44, %v25233_v3  ;;  %v15842_v33 = vpop.permute.xlu0 %15841  ;;  %v16101_v62 = vadd.f32 %v16041_v60, %v15951_v34  ;;  %v15860_v5 = vpop.permute.xlu1 %15859  ;;  %v15982_v35 = vmul.f32 0.5553281, %v15922_v4  ;;  %v15952_v31 = vmul.f32 0.44467193, %v15922_v4 }
 0xb79   :  { %v16114_v25 = vmul.f32 %v16084_v17, %v16084_v17  ;;  %v25245_v52 = vmul.f32 %v16090_v37, %v16084_v17  ;;  %v16037_v6 = vrot.slane %v15977_v8, 1  ;;  %v15915_v19 = vadd.f32 %v15842_v33, %v15735_v40 }
 0xb7a   :  { %v16137_v16 = vsub.f32 %v16101_v62, %v16119_v44  ;;  %v15924_v57 = vadd.f32 %v15860_v5, %v15744_v10  ;;  %v16042_v20 = vrot.slane %v15982_v35, 1  ;;  %v15748_v42 = vmul.f32 0.44467193, %v25620_v27 }
 0xb7b   :  { %v25249_v9 = vadd.f32 %v25240_v56, %v16114_v25  ;;  %v16097_v63 = vadd.f32 %v16037_v6, %v15947_v46  ;;  %v15975_v58 = vmul.f32 0.5553281, %v15915_v19  ;;  %v15945_v12 = vmul.f32 0.44467193, %v15915_v19 }
 0xb7c   :  { %v15844_v48 = vpop.permute.xlu0 %15843  ;;  %v15864_v26 = vpop.permute.xlu1 %15863  ;;  %v15984_v28 = vmul.f32 0.5553281, %v15924_v57  ;;  %v16102_v23 = vadd.f32 %v16042_v20, %v15952_v31  ;;  %v15954_v13 = vmul.f32 0.44467193, %v15924_v57  ;;  %v15745_v62 = vmul.f32 0.44467193, %v25622_v0 }
 0xb7d   :  { %v16133_v40 = vsub.f32 %v16097_v63, %v25188_v43  ;;  %v15916_v37 = vadd.f32 %v15844_v48, %v15736_v1  ;;  %v15926_v30 = vadd.f32 %v15864_v26, %v15746_v54  ;;  %v16035_v24 = vrot.slane %v15975_v58, 1 }
 0xb7e   :  { %v16044_v38 = vrot.slane %v15984_v28, 1  ;;  %v16138_v43 = vsub.f32 %v16102_v23, %v25240_v56 }
 0xb7f   :  { %v25258_v15 = vadd.f32 %v16133_v40, %v16127_v36  ;;  %v15976_v51 = vmul.f32 0.5553281, %v15916_v37  ;;  %v16095_v39 = vadd.f32 %v16035_v24, %v15945_v12  ;;  %v15946_v55 = vmul.f32 0.44467193, %v15916_v37 }
 0xb80   :  { %v15858_v34 = vpop.permute.xlu0 %15857  ;;  %v15986_v44 = vmul.f32 0.5553281, %v15926_v30  ;;  %v15868_v60 = vpop.permute.xlu1 %15867  ;;  %v25261_v8 = vadd.f32 %v16044_v38, %v15954_v13  ;;  %v15956_v22 = vmul.f32 0.44467193, %v15926_v30  ;;  %v25624_v13 = vld [vmem:[#allocation38_spill] sm:$0xff] }
 0xb81   :  { %v16036_v4 = vrot.slane %v15976_v51, 1  ;;  %v15923_v17 = vadd.f32 %v15858_v34, %v15743_v14  ;;  %v15928_v27 = vadd.f32 %v15868_v60, %v15748_v42  ;;  %v16131_v10 = vsub.f32 %v16095_v39, %v25233_v3 }
 0xb82   :  { %v16046_v59 = vrot.slane %v15986_v44, 1  ;;  %v16140_v33 = vsub.f32 %v25261_v8, %v25178_v18  ;;  %v16183_v44 = vmul.f32 2.0, %v25178_v18  ;;  %v16182_v60 = vmul.f32 2.0, %v25192_v2 }
 0xb83   :  { %v16096_v36 = vadd.f32 %v16036_v4, %v15946_v55  ;;  %v15983_v46 = vmul.f32 0.5553281, %v15923_v17  ;;  %v25267_v56 = vadd.f32 %v16137_v16, %v16131_v10  ;;  %v15988_v19 = vmul.f32 0.5553281, %v15928_v27 }
 0xb84   :  { %v15862_v5 = vpop.permute.xlu0 %15861  ;;  %v16106_v6 = vadd.f32 %v16046_v59, %v15956_v22  ;;  %v15953_v35 = vmul.f32 0.44467193, %v15923_v17  ;;  %v15958_v14 = vmul.f32 0.44467193, %v15928_v27  ;;  %v15747_v16 = vmul.f32 0.44467193, %v25623_v53 }
 0xb85   :  { %v16132_v1 = vsub.f32 %v16096_v36, %v16114_v25  ;;  %v16043_v57 = vrot.slane %v15983_v46, 1  ;;  %v15925_v63 = vadd.f32 %v15862_v5, %v15745_v62  ;;  %v16048_v54 = vrot.slane %v15988_v19, 1 }
 0xb86   :  { %s19536_s26 = spop %19535  ;;  %v16142_v3 = vsub.f32 %v16106_v6, %v25215_v32  ;;  %v16185_v4 = vmul.f32 2.0, %v25215_v32  ;;  %v16184_v17 = vmul.f32 2.0, %v25211_v50  ;;  %v16186_v8 = vmul.f32 2.0, %v25235_v61 }
 0xb87   :  { %v25270_v58 = vadd.f32 %v16138_v43, %v16132_v1  ;;  %s13864_s3 = smul.f32 0.16666667, %s19536_s26  ;;  %s19538_s8 = spop %19537  ;;  %v16103_v48 = vadd.f32 %v16043_v57, %v15953_v35  ;;  %v15985_v0 = vmul.f32 0.5553281, %v15925_v63  ;;  %v15955_v31 = vmul.f32 0.44467193, %v15925_v63 }
 0xb88   :  { %s13885_s24 = smul.f32 0.16666667, %s19538_s8  ;;  %v15866_v20 = vpop.permute.xlu0 %15865  ;;  %v16108_v25 = vadd.f32 %v16048_v54, %v15958_v14  ;;  %v16187_v27 = vmul.f32 2.0, %v25245_v52  ;;  %v16146_v22 = vmul.f32 2.0, %v16140_v33  ;;  %v16148_v59 = vmul.f32 2.0, %v16142_v3 }
 0xb89   :  { %v13886_v26 = vstv %s13864_s3  ;;  %v16139_v40 = vsub.f32 %v16103_v48, %v25192_v2  ;;  %v16045_v37 = vrot.slane %v15985_v0, 1  ;;  %v15927_v28 = vadd.f32 %v15866_v20, %v15747_v16 }
 0xb8a   :  { %v13887_v30 = vstv %s13885_s24  ;;  %v16144_v12 = vsub.f32 %v16108_v25, %v25245_v52 }
 0xb8b   :  { %v13888_v24 = vsel %vm4293_vm7, %v13886_v26, %v13887_v30  ;;  %v16105_v23 = vadd.f32 %v16045_v37, %v15955_v31  ;;  %s19540_s9 = spop %19539  ;;  %v15987_v51 = vmul.f32 0.5553281, %v15927_v28  ;;  %v15957_v39 = vmul.f32 0.44467193, %v15927_v28 }
 0xb8c   :  { %v16283_v42 = vrot.slane %v13888_v24, 5  ;;  %p15692_p2 = scmp.gt.f32.partialorder %s19540_s9, 128.0  ;;  %v16145_v10 = vmul.f32 2.0, %v16139_v40  ;;  %v16150_v18 = vmul.f32 2.0, %v16144_v12 }
 0xb8d   :  { %v16141_v53 = vsub.f32 %v16105_v23, %v25211_v50  ;;  %v16047_v55 = vrot.slane %v15987_v51, 1 }
 0xb8e   :  { %v25278_v38 = vsel %vm16292_vm15, %v25624_v13, %v16283_v42  ;;  %s19542_s19 = spop %19541 }
 0xb8f   :  { %p15694_p3 = scmp.lt.f32.partialorder %s19542_s19, -0.5  ;;  %v16107_v43 = vadd.f32 %v16047_v55, %v15957_v39  ;;  %v16147_v36 = vmul.f32 2.0, %v16141_v53 }
 0xb90   :  { %s15693_s10 = scalar_select %p15692_p2, 255.0, 1.0 }
 0xb91   :  { %s15695_s21 = scalar_select %p15694_p3, -1.0, 0.0  ;;  %v16143_v34 = vsub.f32 %v16107_v43, %v25235_v61 }
 0xb93   :  { %s15696_s16 = ssub.f32 %s15693_s10, %s15695_s21  ;;  %v16149_v62 = vmul.f32 2.0, %v16143_v34 }
 0xb95   :  { %s15697_s22 = smul.f32 0.01, %s15696_s16 }
 0xb96   :  { %s15699_s2 = smul.f32 0.03, %s15696_s16 }
 0xb97   :  { %s15698_s20 = smul.f32 %s15697_s22, %s15697_s22 }
 0xb98   :  { %s15700_s1 = smul.f32 %s15699_s2, %s15699_s2 }
 0xb99   :  { %v16188_v46 = vstv %s15698_s20 }
 0xb9a   :  { %v16151_v5 = vstv %s15700_s1  ;;  %v16189_v6 = vadd.f32 %v16188_v46, %v16182_v60  ;;  %v16190_v2 = vadd.f32 %v16188_v46, %v16183_v44  ;;  %v16191_v19 = vadd.f32 %v16188_v46, %v16184_v17 }
 0xb9b   :  { %v16156_v32 = vadd.f32 %v16151_v5, %v16149_v62  ;;  %v16152_v1 = vadd.f32 %v16151_v5, %v16145_v10  ;;  %v16153_v50 = vadd.f32 %v16151_v5, %v16146_v22  ;;  %v16154_v35 = vadd.f32 %v16151_v5, %v16147_v36 }
 0xb9c   :  { %v16155_v61 = vadd.f32 %v16151_v5, %v16148_v59  ;;  %v16157_v57 = vadd.f32 %v16151_v5, %v16150_v18  ;;  %v16164_v52 = vadd.f32 %v25258_v15, %v16151_v5  ;;  %v16165_v33 = vadd.f32 %v25202_v49, %v16151_v5 }
 0xb9d   :  { %v16166_v63 = vadd.f32 %v25229_v45, %v16151_v5  ;;  %v16167_v3 = vadd.f32 %v25237_v41, %v16151_v5  ;;  %v16168_v14 = vadd.f32 %v25267_v56, %v16151_v5  ;;  %v16169_v54 = vadd.f32 %v25270_v58, %v16151_v5 }
 0xb9e   :  { %19711 = vrcp.f32 %v16164_v52  ;;  %v16192_v48 = vadd.f32 %v16188_v46, %v16185_v4  ;;  %v16193_v0 = vadd.f32 %v16188_v46, %v16186_v8  ;;  %v16194_v16 = vadd.f32 %v16188_v46, %v16187_v27 }
 0xb9f   :  { %19713 = vrcp.f32 %v16165_v33  ;;  %v16195_v31 = vmul.f32 %v16189_v6, %v16152_v1  ;;  %v16196_v20 = vmul.f32 %v16190_v2, %v16153_v50  ;;  %v16197_v25 = vmul.f32 %v16191_v19, %v16154_v35 }
 0xba0   :  { %19715 = vrcp.f32 %v16166_v63  ;;  %v16198_v15 = vmul.f32 %v16192_v48, %v16155_v61  ;;  %v16199_v26 = vmul.f32 %v16193_v0, %v16156_v32  ;;  %v16200_v49 = vmul.f32 %v16194_v16, %v16157_v57 }
 0xba1   :  { %19717 = vrcp.f32 %v16167_v3  ;;  %v16207_v45 = vadd.f32 %v25197_v21, %v16188_v46  ;;  %v16208_v41 = vadd.f32 %v25181_v7, %v16188_v46  ;;  %v16209_v56 = vadd.f32 %v25217_v11, %v16188_v46 }
 0xba2   :  { %19719 = vrcp.f32 %v16168_v14  ;;  %v16210_v58 = vadd.f32 %v25222_v47, %v16188_v46  ;;  %v16211_v40 = vadd.f32 %v25243_v29, %v16188_v46  ;;  %v16212_v37 = vadd.f32 %v25249_v9, %v16188_v46 }
 0xba3   :  { %19721 = vrcp.f32 %v16169_v54  ;;  %v16213_v28 = vmul.f32 %v16207_v45, %v16164_v52  ;;  %v16214_v30 = vmul.f32 %v16208_v41, %v16165_v33  ;;  %v16215_v12 = vmul.f32 %v16209_v56, %v16166_v63 }
 0xba4   :  { %v16216_v24 = vmul.f32 %v16210_v58, %v16167_v3  ;;  %v16217_v23 = vmul.f32 %v16211_v40, %v16168_v14  ;;  %v16218_v42 = vmul.f32 %v16212_v37, %v16169_v54 }
 0xba5   :  { %19723 = vrcp.f32 %v16213_v28 }
 0xba6   :  { %19725 = vrcp.f32 %v16214_v30 }
 0xba7   :  { %19727 = vrcp.f32 %v16215_v12 }
 0xba8   :  { %v19712_v7 = vpop.eup %19711  ;;  %19729 = vrcp.f32 %v16216_v24 }
 0xba9   :  { %v19714_v21 = vpop.eup %19713  ;;  %v16171_v11 = vmul.f32 %v19712_v7, %v16152_v1  ;;  %19731 = vrcp.f32 %v16217_v23 }
 0xbaa   :  { %v19716_v47 = vpop.eup %19715  ;;  %v16173_v51 = vmul.f32 %v19714_v21, %v16153_v50  ;;  %19733 = vrcp.f32 %v16218_v42 }
 0xbab   :  { %v19718_v29 = vpop.eup %19717  ;;  %v16175_v9 = vmul.f32 %v19716_v47, %v16154_v35  ;;  %v16252_v53 = vsel %vm11672_vm11, %v16171_v11, 0.0 }
 0xbac   :  { %v19720_v13 = vpop.eup %19719  ;;  %v16177_v39 = vmul.f32 %v19718_v29, %v16155_v61  ;;  %v16253_v55 = vsel %vm11672_vm11, %v16173_v51, 0.0 }
 0xbad   :  { %v19722_v43 = vpop.eup %19721  ;;  %v16179_v34 = vmul.f32 %v19720_v13, %v16156_v32  ;;  %v16254_v44 = vadd.f32 %v16253_v55, %v16252_v53  ;;  %v16255_v4 = vsel %vm11672_vm11, %v16175_v9, 0.0 }
 0xbae   :  { %v16181_v60 = vmul.f32 %v19722_v43, %v16157_v57  ;;  %v16257_v10 = vsel %vm11672_vm11, %v16177_v39, 0.0 }
 0xbaf   :  { %v19724_v17 = vpop.eup %19723  ;;  %v16256_v8 = vadd.f32 %v16255_v4, %v16254_v44  ;;  %v16259_v18 = vsel %vm11672_vm11, %v16179_v34, 0.0 }
 0xbb0   :  { %v19726_v27 = vpop.eup %19725  ;;  %v16220_v22 = vmul.f32 %v19724_v17, %v16195_v31  ;;  %v16261_v35 = vsel %vm11672_vm11, %v16181_v60, 0.0 }
 0xbb1   :  { %v19728_v59 = vpop.eup %19727  ;;  %v16258_v36 = vadd.f32 %v16257_v10, %v16256_v8  ;;  %v16222_v46 = vmul.f32 %v19726_v27, %v16196_v20 }
 0xbb2   :  { %v19730_v62 = vpop.eup %19729  ;;  %v16224_v5 = vmul.f32 %v19728_v59, %v16197_v25  ;;  %v16231_v6 = vsel %vm11672_vm11, %v16220_v22, 0.0 }
 0xbb3   :  { %v19732_v2 = vpop.eup %19731  ;;  %v16260_v19 = vadd.f32 %v16259_v18, %v16258_v36  ;;  %v16226_v32 = vmul.f32 %v19730_v62, %v16198_v15  ;;  %v16232_v1 = vsel %vm11672_vm11, %v16222_v46, 0.0 }
 0xbb4   :  { %v19734_v50 = vpop.eup %19733  ;;  %v16228_v61 = vmul.f32 %v19732_v2, %v16199_v26  ;;  %v16233_v57 = vadd.f32 %v16232_v1, %v16231_v6  ;;  %v16234_v63 = vsel %vm11672_vm11, %v16224_v5, 0.0 }
 0xbb5   :  { %v16262_v52 = vadd.f32 %v16261_v35, %v16260_v19  ;;  %v16230_v33 = vmul.f32 %v19734_v50, %v16200_v49  ;;  %v16236_v14 = vsel %vm11672_vm11, %v16226_v32, 0.0 }
 0xbb6   :  { %v16235_v3 = vadd.f32 %v16234_v63, %v16233_v57  ;;  %v16238_v48 = vsel %vm11672_vm11, %v16228_v61, 0.0 }
 0xbb7   :  { %16263 = vadd.xlane.f32.xlu1 %v16262_v52  ;;  %v16240_v16 = vsel %vm11672_vm11, %v16230_v33, 0.0 }
 0xbb8   :  { %v16237_v54 = vadd.f32 %v16236_v14, %v16235_v3 }
 0xbba   :  { %v16239_v0 = vadd.f32 %v16238_v48, %v16237_v54 }
 0xbbc   :  { %v16241_v31 = vadd.f32 %v16240_v16, %v16239_v0 }
 0xbbe   :  { %16242 = vadd.xlane.f32.xlu0 %v16241_v31 }
 0xc44   :  { %v16264_v20 = vpop.xlane.xlu1 %16263 }
 0xc45   :  { %v16265_v25 = vrot.slane %v16264_v20, 4 }
 0xc47   :  { %v16266_v15 = vadd.f32 %v16265_v25, %v16264_v20 }
 0xc49   :  { %v16267_v26 = vrot.slane %v16266_v15, 2 }
 0xc4b   :  { %v16243_v45 = vpop.xlane.xlu0 %16242  ;;  %v16268_v56 = vadd.f32 %v16267_v26, %v16266_v15 }
 0xc4c   :  { %v16244_v49 = vrot.slane %v16243_v45, 4 }
 0xc4d   :  { %v16269_v37 = vrot.slane %v16268_v56, 1 }
 0xc4e   :  { %v16245_v41 = vadd.f32 %v16244_v49, %v16243_v45 }
 0xc4f   :  { %v16270_v12 = vadd.f32 %v16269_v37, %v16268_v56 }
 0xc50   :  { %v16246_v58 = vrot.slane %v16245_v41, 2 }
 0xc52   :  { %v16247_v40 = vadd.f32 %v16246_v58, %v16245_v41 }
 0xc54   :  { %v16248_v28 = vrot.slane %v16247_v40, 1 }
 0xc56   :  { %v16249_v30 = vadd.f32 %v16248_v28, %v16247_v40 }
 0xc58   :  { %19543 = vpush %v16249_v30 }
 0xc59   :  { %19545 = vpush %v16270_v12 }
 0xc89   :  { %s19544_s23 = spop %19543 }
 0xc8a   :  { %s16251_s6 = smul.f32 0.16666667, %s19544_s23  ;;  %s19546_s12 = spop %19545 }
 0xc8b   :  { %s16272_s25 = smul.f32 0.16666667, %s19546_s12 }
 0xc8c   :  { %v16273_v24 = vstv %s16251_s6 }
 0xc8d   :  { %v16274_v23 = vstv %s16272_s25 }
 0xc8e   :  { %v16275_v42 = vsel %vm4293_vm7, %v16273_v24, %v16274_v23 }
 0xc8f   :  { %v16286_v7 = vrot.slane %v16275_v42, 4 }
 0xc91   :  { %v16294_v21 = vsel %vm13895_vm9, %v25278_v38, %v16286_v7 }
 0xc92   :  { %16296 = vst.msk [vmem:[%s25331_s14] sm:$0x1f] %vm16295_vm0, %v16294_v21 }
 0xc93   :  { %16301 = vsyncpa [#allocation3], 1 }
 0xc94   :  { %16302 = vsyncpa [#allocation5], 1 }
 0xc95   :  { %16303 = vsyncpa [#allocation8], 1 }
 0xc96   :  { %16304 = vsyncpa [#allocation11], 1 }
 0xc97   :  { %16305 = vsyncpa [#allocation14], 1 }

</bundles_post_ra>
